<compile_context>
chip_gen: v7x
topology: tpu7x:2x2x1
jax: 0.10.0
libtpu: 0.0.40
codegen_flags: <defaults>
</compile_context>

<pallas_src>
import functools
import math

import jax
import jax.numpy as jnp
from jax.experimental import pallas as pl
from jax.experimental.pallas import tpu as pltpu


def _round_up(x, m):
    return (x + m - 1) // m * m


_VMEM_LIMIT = 32 * 1024 * 1024   # explicit scoped-VMEM budget (helps v5e's 16 MiB default)


# ----------------------------------------------------------------------------
# Fused conv / matmul kernel (single full-K dot per tap, no accumulator scratch)
#   direct path : x block = (T_out + k - 1, Cp) halo rows, k shifted dots
#   im2col path : x block = (tm, Kp), k == 1, one dot
# Epilogue: bias -> activation -> time-conditioning add -> residual adds -> LayerNorm.
# ----------------------------------------------------------------------------
def _conv_kernel(*refs, k, cp, act, has_temb, n_res, ln):
    x_ref, w_ref, b_ref = refs[0], refs[1], refs[2]
    pos = 3
    temb_ref = None
    if has_temb:
        temb_ref = refs[pos]
        pos += 1
    res_refs = refs[pos:pos + n_res]
    o_ref = refs[pos + n_res]

    t_out = o_ref.shape[0]
    # k shifted dots over the haloed block (k == 1 on the im2col path).
    y = jnp.dot(x_ref[pl.ds(0, t_out), :], w_ref[pl.ds(0, cp), :],
                preferred_element_type=jnp.float32)
    for j in range(1, k):
        y += jnp.dot(x_ref[pl.ds(j, t_out), :], w_ref[pl.ds(j * cp, cp), :],
                     preferred_element_type=jnp.float32)

    y = y + b_ref[...]                                      # f32 epilogue
    if act == "elu":
        y = jnp.where(y > 0, y, jnp.exp(jnp.minimum(y, 0.0)) - 1.0)
    elif act == "silu":
        y = y * jax.nn.sigmoid(y)
    if has_temb:
        y = y + temb_ref[...].astype(jnp.float32)           # (1, N) broadcast over rows
    for r in res_refs:
        y = y + r[...].astype(jnp.float32)                  # fused skip / conditioning adds
    if ln:                                                  # fused affine-free LayerNorm(C)
        # NOTE: only correct when Np == true Cout (enc bottleneck: 128, no pad cols).
        mu = jnp.mean(y, axis=-1, keepdims=True)
        yc = y - mu
        var = jnp.mean(yc * yc, axis=-1, keepdims=True)
        y = yc * jax.lax.rsqrt(var + 1e-5)
    o_ref[...] = y.astype(o_ref.dtype)


def _launch_conv(x3, w_pad, b_pad, *, k, cp, t_out, tm, act, temb, residuals,
                 ln, out_dtype):
    """x3: (B, T_in, cp) bf16 (T_in = t_out + k - 1 on the direct path);
    w_pad: (Kp, Np) bf16 with Kp >= k*cp; b_pad: (1, Np) f32."""
    B, T_in, _ = x3.shape
    Kp, Np = w_pad.shape
    assert Kp >= k * cp
    n_t = t_out // tm
    assert k == 1 or n_t == 1          # halo blocks only supported whole-time

    if n_t == 1:
        x_spec = pl.BlockSpec((None, T_in, cp), lambda b, i: (b, 0, 0))
    else:
        x_spec = pl.BlockSpec((None, tm, cp), lambda b, i: (b, i, 0))

    in_specs = [x_spec,
                pl.BlockSpec((Kp, Np), lambda b, i: (0, 0)),    # weight fetched once
                pl.BlockSpec((1, Np), lambda b, i: (0, 0))]
    inputs = [x3, w_pad, b_pad]
    if temb is not None:
        in_specs.append(pl.BlockSpec((None, 1, Np), lambda b, i: (b, 0, 0)))
        inputs.append(temb)
    for r in residuals:
        in_specs.append(pl.BlockSpec((None, tm, Np), lambda b, i: (b, i, 0)))
        inputs.append(r)

    return pl.pallas_call(
        functools.partial(_conv_kernel, k=k, cp=cp, act=act,
                          has_temb=temb is not None, n_res=len(residuals), ln=ln),
        out_shape=jax.ShapeDtypeStruct((B, t_out, Np), out_dtype),
        grid=(B, n_t),
        in_specs=in_specs,
        out_specs=pl.BlockSpec((None, tm, Np), lambda b, i: (b, i, 0)),
        compiler_params=pltpu.CompilerParams(
            dimension_semantics=("parallel", "parallel"),
            vmem_limit_bytes=_VMEM_LIMIT),
    )(*inputs)


# ----------------------------------------------------------------------------
# Conv1d (channels-last).  Direct haloed path for stride-1 / Cin%128==0 layers,
# im2col (static strided slices, no gather) for strided / tiny-Cin layers.
# ----------------------------------------------------------------------------
def _im2col(x, k, stride, pad):
    B, T, Cin = x.shape
    if pad:
        x = jnp.pad(x, ((0, 0), (pad, pad), (0, 0)))
    T_out = (T + 2 * pad - k) // stride + 1
    if k == 1 and stride == 1:
        return x, T_out
    taps = [x[:, j: j + (T_out - 1) * stride + 1: stride, :] for j in range(k)]
    cols = jnp.concatenate(taps, axis=-1)      # tap-major, channel-minor (matches weight)
    return cols, T_out


def conv1d_cl(x, wb, k, stride, pad, *, act="none", temb=None, residuals=(),
              ln=False, out_dtype=jnp.bfloat16):
    """x: (B, T, Cin) bf16 -> (B, T_out, Np) out_dtype.  Weights pre-reshaped/padded/bf16."""
    w_pad, b_pad = wb
    B, T, Cin = x.shape
    Kp, Np = w_pad.shape
    T_out = (T + 2 * pad - k) // stride + 1
    if ln:
        assert Np == 128     # LayerNorm reduces over the full lane width -> must be unpadded

    direct_ok = (stride == 1 and Cin % 128 == 0 and Kp == Cin * k
                 and (T + 2 * pad) * Cin * 2 <= 8 * 1024 * 1024)
    if direct_ok:
        # Haloed whole-time block: x is read once (+ k-1 halo rows), no im2col copy.
        xh = jnp.pad(x, ((0, 0), (pad, pad), (0, 0))) if pad else x
        return _launch_conv(xh, w_pad, b_pad, k=k, cp=Cin, t_out=T_out, tm=T_out,
                            act=act, temb=temb, residuals=residuals, ln=ln,
                            out_dtype=out_dtype)
    # TODO(synk): very long sequences on the direct path would need haloed time tiling
    # (manual DMA) instead of this im2col fallback.

    cols, T_out = _im2col(x, k, stride, pad)
    cink = Cin * k
    if cink != Kp:                                          # only tiny-Cin layers hit this
        cols = jnp.pad(cols, ((0, 0), (0, 0), (0, Kp - cink)))
    Tp = _round_up(T_out, 8)
    if Tp != T_out:
        cols = jnp.pad(cols, ((0, 0), (0, Tp - T_out), (0, 0)))
        residuals = tuple(jnp.pad(r, ((0, 0), (0, Tp - T_out), (0, 0)))
                          for r in residuals)
    if Tp <= 512:
        tm = Tp
    else:
        tm = next((c for c in (512, 384, 256, 128, 64, 32, 16, 8) if Tp % c == 0), Tp)
    out = _launch_conv(cols, w_pad, b_pad, k=1, cp=Kp, t_out=Tp, tm=tm,
                       act=act, temb=temb, residuals=residuals, ln=ln,
                       out_dtype=out_dtype)
    if Tp != T_out:
        out = out[:, :T_out]
    return out


# ----------------------------------------------------------------------------
# Fused time-embedding MLP: fc0 -> silu -> fc1 -> silu -> merged per-level projection,
# one pallas_call, all weights resident in VMEM.
# ----------------------------------------------------------------------------
def _temb_kernel(x_ref, w0_ref, b0_ref, w1_ref, b1_ref, wc_ref, bc_ref, o_ref):
    h = jnp.dot(x_ref[...], w0_ref[...], preferred_element_type=jnp.float32) + b0_ref[...]
    h = h * jax.nn.sigmoid(h)
    h = jnp.dot(h.astype(jnp.bfloat16), w1_ref[...],
                preferred_element_type=jnp.float32) + b1_ref[...]
    h = h * jax.nn.sigmoid(h)
    o_ref[...] = jnp.dot(h.astype(jnp.bfloat16), wc_ref[...],
                         preferred_element_type=jnp.float32) + bc_ref[...]


def pallas_temb(temb_in, p):
    """temb_in: (B, 128) f32 -> (B, 896) f32 (concatenated c0/c1/c2 conditionings)."""
    B = temb_in.shape[0]
    Bp = _round_up(B, 8)
    xp = jnp.zeros((Bp, 128), jnp.bfloat16).at[:B].set(temb_in.astype(jnp.bfloat16))
    (w0, b0), (w1, b1), (wc, bc) = p["t_fc0"], p["t_fc1"], p["t_c"]

    def full(shape):
        return pl.BlockSpec(shape, lambda i: (0,) * len(shape))

    out = pl.pallas_call(
        _temb_kernel,
        out_shape=jax.ShapeDtypeStruct((Bp, wc.shape[1]), jnp.float32),
        grid=(1,),
        in_specs=[full((Bp, 128)), full(w0.shape), full(b0.shape),
                  full(w1.shape), full(b1.shape), full(wc.shape), full(bc.shape)],
        out_specs=full((Bp, wc.shape[1])),
        compiler_params=pltpu.CompilerParams(vmem_limit_bytes=_VMEM_LIMIT),
    )(xp, w0, b0, w1, b1, wc, bc)
    return out[:B]


# ----------------------------------------------------------------------------
# Flow-matching prep and tiled MSE loss (no padded HBM copies)
# ----------------------------------------------------------------------------
def _time_tile(T):
    if T % 128 == 0 and T > 2048:
        for c in (2048, 1024, 512, 256, 128):
            if T % c == 0:
                return c
    return T


def _fm_prep_kernel(x_ref, e_ref, t_ref, xt_ref, tgt_ref):
    x = x_ref[...]
    e = e_ref[...]
    t = t_ref[...]                              # (B, 1) broadcast over time
    xt_ref[...] = (t * x + (1.0 - t) * e).astype(xt_ref.dtype)
    tgt_ref[...] = x - e


def pallas_fm_prep(x2, e2, t):
    """x2, e2: (B, T) f32 ; t: (B, 1).  Returns (x_t bf16, target f32)."""
    B, T = x2.shape
    tT = _time_tile(T)
    n_t = T // tT
    return pl.pallas_call(
        _fm_prep_kernel,
        out_shape=(jax.ShapeDtypeStruct((B, T), jnp.bfloat16),
                   jax.ShapeDtypeStruct((B, T), jnp.float32)),
        grid=(n_t,),
        in_specs=[pl.BlockSpec((B, tT), lambda i: (0, i)),
                  pl.BlockSpec((B, tT), lambda i: (0, i)),
                  pl.BlockSpec((B, 1), lambda i: (0, 0))],
        out_specs=(pl.BlockSpec((B, tT), lambda i: (0, i)),
                   pl.BlockSpec((B, tT), lambda i: (0, i))),
        compiler_params=pltpu.CompilerParams(
            dimension_semantics=("parallel",), vmem_limit_bytes=_VMEM_LIMIT),
    )(x2, e2, t)


def _mse_kernel(y_ref, t_ref, o_ref, acc_ref, *, denom):
    i = pl.program_id(0)

    @pl.when(i == 0)
    def _():
        acc_ref[...] = jnp.zeros_like(acc_ref)

    d = y_ref[...] - t_ref[...]
    s = jnp.sum(d * d, axis=1, keepdims=True)
    acc_ref[...] += jnp.sum(s, axis=0, keepdims=True)

    @pl.when(i == pl.num_programs(0) - 1)
    def _():
        o_ref[...] = acc_ref[...] * (1.0 / denom)


def pallas_mse(y2, t2):
    """Mean squared error over all elements; tiled reduction with a resident accumulator."""
    B, T = y2.shape
    tT = _time_tile(T)
    n_t = T // tT
    out = pl.pallas_call(
        functools.partial(_mse_kernel, denom=float(B * T)),
        out_shape=jax.ShapeDtypeStruct((1, 1), jnp.float32),
        grid=(n_t,),
        in_specs=[pl.BlockSpec((B, tT), lambda i: (0, i)),
                  pl.BlockSpec((B, tT), lambda i: (0, i))],
        out_specs=pl.BlockSpec((1, 1), lambda i: (0, 0)),
        scratch_shapes=[pltpu.VMEM((1, 1), jnp.float32)],
        compiler_params=pltpu.CompilerParams(
            dimension_semantics=("arbitrary",), vmem_limit_bytes=_VMEM_LIMIT),
    )(y2, t2)
    return out[0, 0]


# ----------------------------------------------------------------------------
# Parameter init: weights reshaped to (Cin*K, Cout) tap-major / channel-minor,
# padded to lane multiples, cast to bf16 ONCE here (hoisted out of the forward).
# Padded weight columns and biases are zero so epilogue math in pad lanes stays zero.
# ----------------------------------------------------------------------------
def _conv_param(key, cout, cin, k):
    w = jax.random.normal(key, (cout, cin, k), jnp.float32) / math.sqrt(cin * k)
    w2 = jnp.transpose(w, (2, 1, 0)).reshape(cin * k, cout)
    kp, np_ = _round_up(cin * k, 128), _round_up(cout, 128)
    wp = jnp.zeros((kp, np_), jnp.float32).at[:cin * k, :cout].set(w2).astype(jnp.bfloat16)
    bp = jnp.zeros((1, np_), jnp.float32)
    return (wp, bp)


def _dense_param(key, din, dout):
    w = jax.random.normal(key, (din, dout), jnp.float32) / math.sqrt(din)
    kp, np_ = _round_up(din, 128), _round_up(dout, 128)
    wp = jnp.zeros((kp, np_), jnp.float32).at[:din, :dout].set(w).astype(jnp.bfloat16)
    bp = jnp.zeros((1, np_), jnp.float32)
    return (wp, bp)


def _dense_param_concat(key, din, douts):
    keys = jax.random.split(key, len(douts))
    ws = [jax.random.normal(kk, (din, d), jnp.float32) / math.sqrt(din)
          for kk, d in zip(keys, douts)]
    w = jnp.concatenate(ws, axis=1)
    dout = sum(douts)
    kp, np_ = _round_up(din, 128), _round_up(dout, 128)
    wp = jnp.zeros((kp, np_), jnp.float32).at[:din, :dout].set(w).astype(jnp.bfloat16)
    bp = jnp.zeros((1, np_), jnp.float32)
    return (wp, bp)


def init_params(key):
    keys = jax.random.split(key, 16)
    ki = iter(keys)
    c0, c1, c2, zdim = 128, 256, 512, 128
    p = {}
    # SEANet-style encoder (simplified)            # TODO(synk): full SEANetEncoder
    p["enc0"] = _conv_param(next(ki), 32, 1, 7)
    p["enc1"] = _conv_param(next(ki), 64, 32, 4)
    p["enc2"] = _conv_param(next(ki), 128, 64, 4)
    p["enc3"] = _conv_param(next(ki), zdim, 128, 3)
    # UNet time embedding + merged per-level projections (fused into one kernel)
    p["t_fc0"] = _dense_param(next(ki), 128, 128)
    p["t_fc1"] = _dense_param(next(ki), 128, 128)
    p["t_c"] = _dense_param_concat(next(ki), 128, (c0, c1, c2))
    # UNet convs                                    # TODO(synk): full ConsistencyDecoderUNet
    p["z_proj"] = _conv_param(next(ki), c0, zdim, 1)
    p["in_conv"] = _conv_param(next(ki), c0, 1, 3)
    p["down1"] = _conv_param(next(ki), c1, c0, 3)
    p["down2"] = _conv_param(next(ki), c2, c1, 3)
    p["mid"] = _conv_param(next(ki), c2, c2, 3)
    p["up1"] = _conv_param(next(ki), c1, c2, 3)
    p["up0"] = _conv_param(next(ki), c0, c1, 3)
    p["out_conv"] = _conv_param(next(ki), 1, c0, 3)
    return p


# ----------------------------------------------------------------------------
# Model forward passes (all activations channels-last bf16)
# ----------------------------------------------------------------------------
def encoder_forward(p, x_cl):
    h = conv1d_cl(x_cl, p["enc0"], 7, 1, 3, act="elu")[:, :, :32]    # (B, T, 32)
    h = conv1d_cl(h, p["enc1"], 4, 2, 1, act="elu")[:, :, :64]       # (B, T/2, 64)
    h = conv1d_cl(h, p["enc2"], 4, 2, 1, act="elu")                  # (B, T/4, 128)
    z = conv1d_cl(h, p["enc3"], 3, 1, 1, act="none", ln=True)        # fused LayerNorm(128)
    return z                                                         # (B, T/4, 128)


def timestep_embedding(t, dim=128):
    half = dim // 2
    freqs = jnp.exp(-math.log(10000.0) * jnp.arange(half, dtype=jnp.float32) / half)
    args = t[:, None] * freqs[None, :]
    return jnp.concatenate([jnp.sin(args), jnp.cos(args)], axis=-1)


def unet_forward(p, x_cl, t, z):
    B, T, _ = x_cl.shape
    c0, c1, c2 = 128, 256, 512

    # time embedding MLP + merged per-level projections: ONE fused kernel
    tc = pallas_temb(timestep_embedding(t, 128), p)                  # (B, 896) f32
    t_c0 = tc[:, :c0].reshape(B, 1, c0)
    t_c1 = tc[:, c0:c0 + c1].reshape(B, 1, c1)
    t_c2 = tc[:, c0 + c1:].reshape(B, 1, c2)

    # latent conditioning: 1x1 projection first (4x less work), then nearest upsample
    zc = conv1d_cl(z, p["z_proj"], 1, 1, 0, act="none")              # (B, Tz, c0)
    zc = jnp.repeat(zc, T // z.shape[1], axis=1)                     # (B, T, c0)
    # TODO(synk): fold the nearest-neighbour repeats (zc, m, u1) into the consumer
    # conv's input indexing instead of materializing the upsampled slabs in HBM.

    h0 = conv1d_cl(x_cl, p["in_conv"], 3, 1, 1, act="elu",
                   temb=t_c0, residuals=(zc,))                       # (B, T, c0)
    h1 = conv1d_cl(h0, p["down1"], 3, 2, 1, act="elu", temb=t_c1)    # (B, T/2, c1)
    h2 = conv1d_cl(h1, p["down2"], 3, 2, 1, act="elu", temb=t_c2)    # (B, T/4, c2)
    m = conv1d_cl(h2, p["mid"], 3, 1, 1, act="elu")                  # (B, T/4, c2)

    u1 = conv1d_cl(jnp.repeat(m, 2, axis=1), p["up1"], 3, 1, 1,
                   act="elu", residuals=(h1,))                       # (B, T/2, c1)
    u0 = conv1d_cl(jnp.repeat(u1, 2, axis=1), p["up0"], 3, 1, 1,
                   act="elu", residuals=(h0,))                       # (B, T, c0)

    y = conv1d_cl(u0, p["out_conv"], 3, 1, 1, act="none",
                  out_dtype=jnp.float32)                             # lane-dense (B, T, 128)
    return y[:, :, :1]                                               # (B, T, 1)


def dito_forward(p, x_t_cl, t):
    z = encoder_forward(p, x_t_cl)            # LayerNorm already fused into enc3 epilogue
    return unet_forward(p, x_t_cl, t, z)


def dito_trainer_forward(p, x, key):
    """FM.loss(model, x, return_all=True) -> (loss, x_t, y); DiToTrainer returns (y, loss)."""
    B, C, T = x.shape                          # C == 1
    kt, ke = jax.random.split(key)
    t = jax.random.uniform(kt, (B,), jnp.float32)
    eps = jax.random.normal(ke, x.shape, jnp.float32)

    x2 = x.reshape(B, C * T)
    e2 = eps.reshape(B, C * T)
    xt2, tgt2 = pallas_fm_prep(x2, e2, t[:, None])   # x_t = t*x + (1-t)*eps ; tgt = x - eps

    x_t_cl = xt2.reshape(B, T, C)              # channels-last (free: C == 1)
    y_cl = dito_forward(p, x_t_cl, t)          # (B, T, 1) f32
    loss = pallas_mse(y_cl.reshape(B, C * T), tgt2)
    y = y_cl.reshape(B, C, T)                  # back to NCL (free: C == 1)
    return y, loss


# ----------------------------------------------------------------------------
if __name__ == "__main__":
    key = jax.random.PRNGKey(0)
    kparam, kx, kfm = jax.random.split(key, 3)

    params = init_params(kparam)
    B, T = 2, 64
    x = jax.random.normal(kx, (B, 1, T), jnp.float32)

    fwd = jax.jit(dito_trainer_forward)
    y, loss = fwd(params, x, kfm)
    jax.block_until_ready((y, loss))

    assert y.shape == (B, 1, T) and y.dtype == jnp.float32
    assert loss.shape == () and jnp.isfinite(loss)
    print("KERNEL_OK")
</pallas_src>

<mosaic_0001>
module attributes {stable_mosaic.version = 11 : i64} {
  func.func @_conv_kernel(%arg0: i32, %arg1: i32, %arg2: memref<1x64x128xbf16, #tpu.memory_space<vmem>>, %arg3: memref<128x128xbf16, #tpu.memory_space<vmem>>, %arg4: memref<1x128xf32, #tpu.memory_space<vmem>>, %arg5: memref<1x64x128xbf16, #tpu.memory_space<vmem>>) attributes {dimension_semantics = [#tpu.dimension_semantics<parallel>, #tpu.dimension_semantics<parallel>], iteration_bounds = array<i64: 2, 1>, scalar_prefetch = 0 : i64, scratch_operands = 0 : i64, tpu.core_type = #tpu.core_type<tc>, window_params = [{transform_indices = @transform_0, window_bounds = array<i64: 1, 64, 128>}, {pipeline_mode = #tpu.pipeline_mode<synchronous>, transform_indices = @transform_1, window_bounds = array<i64: 128, 128>}, {pipeline_mode = #tpu.pipeline_mode<synchronous>, transform_indices = @transform_2, window_bounds = array<i64: 1, 128>}, {transform_indices = @transform_3, window_bounds = array<i64: 1, 64, 128>}]} {
    %c0 = arith.constant 0 : index
    %c0_0 = arith.constant 0 : index
    %c0_1 = arith.constant 0 : index
    %0 = vector.load %arg2[%c0, %c0_0, %c0_1] : memref<1x64x128xbf16, #tpu.memory_space<vmem>>, vector<1x64x128xbf16>
    %1 = vector.shape_cast %0 : vector<1x64x128xbf16> to vector<64x128xbf16>
    %c0_2 = arith.constant 0 : index
    %c0_3 = arith.constant 0 : index
    %2 = vector.load %arg3[%c0_2, %c0_3] : memref<128x128xbf16, #tpu.memory_space<vmem>>, vector<128x128xbf16>
    %cst = arith.constant dense<0.000000e+00> : vector<64x128xf32>
    %3 = tpu.matmul %1, %2, %cst {dimension_numbers = #tpu.dot_dimension_numbers<[1], [0], [0], [1], [0, 0, 1, 1], [], []>} : vector<64x128xbf16>, vector<128x128xbf16>, vector<64x128xf32> -> vector<64x128xf32>
    %c0_4 = arith.constant 0 : index
    %c0_5 = arith.constant 0 : index
    %4 = vector.load %arg4[%c0_4, %c0_5] : memref<1x128xf32, #tpu.memory_space<vmem>>, vector<1x128xf32>
    %5 = vector.broadcast %4 : vector<1x128xf32> to vector<64x128xf32>
    %6 = arith.addf %3, %5 : vector<64x128xf32>
    %cst_6 = arith.constant 0.000000e+00 : f32
    %7 = vector.broadcast %cst_6 : f32 to vector<64x128xf32>
    %8 = arith.cmpf ogt, %6, %7 : vector<64x128xf32>
    %cst_7 = arith.constant 0.000000e+00 : f32
    %9 = vector.broadcast %cst_7 : f32 to vector<64x128xf32>
    %10 = arith.minimumf %6, %9 : vector<64x128xf32>
    %11 = math.exp %10 : vector<64x128xf32>
    %cst_8 = arith.constant 1.000000e+00 : f32
    %12 = vector.broadcast %cst_8 : f32 to vector<64x128xf32>
    %13 = arith.subf %11, %12 : vector<64x128xf32>
    %14 = arith.select %8, %6, %13 : vector<64x128xi1>, vector<64x128xf32>
    %15 = arith.truncf %14 : vector<64x128xf32> to vector<64x128xbf16>
    %c0_9 = arith.constant 0 : index
    %c0_10 = arith.constant 0 : index
    %c0_11 = arith.constant 0 : index
    %16 = vector.load %arg5[%c0_9, %c0_10, %c0_11] : memref<1x64x128xbf16, #tpu.memory_space<vmem>>, vector<1x64x128xbf16>
    %17 = vector.shape_cast %16 : vector<1x64x128xbf16> to vector<64x128xbf16>
    %18 = vector.shape_cast %15 : vector<64x128xbf16> to vector<1x64x128xbf16>
    tpu.vector_store %arg5[%c0_9, %c0_10, %c0_11], %18 {strides = array<i32>} : memref<1x64x128xbf16, #tpu.memory_space<vmem>>, vector<1x64x128xbf16>,
    return
  }
  func.func @transform_0(%arg0: i32, %arg1: i32) -> (i32, i32, i32) {
    %c0_i32 = arith.constant 0 : i32
    %c0_i32_0 = arith.constant 0 : i32
    %c0_i32_1 = arith.constant 0 : i32
    return %arg0, %c0_i32, %c0_i32_0 : i32, i32, i32
  }
  func.func @transform_1(%arg0: i32, %arg1: i32) -> (i32, i32) {
    %c0_i32 = arith.constant 0 : i32
    %c0_i32_0 = arith.constant 0 : i32
    %c0_i32_1 = arith.constant 0 : i32
    return %c0_i32, %c0_i32_0 : i32, i32
  }
  func.func @transform_2(%arg0: i32, %arg1: i32) -> (i32, i32) {
    %c0_i32 = arith.constant 0 : i32
    %c0_i32_0 = arith.constant 0 : i32
    %c0_i32_1 = arith.constant 0 : i32
    return %c0_i32, %c0_i32_0 : i32, i32
  }
  func.func @transform_3(%arg0: i32, %arg1: i32) -> (i32, i32, i32) {
    %c0_i32 = arith.constant 0 : i32
    %c0_i32_0 = arith.constant 0 : i32
    return %arg0, %arg1, %c0_i32 : i32, i32, i32
  }
}

module attributes {stable_mosaic.version = 11 : i64} {
  func.func @_fm_prep_kernel(%arg0: i32, %arg1: memref<2x64xf32, #tpu.memory_space<vmem>>, %arg2: memref<2x64xf32, #tpu.memory_space<vmem>>, %arg3: memref<2x1xf32, #tpu.memory_space<vmem>>, %arg4: memref<2x64xbf16, #tpu.memory_space<vmem>>, %arg5: memref<2x64xf32, #tpu.memory_space<vmem>>) attributes {dimension_semantics = [#tpu.dimension_semantics<parallel>], iteration_bounds = array<i64: 1>, scalar_prefetch = 0 : i64, scratch_operands = 0 : i64, tpu.core_type = #tpu.core_type<tc>, window_params = [{transform_indices = @transform_0, window_bounds = array<i64: 2, 64>}, {transform_indices = @transform_1, window_bounds = array<i64: 2, 64>}, {pipeline_mode = #tpu.pipeline_mode<synchronous>, transform_indices = @transform_2, window_bounds = array<i64: 2, 1>}, {transform_indices = @transform_3, window_bounds = array<i64: 2, 64>}, {transform_indices = @transform_4, window_bounds = array<i64: 2, 64>}]} {
    %c0 = arith.constant 0 : index
    %c0_0 = arith.constant 0 : index
    %0 = vector.load %arg1[%c0, %c0_0] : memref<2x64xf32, #tpu.memory_space<vmem>>, vector<2x64xf32>
    %c0_1 = arith.constant 0 : index
    %c0_2 = arith.constant 0 : index
    %1 = vector.load %arg2[%c0_1, %c0_2] : memref<2x64xf32, #tpu.memory_space<vmem>>, vector<2x64xf32>
    %c0_3 = arith.constant 0 : index
    %c0_4 = arith.constant 0 : index
    %2 = vector.load %arg3[%c0_3, %c0_4] : memref<2x1xf32, #tpu.memory_space<vmem>>, vector<2x1xf32>
    %3 = vector.broadcast %2 : vector<2x1xf32> to vector<2x64xf32>
    %4 = arith.mulf %3, %0 : vector<2x64xf32>
    %cst = arith.constant 1.000000e+00 : f32
    %5 = vector.broadcast %cst : f32 to vector<2x1xf32>
    %6 = arith.subf %5, %2 : vector<2x1xf32>
    %7 = vector.broadcast %6 : vector<2x1xf32> to vector<2x64xf32>
    %8 = arith.mulf %7, %1 : vector<2x64xf32>
    %9 = arith.addf %4, %8 : vector<2x64xf32>
    %10 = arith.truncf %9 : vector<2x64xf32> to vector<2x64xbf16>
    %c0_5 = arith.constant 0 : index
    %c0_6 = arith.constant 0 : index
    %11 = vector.load %arg4[%c0_5, %c0_6] : memref<2x64xbf16, #tpu.memory_space<vmem>>, vector<2x64xbf16>
    tpu.vector_store %arg4[%c0_5, %c0_6], %10 {strides = array<i32>} : memref<2x64xbf16, #tpu.memory_space<vmem>>, vector<2x64xbf16>,
    %12 = arith.subf %0, %1 : vector<2x64xf32>
    %c0_7 = arith.constant 0 : index
    %c0_8 = arith.constant 0 : index
    %13 = vector.load %arg5[%c0_7, %c0_8] : memref<2x64xf32, #tpu.memory_space<vmem>>, vector<2x64xf32>
    tpu.vector_store %arg5[%c0_7, %c0_8], %12 {strides = array<i32>} : memref<2x64xf32, #tpu.memory_space<vmem>>, vector<2x64xf32>,
    return
  }
  func.func @transform_0(%arg0: i32) -> (i32, i32) {
    %c0_i32 = arith.constant 0 : i32
    %c0_i32_0 = arith.constant 0 : i32
    return %c0_i32, %arg0 : i32, i32
  }
  func.func @transform_1(%arg0: i32) -> (i32, i32) {
    %c0_i32 = arith.constant 0 : i32
    %c0_i32_0 = arith.constant 0 : i32
    return %c0_i32, %arg0 : i32, i32
  }
  func.func @transform_2(%arg0: i32) -> (i32, i32) {
    %c0_i32 = arith.constant 0 : i32
    %c0_i32_0 = arith.constant 0 : i32
    %c0_i32_1 = arith.constant 0 : i32
    return %c0_i32, %c0_i32_0 : i32, i32
  }
  func.func @transform_3(%arg0: i32) -> (i32, i32) {
    %c0_i32 = arith.constant 0 : i32
    %c0_i32_0 = arith.constant 0 : i32
    return %c0_i32, %arg0 : i32, i32
  }
  func.func @transform_4(%arg0: i32) -> (i32, i32) {
    %c0_i32 = arith.constant 0 : i32
    %c0_i32_0 = arith.constant 0 : i32
    return %c0_i32, %arg0 : i32, i32
  }
}

module attributes {stable_mosaic.version = 11 : i64} {
  func.func @_temb_kernel(%arg0: i32, %arg1: memref<8x128xbf16, #tpu.memory_space<vmem>>, %arg2: memref<128x128xbf16, #tpu.memory_space<vmem>>, %arg3: memref<1x128xf32, #tpu.memory_space<vmem>>, %arg4: memref<128x128xbf16, #tpu.memory_space<vmem>>, %arg5: memref<1x128xf32, #tpu.memory_space<vmem>>, %arg6: memref<128x896xbf16, #tpu.memory_space<vmem>>, %arg7: memref<1x896xf32, #tpu.memory_space<vmem>>, %arg8: memref<8x896xf32, #tpu.memory_space<vmem>>) attributes {dimension_semantics = [#tpu.dimension_semantics<arbitrary>], iteration_bounds = array<i64: 1>, scalar_prefetch = 0 : i64, scratch_operands = 0 : i64, tpu.core_type = #tpu.core_type<tc>, window_params = [{pipeline_mode = #tpu.pipeline_mode<synchronous>, transform_indices = @transform_0, window_bounds = array<i64: 8, 128>}, {pipeline_mode = #tpu.pipeline_mode<synchronous>, transform_indices = @transform_1, window_bounds = array<i64: 128, 128>}, {pipeline_mode = #tpu.pipeline_mode<synchronous>, transform_indices = @transform_2, window_bounds = array<i64: 1, 128>}, {pipeline_mode = #tpu.pipeline_mode<synchronous>, transform_indices = @transform_3, window_bounds = array<i64: 128, 128>}, {pipeline_mode = #tpu.pipeline_mode<synchronous>, transform_indices = @transform_4, window_bounds = array<i64: 1, 128>}, {pipeline_mode = #tpu.pipeline_mode<synchronous>, transform_indices = @transform_5, window_bounds = array<i64: 128, 896>}, {pipeline_mode = #tpu.pipeline_mode<synchronous>, transform_indices = @transform_6, window_bounds = array<i64: 1, 896>}, {pipeline_mode = #tpu.pipeline_mode<synchronous>, transform_indices = @transform_7, window_bounds = array<i64: 8, 896>}]} {
    %c0 = arith.constant 0 : index
    %c0_0 = arith.constant 0 : index
    %0 = vector.load %arg1[%c0, %c0_0] : memref<8x128xbf16, #tpu.memory_space<vmem>>, vector<8x128xbf16>
    %c0_1 = arith.constant 0 : index
    %c0_2 = arith.constant 0 : index
    %1 = vector.load %arg2[%c0_1, %c0_2] : memref<128x128xbf16, #tpu.memory_space<vmem>>, vector<128x128xbf16>
    %cst = arith.constant dense<0.000000e+00> : vector<8x128xf32>
    %2 = tpu.matmul %0, %1, %cst {dimension_numbers = #tpu.dot_dimension_numbers<[1], [0], [0], [1], [0, 0, 1, 1], [], []>} : vector<8x128xbf16>, vector<128x128xbf16>, vector<8x128xf32> -> vector<8x128xf32>
    %c0_3 = arith.constant 0 : index
    %c0_4 = arith.constant 0 : index
    %3 = vector.load %arg3[%c0_3, %c0_4] : memref<1x128xf32, #tpu.memory_space<vmem>>, vector<1x128xf32>
    %4 = vector.broadcast %3 : vector<1x128xf32> to vector<8x128xf32>
    %5 = arith.addf %2, %4 : vector<8x128xf32>
    %6 = arith.negf %5 : vector<8x128xf32>
    %7 = math.exp %6 : vector<8x128xf32>
    %cst_5 = arith.constant 1.000000e+00 : f32
    %8 = vector.broadcast %cst_5 : f32 to vector<8x128xf32>
    %9 = arith.addf %8, %7 : vector<8x128xf32>
    %10 = arith.divf %8, %9 : vector<8x128xf32>
    %11 = arith.mulf %5, %10 : vector<8x128xf32>
    %12 = arith.truncf %11 : vector<8x128xf32> to vector<8x128xbf16>
    %c0_6 = arith.constant 0 : index
    %c0_7 = arith.constant 0 : index
    %13 = vector.load %arg4[%c0_6, %c0_7] : memref<128x128xbf16, #tpu.memory_space<vmem>>, vector<128x128xbf16>
    %cst_8 = arith.constant dense<0.000000e+00> : vector<8x128xf32>
    %14 = tpu.matmul %12, %13, %cst_8 {dimension_numbers = #tpu.dot_dimension_numbers<[1], [0], [0], [1], [0, 0, 1, 1], [], []>} : vector<8x128xbf16>, vector<128x128xbf16>, vector<8x128xf32> -> vector<8x128xf32>
    %c0_9 = arith.constant 0 : index
    %c0_10 = arith.constant 0 : index
    %15 = vector.load %arg5[%c0_9, %c0_10] : memref<1x128xf32, #tpu.memory_space<vmem>>, vector<1x128xf32>
    %16 = vector.broadcast %15 : vector<1x128xf32> to vector<8x128xf32>
    %17 = arith.addf %14, %16 : vector<8x128xf32>
    %18 = arith.negf %17 : vector<8x128xf32>
    %19 = math.exp %18 : vector<8x128xf32>
    %cst_11 = arith.constant 1.000000e+00 : f32
    %20 = vector.broadcast %cst_11 : f32 to vector<8x128xf32>
    %21 = arith.addf %20, %19 : vector<8x128xf32>
    %22 = arith.divf %20, %21 : vector<8x128xf32>
    %23 = arith.mulf %17, %22 : vector<8x128xf32>
    %24 = arith.truncf %23 : vector<8x128xf32> to vector<8x128xbf16>
    %c0_12 = arith.constant 0 : index
    %c0_13 = arith.constant 0 : index
    %25 = vector.load %arg6[%c0_12, %c0_13] : memref<128x896xbf16, #tpu.memory_space<vmem>>, vector<128x896xbf16>
    %cst_14 = arith.constant dense<0.000000e+00> : vector<8x896xf32>
    %26 = tpu.matmul %24, %25, %cst_14 {dimension_numbers = #tpu.dot_dimension_numbers<[1], [0], [0], [1], [0, 0, 1, 1], [], []>} : vector<8x128xbf16>, vector<128x896xbf16>, vector<8x896xf32> -> vector<8x896xf32>
    %c0_15 = arith.constant 0 : index
    %c0_16 = arith.constant 0 : index
    %27 = vector.load %arg7[%c0_15, %c0_16] : memref<1x896xf32, #tpu.memory_space<vmem>>, vector<1x896xf32>
    %28 = vector.broadcast %27 : vector<1x896xf32> to vector<8x896xf32>
    %29 = arith.addf %26, %28 : vector<8x896xf32>
    %c0_17 = arith.constant 0 : index
    %c0_18 = arith.constant 0 : index
    %30 = vector.load %arg8[%c0_17, %c0_18] : memref<8x896xf32, #tpu.memory_space<vmem>>, vector<8x896xf32>
    tpu.vector_store %arg8[%c0_17, %c0_18], %29 {strides = array<i32>} : memref<8x896xf32, #tpu.memory_space<vmem>>, vector<8x896xf32>,
    return
  }
  func.func @transform_0(%arg0: i32) -> (i32, i32) {
    %c0_i32 = arith.constant 0 : i32
    %c0_i32_0 = arith.constant 0 : i32
    %c0_i32_1 = arith.constant 0 : i32
    return %c0_i32, %c0_i32_0 : i32, i32
  }
  func.func @transform_1(%arg0: i32) -> (i32, i32) {
    %c0_i32 = arith.constant 0 : i32
    %c0_i32_0 = arith.constant 0 : i32
    %c0_i32_1 = arith.constant 0 : i32
    return %c0_i32, %c0_i32_0 : i32, i32
  }
  func.func @transform_2(%arg0: i32) -> (i32, i32) {
    %c0_i32 = arith.constant 0 : i32
    %c0_i32_0 = arith.constant 0 : i32
    %c0_i32_1 = arith.constant 0 : i32
    return %c0_i32, %c0_i32_0 : i32, i32
  }
  func.func @transform_3(%arg0: i32) -> (i32, i32) {
    %c0_i32 = arith.constant 0 : i32
    %c0_i32_0 = arith.constant 0 : i32
    %c0_i32_1 = arith.constant 0 : i32
    return %c0_i32, %c0_i32_0 : i32, i32
  }
  func.func @transform_4(%arg0: i32) -> (i32, i32) {
    %c0_i32 = arith.constant 0 : i32
    %c0_i32_0 = arith.constant 0 : i32
    %c0_i32_1 = arith.constant 0 : i32
    return %c0_i32, %c0_i32_0 : i32, i32
  }
  func.func @transform_5(%arg0: i32) -> (i32, i32) {
    %c0_i32 = arith.constant 0 : i32
    %c0_i32_0 = arith.constant 0 : i32
    %c0_i32_1 = arith.constant 0 : i32
    return %c0_i32, %c0_i32_0 : i32, i32
  }
  func.func @transform_6(%arg0: i32) -> (i32, i32) {
    %c0_i32 = arith.constant 0 : i32
    %c0_i32_0 = arith.constant 0 : i32
    %c0_i32_1 = arith.constant 0 : i32
    return %c0_i32, %c0_i32_0 : i32, i32
  }
  func.func @transform_7(%arg0: i32) -> (i32, i32) {
    %c0_i32 = arith.constant 0 : i32
    %c0_i32_0 = arith.constant 0 : i32
    %c0_i32_1 = arith.constant 0 : i32
    return %c0_i32, %c0_i32_0 : i32, i32
  }
}

module attributes {stable_mosaic.version = 11 : i64} {
  func.func @_conv_kernel(%arg0: i32, %arg1: i32, %arg2: memref<1x32x128xbf16, #tpu.memory_space<vmem>>, %arg3: memref<128x128xbf16, #tpu.memory_space<vmem>>, %arg4: memref<1x128xf32, #tpu.memory_space<vmem>>, %arg5: memref<1x32x128xbf16, #tpu.memory_space<vmem>>) attributes {dimension_semantics = [#tpu.dimension_semantics<parallel>, #tpu.dimension_semantics<parallel>], iteration_bounds = array<i64: 2, 1>, scalar_prefetch = 0 : i64, scratch_operands = 0 : i64, tpu.core_type = #tpu.core_type<tc>, window_params = [{transform_indices = @transform_0, window_bounds = array<i64: 1, 32, 128>}, {pipeline_mode = #tpu.pipeline_mode<synchronous>, transform_indices = @transform_1, window_bounds = array<i64: 128, 128>}, {pipeline_mode = #tpu.pipeline_mode<synchronous>, transform_indices = @transform_2, window_bounds = array<i64: 1, 128>}, {transform_indices = @transform_3, window_bounds = array<i64: 1, 32, 128>}]} {
    %c0 = arith.constant 0 : index
    %c0_0 = arith.constant 0 : index
    %c0_1 = arith.constant 0 : index
    %0 = vector.load %arg2[%c0, %c0_0, %c0_1] : memref<1x32x128xbf16, #tpu.memory_space<vmem>>, vector<1x32x128xbf16>
    %1 = vector.shape_cast %0 : vector<1x32x128xbf16> to vector<32x128xbf16>
    %c0_2 = arith.constant 0 : index
    %c0_3 = arith.constant 0 : index
    %2 = vector.load %arg3[%c0_2, %c0_3] : memref<128x128xbf16, #tpu.memory_space<vmem>>, vector<128x128xbf16>
    %cst = arith.constant dense<0.000000e+00> : vector<32x128xf32>
    %3 = tpu.matmul %1, %2, %cst {dimension_numbers = #tpu.dot_dimension_numbers<[1], [0], [0], [1], [0, 0, 1, 1], [], []>} : vector<32x128xbf16>, vector<128x128xbf16>, vector<32x128xf32> -> vector<32x128xf32>
    %c0_4 = arith.constant 0 : index
    %c0_5 = arith.constant 0 : index
    %4 = vector.load %arg4[%c0_4, %c0_5] : memref<1x128xf32, #tpu.memory_space<vmem>>, vector<1x128xf32>
    %5 = vector.broadcast %4 : vector<1x128xf32> to vector<32x128xf32>
    %6 = arith.addf %3, %5 : vector<32x128xf32>
    %cst_6 = arith.constant 0.000000e+00 : f32
    %7 = vector.broadcast %cst_6 : f32 to vector<32x128xf32>
    %8 = arith.cmpf ogt, %6, %7 : vector<32x128xf32>
    %cst_7 = arith.constant 0.000000e+00 : f32
    %9 = vector.broadcast %cst_7 : f32 to vector<32x128xf32>
    %10 = arith.minimumf %6, %9 : vector<32x128xf32>
    %11 = math.exp %10 : vector<32x128xf32>
    %cst_8 = arith.constant 1.000000e+00 : f32
    %12 = vector.broadcast %cst_8 : f32 to vector<32x128xf32>
    %13 = arith.subf %11, %12 : vector<32x128xf32>
    %14 = arith.select %8, %6, %13 : vector<32x128xi1>, vector<32x128xf32>
    %15 = arith.truncf %14 : vector<32x128xf32> to vector<32x128xbf16>
    %c0_9 = arith.constant 0 : index
    %c0_10 = arith.constant 0 : index
    %c0_11 = arith.constant 0 : index
    %16 = vector.load %arg5[%c0_9, %c0_10, %c0_11] : memref<1x32x128xbf16, #tpu.memory_space<vmem>>, vector<1x32x128xbf16>
    %17 = vector.shape_cast %16 : vector<1x32x128xbf16> to vector<32x128xbf16>
    %18 = vector.shape_cast %15 : vector<32x128xbf16> to vector<1x32x128xbf16>
    tpu.vector_store %arg5[%c0_9, %c0_10, %c0_11], %18 {strides = array<i32>} : memref<1x32x128xbf16, #tpu.memory_space<vmem>>, vector<1x32x128xbf16>,
    return
  }
  func.func @transform_0(%arg0: i32, %arg1: i32) -> (i32, i32, i32) {
    %c0_i32 = arith.constant 0 : i32
    %c0_i32_0 = arith.constant 0 : i32
    %c0_i32_1 = arith.constant 0 : i32
    return %arg0, %c0_i32, %c0_i32_0 : i32, i32, i32
  }
  func.func @transform_1(%arg0: i32, %arg1: i32) -> (i32, i32) {
    %c0_i32 = arith.constant 0 : i32
    %c0_i32_0 = arith.constant 0 : i32
    %c0_i32_1 = arith.constant 0 : i32
    return %c0_i32, %c0_i32_0 : i32, i32
  }
  func.func @transform_2(%arg0: i32, %arg1: i32) -> (i32, i32) {
    %c0_i32 = arith.constant 0 : i32
    %c0_i32_0 = arith.constant 0 : i32
    %c0_i32_1 = arith.constant 0 : i32
    return %c0_i32, %c0_i32_0 : i32, i32
  }
  func.func @transform_3(%arg0: i32, %arg1: i32) -> (i32, i32, i32) {
    %c0_i32 = arith.constant 0 : i32
    %c0_i32_0 = arith.constant 0 : i32
    return %arg0, %arg1, %c0_i32 : i32, i32, i32
  }
}

module attributes {stable_mosaic.version = 11 : i64} {
  func.func @_conv_kernel(%arg0: i32, %arg1: i32, %arg2: memref<1x16x256xbf16, #tpu.memory_space<vmem>>, %arg3: memref<256x128xbf16, #tpu.memory_space<vmem>>, %arg4: memref<1x128xf32, #tpu.memory_space<vmem>>, %arg5: memref<1x16x128xbf16, #tpu.memory_space<vmem>>) attributes {dimension_semantics = [#tpu.dimension_semantics<parallel>, #tpu.dimension_semantics<parallel>], iteration_bounds = array<i64: 2, 1>, scalar_prefetch = 0 : i64, scratch_operands = 0 : i64, tpu.core_type = #tpu.core_type<tc>, window_params = [{transform_indices = @transform_0, window_bounds = array<i64: 1, 16, 256>}, {pipeline_mode = #tpu.pipeline_mode<synchronous>, transform_indices = @transform_1, window_bounds = array<i64: 256, 128>}, {pipeline_mode = #tpu.pipeline_mode<synchronous>, transform_indices = @transform_2, window_bounds = array<i64: 1, 128>}, {transform_indices = @transform_3, window_bounds = array<i64: 1, 16, 128>}]} {
    %c0 = arith.constant 0 : index
    %c0_0 = arith.constant 0 : index
    %c0_1 = arith.constant 0 : index
    %0 = vector.load %arg2[%c0, %c0_0, %c0_1] : memref<1x16x256xbf16, #tpu.memory_space<vmem>>, vector<1x16x256xbf16>
    %1 = vector.shape_cast %0 : vector<1x16x256xbf16> to vector<16x256xbf16>
    %c0_2 = arith.constant 0 : index
    %c0_3 = arith.constant 0 : index
    %2 = vector.load %arg3[%c0_2, %c0_3] : memref<256x128xbf16, #tpu.memory_space<vmem>>, vector<256x128xbf16>
    %cst = arith.constant dense<0.000000e+00> : vector<16x128xf32>
    %3 = tpu.matmul %1, %2, %cst {dimension_numbers = #tpu.dot_dimension_numbers<[1], [0], [0], [1], [0, 0, 1, 1], [], []>} : vector<16x256xbf16>, vector<256x128xbf16>, vector<16x128xf32> -> vector<16x128xf32>
    %c0_4 = arith.constant 0 : index
    %c0_5 = arith.constant 0 : index
    %4 = vector.load %arg4[%c0_4, %c0_5] : memref<1x128xf32, #tpu.memory_space<vmem>>, vector<1x128xf32>
    %5 = vector.broadcast %4 : vector<1x128xf32> to vector<16x128xf32>
    %6 = arith.addf %3, %5 : vector<16x128xf32>
    %cst_6 = arith.constant 0.000000e+00 : f32
    %7 = vector.broadcast %cst_6 : f32 to vector<16x128xf32>
    %8 = arith.cmpf ogt, %6, %7 : vector<16x128xf32>
    %cst_7 = arith.constant 0.000000e+00 : f32
    %9 = vector.broadcast %cst_7 : f32 to vector<16x128xf32>
    %10 = arith.minimumf %6, %9 : vector<16x128xf32>
    %11 = math.exp %10 : vector<16x128xf32>
    %cst_8 = arith.constant 1.000000e+00 : f32
    %12 = vector.broadcast %cst_8 : f32 to vector<16x128xf32>
    %13 = arith.subf %11, %12 : vector<16x128xf32>
    %14 = arith.select %8, %6, %13 : vector<16x128xi1>, vector<16x128xf32>
    %15 = arith.truncf %14 : vector<16x128xf32> to vector<16x128xbf16>
    %c0_9 = arith.constant 0 : index
    %c0_10 = arith.constant 0 : index
    %c0_11 = arith.constant 0 : index
    %16 = vector.load %arg5[%c0_9, %c0_10, %c0_11] : memref<1x16x128xbf16, #tpu.memory_space<vmem>>, vector<1x16x128xbf16>
    %17 = vector.shape_cast %16 : vector<1x16x128xbf16> to vector<16x128xbf16>
    %18 = vector.shape_cast %15 : vector<16x128xbf16> to vector<1x16x128xbf16>
    tpu.vector_store %arg5[%c0_9, %c0_10, %c0_11], %18 {strides = array<i32>} : memref<1x16x128xbf16, #tpu.memory_space<vmem>>, vector<1x16x128xbf16>,
    return
  }
  func.func @transform_0(%arg0: i32, %arg1: i32) -> (i32, i32, i32) {
    %c0_i32 = arith.constant 0 : i32
    %c0_i32_0 = arith.constant 0 : i32
    %c0_i32_1 = arith.constant 0 : i32
    return %arg0, %c0_i32, %c0_i32_0 : i32, i32, i32
  }
  func.func @transform_1(%arg0: i32, %arg1: i32) -> (i32, i32) {
    %c0_i32 = arith.constant 0 : i32
    %c0_i32_0 = arith.constant 0 : i32
    %c0_i32_1 = arith.constant 0 : i32
    return %c0_i32, %c0_i32_0 : i32, i32
  }
  func.func @transform_2(%arg0: i32, %arg1: i32) -> (i32, i32) {
    %c0_i32 = arith.constant 0 : i32
    %c0_i32_0 = arith.constant 0 : i32
    %c0_i32_1 = arith.constant 0 : i32
    return %c0_i32, %c0_i32_0 : i32, i32
  }
  func.func @transform_3(%arg0: i32, %arg1: i32) -> (i32, i32, i32) {
    %c0_i32 = arith.constant 0 : i32
    %c0_i32_0 = arith.constant 0 : i32
    return %arg0, %arg1, %c0_i32 : i32, i32, i32
  }
}

module attributes {stable_mosaic.version = 11 : i64} {
  func.func @_conv_kernel(%arg0: i32, %arg1: i32, %arg2: memref<1x16x128xbf16, #tpu.memory_space<vmem>>, %arg3: memref<128x128xbf16, #tpu.memory_space<vmem>>, %arg4: memref<1x128xf32, #tpu.memory_space<vmem>>, %arg5: memref<1x16x128xbf16, #tpu.memory_space<vmem>>) attributes {dimension_semantics = [#tpu.dimension_semantics<parallel>, #tpu.dimension_semantics<parallel>], iteration_bounds = array<i64: 2, 1>, scalar_prefetch = 0 : i64, scratch_operands = 0 : i64, tpu.core_type = #tpu.core_type<tc>, window_params = [{transform_indices = @transform_0, window_bounds = array<i64: 1, 16, 128>}, {pipeline_mode = #tpu.pipeline_mode<synchronous>, transform_indices = @transform_1, window_bounds = array<i64: 128, 128>}, {pipeline_mode = #tpu.pipeline_mode<synchronous>, transform_indices = @transform_2, window_bounds = array<i64: 1, 128>}, {transform_indices = @transform_3, window_bounds = array<i64: 1, 16, 128>}]} {
    %c0 = arith.constant 0 : index
    %c0_0 = arith.constant 0 : index
    %c0_1 = arith.constant 0 : index
    %0 = vector.load %arg2[%c0, %c0_0, %c0_1] : memref<1x16x128xbf16, #tpu.memory_space<vmem>>, vector<1x16x128xbf16>
    %1 = vector.shape_cast %0 : vector<1x16x128xbf16> to vector<16x128xbf16>
    %c0_2 = arith.constant 0 : index
    %c0_3 = arith.constant 0 : index
    %2 = vector.load %arg3[%c0_2, %c0_3] : memref<128x128xbf16, #tpu.memory_space<vmem>>, vector<128x128xbf16>
    %cst = arith.constant dense<0.000000e+00> : vector<16x128xf32>
    %3 = tpu.matmul %1, %2, %cst {dimension_numbers = #tpu.dot_dimension_numbers<[1], [0], [0], [1], [0, 0, 1, 1], [], []>} : vector<16x128xbf16>, vector<128x128xbf16>, vector<16x128xf32> -> vector<16x128xf32>
    %c0_4 = arith.constant 0 : index
    %c0_5 = arith.constant 0 : index
    %4 = vector.load %arg4[%c0_4, %c0_5] : memref<1x128xf32, #tpu.memory_space<vmem>>, vector<1x128xf32>
    %5 = vector.broadcast %4 : vector<1x128xf32> to vector<16x128xf32>
    %6 = arith.addf %3, %5 : vector<16x128xf32>
    %7 = arith.truncf %6 : vector<16x128xf32> to vector<16x128xbf16>
    %c0_6 = arith.constant 0 : index
    %c0_7 = arith.constant 0 : index
    %c0_8 = arith.constant 0 : index
    %8 = vector.load %arg5[%c0_6, %c0_7, %c0_8] : memref<1x16x128xbf16, #tpu.memory_space<vmem>>, vector<1x16x128xbf16>
    %9 = vector.shape_cast %8 : vector<1x16x128xbf16> to vector<16x128xbf16>
    %10 = vector.shape_cast %7 : vector<16x128xbf16> to vector<1x16x128xbf16>
    tpu.vector_store %arg5[%c0_6, %c0_7, %c0_8], %10 {strides = array<i32>} : memref<1x16x128xbf16, #tpu.memory_space<vmem>>, vector<1x16x128xbf16>,
    return
  }
  func.func @transform_0(%arg0: i32, %arg1: i32) -> (i32, i32, i32) {
    %c0_i32 = arith.constant 0 : i32
    %c0_i32_0 = arith.constant 0 : i32
    %c0_i32_1 = arith.constant 0 : i32
    return %arg0, %c0_i32, %c0_i32_0 : i32, i32, i32
  }
  func.func @transform_1(%arg0: i32, %arg1: i32) -> (i32, i32) {
    %c0_i32 = arith.constant 0 : i32
    %c0_i32_0 = arith.constant 0 : i32
    %c0_i32_1 = arith.constant 0 : i32
    return %c0_i32, %c0_i32_0 : i32, i32
  }
  func.func @transform_2(%arg0: i32, %arg1: i32) -> (i32, i32) {
    %c0_i32 = arith.constant 0 : i32
    %c0_i32_0 = arith.constant 0 : i32
    %c0_i32_1 = arith.constant 0 : i32
    return %c0_i32, %c0_i32_0 : i32, i32
  }
  func.func @transform_3(%arg0: i32, %arg1: i32) -> (i32, i32, i32) {
    %c0_i32 = arith.constant 0 : i32
    %c0_i32_0 = arith.constant 0 : i32
    return %arg0, %arg1, %c0_i32 : i32, i32, i32
  }
}

module attributes {stable_mosaic.version = 11 : i64} {
  func.func @_conv_kernel(%arg0: i32, %arg1: i32, %arg2: memref<1x18x128xbf16, #tpu.memory_space<vmem>>, %arg3: memref<384x128xbf16, #tpu.memory_space<vmem>>, %arg4: memref<1x128xf32, #tpu.memory_space<vmem>>, %arg5: memref<1x16x128xbf16, #tpu.memory_space<vmem>>) attributes {dimension_semantics = [#tpu.dimension_semantics<parallel>, #tpu.dimension_semantics<parallel>], iteration_bounds = array<i64: 2, 1>, scalar_prefetch = 0 : i64, scratch_operands = 0 : i64, tpu.core_type = #tpu.core_type<tc>, window_params = [{transform_indices = @transform_0, window_bounds = array<i64: 1, 18, 128>}, {pipeline_mode = #tpu.pipeline_mode<synchronous>, transform_indices = @transform_1, window_bounds = array<i64: 384, 128>}, {pipeline_mode = #tpu.pipeline_mode<synchronous>, transform_indices = @transform_2, window_bounds = array<i64: 1, 128>}, {transform_indices = @transform_3, window_bounds = array<i64: 1, 16, 128>}]} {
    %c0 = arith.constant 0 : index
    %c0_0 = arith.constant 0 : index
    %c0_1 = arith.constant 0 : index
    %0 = vector.load %arg2[%c0, %c0_0, %c0_1] : memref<1x18x128xbf16, #tpu.memory_space<vmem>>, vector<1x16x128xbf16>
    %1 = vector.shape_cast %0 : vector<1x16x128xbf16> to vector<16x128xbf16>
    %c0_2 = arith.constant 0 : index
    %c0_3 = arith.constant 0 : index
    %2 = vector.load %arg3[%c0_2, %c0_3] : memref<384x128xbf16, #tpu.memory_space<vmem>>, vector<128x128xbf16>
    %cst = arith.constant dense<0.000000e+00> : vector<16x128xf32>
    %3 = tpu.matmul %1, %2, %cst {dimension_numbers = #tpu.dot_dimension_numbers<[1], [0], [0], [1], [0, 0, 1, 1], [], []>} : vector<16x128xbf16>, vector<128x128xbf16>, vector<16x128xf32> -> vector<16x128xf32>
    %c0_4 = arith.constant 0 : index
    %c1 = arith.constant 1 : index
    %c0_5 = arith.constant 0 : index
    %4 = vector.load %arg2[%c0_4, %c1, %c0_5] : memref<1x18x128xbf16, #tpu.memory_space<vmem>>, vector<1x16x128xbf16>
    %5 = vector.shape_cast %4 : vector<1x16x128xbf16> to vector<16x128xbf16>
    %c128 = arith.constant 128 : index
    %c0_6 = arith.constant 0 : index
    %6 = vector.load %arg3[%c128, %c0_6] : memref<384x128xbf16, #tpu.memory_space<vmem>>, vector<128x128xbf16>
    %cst_7 = arith.constant dense<0.000000e+00> : vector<16x128xf32>
    %7 = tpu.matmul %5, %6, %cst_7 {dimension_numbers = #tpu.dot_dimension_numbers<[1], [0], [0], [1], [0, 0, 1, 1], [], []>} : vector<16x128xbf16>, vector<128x128xbf16>, vector<16x128xf32> -> vector<16x128xf32>
    %8 = arith.addf %3, %7 : vector<16x128xf32>
    %c0_8 = arith.constant 0 : index
    %c2 = arith.constant 2 : index
    %c0_9 = arith.constant 0 : index
    %9 = vector.load %arg2[%c0_8, %c2, %c0_9] : memref<1x18x128xbf16, #tpu.memory_space<vmem>>, vector<1x16x128xbf16>
    %10 = vector.shape_cast %9 : vector<1x16x128xbf16> to vector<16x128xbf16>
    %c256 = arith.constant 256 : index
    %c0_10 = arith.constant 0 : index
    %11 = vector.load %arg3[%c256, %c0_10] : memref<384x128xbf16, #tpu.memory_space<vmem>>, vector<128x128xbf16>
    %cst_11 = arith.constant dense<0.000000e+00> : vector<16x128xf32>
    %12 = tpu.matmul %10, %11, %cst_11 {dimension_numbers = #tpu.dot_dimension_numbers<[1], [0], [0], [1], [0, 0, 1, 1], [], []>} : vector<16x128xbf16>, vector<128x128xbf16>, vector<16x128xf32> -> vector<16x128xf32>
    %13 = arith.addf %8, %12 : vector<16x128xf32>
    %c0_12 = arith.constant 0 : index
    %c0_13 = arith.constant 0 : index
    %14 = vector.load %arg4[%c0_12, %c0_13] : memref<1x128xf32, #tpu.memory_space<vmem>>, vector<1x128xf32>
    %15 = vector.broadcast %14 : vector<1x128xf32> to vector<16x128xf32>
    %16 = arith.addf %13, %15 : vector<16x128xf32>
    %cst_14 = arith.constant dense<0.000000e+00> : vector<16xf32>
    %17 = vector.multi_reduction <add>, %16, %cst_14 [1] : vector<16x128xf32> to vector<16xf32>
    %18 = vector.shape_cast %17 : vector<16xf32> to vector<16x1xf32>
    %cst_15 = arith.constant 1.280000e+02 : f32
    %19 = vector.broadcast %cst_15 : f32 to vector<16x1xf32>
    %20 = arith.divf %18, %19 : vector<16x1xf32>
    %21 = vector.broadcast %20 : vector<16x1xf32> to vector<16x128xf32>
    %22 = arith.subf %16, %21 : vector<16x128xf32>
    %23 = arith.mulf %22, %22 : vector<16x128xf32>
    %cst_16 = arith.constant dense<0.000000e+00> : vector<16xf32>
    %24 = vector.multi_reduction <add>, %23, %cst_16 [1] : vector<16x128xf32> to vector<16xf32>
    %25 = vector.shape_cast %24 : vector<16xf32> to vector<16x1xf32>
    %cst_17 = arith.constant 1.280000e+02 : f32
    %26 = vector.broadcast %cst_17 : f32 to vector<16x1xf32>
    %27 = arith.divf %25, %26 : vector<16x1xf32>
    %cst_18 = arith.constant 9.99999974E-6 : f32
    %28 = vector.broadcast %cst_18 : f32 to vector<16x1xf32>
    %29 = arith.addf %27, %28 : vector<16x1xf32>
    %30 = math.rsqrt %29 : vector<16x1xf32>
    %31 = vector.broadcast %30 : vector<16x1xf32> to vector<16x128xf32>
    %32 = arith.mulf %22, %31 : vector<16x128xf32>
    %33 = arith.truncf %32 : vector<16x128xf32> to vector<16x128xbf16>
    %c0_19 = arith.constant 0 : index
    %c0_20 = arith.constant 0 : index
    %c0_21 = arith.constant 0 : index
    %34 = vector.load %arg5[%c0_19, %c0_20, %c0_21] : memref<1x16x128xbf16, #tpu.memory_space<vmem>>, vector<1x16x128xbf16>
    %35 = vector.shape_cast %34 : vector<1x16x128xbf16> to vector<16x128xbf16>
    %36 = vector.shape_cast %33 : vector<16x128xbf16> to vector<1x16x128xbf16>
    tpu.vector_store %arg5[%c0_19, %c0_20, %c0_21], %36 {strides = array<i32>} : memref<1x16x128xbf16, #tpu.memory_space<vmem>>, vector<1x16x128xbf16>,
    return
  }
  func.func @transform_0(%arg0: i32, %arg1: i32) -> (i32, i32, i32) {
    %c0_i32 = arith.constant 0 : i32
    %c0_i32_0 = arith.constant 0 : i32
    %c0_i32_1 = arith.constant 0 : i32
    return %arg0, %c0_i32, %c0_i32_0 : i32, i32, i32
  }
  func.func @transform_1(%arg0: i32, %arg1: i32) -> (i32, i32) {
    %c0_i32 = arith.constant 0 : i32
    %c0_i32_0 = arith.constant 0 : i32
    %c0_i32_1 = arith.constant 0 : i32
    return %c0_i32, %c0_i32_0 : i32, i32
  }
  func.func @transform_2(%arg0: i32, %arg1: i32) -> (i32, i32) {
    %c0_i32 = arith.constant 0 : i32
    %c0_i32_0 = arith.constant 0 : i32
    %c0_i32_1 = arith.constant 0 : i32
    return %c0_i32, %c0_i32_0 : i32, i32
  }
  func.func @transform_3(%arg0: i32, %arg1: i32) -> (i32, i32, i32) {
    %c0_i32 = arith.constant 0 : i32
    %c0_i32_0 = arith.constant 0 : i32
    return %arg0, %arg1, %c0_i32 : i32, i32, i32
  }
}

module attributes {stable_mosaic.version = 11 : i64} {
  func.func @_conv_kernel(%arg0: i32, %arg1: i32, %arg2: memref<1x64x128xbf16, #tpu.memory_space<vmem>>, %arg3: memref<128x128xbf16, #tpu.memory_space<vmem>>, %arg4: memref<1x128xf32, #tpu.memory_space<vmem>>, %arg5: memref<1x1x128xf32, #tpu.memory_space<vmem>>, %arg6: memref<1x64x128xbf16, #tpu.memory_space<vmem>>, %arg7: memref<1x64x128xbf16, #tpu.memory_space<vmem>>) attributes {dimension_semantics = [#tpu.dimension_semantics<parallel>, #tpu.dimension_semantics<parallel>], iteration_bounds = array<i64: 2, 1>, scalar_prefetch = 0 : i64, scratch_operands = 0 : i64, tpu.core_type = #tpu.core_type<tc>, window_params = [{transform_indices = @transform_0, window_bounds = array<i64: 1, 64, 128>}, {pipeline_mode = #tpu.pipeline_mode<synchronous>, transform_indices = @transform_1, window_bounds = array<i64: 128, 128>}, {pipeline_mode = #tpu.pipeline_mode<synchronous>, transform_indices = @transform_2, window_bounds = array<i64: 1, 128>}, {transform_indices = @transform_3, window_bounds = array<i64: 1, 1, 128>}, {transform_indices = @transform_4, window_bounds = array<i64: 1, 64, 128>}, {transform_indices = @transform_5, window_bounds = array<i64: 1, 64, 128>}]} {
    %c0 = arith.constant 0 : index
    %c0_0 = arith.constant 0 : index
    %c0_1 = arith.constant 0 : index
    %0 = vector.load %arg2[%c0, %c0_0, %c0_1] : memref<1x64x128xbf16, #tpu.memory_space<vmem>>, vector<1x64x128xbf16>
    %1 = vector.shape_cast %0 : vector<1x64x128xbf16> to vector<64x128xbf16>
    %c0_2 = arith.constant 0 : index
    %c0_3 = arith.constant 0 : index
    %2 = vector.load %arg3[%c0_2, %c0_3] : memref<128x128xbf16, #tpu.memory_space<vmem>>, vector<128x128xbf16>
    %cst = arith.constant dense<0.000000e+00> : vector<64x128xf32>
    %3 = tpu.matmul %1, %2, %cst {dimension_numbers = #tpu.dot_dimension_numbers<[1], [0], [0], [1], [0, 0, 1, 1], [], []>} : vector<64x128xbf16>, vector<128x128xbf16>, vector<64x128xf32> -> vector<64x128xf32>
    %c0_4 = arith.constant 0 : index
    %c0_5 = arith.constant 0 : index
    %4 = vector.load %arg4[%c0_4, %c0_5] : memref<1x128xf32, #tpu.memory_space<vmem>>, vector<1x128xf32>
    %5 = vector.broadcast %4 : vector<1x128xf32> to vector<64x128xf32>
    %6 = arith.addf %3, %5 : vector<64x128xf32>
    %cst_6 = arith.constant 0.000000e+00 : f32
    %7 = vector.broadcast %cst_6 : f32 to vector<64x128xf32>
    %8 = arith.cmpf ogt, %6, %7 : vector<64x128xf32>
    %cst_7 = arith.constant 0.000000e+00 : f32
    %9 = vector.broadcast %cst_7 : f32 to vector<64x128xf32>
    %10 = arith.minimumf %6, %9 : vector<64x128xf32>
    %11 = math.exp %10 : vector<64x128xf32>
    %cst_8 = arith.constant 1.000000e+00 : f32
    %12 = vector.broadcast %cst_8 : f32 to vector<64x128xf32>
    %13 = arith.subf %11, %12 : vector<64x128xf32>
    %14 = arith.select %8, %6, %13 : vector<64x128xi1>, vector<64x128xf32>
    %c0_9 = arith.constant 0 : index
    %c0_10 = arith.constant 0 : index
    %c0_11 = arith.constant 0 : index
    %15 = vector.load %arg5[%c0_9, %c0_10, %c0_11] : memref<1x1x128xf32, #tpu.memory_space<vmem>>, vector<1x1x128xf32>
    %16 = vector.shape_cast %15 : vector<1x1x128xf32> to vector<1x128xf32>
    %17 = vector.broadcast %16 : vector<1x128xf32> to vector<64x128xf32>
    %18 = arith.addf %14, %17 : vector<64x128xf32>
    %c0_12 = arith.constant 0 : index
    %c0_13 = arith.constant 0 : index
    %c0_14 = arith.constant 0 : index
    %19 = vector.load %arg6[%c0_12, %c0_13, %c0_14] : memref<1x64x128xbf16, #tpu.memory_space<vmem>>, vector<1x64x128xbf16>
    %20 = vector.shape_cast %19 : vector<1x64x128xbf16> to vector<64x128xbf16>
    %21 = arith.extf %20 : vector<64x128xbf16> to vector<64x128xf32>
    %22 = arith.addf %18, %21 : vector<64x128xf32>
    %23 = arith.truncf %22 : vector<64x128xf32> to vector<64x128xbf16>
    %c0_15 = arith.constant 0 : index
    %c0_16 = arith.constant 0 : index
    %c0_17 = arith.constant 0 : index
    %24 = vector.load %arg7[%c0_15, %c0_16, %c0_17] : memref<1x64x128xbf16, #tpu.memory_space<vmem>>, vector<1x64x128xbf16>
    %25 = vector.shape_cast %24 : vector<1x64x128xbf16> to vector<64x128xbf16>
    %26 = vector.shape_cast %23 : vector<64x128xbf16> to vector<1x64x128xbf16>
    tpu.vector_store %arg7[%c0_15, %c0_16, %c0_17], %26 {strides = array<i32>} : memref<1x64x128xbf16, #tpu.memory_space<vmem>>, vector<1x64x128xbf16>,
    return
  }
  func.func @transform_0(%arg0: i32, %arg1: i32) -> (i32, i32, i32) {
    %c0_i32 = arith.constant 0 : i32
    %c0_i32_0 = arith.constant 0 : i32
    %c0_i32_1 = arith.constant 0 : i32
    return %arg0, %c0_i32, %c0_i32_0 : i32, i32, i32
  }
  func.func @transform_1(%arg0: i32, %arg1: i32) -> (i32, i32) {
    %c0_i32 = arith.constant 0 : i32
    %c0_i32_0 = arith.constant 0 : i32
    %c0_i32_1 = arith.constant 0 : i32
    return %c0_i32, %c0_i32_0 : i32, i32
  }
  func.func @transform_2(%arg0: i32, %arg1: i32) -> (i32, i32) {
    %c0_i32 = arith.constant 0 : i32
    %c0_i32_0 = arith.constant 0 : i32
    %c0_i32_1 = arith.constant 0 : i32
    return %c0_i32, %c0_i32_0 : i32, i32
  }
  func.func @transform_3(%arg0: i32, %arg1: i32) -> (i32, i32, i32) {
    %c0_i32 = arith.constant 0 : i32
    %c0_i32_0 = arith.constant 0 : i32
    %c0_i32_1 = arith.constant 0 : i32
    return %arg0, %c0_i32, %c0_i32_0 : i32, i32, i32
  }
  func.func @transform_4(%arg0: i32, %arg1: i32) -> (i32, i32, i32) {
    %c0_i32 = arith.constant 0 : i32
    %c0_i32_0 = arith.constant 0 : i32
    return %arg0, %arg1, %c0_i32 : i32, i32, i32
  }
  func.func @transform_5(%arg0: i32, %arg1: i32) -> (i32, i32, i32) {
    %c0_i32 = arith.constant 0 : i32
    %c0_i32_0 = arith.constant 0 : i32
    return %arg0, %arg1, %c0_i32 : i32, i32, i32
  }
}

module attributes {stable_mosaic.version = 11 : i64} {
  func.func @_conv_kernel(%arg0: i32, %arg1: i32, %arg2: memref<1x32x384xbf16, #tpu.memory_space<vmem>>, %arg3: memref<384x256xbf16, #tpu.memory_space<vmem>>, %arg4: memref<1x256xf32, #tpu.memory_space<vmem>>, %arg5: memref<1x1x256xf32, #tpu.memory_space<vmem>>, %arg6: memref<1x32x256xbf16, #tpu.memory_space<vmem>>) attributes {dimension_semantics = [#tpu.dimension_semantics<parallel>, #tpu.dimension_semantics<parallel>], iteration_bounds = array<i64: 2, 1>, scalar_prefetch = 0 : i64, scratch_operands = 0 : i64, tpu.core_type = #tpu.core_type<tc>, window_params = [{transform_indices = @transform_0, window_bounds = array<i64: 1, 32, 384>}, {pipeline_mode = #tpu.pipeline_mode<synchronous>, transform_indices = @transform_1, window_bounds = array<i64: 384, 256>}, {pipeline_mode = #tpu.pipeline_mode<synchronous>, transform_indices = @transform_2, window_bounds = array<i64: 1, 256>}, {transform_indices = @transform_3, window_bounds = array<i64: 1, 1, 256>}, {transform_indices = @transform_4, window_bounds = array<i64: 1, 32, 256>}]} {
    %c0 = arith.constant 0 : index
    %c0_0 = arith.constant 0 : index
    %c0_1 = arith.constant 0 : index
    %0 = vector.load %arg2[%c0, %c0_0, %c0_1] : memref<1x32x384xbf16, #tpu.memory_space<vmem>>, vector<1x32x384xbf16>
    %1 = vector.shape_cast %0 : vector<1x32x384xbf16> to vector<32x384xbf16>
    %c0_2 = arith.constant 0 : index
    %c0_3 = arith.constant 0 : index
    %2 = vector.load %arg3[%c0_2, %c0_3] : memref<384x256xbf16, #tpu.memory_space<vmem>>, vector<384x256xbf16>
    %cst = arith.constant dense<0.000000e+00> : vector<32x256xf32>
    %3 = tpu.matmul %1, %2, %cst {dimension_numbers = #tpu.dot_dimension_numbers<[1], [0], [0], [1], [0, 0, 1, 1], [], []>} : vector<32x384xbf16>, vector<384x256xbf16>, vector<32x256xf32> -> vector<32x256xf32>
    %c0_4 = arith.constant 0 : index
    %c0_5 = arith.constant 0 : index
    %4 = vector.load %arg4[%c0_4, %c0_5] : memref<1x256xf32, #tpu.memory_space<vmem>>, vector<1x256xf32>
    %5 = vector.broadcast %4 : vector<1x256xf32> to vector<32x256xf32>
    %6 = arith.addf %3, %5 : vector<32x256xf32>
    %cst_6 = arith.constant 0.000000e+00 : f32
    %7 = vector.broadcast %cst_6 : f32 to vector<32x256xf32>
    %8 = arith.cmpf ogt, %6, %7 : vector<32x256xf32>
    %cst_7 = arith.constant 0.000000e+00 : f32
    %9 = vector.broadcast %cst_7 : f32 to vector<32x256xf32>
    %10 = arith.minimumf %6, %9 : vector<32x256xf32>
    %11 = math.exp %10 : vector<32x256xf32>
    %cst_8 = arith.constant 1.000000e+00 : f32
    %12 = vector.broadcast %cst_8 : f32 to vector<32x256xf32>
    %13 = arith.subf %11, %12 : vector<32x256xf32>
    %14 = arith.select %8, %6, %13 : vector<32x256xi1>, vector<32x256xf32>
    %c0_9 = arith.constant 0 : index
    %c0_10 = arith.constant 0 : index
    %c0_11 = arith.constant 0 : index
    %15 = vector.load %arg5[%c0_9, %c0_10, %c0_11] : memref<1x1x256xf32, #tpu.memory_space<vmem>>, vector<1x1x256xf32>
    %16 = vector.shape_cast %15 : vector<1x1x256xf32> to vector<1x256xf32>
    %17 = vector.broadcast %16 : vector<1x256xf32> to vector<32x256xf32>
    %18 = arith.addf %14, %17 : vector<32x256xf32>
    %19 = arith.truncf %18 : vector<32x256xf32> to vector<32x256xbf16>
    %c0_12 = arith.constant 0 : index
    %c0_13 = arith.constant 0 : index
    %c0_14 = arith.constant 0 : index
    %20 = vector.load %arg6[%c0_12, %c0_13, %c0_14] : memref<1x32x256xbf16, #tpu.memory_space<vmem>>, vector<1x32x256xbf16>
    %21 = vector.shape_cast %20 : vector<1x32x256xbf16> to vector<32x256xbf16>
    %22 = vector.shape_cast %19 : vector<32x256xbf16> to vector<1x32x256xbf16>
    tpu.vector_store %arg6[%c0_12, %c0_13, %c0_14], %22 {strides = array<i32>} : memref<1x32x256xbf16, #tpu.memory_space<vmem>>, vector<1x32x256xbf16>,
    return
  }
  func.func @transform_0(%arg0: i32, %arg1: i32) -> (i32, i32, i32) {
    %c0_i32 = arith.constant 0 : i32
    %c0_i32_0 = arith.constant 0 : i32
    %c0_i32_1 = arith.constant 0 : i32
    return %arg0, %c0_i32, %c0_i32_0 : i32, i32, i32
  }
  func.func @transform_1(%arg0: i32, %arg1: i32) -> (i32, i32) {
    %c0_i32 = arith.constant 0 : i32
    %c0_i32_0 = arith.constant 0 : i32
    %c0_i32_1 = arith.constant 0 : i32
    return %c0_i32, %c0_i32_0 : i32, i32
  }
  func.func @transform_2(%arg0: i32, %arg1: i32) -> (i32, i32) {
    %c0_i32 = arith.constant 0 : i32
    %c0_i32_0 = arith.constant 0 : i32
    %c0_i32_1 = arith.constant 0 : i32
    return %c0_i32, %c0_i32_0 : i32, i32
  }
  func.func @transform_3(%arg0: i32, %arg1: i32) -> (i32, i32, i32) {
    %c0_i32 = arith.constant 0 : i32
    %c0_i32_0 = arith.constant 0 : i32
    %c0_i32_1 = arith.constant 0 : i32
    return %arg0, %c0_i32, %c0_i32_0 : i32, i32, i32
  }
  func.func @transform_4(%arg0: i32, %arg1: i32) -> (i32, i32, i32) {
    %c0_i32 = arith.constant 0 : i32
    %c0_i32_0 = arith.constant 0 : i32
    return %arg0, %arg1, %c0_i32 : i32, i32, i32
  }
}

module attributes {stable_mosaic.version = 11 : i64} {
  func.func @_conv_kernel(%arg0: i32, %arg1: i32, %arg2: memref<1x18x512xbf16, #tpu.memory_space<vmem>>, %arg3: memref<1536x512xbf16, #tpu.memory_space<vmem>>, %arg4: memref<1x512xf32, #tpu.memory_space<vmem>>, %arg5: memref<1x16x512xbf16, #tpu.memory_space<vmem>>) attributes {dimension_semantics = [#tpu.dimension_semantics<parallel>, #tpu.dimension_semantics<parallel>], iteration_bounds = array<i64: 2, 1>, scalar_prefetch = 0 : i64, scratch_operands = 0 : i64, tpu.core_type = #tpu.core_type<tc>, window_params = [{transform_indices = @transform_0, window_bounds = array<i64: 1, 18, 512>}, {pipeline_mode = #tpu.pipeline_mode<synchronous>, transform_indices = @transform_1, window_bounds = array<i64: 1536, 512>}, {pipeline_mode = #tpu.pipeline_mode<synchronous>, transform_indices = @transform_2, window_bounds = array<i64: 1, 512>}, {transform_indices = @transform_3, window_bounds = array<i64: 1, 16, 512>}]} {
    %c0 = arith.constant 0 : index
    %c0_0 = arith.constant 0 : index
    %c0_1 = arith.constant 0 : index
    %0 = vector.load %arg2[%c0, %c0_0, %c0_1] : memref<1x18x512xbf16, #tpu.memory_space<vmem>>, vector<1x16x512xbf16>
    %1 = vector.shape_cast %0 : vector<1x16x512xbf16> to vector<16x512xbf16>
    %c0_2 = arith.constant 0 : index
    %c0_3 = arith.constant 0 : index
    %2 = vector.load %arg3[%c0_2, %c0_3] : memref<1536x512xbf16, #tpu.memory_space<vmem>>, vector<512x512xbf16>
    %cst = arith.constant dense<0.000000e+00> : vector<16x512xf32>
    %3 = tpu.matmul %1, %2, %cst {dimension_numbers = #tpu.dot_dimension_numbers<[1], [0], [0], [1], [0, 0, 1, 1], [], []>} : vector<16x512xbf16>, vector<512x512xbf16>, vector<16x512xf32> -> vector<16x512xf32>
    %c0_4 = arith.constant 0 : index
    %c1 = arith.constant 1 : index
    %c0_5 = arith.constant 0 : index
    %4 = vector.load %arg2[%c0_4, %c1, %c0_5] : memref<1x18x512xbf16, #tpu.memory_space<vmem>>, vector<1x16x512xbf16>
    %5 = vector.shape_cast %4 : vector<1x16x512xbf16> to vector<16x512xbf16>
    %c512 = arith.constant 512 : index
    %c0_6 = arith.constant 0 : index
    %6 = vector.load %arg3[%c512, %c0_6] : memref<1536x512xbf16, #tpu.memory_space<vmem>>, vector<512x512xbf16>
    %cst_7 = arith.constant dense<0.000000e+00> : vector<16x512xf32>
    %7 = tpu.matmul %5, %6, %cst_7 {dimension_numbers = #tpu.dot_dimension_numbers<[1], [0], [0], [1], [0, 0, 1, 1], [], []>} : vector<16x512xbf16>, vector<512x512xbf16>, vector<16x512xf32> -> vector<16x512xf32>
    %8 = arith.addf %3, %7 : vector<16x512xf32>
    %c0_8 = arith.constant 0 : index
    %c2 = arith.constant 2 : index
    %c0_9 = arith.constant 0 : index
    %9 = vector.load %arg2[%c0_8, %c2, %c0_9] : memref<1x18x512xbf16, #tpu.memory_space<vmem>>, vector<1x16x512xbf16>
    %10 = vector.shape_cast %9 : vector<1x16x512xbf16> to vector<16x512xbf16>
    %c1024 = arith.constant 1024 : index
    %c0_10 = arith.constant 0 : index
    %11 = vector.load %arg3[%c1024, %c0_10] : memref<1536x512xbf16, #tpu.memory_space<vmem>>, vector<512x512xbf16>
    %cst_11 = arith.constant dense<0.000000e+00> : vector<16x512xf32>
    %12 = tpu.matmul %10, %11, %cst_11 {dimension_numbers = #tpu.dot_dimension_numbers<[1], [0], [0], [1], [0, 0, 1, 1], [], []>} : vector<16x512xbf16>, vector<512x512xbf16>, vector<16x512xf32> -> vector<16x512xf32>
    %13 = arith.addf %8, %12 : vector<16x512xf32>
    %c0_12 = arith.constant 0 : index
    %c0_13 = arith.constant 0 : index
    %14 = vector.load %arg4[%c0_12, %c0_13] : memref<1x512xf32, #tpu.memory_space<vmem>>, vector<1x512xf32>
    %15 = vector.broadcast %14 : vector<1x512xf32> to vector<16x512xf32>
    %16 = arith.addf %13, %15 : vector<16x512xf32>
    %cst_14 = arith.constant 0.000000e+00 : f32
    %17 = vector.broadcast %cst_14 : f32 to vector<16x512xf32>
    %18 = arith.cmpf ogt, %16, %17 : vector<16x512xf32>
    %cst_15 = arith.constant 0.000000e+00 : f32
    %19 = vector.broadcast %cst_15 : f32 to vector<16x512xf32>
    %20 = arith.minimumf %16, %19 : vector<16x512xf32>
    %21 = math.exp %20 : vector<16x512xf32>
    %cst_16 = arith.constant 1.000000e+00 : f32
    %22 = vector.broadcast %cst_16 : f32 to vector<16x512xf32>
    %23 = arith.subf %21, %22 : vector<16x512xf32>
    %24 = arith.select %18, %16, %23 : vector<16x512xi1>, vector<16x512xf32>
    %25 = arith.truncf %24 : vector<16x512xf32> to vector<16x512xbf16>
    %c0_17 = arith.constant 0 : index
    %c0_18 = arith.constant 0 : index
    %c0_19 = arith.constant 0 : index
    %26 = vector.load %arg5[%c0_17, %c0_18, %c0_19] : memref<1x16x512xbf16, #tpu.memory_space<vmem>>, vector<1x16x512xbf16>
    %27 = vector.shape_cast %26 : vector<1x16x512xbf16> to vector<16x512xbf16>
    %28 = vector.shape_cast %25 : vector<16x512xbf16> to vector<1x16x512xbf16>
    tpu.vector_store %arg5[%c0_17, %c0_18, %c0_19], %28 {strides = array<i32>} : memref<1x16x512xbf16, #tpu.memory_space<vmem>>, vector<1x16x512xbf16>,
    return
  }
  func.func @transform_0(%arg0: i32, %arg1: i32) -> (i32, i32, i32) {
    %c0_i32 = arith.constant 0 : i32
    %c0_i32_0 = arith.constant 0 : i32
    %c0_i32_1 = arith.constant 0 : i32
    return %arg0, %c0_i32, %c0_i32_0 : i32, i32, i32
  }
  func.func @transform_1(%arg0: i32, %arg1: i32) -> (i32, i32) {
    %c0_i32 = arith.constant 0 : i32
    %c0_i32_0 = arith.constant 0 : i32
    %c0_i32_1 = arith.constant 0 : i32
    return %c0_i32, %c0_i32_0 : i32, i32
  }
  func.func @transform_2(%arg0: i32, %arg1: i32) -> (i32, i32) {
    %c0_i32 = arith.constant 0 : i32
    %c0_i32_0 = arith.constant 0 : i32
    %c0_i32_1 = arith.constant 0 : i32
    return %c0_i32, %c0_i32_0 : i32, i32
  }
  func.func @transform_3(%arg0: i32, %arg1: i32) -> (i32, i32, i32) {
    %c0_i32 = arith.constant 0 : i32
    %c0_i32_0 = arith.constant 0 : i32
    return %arg0, %arg1, %c0_i32 : i32, i32, i32
  }
}

module attributes {stable_mosaic.version = 11 : i64} {
  func.func @_conv_kernel(%arg0: i32, %arg1: i32, %arg2: memref<1x16x768xbf16, #tpu.memory_space<vmem>>, %arg3: memref<768x512xbf16, #tpu.memory_space<vmem>>, %arg4: memref<1x512xf32, #tpu.memory_space<vmem>>, %arg5: memref<1x1x512xf32, #tpu.memory_space<vmem>>, %arg6: memref<1x16x512xbf16, #tpu.memory_space<vmem>>) attributes {dimension_semantics = [#tpu.dimension_semantics<parallel>, #tpu.dimension_semantics<parallel>], iteration_bounds = array<i64: 2, 1>, scalar_prefetch = 0 : i64, scratch_operands = 0 : i64, tpu.core_type = #tpu.core_type<tc>, window_params = [{transform_indices = @transform_0, window_bounds = array<i64: 1, 16, 768>}, {pipeline_mode = #tpu.pipeline_mode<synchronous>, transform_indices = @transform_1, window_bounds = array<i64: 768, 512>}, {pipeline_mode = #tpu.pipeline_mode<synchronous>, transform_indices = @transform_2, window_bounds = array<i64: 1, 512>}, {transform_indices = @transform_3, window_bounds = array<i64: 1, 1, 512>}, {transform_indices = @transform_4, window_bounds = array<i64: 1, 16, 512>}]} {
    %c0 = arith.constant 0 : index
    %c0_0 = arith.constant 0 : index
    %c0_1 = arith.constant 0 : index
    %0 = vector.load %arg2[%c0, %c0_0, %c0_1] : memref<1x16x768xbf16, #tpu.memory_space<vmem>>, vector<1x16x768xbf16>
    %1 = vector.shape_cast %0 : vector<1x16x768xbf16> to vector<16x768xbf16>
    %c0_2 = arith.constant 0 : index
    %c0_3 = arith.constant 0 : index
    %2 = vector.load %arg3[%c0_2, %c0_3] : memref<768x512xbf16, #tpu.memory_space<vmem>>, vector<768x512xbf16>
    %cst = arith.constant dense<0.000000e+00> : vector<16x512xf32>
    %3 = tpu.matmul %1, %2, %cst {dimension_numbers = #tpu.dot_dimension_numbers<[1], [0], [0], [1], [0, 0, 1, 1], [], []>} : vector<16x768xbf16>, vector<768x512xbf16>, vector<16x512xf32> -> vector<16x512xf32>
    %c0_4 = arith.constant 0 : index
    %c0_5 = arith.constant 0 : index
    %4 = vector.load %arg4[%c0_4, %c0_5] : memref<1x512xf32, #tpu.memory_space<vmem>>, vector<1x512xf32>
    %5 = vector.broadcast %4 : vector<1x512xf32> to vector<16x512xf32>
    %6 = arith.addf %3, %5 : vector<16x512xf32>
    %cst_6 = arith.constant 0.000000e+00 : f32
    %7 = vector.broadcast %cst_6 : f32 to vector<16x512xf32>
    %8 = arith.cmpf ogt, %6, %7 : vector<16x512xf32>
    %cst_7 = arith.constant 0.000000e+00 : f32
    %9 = vector.broadcast %cst_7 : f32 to vector<16x512xf32>
    %10 = arith.minimumf %6, %9 : vector<16x512xf32>
    %11 = math.exp %10 : vector<16x512xf32>
    %cst_8 = arith.constant 1.000000e+00 : f32
    %12 = vector.broadcast %cst_8 : f32 to vector<16x512xf32>
    %13 = arith.subf %11, %12 : vector<16x512xf32>
    %14 = arith.select %8, %6, %13 : vector<16x512xi1>, vector<16x512xf32>
    %c0_9 = arith.constant 0 : index
    %c0_10 = arith.constant 0 : index
    %c0_11 = arith.constant 0 : index
    %15 = vector.load %arg5[%c0_9, %c0_10, %c0_11] : memref<1x1x512xf32, #tpu.memory_space<vmem>>, vector<1x1x512xf32>
    %16 = vector.shape_cast %15 : vector<1x1x512xf32> to vector<1x512xf32>
    %17 = vector.broadcast %16 : vector<1x512xf32> to vector<16x512xf32>
    %18 = arith.addf %14, %17 : vector<16x512xf32>
    %19 = arith.truncf %18 : vector<16x512xf32> to vector<16x512xbf16>
    %c0_12 = arith.constant 0 : index
    %c0_13 = arith.constant 0 : index
    %c0_14 = arith.constant 0 : index
    %20 = vector.load %arg6[%c0_12, %c0_13, %c0_14] : memref<1x16x512xbf16, #tpu.memory_space<vmem>>, vector<1x16x512xbf16>
    %21 = vector.shape_cast %20 : vector<1x16x512xbf16> to vector<16x512xbf16>
    %22 = vector.shape_cast %19 : vector<16x512xbf16> to vector<1x16x512xbf16>
    tpu.vector_store %arg6[%c0_12, %c0_13, %c0_14], %22 {strides = array<i32>} : memref<1x16x512xbf16, #tpu.memory_space<vmem>>, vector<1x16x512xbf16>,
    return
  }
  func.func @transform_0(%arg0: i32, %arg1: i32) -> (i32, i32, i32) {
    %c0_i32 = arith.constant 0 : i32
    %c0_i32_0 = arith.constant 0 : i32
    %c0_i32_1 = arith.constant 0 : i32
    return %arg0, %c0_i32, %c0_i32_0 : i32, i32, i32
  }
  func.func @transform_1(%arg0: i32, %arg1: i32) -> (i32, i32) {
    %c0_i32 = arith.constant 0 : i32
    %c0_i32_0 = arith.constant 0 : i32
    %c0_i32_1 = arith.constant 0 : i32
    return %c0_i32, %c0_i32_0 : i32, i32
  }
  func.func @transform_2(%arg0: i32, %arg1: i32) -> (i32, i32) {
    %c0_i32 = arith.constant 0 : i32
    %c0_i32_0 = arith.constant 0 : i32
    %c0_i32_1 = arith.constant 0 : i32
    return %c0_i32, %c0_i32_0 : i32, i32
  }
  func.func @transform_3(%arg0: i32, %arg1: i32) -> (i32, i32, i32) {
    %c0_i32 = arith.constant 0 : i32
    %c0_i32_0 = arith.constant 0 : i32
    %c0_i32_1 = arith.constant 0 : i32
    return %arg0, %c0_i32, %c0_i32_0 : i32, i32, i32
  }
  func.func @transform_4(%arg0: i32, %arg1: i32) -> (i32, i32, i32) {
    %c0_i32 = arith.constant 0 : i32
    %c0_i32_0 = arith.constant 0 : i32
    return %arg0, %arg1, %c0_i32 : i32, i32, i32
  }
}

module attributes {stable_mosaic.version = 11 : i64} {
  func.func @_conv_kernel(%arg0: i32, %arg1: i32, %arg2: memref<1x34x512xbf16, #tpu.memory_space<vmem>>, %arg3: memref<1536x256xbf16, #tpu.memory_space<vmem>>, %arg4: memref<1x256xf32, #tpu.memory_space<vmem>>, %arg5: memref<1x32x256xbf16, #tpu.memory_space<vmem>>, %arg6: memref<1x32x256xbf16, #tpu.memory_space<vmem>>) attributes {dimension_semantics = [#tpu.dimension_semantics<parallel>, #tpu.dimension_semantics<parallel>], iteration_bounds = array<i64: 2, 1>, scalar_prefetch = 0 : i64, scratch_operands = 0 : i64, tpu.core_type = #tpu.core_type<tc>, window_params = [{transform_indices = @transform_0, window_bounds = array<i64: 1, 34, 512>}, {pipeline_mode = #tpu.pipeline_mode<synchronous>, transform_indices = @transform_1, window_bounds = array<i64: 1536, 256>}, {pipeline_mode = #tpu.pipeline_mode<synchronous>, transform_indices = @transform_2, window_bounds = array<i64: 1, 256>}, {transform_indices = @transform_3, window_bounds = array<i64: 1, 32, 256>}, {transform_indices = @transform_4, window_bounds = array<i64: 1, 32, 256>}]} {
    %c0 = arith.constant 0 : index
    %c0_0 = arith.constant 0 : index
    %c0_1 = arith.constant 0 : index
    %0 = vector.load %arg2[%c0, %c0_0, %c0_1] : memref<1x34x512xbf16, #tpu.memory_space<vmem>>, vector<1x32x512xbf16>
    %1 = vector.shape_cast %0 : vector<1x32x512xbf16> to vector<32x512xbf16>
    %c0_2 = arith.constant 0 : index
    %c0_3 = arith.constant 0 : index
    %2 = vector.load %arg3[%c0_2, %c0_3] : memref<1536x256xbf16, #tpu.memory_space<vmem>>, vector<512x256xbf16>
    %cst = arith.constant dense<0.000000e+00> : vector<32x256xf32>
    %3 = tpu.matmul %1, %2, %cst {dimension_numbers = #tpu.dot_dimension_numbers<[1], [0], [0], [1], [0, 0, 1, 1], [], []>} : vector<32x512xbf16>, vector<512x256xbf16>, vector<32x256xf32> -> vector<32x256xf32>
    %c0_4 = arith.constant 0 : index
    %c1 = arith.constant 1 : index
    %c0_5 = arith.constant 0 : index
    %4 = vector.load %arg2[%c0_4, %c1, %c0_5] : memref<1x34x512xbf16, #tpu.memory_space<vmem>>, vector<1x32x512xbf16>
    %5 = vector.shape_cast %4 : vector<1x32x512xbf16> to vector<32x512xbf16>
    %c512 = arith.constant 512 : index
    %c0_6 = arith.constant 0 : index
    %6 = vector.load %arg3[%c512, %c0_6] : memref<1536x256xbf16, #tpu.memory_space<vmem>>, vector<512x256xbf16>
    %cst_7 = arith.constant dense<0.000000e+00> : vector<32x256xf32>
    %7 = tpu.matmul %5, %6, %cst_7 {dimension_numbers = #tpu.dot_dimension_numbers<[1], [0], [0], [1], [0, 0, 1, 1], [], []>} : vector<32x512xbf16>, vector<512x256xbf16>, vector<32x256xf32> -> vector<32x256xf32>
    %8 = arith.addf %3, %7 : vector<32x256xf32>
    %c0_8 = arith.constant 0 : index
    %c2 = arith.constant 2 : index
    %c0_9 = arith.constant 0 : index
    %9 = vector.load %arg2[%c0_8, %c2, %c0_9] : memref<1x34x512xbf16, #tpu.memory_space<vmem>>, vector<1x32x512xbf16>
    %10 = vector.shape_cast %9 : vector<1x32x512xbf16> to vector<32x512xbf16>
    %c1024 = arith.constant 1024 : index
    %c0_10 = arith.constant 0 : index
    %11 = vector.load %arg3[%c1024, %c0_10] : memref<1536x256xbf16, #tpu.memory_space<vmem>>, vector<512x256xbf16>
    %cst_11 = arith.constant dense<0.000000e+00> : vector<32x256xf32>
    %12 = tpu.matmul %10, %11, %cst_11 {dimension_numbers = #tpu.dot_dimension_numbers<[1], [0], [0], [1], [0, 0, 1, 1], [], []>} : vector<32x512xbf16>, vector<512x256xbf16>, vector<32x256xf32> -> vector<32x256xf32>
    %13 = arith.addf %8, %12 : vector<32x256xf32>
    %c0_12 = arith.constant 0 : index
    %c0_13 = arith.constant 0 : index
    %14 = vector.load %arg4[%c0_12, %c0_13] : memref<1x256xf32, #tpu.memory_space<vmem>>, vector<1x256xf32>
    %15 = vector.broadcast %14 : vector<1x256xf32> to vector<32x256xf32>
    %16 = arith.addf %13, %15 : vector<32x256xf32>
    %cst_14 = arith.constant 0.000000e+00 : f32
    %17 = vector.broadcast %cst_14 : f32 to vector<32x256xf32>
    %18 = arith.cmpf ogt, %16, %17 : vector<32x256xf32>
    %cst_15 = arith.constant 0.000000e+00 : f32
    %19 = vector.broadcast %cst_15 : f32 to vector<32x256xf32>
    %20 = arith.minimumf %16, %19 : vector<32x256xf32>
    %21 = math.exp %20 : vector<32x256xf32>
    %cst_16 = arith.constant 1.000000e+00 : f32
    %22 = vector.broadcast %cst_16 : f32 to vector<32x256xf32>
    %23 = arith.subf %21, %22 : vector<32x256xf32>
    %24 = arith.select %18, %16, %23 : vector<32x256xi1>, vector<32x256xf32>
    %c0_17 = arith.constant 0 : index
    %c0_18 = arith.constant 0 : index
    %c0_19 = arith.constant 0 : index
    %25 = vector.load %arg5[%c0_17, %c0_18, %c0_19] : memref<1x32x256xbf16, #tpu.memory_space<vmem>>, vector<1x32x256xbf16>
    %26 = vector.shape_cast %25 : vector<1x32x256xbf16> to vector<32x256xbf16>
    %27 = arith.extf %26 : vector<32x256xbf16> to vector<32x256xf32>
    %28 = arith.addf %24, %27 : vector<32x256xf32>
    %29 = arith.truncf %28 : vector<32x256xf32> to vector<32x256xbf16>
    %c0_20 = arith.constant 0 : index
    %c0_21 = arith.constant 0 : index
    %c0_22 = arith.constant 0 : index
    %30 = vector.load %arg6[%c0_20, %c0_21, %c0_22] : memref<1x32x256xbf16, #tpu.memory_space<vmem>>, vector<1x32x256xbf16>
    %31 = vector.shape_cast %30 : vector<1x32x256xbf16> to vector<32x256xbf16>
    %32 = vector.shape_cast %29 : vector<32x256xbf16> to vector<1x32x256xbf16>
    tpu.vector_store %arg6[%c0_20, %c0_21, %c0_22], %32 {strides = array<i32>} : memref<1x32x256xbf16, #tpu.memory_space<vmem>>, vector<1x32x256xbf16>,
    return
  }
  func.func @transform_0(%arg0: i32, %arg1: i32) -> (i32, i32, i32) {
    %c0_i32 = arith.constant 0 : i32
    %c0_i32_0 = arith.constant 0 : i32
    %c0_i32_1 = arith.constant 0 : i32
    return %arg0, %c0_i32, %c0_i32_0 : i32, i32, i32
  }
  func.func @transform_1(%arg0: i32, %arg1: i32) -> (i32, i32) {
    %c0_i32 = arith.constant 0 : i32
    %c0_i32_0 = arith.constant 0 : i32
    %c0_i32_1 = arith.constant 0 : i32
    return %c0_i32, %c0_i32_0 : i32, i32
  }
  func.func @transform_2(%arg0: i32, %arg1: i32) -> (i32, i32) {
    %c0_i32 = arith.constant 0 : i32
    %c0_i32_0 = arith.constant 0 : i32
    %c0_i32_1 = arith.constant 0 : i32
    return %c0_i32, %c0_i32_0 : i32, i32
  }
  func.func @transform_3(%arg0: i32, %arg1: i32) -> (i32, i32, i32) {
    %c0_i32 = arith.constant 0 : i32
    %c0_i32_0 = arith.constant 0 : i32
    return %arg0, %arg1, %c0_i32 : i32, i32, i32
  }
  func.func @transform_4(%arg0: i32, %arg1: i32) -> (i32, i32, i32) {
    %c0_i32 = arith.constant 0 : i32
    %c0_i32_0 = arith.constant 0 : i32
    return %arg0, %arg1, %c0_i32 : i32, i32, i32
  }
}

module attributes {stable_mosaic.version = 11 : i64} {
  func.func @_conv_kernel(%arg0: i32, %arg1: i32, %arg2: memref<1x66x256xbf16, #tpu.memory_space<vmem>>, %arg3: memref<768x128xbf16, #tpu.memory_space<vmem>>, %arg4: memref<1x128xf32, #tpu.memory_space<vmem>>, %arg5: memref<1x64x128xbf16, #tpu.memory_space<vmem>>, %arg6: memref<1x64x128xbf16, #tpu.memory_space<vmem>>) attributes {dimension_semantics = [#tpu.dimension_semantics<parallel>, #tpu.dimension_semantics<parallel>], iteration_bounds = array<i64: 2, 1>, scalar_prefetch = 0 : i64, scratch_operands = 0 : i64, tpu.core_type = #tpu.core_type<tc>, window_params = [{transform_indices = @transform_0, window_bounds = array<i64: 1, 66, 256>}, {pipeline_mode = #tpu.pipeline_mode<synchronous>, transform_indices = @transform_1, window_bounds = array<i64: 768, 128>}, {pipeline_mode = #tpu.pipeline_mode<synchronous>, transform_indices = @transform_2, window_bounds = array<i64: 1, 128>}, {transform_indices = @transform_3, window_bounds = array<i64: 1, 64, 128>}, {transform_indices = @transform_4, window_bounds = array<i64: 1, 64, 128>}]} {
    %c0 = arith.constant 0 : index
    %c0_0 = arith.constant 0 : index
    %c0_1 = arith.constant 0 : index
    %0 = vector.load %arg2[%c0, %c0_0, %c0_1] : memref<1x66x256xbf16, #tpu.memory_space<vmem>>, vector<1x64x256xbf16>
    %1 = vector.shape_cast %0 : vector<1x64x256xbf16> to vector<64x256xbf16>
    %c0_2 = arith.constant 0 : index
    %c0_3 = arith.constant 0 : index
    %2 = vector.load %arg3[%c0_2, %c0_3] : memref<768x128xbf16, #tpu.memory_space<vmem>>, vector<256x128xbf16>
    %cst = arith.constant dense<0.000000e+00> : vector<64x128xf32>
    %3 = tpu.matmul %1, %2, %cst {dimension_numbers = #tpu.dot_dimension_numbers<[1], [0], [0], [1], [0, 0, 1, 1], [], []>} : vector<64x256xbf16>, vector<256x128xbf16>, vector<64x128xf32> -> vector<64x128xf32>
    %c0_4 = arith.constant 0 : index
    %c1 = arith.constant 1 : index
    %c0_5 = arith.constant 0 : index
    %4 = vector.load %arg2[%c0_4, %c1, %c0_5] : memref<1x66x256xbf16, #tpu.memory_space<vmem>>, vector<1x64x256xbf16>
    %5 = vector.shape_cast %4 : vector<1x64x256xbf16> to vector<64x256xbf16>
    %c256 = arith.constant 256 : index
    %c0_6 = arith.constant 0 : index
    %6 = vector.load %arg3[%c256, %c0_6] : memref<768x128xbf16, #tpu.memory_space<vmem>>, vector<256x128xbf16>
    %cst_7 = arith.constant dense<0.000000e+00> : vector<64x128xf32>
    %7 = tpu.matmul %5, %6, %cst_7 {dimension_numbers = #tpu.dot_dimension_numbers<[1], [0], [0], [1], [0, 0, 1, 1], [], []>} : vector<64x256xbf16>, vector<256x128xbf16>, vector<64x128xf32> -> vector<64x128xf32>
    %8 = arith.addf %3, %7 : vector<64x128xf32>
    %c0_8 = arith.constant 0 : index
    %c2 = arith.constant 2 : index
    %c0_9 = arith.constant 0 : index
    %9 = vector.load %arg2[%c0_8, %c2, %c0_9] : memref<1x66x256xbf16, #tpu.memory_space<vmem>>, vector<1x64x256xbf16>
    %10 = vector.shape_cast %9 : vector<1x64x256xbf16> to vector<64x256xbf16>
    %c512 = arith.constant 512 : index
    %c0_10 = arith.constant 0 : index
    %11 = vector.load %arg3[%c512, %c0_10] : memref<768x128xbf16, #tpu.memory_space<vmem>>, vector<256x128xbf16>
    %cst_11 = arith.constant dense<0.000000e+00> : vector<64x128xf32>
    %12 = tpu.matmul %10, %11, %cst_11 {dimension_numbers = #tpu.dot_dimension_numbers<[1], [0], [0], [1], [0, 0, 1, 1], [], []>} : vector<64x256xbf16>, vector<256x128xbf16>, vector<64x128xf32> -> vector<64x128xf32>
    %13 = arith.addf %8, %12 : vector<64x128xf32>
    %c0_12 = arith.constant 0 : index
    %c0_13 = arith.constant 0 : index
    %14 = vector.load %arg4[%c0_12, %c0_13] : memref<1x128xf32, #tpu.memory_space<vmem>>, vector<1x128xf32>
    %15 = vector.broadcast %14 : vector<1x128xf32> to vector<64x128xf32>
    %16 = arith.addf %13, %15 : vector<64x128xf32>
    %cst_14 = arith.constant 0.000000e+00 : f32
    %17 = vector.broadcast %cst_14 : f32 to vector<64x128xf32>
    %18 = arith.cmpf ogt, %16, %17 : vector<64x128xf32>
    %cst_15 = arith.constant 0.000000e+00 : f32
    %19 = vector.broadcast %cst_15 : f32 to vector<64x128xf32>
    %20 = arith.minimumf %16, %19 : vector<64x128xf32>
    %21 = math.exp %20 : vector<64x128xf32>
    %cst_16 = arith.constant 1.000000e+00 : f32
    %22 = vector.broadcast %cst_16 : f32 to vector<64x128xf32>
    %23 = arith.subf %21, %22 : vector<64x128xf32>
    %24 = arith.select %18, %16, %23 : vector<64x128xi1>, vector<64x128xf32>
    %c0_17 = arith.constant 0 : index
    %c0_18 = arith.constant 0 : index
    %c0_19 = arith.constant 0 : index
    %25 = vector.load %arg5[%c0_17, %c0_18, %c0_19] : memref<1x64x128xbf16, #tpu.memory_space<vmem>>, vector<1x64x128xbf16>
    %26 = vector.shape_cast %25 : vector<1x64x128xbf16> to vector<64x128xbf16>
    %27 = arith.extf %26 : vector<64x128xbf16> to vector<64x128xf32>
    %28 = arith.addf %24, %27 : vector<64x128xf32>
    %29 = arith.truncf %28 : vector<64x128xf32> to vector<64x128xbf16>
    %c0_20 = arith.constant 0 : index
    %c0_21 = arith.constant 0 : index
    %c0_22 = arith.constant 0 : index
    %30 = vector.load %arg6[%c0_20, %c0_21, %c0_22] : memref<1x64x128xbf16, #tpu.memory_space<vmem>>, vector<1x64x128xbf16>
    %31 = vector.shape_cast %30 : vector<1x64x128xbf16> to vector<64x128xbf16>
    %32 = vector.shape_cast %29 : vector<64x128xbf16> to vector<1x64x128xbf16>
    tpu.vector_store %arg6[%c0_20, %c0_21, %c0_22], %32 {strides = array<i32>} : memref<1x64x128xbf16, #tpu.memory_space<vmem>>, vector<1x64x128xbf16>,
    return
  }
  func.func @transform_0(%arg0: i32, %arg1: i32) -> (i32, i32, i32) {
    %c0_i32 = arith.constant 0 : i32
    %c0_i32_0 = arith.constant 0 : i32
    %c0_i32_1 = arith.constant 0 : i32
    return %arg0, %c0_i32, %c0_i32_0 : i32, i32, i32
  }
  func.func @transform_1(%arg0: i32, %arg1: i32) -> (i32, i32) {
    %c0_i32 = arith.constant 0 : i32
    %c0_i32_0 = arith.constant 0 : i32
    %c0_i32_1 = arith.constant 0 : i32
    return %c0_i32, %c0_i32_0 : i32, i32
  }
  func.func @transform_2(%arg0: i32, %arg1: i32) -> (i32, i32) {
    %c0_i32 = arith.constant 0 : i32
    %c0_i32_0 = arith.constant 0 : i32
    %c0_i32_1 = arith.constant 0 : i32
    return %c0_i32, %c0_i32_0 : i32, i32
  }
  func.func @transform_3(%arg0: i32, %arg1: i32) -> (i32, i32, i32) {
    %c0_i32 = arith.constant 0 : i32
    %c0_i32_0 = arith.constant 0 : i32
    return %arg0, %arg1, %c0_i32 : i32, i32, i32
  }
  func.func @transform_4(%arg0: i32, %arg1: i32) -> (i32, i32, i32) {
    %c0_i32 = arith.constant 0 : i32
    %c0_i32_0 = arith.constant 0 : i32
    return %arg0, %arg1, %c0_i32 : i32, i32, i32
  }
}

module attributes {stable_mosaic.version = 11 : i64} {
  func.func @_conv_kernel(%arg0: i32, %arg1: i32, %arg2: memref<1x66x128xbf16, #tpu.memory_space<vmem>>, %arg3: memref<384x128xbf16, #tpu.memory_space<vmem>>, %arg4: memref<1x128xf32, #tpu.memory_space<vmem>>, %arg5: memref<1x64x128xf32, #tpu.memory_space<vmem>>) attributes {dimension_semantics = [#tpu.dimension_semantics<parallel>, #tpu.dimension_semantics<parallel>], iteration_bounds = array<i64: 2, 1>, scalar_prefetch = 0 : i64, scratch_operands = 0 : i64, tpu.core_type = #tpu.core_type<tc>, window_params = [{transform_indices = @transform_0, window_bounds = array<i64: 1, 66, 128>}, {pipeline_mode = #tpu.pipeline_mode<synchronous>, transform_indices = @transform_1, window_bounds = array<i64: 384, 128>}, {pipeline_mode = #tpu.pipeline_mode<synchronous>, transform_indices = @transform_2, window_bounds = array<i64: 1, 128>}, {transform_indices = @transform_3, window_bounds = array<i64: 1, 64, 128>}]} {
    %c0 = arith.constant 0 : index
    %c0_0 = arith.constant 0 : index
    %c0_1 = arith.constant 0 : index
    %0 = vector.load %arg2[%c0, %c0_0, %c0_1] : memref<1x66x128xbf16, #tpu.memory_space<vmem>>, vector<1x64x128xbf16>
    %1 = vector.shape_cast %0 : vector<1x64x128xbf16> to vector<64x128xbf16>
    %c0_2 = arith.constant 0 : index
    %c0_3 = arith.constant 0 : index
    %2 = vector.load %arg3[%c0_2, %c0_3] : memref<384x128xbf16, #tpu.memory_space<vmem>>, vector<128x128xbf16>
    %cst = arith.constant dense<0.000000e+00> : vector<64x128xf32>
    %3 = tpu.matmul %1, %2, %cst {dimension_numbers = #tpu.dot_dimension_numbers<[1], [0], [0], [1], [0, 0, 1, 1], [], []>} : vector<64x128xbf16>, vector<128x128xbf16>, vector<64x128xf32> -> vector<64x128xf32>
    %c0_4 = arith.constant 0 : index
    %c1 = arith.constant 1 : index
    %c0_5 = arith.constant 0 : index
    %4 = vector.load %arg2[%c0_4, %c1, %c0_5] : memref<1x66x128xbf16, #tpu.memory_space<vmem>>, vector<1x64x128xbf16>
    %5 = vector.shape_cast %4 : vector<1x64x128xbf16> to vector<64x128xbf16>
    %c128 = arith.constant 128 : index
    %c0_6 = arith.constant 0 : index
    %6 = vector.load %arg3[%c128, %c0_6] : memref<384x128xbf16, #tpu.memory_space<vmem>>, vector<128x128xbf16>
    %cst_7 = arith.constant dense<0.000000e+00> : vector<64x128xf32>
    %7 = tpu.matmul %5, %6, %cst_7 {dimension_numbers = #tpu.dot_dimension_numbers<[1], [0], [0], [1], [0, 0, 1, 1], [], []>} : vector<64x128xbf16>, vector<128x128xbf16>, vector<64x128xf32> -> vector<64x128xf32>
    %8 = arith.addf %3, %7 : vector<64x128xf32>
    %c0_8 = arith.constant 0 : index
    %c2 = arith.constant 2 : index
    %c0_9 = arith.constant 0 : index
    %9 = vector.load %arg2[%c0_8, %c2, %c0_9] : memref<1x66x128xbf16, #tpu.memory_space<vmem>>, vector<1x64x128xbf16>
    %10 = vector.shape_cast %9 : vector<1x64x128xbf16> to vector<64x128xbf16>
    %c256 = arith.constant 256 : index
    %c0_10 = arith.constant 0 : index
    %11 = vector.load %arg3[%c256, %c0_10] : memref<384x128xbf16, #tpu.memory_space<vmem>>, vector<128x128xbf16>
    %cst_11 = arith.constant dense<0.000000e+00> : vector<64x128xf32>
    %12 = tpu.matmul %10, %11, %cst_11 {dimension_numbers = #tpu.dot_dimension_numbers<[1], [0], [0], [1], [0, 0, 1, 1], [], []>} : vector<64x128xbf16>, vector<128x128xbf16>, vector<64x128xf32> -> vector<64x128xf32>
    %13 = arith.addf %8, %12 : vector<64x128xf32>
    %c0_12 = arith.constant 0 : index
    %c0_13 = arith.constant 0 : index
    %14 = vector.load %arg4[%c0_12, %c0_13] : memref<1x128xf32, #tpu.memory_space<vmem>>, vector<1x128xf32>
    %15 = vector.broadcast %14 : vector<1x128xf32> to vector<64x128xf32>
    %16 = arith.addf %13, %15 : vector<64x128xf32>
    %c0_14 = arith.constant 0 : index
    %c0_15 = arith.constant 0 : index
    %c0_16 = arith.constant 0 : index
    %17 = vector.load %arg5[%c0_14, %c0_15, %c0_16] : memref<1x64x128xf32, #tpu.memory_space<vmem>>, vector<1x64x128xf32>
    %18 = vector.shape_cast %17 : vector<1x64x128xf32> to vector<64x128xf32>
    %19 = vector.shape_cast %16 : vector<64x128xf32> to vector<1x64x128xf32>
    tpu.vector_store %arg5[%c0_14, %c0_15, %c0_16], %19 {strides = array<i32>} : memref<1x64x128xf32, #tpu.memory_space<vmem>>, vector<1x64x128xf32>,
    return
  }
  func.func @transform_0(%arg0: i32, %arg1: i32) -> (i32, i32, i32) {
    %c0_i32 = arith.constant 0 : i32
    %c0_i32_0 = arith.constant 0 : i32
    %c0_i32_1 = arith.constant 0 : i32
    return %arg0, %c0_i32, %c0_i32_0 : i32, i32, i32
  }
  func.func @transform_1(%arg0: i32, %arg1: i32) -> (i32, i32) {
    %c0_i32 = arith.constant 0 : i32
    %c0_i32_0 = arith.constant 0 : i32
    %c0_i32_1 = arith.constant 0 : i32
    return %c0_i32, %c0_i32_0 : i32, i32
  }
  func.func @transform_2(%arg0: i32, %arg1: i32) -> (i32, i32) {
    %c0_i32 = arith.constant 0 : i32
    %c0_i32_0 = arith.constant 0 : i32
    %c0_i32_1 = arith.constant 0 : i32
    return %c0_i32, %c0_i32_0 : i32, i32
  }
  func.func @transform_3(%arg0: i32, %arg1: i32) -> (i32, i32, i32) {
    %c0_i32 = arith.constant 0 : i32
    %c0_i32_0 = arith.constant 0 : i32
    return %arg0, %arg1, %c0_i32 : i32, i32, i32
  }
}

module attributes {stable_mosaic.version = 11 : i64} {
  func.func @_mse_kernel(%arg0: i32, %arg1: memref<2x64xf32, #tpu.memory_space<vmem>>, %arg2: memref<2x64xf32, #tpu.memory_space<vmem>>, %arg3: memref<1x1xf32, #tpu.memory_space<vmem>>, %arg4: memref<1x1xf32, #tpu.memory_space<vmem>>) attributes {dimension_semantics = [#tpu.dimension_semantics<arbitrary>], iteration_bounds = array<i64: 1>, scalar_prefetch = 0 : i64, scratch_operands = 1 : i64, tpu.core_type = #tpu.core_type<tc>, window_params = [{transform_indices = @transform_0, window_bounds = array<i64: 2, 64>}, {transform_indices = @transform_1, window_bounds = array<i64: 2, 64>}, {pipeline_mode = #tpu.pipeline_mode<synchronous>, transform_indices = @transform_2, window_bounds = array<i64: 1, 1>}]} {
    %c0_i32 = arith.constant 0 : i32
    %0 = arith.cmpi eq, %arg0, %c0_i32 : i32
    %1 = arith.extui %0 : i1 to i32
    %c0_i32_0 = arith.constant 0 : i32
    %2 = arith.cmpi ne, %1, %c0_i32_0 : i32
    scf.if %2 {
      %cst_11 = arith.constant 0.000000e+00 : f32
      %17 = vector.broadcast %cst_11 : f32 to vector<1x1xf32>
      %c0_12 = arith.constant 0 : index
      %c0_13 = arith.constant 0 : index
      %18 = vector.load %arg4[%c0_12, %c0_13] : memref<1x1xf32, #tpu.memory_space<vmem>>, vector<1x1xf32>
      tpu.vector_store %arg4[%c0_12, %c0_13], %17 {strides = array<i32>} : memref<1x1xf32, #tpu.memory_space<vmem>>, vector<1x1xf32>,
    } else {
    }
    %c0 = arith.constant 0 : index
    %c0_1 = arith.constant 0 : index
    %3 = vector.load %arg1[%c0, %c0_1] : memref<2x64xf32, #tpu.memory_space<vmem>>, vector<2x64xf32>
    %c0_2 = arith.constant 0 : index
    %c0_3 = arith.constant 0 : index
    %4 = vector.load %arg2[%c0_2, %c0_3] : memref<2x64xf32, #tpu.memory_space<vmem>>, vector<2x64xf32>
    %5 = arith.subf %3, %4 : vector<2x64xf32>
    %6 = arith.mulf %5, %5 : vector<2x64xf32>
    %cst = arith.constant dense<0.000000e+00> : vector<2xf32>
    %7 = vector.multi_reduction <add>, %6, %cst [1] : vector<2x64xf32> to vector<2xf32>
    %8 = vector.shape_cast %7 : vector<2xf32> to vector<2x1xf32>
    %c0_4 = arith.constant 0 : index
    %c0_5 = arith.constant 0 : index
    %9 = vector.load %arg4[%c0_4, %c0_5] : memref<1x1xf32, #tpu.memory_space<vmem>>, vector<1x1xf32>
    %cst_6 = arith.constant dense<0.000000e+00> : vector<1xf32>
    %10 = vector.multi_reduction <add>, %8, %cst_6 [0] : vector<2x1xf32> to vector<1xf32>
    %11 = vector.shape_cast %10 : vector<1xf32> to vector<1x1xf32>
    %12 = arith.addf %9, %11 : vector<1x1xf32>
    %c0_7 = arith.constant 0 : index
    %c0_8 = arith.constant 0 : index
    %13 = vector.load %arg4[%c0_7, %c0_8] : memref<1x1xf32, #tpu.memory_space<vmem>>, vector<1x1xf32>
    tpu.vector_store %arg4[%c0_7, %c0_8], %12 {strides = array<i32>} : memref<1x1xf32, #tpu.memory_space<vmem>>, vector<1x1xf32>,
    %c0_i32_9 = arith.constant 0 : i32
    %14 = arith.cmpi eq, %arg0, %c0_i32_9 : i32
    %15 = arith.extui %14 : i1 to i32
    %c0_i32_10 = arith.constant 0 : i32
    %16 = arith.cmpi ne, %15, %c0_i32_10 : i32
    scf.if %16 {
      %c0_11 = arith.constant 0 : index
      %c0_12 = arith.constant 0 : index
      %17 = vector.load %arg4[%c0_11, %c0_12] : memref<1x1xf32, #tpu.memory_space<vmem>>, vector<1x1xf32>
      %cst_13 = arith.constant 7.812500e-03 : f32
      %18 = vector.broadcast %cst_13 : f32 to vector<1x1xf32>
      %19 = arith.mulf %17, %18 : vector<1x1xf32>
      %c0_14 = arith.constant 0 : index
      %c0_15 = arith.constant 0 : index
      %20 = vector.load %arg3[%c0_14, %c0_15] : memref<1x1xf32, #tpu.memory_space<vmem>>, vector<1x1xf32>
      tpu.vector_store %arg3[%c0_14, %c0_15], %19 {strides = array<i32>} : memref<1x1xf32, #tpu.memory_space<vmem>>, vector<1x1xf32>,
    } else {
    }
    return
  }
  func.func @transform_0(%arg0: i32) -> (i32, i32) {
    %c0_i32 = arith.constant 0 : i32
    %c0_i32_0 = arith.constant 0 : i32
    return %c0_i32, %arg0 : i32, i32
  }
  func.func @transform_1(%arg0: i32) -> (i32, i32) {
    %c0_i32 = arith.constant 0 : i32
    %c0_i32_0 = arith.constant 0 : i32
    return %c0_i32, %arg0 : i32, i32
  }
  func.func @transform_2(%arg0: i32) -> (i32, i32) {
    %c0_i32 = arith.constant 0 : i32
    %c0_i32_0 = arith.constant 0 : i32
    %c0_i32_1 = arith.constant 0 : i32
    return %c0_i32, %c0_i32_0 : i32, i32
  }
}

</mosaic_0001>

<bundles_post_ra>
// kernel: dito_trainer_forward.27
= control target key start
LH: loop header
LB: loop body
LE: loop exit
PB: predicated region body
PF: predicated region fallthrough
CT: control target
= control target key end

     0   :  { %8 = vsyncpa [#allocation3], 0  ;;  %s1046_s0 = inlined_call_operand.vmem [shape: bf16[2,64,128], index: 0, kind: input, shape index: {}]   ;;  %s1047_s1 = inlined_call_operand.hbm [shape: bf16[128,128], index: 1, kind: input, shape index: {}]   ;;  %s1048_s2 = inlined_call_operand.hbm [shape: f32[1,128], index: 2, kind: input, shape index: {}]   ;;  %s1049_s3 = inlined_call_operand.vmem [shape: bf16[2,64,128], index: 3, kind: output, shape index: {}]  }
   0x1   :  { %9 = vsyncpa [#allocation5], 0  ;;  %s898_s12 = smov 0   ;;  %s900_s13 = smov 0  }
   0x2   :  { %s902_s14 = smov 0  }
   0x3 LB: > { %s582_s15 = sadd.s32 4294967295, %s872_s14   ;;  %s27_s16 = sadd.s32 1, %s868_s13  ;;  %s872_s14 = sphi %s902_s14, %s15_s14   ;;  %s868_s13 = sphi %s900_s13, %s1059_s13   ;;  %s864_s12 = sphi %s898_s12, %s1058_s12  }
   0x4   : > { %p29_p0 = scmp.ge.s32.totalorder %s27_s16, 2  ;;  %p584_p1 = scmp.ge.s32.totalorder %s872_s14, 1 }
   0x5   : > { %p128_p2 = scmp.lt.s32.totalorder %s872_s14, 3  ;;  %p923_p4 = scmp.eq.s32.totalorder %s582_s15, 0 }
   0x6   : > { %s1061_s16 = smov (%p29_p0, %s27_s16), 0  ;;  %s874_s19 = smov [#allocation2]  }
   0x7   : > { %p919_p3 = pnand %p584_p1, %p128_p2  ;;  %s140_s20 = sshll.u32 %s874_s19, 4  ;;  %s141_s20 = int_to_ptr.vmem [resolvable:$true] %s140_s20 }
   0x8   : > { %s1054_s18 = scalar_select %p923_p4, 1, 0 }
   0x9   : > { %s1053_s17 = scalar_select %p919_p3, 1, 0 }
   0xa   : > { %p719_p5 = pneg %p919_p3  ;;  %s875_s22 = smov [#allocation4]  }
   0xb   : > { %s154_s23 = sshll.u32 %s875_s22, 4  ;;  %s786_s26 = scalar_lea.hbm %s1047_s1, 1024  ;;  %s935_s23 = int_to_ptr.vmem [resolvable:$true] %s154_s23 }
   0xc   : > { %p931_p6 = pnand %p923_p4, %p719_p5  ;;  %p787_p7 = scmp.ne.s32.totalorder %s1047_s1, %s786_s26 }
   0xd   : > { %p793_p11 = scmp.lt.u32.totalorder %s786_s26, %s1047_s1 }
   0xe   : > { %p788_p8 = pneg %p931_p6 }
  0x10   : > { %p789_p9 = pnand %p788_p8, %p787_p7 }
  0x12   : > { %p790_p10 = pneg %p789_p9 }
  0x14   : > { %p795_p12 = pnand %p793_p11, %p790_p10 }
  0x16   : > { %798 = shalt.err (!%p795_p12)
}
  0x17   : > { %s799_s4 = scalar_lea.vmem %s141_s20, 1024  ;;  %p807_p2 = scmp.lt.s32.totalorder %s141_s20, %s141_s20 }
  0x18   : > { %p800_p13 = scmp.ne.s32.totalorder %s141_s20, %s799_s4  ;;  %p808_p5 = scmp.lt.s32.totalorder %s799_s4, %s799_s4 }
  0x1a   : > { %p802_p0 = pnand %p800_p13, %p788_p8  ;;  %p809_p4 = por %p808_p5, %p807_p2 }
  0x1c   : > { %p803_p1 = pneg %p802_p0 }
  0x1e   : > { %p810_p3 = pnand %p809_p4, %p803_p1 }
  0x20   : > { %813 = shalt.err (!%p810_p3)
}
  0x21   : > { %s876_s5 = smov 64   ;;  %s877_s6 = smov 4  }
  0x22   : > { %722 = dma.hbm_to_vmem [thread:$0]  (!%p931_p6), %s1047_s1, 1024, %s141_s20, [#allocation3], %s876_s5, %s876_s5, %s877_s6  }
  0x23   : > { %s814_s11 = scalar_lea.hbm %s1048_s2, 16 }
  0x24   : > { %p815_p7 = scmp.ne.s32.totalorder %s1048_s2, %s814_s11  ;;  %p821_p9 = scmp.lt.u32.totalorder %s814_s11, %s1048_s2 }
  0x26   : > { %p817_p3 = pnand %p815_p7, %p788_p8 }
  0x28   : > { %p818_p4 = pneg %p817_p3 }
  0x2a   : > { %p823_p10 = pnand %p821_p9, %p818_p4 }
  0x2c   : > { %826 = shalt.err (!%p823_p10)
}
  0x2d   : > { %s827_s20 = scalar_lea.vmem %s935_s23, 16  ;;  %s834_s25 = scalar_lea.vmem %s935_s23, 32 }
  0x2e   : > { %p828_p11 = scmp.ne.s32.totalorder %s935_s23, %s827_s20  ;;  %p835_p0 = scmp.lt.s32.totalorder %s935_s23, %s935_s23 }
  0x2f   : > { %p836_p1 = scmp.lt.s32.totalorder %s834_s25, %s827_s20 }
  0x30   : > { %p830_p12 = pnand %p828_p11, %p788_p8 }
  0x31   : > { %p837_p2 = por %p836_p1, %p835_p0 }
  0x32   : > { %p831_p13 = pneg %p830_p12 }
  0x34   : > { %p838_p5 = pnand %p837_p2, %p831_p13 }
  0x36   : > { %841 = shalt.err (!%p838_p5)
}
  0x37   : > { %725 = dma.hbm_to_vmem [thread:$0]  (!%p931_p6), %s1048_s2, 16, %s935_s23, [#allocation5]  }
  0x38   : > { %p1056_p7 = scmp.ne.s32.totalorder %s1053_s17, 0 }
  0x39   : > { %p1057_p8 = scmp.ne.s32.totalorder (!%p1056_p7), %s1054_s18, 0 }
  0x3a   : > { %175 = sbr.rel (%p1056_p7) target bundleno = 343 (0x157), region = 32 }
  0x41   : > { %855 = dma.done.wait (%p1057_p8), [#allocation3], 1024  }
  0x42   : > { %857 = vsyncadd (%p1057_p8), [#allocation3], 4294966272 }
  0x43   : > { %859 = dma.done.wait (%p1057_p8), [#allocation5], 16  }
  0x44   : > { %861 = vsyncadd (%p1057_p8), [#allocation5], 4294967280  ;;  %p207_p3 = scmp.lt.s32.totalorder %s864_s12, 1  ;;  %v758_v0 = vld [vmem:[#allocation2] sm:$0xff]   ;;  %v759_v1 = vld [vmem:[#allocation2 + $0x8] sm:$0xff]  }
  0x45   : > { %671 = vmatprep.subr.bf16.mxu0 %v758_v0  ;;  %695 = vmatprep.subr.bf16.mxu1 %v758_v0  ;;  %v760_v2 = vld [vmem:[#allocation2 + $0x10] sm:$0xff]   ;;  %v761_v3 = vld [vmem:[#allocation2 + $0x18] sm:$0xff]   ;;  %v762_v6 = vld [vmem:[#allocation2 + $0x20] sm:$0xff]  }
  0x46   : > { %s1063_s12 = smov (!%p207_p3, %s864_s12), 1  ;;  %672 = vmatpush3.bf16.msra.mxu0 %v758_v0  ;;  %703 = vmatpush3.bf16.msra.mxu1 %v758_v0  ;;  %v763_v7 = vld [vmem:[#allocation2 + $0x28] sm:$0xff]   ;;  %v764_v8 = vld [vmem:[#allocation2 + $0x30] sm:$0xff]   ;;  %v765_v9 = vld [vmem:[#allocation2 + $0x38] sm:$0xff]  }
  0x47   : > { %s626_s17 = sshll.u32 %s1063_s12, 5  ;;  %673 = vmatprep.subr.bf16.mxu0 %v759_v1  ;;  %696 = vmatprep.subr.bf16.mxu1 %v759_v1  ;;  %v595_v12 = vld [vmem:[#allocation4] ss:$0 sm:$0xff] }
  0x48   : > { %s1005_s23 = scalar_lea.vmem %s1046_s0, %s626_s17  ;;  %s220_s30 = scalar_lea.vmem %s1049_s3, %s626_s17 }
  0x49   : > { %v766_v4 = vld [vmem:[%s1005_s23] sm:$0xff]   ;;  %v767_v5 = vld [vmem:[%s1005_s23 + $0x10] sm:$0xff]   ;;  %v768_v10 = vld [vmem:[%s1005_s23 + $0x8] sm:$0xff]  }
  0x4a   : > { %674 = vmatpush3.bf16.msra.mxu0 %v759_v1  ;;  %704 = vmatpush3.bf16.msra.mxu1 %v759_v1  ;;  %v769_v11 = vld [vmem:[%s1005_s23 + $0x18] sm:$0xff]  }
  0x4b   : > { %675 = vmatprep.subr.bf16.mxu0 %v760_v2  ;;  %697 = vmatprep.subr.bf16.mxu1 %v760_v2 }
  0x4c   : > { %687 = vmatprep.mubr.bf16.mxu0 %v766_v4  ;;  %691 = vmatprep.mubr.bf16.mxu1 %v767_v5 }
  0x4e   : > { %676 = vmatpush3.bf16.msra.mxu0 %v760_v2  ;;  %705 = vmatpush3.bf16.msra.mxu1 %v760_v2 }
  0x4f   : > { %677 = vmatprep.subr.bf16.mxu0 %v761_v3  ;;  %698 = vmatprep.subr.bf16.mxu1 %v761_v3 }
  0x52   : > { %678 = vmatpush3.bf16.msra.mxu0 %v761_v3  ;;  %706 = vmatpush3.bf16.msra.mxu1 %v761_v3 }
  0x53   : > { %679 = vmatprep.subr.bf16.mxu0 %v762_v6  ;;  %699 = vmatprep.subr.bf16.mxu1 %v762_v6 }
  0x56   : > { %680 = vmatpush3.bf16.msra.mxu0 %v762_v6  ;;  %707 = vmatpush3.bf16.msra.mxu1 %v762_v6 }
  0x57   : > { %681 = vmatprep.subr.bf16.mxu0 %v763_v7  ;;  %700 = vmatprep.subr.bf16.mxu1 %v763_v7 }
  0x5a   : > { %682 = vmatpush3.bf16.msra.mxu0 %v763_v7  ;;  %708 = vmatpush3.bf16.msra.mxu1 %v763_v7 }
  0x5b   : > { %683 = vmatprep.subr.bf16.mxu0 %v764_v8  ;;  %701 = vmatprep.subr.bf16.mxu1 %v764_v8 }
  0x5e   : > { %684 = vmatpush3.bf16.msra.mxu0 %v764_v8  ;;  %709 = vmatpush3.bf16.msra.mxu1 %v764_v8 }
  0x5f   : > { %685 = vmatprep.subr.bf16.mxu0 %v765_v9  ;;  %702 = vmatprep.subr.bf16.mxu1 %v765_v9 }
  0x62   : > { %686 = vmatpush3.bf16.msra.mxu0 %v765_v9  ;;  %710 = vmatpush3.bf16.msra.mxu1 %v765_v9 }
  0x65   : > { %688 = vmatmul.mubr.bf16.vlgmr.msra.gmra.mrb[0].mxu0 %v768_v10  ;;  %692 = vmatmul.mubr.bf16.vlgmr.msra.gmra.mrb[0].mxu1 %v769_v11 }
 0x138   : > { %v689_v13 = vpop.f32.mrb[0].mxu0  ;;  %v693_v14 = vpop.f32.mrb[0].mxu1 }
 0x139   : > { %v369_v15 = vadd.f32 %v689_v13, %v595_v12  ;;  %v1011_v16 = vadd.f32 %v693_v14, %v595_v12  ;;  %v360_v17 = vpop.f32.mrb[1].mxu0  ;;  %v376_v18 = vpop.f32.mrb[1].mxu1 }
 0x13a   : > { %v1013_v19 = vadd.f32 %v595_v12, %v360_v17  ;;  %v1015_v20 = vadd.f32 %v595_v12, %v376_v18  ;;  %v690_v21 = vpop.f32.mrb[2].mxu0  ;;  %v694_v22 = vpop.f32.mrb[2].mxu1 }
 0x13b   : > { %v401_v23 = vmin.f32 %v369_v15, 0.0  ;;  %v405_v24 = vmin.f32 %v1011_v16, 0.0  ;;  %v363_v25 = vpop.f32.mrb[3].mxu0  ;;  %v379_v26 = vpop.f32.mrb[3].mxu1  ;;  %v372_v31 = vadd.f32 %v690_v21, %v595_v12  ;;  %v388_v32 = vadd.f32 %v694_v22, %v595_v12 }
 0x13c   : > { %v399_v27 = vmin.f32 %v1013_v19, 0.0  ;;  %v403_v28 = vmin.f32 %v1015_v20, 0.0  ;;  %v364_v35 = vadd.f32 %v595_v12, %v363_v25  ;;  %v380_v36 = vadd.f32 %v595_v12, %v379_v26 }
 0x13d   : > { %v411_v29 = vmul.f32 1.442695, %v401_v23  ;;  %v419_v30 = vmul.f32 1.442695, %v405_v24  ;;  %v402_v37 = vmin.f32 %v372_v31, 0.0  ;;  %v406_v38 = vmin.f32 %v388_v32, 0.0 }
 0x13e   : > { %v407_v33 = vmul.f32 1.442695, %v399_v27  ;;  %v415_v34 = vmul.f32 1.442695, %v403_v28  ;;  %v400_v39 = vmin.f32 %v364_v35, 0.0  ;;  %v404_v41 = vmin.f32 %v380_v36, 0.0 }
 0x13f   : > { %770 = vpow2.f32 %v411_v29  ;;  %v413_v40 = vmul.f32 1.442695, %v402_v37  ;;  %v421_v42 = vmul.f32 1.442695, %v406_v38  ;;  %vm393_vm0 = vcmp.gt.f32.partialorder %v369_v15, 0.0 }
 0x140   : > { %772 = vpow2.f32 %v419_v30  ;;  %v409_v43 = vmul.f32 1.442695, %v400_v39  ;;  %v417_v44 = vmul.f32 1.442695, %v404_v41  ;;  %vm397_vm1 = vcmp.gt.f32.partialorder %v1011_v16, 0.0 }
 0x141   : > { %774 = vpow2.f32 %v407_v33  ;;  %vm391_vm2 = vcmp.gt.f32.partialorder %v1013_v19, 0.0  ;;  %vm395_vm3 = vcmp.gt.f32.partialorder %v1015_v20, 0.0  ;;  %vm394_vm4 = vcmp.gt.f32.partialorder %v372_v31, 0.0 }
 0x142   : > { %776 = vpow2.f32 %v415_v34  ;;  %vm398_vm5 = vcmp.gt.f32.partialorder %v388_v32, 0.0  ;;  %vm392_vm6 = vcmp.gt.f32.partialorder %v364_v35, 0.0  ;;  %vm396_vm7 = vcmp.gt.f32.partialorder %v380_v36, 0.0 }
 0x143   : > { %778 = vpow2.f32 %v413_v40 }
 0x144   : > { %780 = vpow2.f32 %v421_v42 }
 0x145   : > { %782 = vpow2.f32 %v409_v43 }
 0x146   : > { %784 = vpow2.f32 %v417_v44 }
 0x149   : > { %v771_v45 = vpop.eup %770 }
 0x14a   : > { %v773_v46 = vpop.eup %772  ;;  %v610_v49 = vadd.f32 -1.0, %v771_v45 }
 0x14b   : > { %v775_v47 = vpop.eup %774  ;;  %v614_v51 = vadd.f32 -1.0, %v773_v46 }
 0x14c   : > { %v777_v48 = vpop.eup %776  ;;  %v608_v53 = vadd.f32 -1.0, %v775_v47  ;;  %v433_v59 = vsel %vm393_vm0, %v369_v15, %v610_v49 }
 0x14d   : > { %v779_v50 = vpop.eup %778  ;;  %v612_v56 = vadd.f32 -1.0, %v777_v48  ;;  %v437_v62 = vsel %vm397_vm1, %v1011_v16, %v614_v51 }
 0x14e   : > { %v781_v52 = vpop.eup %780  ;;  %v611_v54 = vadd.f32 -1.0, %v779_v50  ;;  %v431_v2 = vsel %vm391_vm2, %v1013_v19, %v608_v53 }
 0x14f   : > { %v783_v55 = vpop.eup %782  ;;  %v615_v57 = vadd.f32 -1.0, %v781_v52  ;;  %v435_v5 = vsel %vm395_vm3, %v1015_v20, %v612_v56 }
 0x150   : > { %v785_v58 = vpop.eup %784  ;;  %v434_v60 = vsel %vm394_vm4, %v372_v31, %v611_v54  ;;  %v609_v61 = vadd.f32 -1.0, %v783_v55 }
 0x151   : > { %v644_v63 = vpack.c.bf16 %v434_v60, %v433_v59  ;;  %v438_v0 = vsel %vm398_vm5, %v388_v32, %v615_v57  ;;  %v613_v1 = vadd.f32 -1.0, %v785_v58 }
 0x152   : > { %v654_v3 = vpack.c.bf16 %v438_v0, %v437_v62  ;;  %v432_v4 = vsel %vm392_vm6, %v364_v35, %v609_v61 }
 0x153   : > { %656 = vst [vmem:[%s220_s30 + $0x8] sm:$0xff] %v644_v63   ;;  %v639_v6 = vpack.c.bf16 %v432_v4, %v431_v2  ;;  %v436_v7 = vsel %vm396_vm7, %v380_v36, %v613_v1 }
 0x154   : > { %658 = vst [vmem:[%s220_s30 + $0x18] sm:$0xff] %v654_v3   ;;  %v649_v8 = vpack.c.bf16 %v436_v7, %v435_v5 }
 0x155   : > { %640 = vst [vmem:[%s220_s30] sm:$0xff] %v639_v6  }
 0x156   : > { %657 = vst [vmem:[%s220_s30 + $0x10] sm:$0xff] %v649_v8  }
 0x157 PF: > { %s15_s14 = sadd.s32 1, %s872_s14   ;;  %s1058_s12 = smov %s868_s13 }
 0x158   : > { %p12_p6 = scmp.ge.s32.totalorder %s15_s14, 4   ;;  %s1059_s13 = smov %s1061_s16 }
 0x15a   :  { %14 = sbr.rel (!%p12_p6) target bundleno = 3 (0x3), region = 71 }
 0x161   :  { %509 = vsyncpa [#allocation3], 1 }
 0x162   :  { %511 = vsyncpa [#allocation3 + $0x1], 1 }
 0x163   :  { %512 = vsyncpa [#allocation5], 1 }

// kernel: dito_trainer_forward.25
= control target key start
LH: loop header
LB: loop body
LE: loop exit
PB: predicated region body
PF: predicated region fallthrough
CT: control target
= control target key end

     0   :  { %10 = vsyncpa [#allocation3], 0  ;;  %s87_s15 = smov [#allocation2]   ;;  %s138_s0 = inlined_call_operand.hbm [shape: f32[2,64], index: 0, kind: input, shape index: {}]   ;;  %s139_s1 = inlined_call_operand.vmem [shape: f32[2,64], index: 1, kind: input, shape index: {}]   ;;  %s140_s2 = inlined_call_operand.vmem [shape: f32[2,1], index: 2, kind: input, shape index: {}]   ;;  %s141_s3 = inlined_call_operand.vmem [shape: bf16[2,64], index: 3, kind: output, shape index: {0}]   ;;  %s142_s4 = inlined_call_operand.vmem [shape: f32[2,64], index: 4, kind: output, shape index: {1}]  }
   0x1   :  { %s17_s16 = sshll.u32 %s87_s15, 4  ;;  %s63_s19 = scalar_lea.hbm %s138_s0, 32  ;;  %s18_s16 = int_to_ptr.vmem [resolvable:$true] %s17_s16 }
   0x2   :  { %p64_p0 = scmp.ne.s32.totalorder %s138_s0, %s63_s19  ;;  %p67_p1 = scmp.lt.u32.totalorder %s63_s19, %s138_s0 }
   0x4   :  { %p69_p2 = pnand %p67_p1, %p64_p0 }
   0x6   :  { %72 = shalt.err (!%p69_p2)
}
   0x7   :  { %s73_s24 = scalar_lea.vmem %s18_s16, 32  ;;  %p78_p4 = scmp.lt.s32.totalorder %s18_s16, %s18_s16 }
   0x8   :  { %p74_p3 = scmp.ne.s32.totalorder %s18_s16, %s73_s24  ;;  %p79_p5 = scmp.lt.s32.totalorder %s73_s24, %s73_s24 }
   0xa   :  { %p80_p6 = por %p79_p5, %p78_p4 }
   0xc   :  { %p81_p7 = pnand %p80_p6, %p74_p3 }
   0xe   :  { %84 = shalt.err (!%p81_p7)
}
   0xf   :  { %20 = dma.hbm_to_vmem [thread:$0]  %s138_s0, 32, %s18_s16, [#allocation3]  }
  0x10   :  { %85 = dma.done.wait [#allocation3], 32  }
  0x11   :  { %86 = vsyncadd [#allocation3], 4294967264  ;;  %v88_v0 = vmov 0   ;;  %v30_v1 = vld [vmem:[%s140_s2] sm:$0x3]  ;;  %vm49_vm0 = vcmask 517120  }
  0x12   :  { %62 = vset.pattern.permute.xlu0 %v88_v0  ;;  %v37_v2 = vsub.f32 1.0, %v30_v1  ;;  %v28_v3 = vld [vmem:[#allocation2] sm:$0x3]  ;;  %vm46_vm1 = vcmask 516096  }
  0x13   :  { %33 = vperm.xlu0 %62, %v30_v1   ;;  %v29_v4 = vld [vmem:[%s139_s1] sm:$0x3] }
  0x14   :  { %v48_v5 = vsub.f32 %v28_v3, %v29_v4 }
  0x16   :  { %50 = vst.msk [vmem:[%s142_s4] sm:$0x3] %vm49_vm0, %v48_v5 }
  0x17   :  { %40 = vperm.xlu0 %62, %v37_v2  }
  0x92   :  { %v34_v6 = vpop.permute.xlu0 %33 }
  0x93   :  { %v36_v8 = vmul.f32 %v34_v6, %v28_v3 }
  0x96   :  { %v41_v7 = vpop.permute.xlu0 %40 }
  0x97   :  { %v43_v9 = vmul.f32 %v41_v7, %v29_v4 }
  0x99   :  { %v44_v10 = vadd.f32 %v43_v9, %v36_v8 }
  0x9b   :  { %v45_v11 = vpack.c.bf16 %v44_v10, %v44_v10 }
  0x9d   :  { %47 = vst.msk [vmem:[%s141_s3] sm:$0x1] %vm46_vm1, %v45_v11 }
  0x9e   :  { %59 = vsyncpa [#allocation3], 1 }

// kernel: dito_trainer_forward.26
= control target key start
LH: loop header
LB: loop body
LE: loop exit
PB: predicated region body
PF: predicated region fallthrough
CT: control target
= control target key end

     0   :  { %12 = vsyncpa [#allocation3], 0  ;;  %s1508_s0 = inlined_call_operand.vmem [shape: bf16[8,128], index: 0, kind: input, shape index: {}]   ;;  %s1509_s1 = inlined_call_operand.hbm [shape: bf16[128,128], index: 1, kind: input, shape index: {}]   ;;  %s1510_s2 = inlined_call_operand.hbm [shape: f32[1,128], index: 2, kind: input, shape index: {}]   ;;  %s1511_s3 = inlined_call_operand.hbm [shape: bf16[128,128], index: 3, kind: input, shape index: {}]   ;;  %s1512_s4 = inlined_call_operand.hbm [shape: f32[1,128], index: 4, kind: input, shape index: {}]   ;;  %s1513_s5 = inlined_call_operand.hbm [shape: bf16[128,896], index: 5, kind: input, shape index: {}]   ;;  %s1514_s6 = inlined_call_operand.hbm [shape: f32[1,896], index: 6, kind: input, shape index: {}]   ;;  %s1515_s7 = inlined_call_operand.vmem [shape: f32[8,896], index: 7, kind: output, shape index: {}]  }
   0x1   :  { %13 = vsyncpa [#allocation5], 0 }
   0x2   :  { %14 = vsyncpa [#allocation8], 0 }
   0x3   :  { %15 = vsyncpa [#allocation11], 0  ;;  %s1329_s24 = smov [#allocation4]   ;;  %s1330_s26 = smov [#allocation7]  }
   0x4   :  { %s36_s25 = sshll.u32 %s1329_s24, 4  ;;  %s58_s27 = sshll.u32 %s1330_s26, 4  ;;  %s37_s25 = int_to_ptr.vmem [resolvable:$true] %s36_s25  ;;  %s59_s27 = int_to_ptr.vmem [resolvable:$true] %s58_s27 }
   0x5   :  { %s1189_s30 = scalar_lea.hbm %s1510_s2, 16 }
   0x6   :  { %p1190_p0 = scmp.ne.s32.totalorder %s1510_s2, %s1189_s30  ;;  %p1193_p1 = scmp.lt.u32.totalorder %s1189_s30, %s1510_s2 }
   0x8   :  { %p1195_p2 = pnand %p1193_p1, %p1190_p0 }
   0xa   :  { %1198 = shalt.err (!%p1195_p2)
}
   0xb   :  { %s1199_s12 = scalar_lea.vmem %s37_s25, 16  ;;  %s1203_s13 = scalar_lea.vmem %s37_s25, 32 }
   0xc   :  { %p1200_p3 = scmp.ne.s32.totalorder %s37_s25, %s1199_s12  ;;  %p1204_p4 = scmp.lt.s32.totalorder %s37_s25, %s37_s25 }
   0xd   :  { %p1205_p5 = scmp.lt.s32.totalorder %s1203_s13, %s1199_s12 }
   0xf   :  { %p1206_p6 = por %p1205_p5, %p1204_p4 }
  0x11   :  { %p1207_p7 = pnand %p1206_p6, %p1200_p3 }
  0x13   :  { %1210 = shalt.err (!%p1207_p7)
}
  0x14   :  { %39 = dma.hbm_to_vmem [thread:$0]  %s1510_s2, 16, %s37_s25, [#allocation5]  }
  0x15   :  { %s1211_s18 = scalar_lea.hbm %s1512_s4, 16 }
  0x16   :  { %p1212_p8 = scmp.ne.s32.totalorder %s1512_s4, %s1211_s18  ;;  %p1215_p9 = scmp.lt.u32.totalorder %s1211_s18, %s1512_s4 }
  0x18   :  { %p1217_p10 = pnand %p1215_p9, %p1212_p8 }
  0x1a   :  { %1220 = shalt.err (!%p1217_p10)
}
  0x1b   :  { %s1221_s23 = scalar_lea.vmem %s59_s27, 16  ;;  %s1225_s24 = scalar_lea.vmem %s59_s27, 32 }
  0x1c   :  { %p1222_p11 = scmp.ne.s32.totalorder %s59_s27, %s1221_s23  ;;  %p1226_p12 = scmp.lt.s32.totalorder %s59_s27, %s59_s27 }
  0x1d   :  { %p1227_p13 = scmp.lt.s32.totalorder %s1225_s24, %s1221_s23 }
  0x1f   :  { %p1228_p0 = por %p1227_p13, %p1226_p12 }
  0x21   :  { %p1229_p1 = pnand %p1228_p0, %p1222_p11 }
  0x23   :  { %1232 = shalt.err (!%p1229_p1)
}
  0x24   :  { %61 = dma.hbm_to_vmem [thread:$0]  %s1512_s4, 16, %s59_s27, [#allocation8]  }
  0x25   :  { %s1331_s26 = smov [#allocation2]   ;;  %s1233_s8 = scalar_lea.hbm %s1509_s1, 1024 }
  0x26   :  { %s23_s28 = sshll.u32 %s1331_s26, 4  ;;  %p1234_p2 = scmp.ne.s32.totalorder %s1509_s1, %s1233_s8  ;;  %s24_s28 = int_to_ptr.vmem [resolvable:$true] %s23_s28 }
  0x27   :  { %p1237_p3 = scmp.lt.u32.totalorder %s1233_s8, %s1509_s1 }
  0x29   :  { %p1239_p4 = pnand %p1237_p3, %p1234_p2 }
  0x2b   :  { %1242 = shalt.err (!%p1239_p4)
}
  0x2c   :  { %s1243_s13 = scalar_lea.vmem %s24_s28, 1024  ;;  %p1248_p6 = scmp.lt.s32.totalorder %s24_s28, %s24_s28 }
  0x2d   :  { %p1244_p5 = scmp.ne.s32.totalorder %s24_s28, %s1243_s13  ;;  %p1249_p7 = scmp.lt.s32.totalorder %s1243_s13, %s1243_s13 }
  0x2f   :  { %p1250_p8 = por %p1249_p7, %p1248_p6 }
  0x31   :  { %p1251_p9 = pnand %p1250_p8, %p1244_p5 }
  0x33   :  { %1254 = shalt.err (!%p1251_p9)
}
  0x34   :  { %s1332_s4 = smov 64   ;;  %s1333_s27 = smov 4  }
  0x35   :  { %29 = dma.hbm_to_vmem [thread:$0]  %s1509_s1, 1024, %s24_s28, [#allocation3], %s1332_s4, %s1332_s4, %s1333_s27  }
  0x36   :  { %s1334_s16 = smov [#allocation6]   ;;  %s1335_s18 = smov [#allocation9]  }
  0x37   :  { %s45_s17 = sshll.u32 %s1334_s16, 4  ;;  %s67_s19 = sshll.u32 %s1335_s18, 4  ;;  %s46_s17 = int_to_ptr.vmem [resolvable:$true] %s45_s17  ;;  %s68_s19 = int_to_ptr.vmem [resolvable:$true] %s67_s19 }
  0x38   :  { %s1255_s22 = scalar_lea.hbm %s1511_s3, 1024 }
  0x39   :  { %p1256_p10 = scmp.ne.s32.totalorder %s1511_s3, %s1255_s22  ;;  %p1259_p11 = scmp.lt.u32.totalorder %s1255_s22, %s1511_s3 }
  0x3b   :  { %p1261_p12 = pnand %p1259_p11, %p1256_p10 }
  0x3d   :  { %1264 = shalt.err (!%p1261_p12)
}
  0x3e   :  { %s1265_s1 = scalar_lea.vmem %s46_s17, 1024  ;;  %p1270_p0 = scmp.lt.s32.totalorder %s46_s17, %s46_s17 }
  0x3f   :  { %p1266_p13 = scmp.ne.s32.totalorder %s46_s17, %s1265_s1  ;;  %p1271_p1 = scmp.lt.s32.totalorder %s1265_s1, %s1265_s1 }
  0x41   :  { %p1272_p2 = por %p1271_p1, %p1270_p0 }
  0x43   :  { %p1273_p3 = pnand %p1272_p2, %p1266_p13 }
  0x45   :  { %1276 = shalt.err (!%p1273_p3)
}
  0x46   :  { %51 = dma.hbm_to_vmem [thread:$0]  %s1511_s3, 1024, %s46_s17, [#allocation5], %s1332_s4, %s1332_s4, %s1333_s27  }
  0x47   :  { %s1277_s8 = scalar_lea.hbm %s1513_s5, 7168 }
  0x48   :  { %p1278_p4 = scmp.ne.s32.totalorder %s1513_s5, %s1277_s8  ;;  %p1281_p5 = scmp.lt.u32.totalorder %s1277_s8, %s1513_s5 }
  0x4a   :  { %p1283_p6 = pnand %p1281_p5, %p1278_p4 }
  0x4c   :  { %1286 = shalt.err (!%p1283_p6)
}
  0x4d   :  { %s1287_s13 = scalar_lea.vmem %s68_s19, 7168  ;;  %p1292_p8 = scmp.lt.s32.totalorder %s68_s19, %s68_s19 }
  0x4e   :  { %p1288_p7 = scmp.ne.s32.totalorder %s68_s19, %s1287_s13  ;;  %p1293_p9 = scmp.lt.s32.totalorder %s1287_s13, %s1287_s13 }
  0x50   :  { %p1294_p10 = por %p1293_p9, %p1292_p8 }
  0x52   :  { %p1295_p11 = pnand %p1294_p10, %p1288_p7 }
  0x54   :  { %1298 = shalt.err (!%p1295_p11)
}
  0x55   :  { %s1336_s3 = smov 448   ;;  %s1337_s4 = smov 28  }
  0x56   :  { %73 = dma.hbm_to_vmem [thread:$0]  %s1513_s5, 7168, %s68_s19, [#allocation8], %s1336_s3, %s1336_s3, %s1337_s4  }
  0x57   :  { %s1338_s15 = smov [#allocation10]   ;;  %s1299_s20 = scalar_lea.hbm %s1514_s6, 112 }
  0x58   :  { %s80_s16 = sshll.u32 %s1338_s15, 4  ;;  %p1300_p12 = scmp.ne.s32.totalorder %s1514_s6, %s1299_s20  ;;  %s81_s16 = int_to_ptr.vmem [resolvable:$true] %s80_s16 }
  0x59   :  { %p1303_p13 = scmp.lt.u32.totalorder %s1299_s20, %s1514_s6 }
  0x5b   :  { %p1305_p0 = pnand %p1303_p13, %p1300_p12 }
  0x5d   :  { %1308 = shalt.err (!%p1305_p0)
}
  0x5e   :  { %s1309_s2 = scalar_lea.vmem %s81_s16, 112  ;;  %s1313_s5 = scalar_lea.vmem %s81_s16, 128 }
  0x5f   :  { %p1310_p1 = scmp.ne.s32.totalorder %s81_s16, %s1309_s2  ;;  %p1314_p2 = scmp.lt.s32.totalorder %s81_s16, %s81_s16 }
  0x60   :  { %p1315_p3 = scmp.lt.s32.totalorder %s1313_s5, %s1309_s2 }
  0x62   :  { %p1316_p4 = por %p1315_p3, %p1314_p2 }
  0x64   :  { %p1317_p5 = pnand %p1316_p4, %p1310_p1 }
  0x66   :  { %1320 = shalt.err (!%p1317_p5)
}
  0x67   :  { %83 = dma.hbm_to_vmem [thread:$0]  %s1514_s6, 112, %s81_s16, [#allocation11]  }
  0x68   :  { %1321 = dma.done.wait [#allocation3], 1024  }
  0x69   :  { %1322 = vsyncadd [#allocation3], 4294966272 }
  0x6a   :  { %1323 = dma.done.wait [#allocation5], 1040  }
  0x6b   :  { %1324 = vsyncadd [#allocation5], 4294966256 }
  0x6c   :  { %1325 = dma.done.wait [#allocation8], 7184  }
  0x6d   :  { %1326 = vsyncadd [#allocation8], 4294960112 }
  0x6e   :  { %1327 = dma.done.wait [#allocation11], 112  }
  0x6f   :  { %1328 = vsyncadd [#allocation11], 4294967184  ;;  %v1339_v0 = vmov 0.0   ;;  %vm1340_vm0 = vmmov 0   ;;  %v1085_v1 = vld [vmem:[#allocation2] sm:$0xff]   ;;  %v1086_v2 = vld [vmem:[#allocation2 + $0x8] sm:$0xff]  }
  0x70   :  { %1012 = vmatprep.subr.bf16.mxu0 %v1339_v0  ;;  %1028 = vmatprep.mubr.msk.bf16.mxu0 %vm1340_vm0, %v1339_v0  ;;  %v1087_v3 = vld [vmem:[#allocation2 + $0x10] sm:$0xff]   ;;  %v1088_v4 = vld [vmem:[#allocation2 + $0x18] sm:$0xff]   ;;  %v1089_v5 = vld [vmem:[#allocation2 + $0x20] sm:$0xff]   ;;  %v1341_v63 = vmov 0  }
  0x71   :  { %1032 = vmatprep.subr.bf16.mxu1 %v1339_v0  ;;  %1048 = vmatprep.mubr.msk.bf16.mxu1 %vm1340_vm0, %v1339_v0  ;;  %v1090_v6 = vld [vmem:[#allocation2 + $0x28] sm:$0xff]   ;;  %v1091_v7 = vld [vmem:[#allocation2 + $0x30] sm:$0xff]   ;;  %v1092_v8 = vld [vmem:[#allocation2 + $0x38] sm:$0xff]  }
  0x72   :  { %1013 = vmatpush3.bf16.msra.mxu0 %v1085_v1  ;;  %v103_v9 = vld [vmem:[%s1508_s0] sm:$0xf]  ;;  %v1094_v11 = vld [vmem:[#allocation6 + $0x8] sm:$0xff]   ;;  %v1095_v12 = vld [vmem:[#allocation6 + $0x10] sm:$0xff]  }
  0x73   :  { %1014 = vmatprep.subr.bf16.mxu0 %v1339_v0  ;;  %v1093_v10 = vld [vmem:[#allocation6] sm:$0xff]   ;;  %v1096_v13 = vld [vmem:[#allocation6 + $0x18] sm:$0xff]   ;;  %v1098_v15 = vld [vmem:[#allocation6 + $0x28] sm:$0xff]  }
  0x74   :  { %1033 = vmatpush3.bf16.msra.mxu1 %v1093_v10  ;;  %v1097_v14 = vld [vmem:[#allocation6 + $0x20] sm:$0xff]   ;;  %v1099_v16 = vld [vmem:[#allocation6 + $0x30] sm:$0xff]   ;;  %v1100_v17 = vld [vmem:[#allocation6 + $0x38] sm:$0xff]  }
  0x75   :  { %1034 = vmatprep.subr.bf16.mxu1 %v1339_v0  ;;  %v909_v18 = vld [vmem:[#allocation4] ss:$0 sm:$0xff]  ;;  %v1103_v30 = vld [vmem:[#allocation9 + $0x4] ss:$28 sps:$4 sm:$0xff]   ;;  %v1106_v31 = vld [vmem:[#allocation9 + $0xc] ss:$28 sps:$4 sm:$0xff]  }
  0x76   :  { %1015 = vmatpush3.bf16.msra.mxu0 %v1086_v2  ;;  %v1101_v32 = vld [vmem:[#allocation9] ss:$28 sps:$4 sm:$0xff]   ;;  %v1104_v33 = vld [vmem:[#allocation9 + $0x8] ss:$28 sps:$4 sm:$0xff]   ;;  %v1107_v36 = vld [vmem:[#allocation9 + $0x38] ss:$28 sps:$4 sm:$0xff]  }
  0x77   :  { %1016 = vmatprep.subr.bf16.mxu0 %v1339_v0  ;;  %v1109_v34 = vld [vmem:[#allocation9 + $0x3c] ss:$28 sps:$4 sm:$0xff]   ;;  %v1112_v35 = vld [vmem:[#allocation9 + $0x44] ss:$28 sps:$4 sm:$0xff]   ;;  %v1115_v38 = vld [vmem:[#allocation9 + $0x74] ss:$28 sps:$4 sm:$0xff]  }
  0x78   :  { %1035 = vmatpush3.bf16.msra.mxu1 %v1094_v11  ;;  %v1110_v37 = vld [vmem:[#allocation9 + $0x40] ss:$28 sps:$4 sm:$0xff]   ;;  %v1113_v40 = vld [vmem:[#allocation9 + $0x70] ss:$28 sps:$4 sm:$0xff]   ;;  %v1116_v41 = vld [vmem:[#allocation9 + $0x78] ss:$28 sps:$4 sm:$0xff]  }
  0x79   :  { %1036 = vmatprep.subr.bf16.mxu1 %v1339_v0  ;;  %v1118_v39 = vld [vmem:[#allocation9 + $0x7c] ss:$28 sps:$4 sm:$0xff]   ;;  %v1121_v42 = vld [vmem:[#allocation9 + $0xac] ss:$28 sps:$4 sm:$0xff]   ;;  %v1124_v43 = vld [vmem:[#allocation9 + $0xb4] ss:$28 sps:$4 sm:$0xff]  }
  0x7a   :  { %1017 = vmatpush3.bf16.msra.mxu0 %v1087_v3  ;;  %v1119_v44 = vld [vmem:[#allocation9 + $0xa8] ss:$28 sps:$4 sm:$0xff]   ;;  %v1122_v45 = vld [vmem:[#allocation9 + $0xb0] ss:$28 sps:$4 sm:$0xff]   ;;  %v1125_v48 = vld [vmem:[#allocation9 + $0xe0] ss:$28 sps:$4 sm:$0xff]  }
  0x7b   :  { %1018 = vmatprep.subr.bf16.mxu0 %v1339_v0  ;;  %v1127_v46 = vld [vmem:[#allocation9 + $0xe4] ss:$28 sps:$4 sm:$0xff]   ;;  %v1130_v47 = vld [vmem:[#allocation9 + $0xec] ss:$28 sps:$4 sm:$0xff]   ;;  %v1133_v50 = vld [vmem:[#allocation9 + $0x11c] ss:$28 sps:$4 sm:$0xff]  }
  0x7c   :  { %1037 = vmatpush3.bf16.msra.mxu1 %v1095_v12  ;;  %v1128_v49 = vld [vmem:[#allocation9 + $0xe8] ss:$28 sps:$4 sm:$0xff]   ;;  %v1131_v52 = vld [vmem:[#allocation9 + $0x118] ss:$28 sps:$4 sm:$0xff]   ;;  %v1134_v53 = vld [vmem:[#allocation9 + $0x120] ss:$28 sps:$4 sm:$0xff]  }
  0x7d   :  { %1038 = vmatprep.subr.bf16.mxu1 %v1339_v0  ;;  %v1136_v51 = vld [vmem:[#allocation9 + $0x124] ss:$28 sps:$4 sm:$0xff]   ;;  %v1139_v54 = vld [vmem:[#allocation9 + $0x154] ss:$28 sps:$4 sm:$0xff]   ;;  %v1142_v55 = vld [vmem:[#allocation9 + $0x15c] ss:$28 sps:$4 sm:$0xff]  }
  0x7e   :  { %1019 = vmatpush3.bf16.msra.mxu0 %v1088_v4  ;;  %v1137_v56 = vld [vmem:[#allocation9 + $0x150] ss:$28 sps:$4 sm:$0xff]   ;;  %v1140_v57 = vld [vmem:[#allocation9 + $0x158] ss:$28 sps:$4 sm:$0xff]   ;;  %v1143_v60 = vld [vmem:[#allocation9 + $0x188] ss:$28 sps:$4 sm:$0xff]  }
  0x7f   :  { %1020 = vmatprep.subr.bf16.mxu0 %v1339_v0  ;;  %v1145_v58 = vld [vmem:[#allocation9 + $0x18c] ss:$28 sps:$4 sm:$0xff]   ;;  %v1148_v59 = vld [vmem:[#allocation9 + $0x194] ss:$28 sps:$4 sm:$0xff]   ;;  %v919_v1 = vld [vmem:[#allocation7] ss:$0 sm:$0xff] }
  0x80   :  { %1039 = vmatpush3.bf16.msra.mxu1 %v1096_v13  ;;  %v1146_v61 = vld [vmem:[#allocation9 + $0x190] ss:$28 sps:$4 sm:$0xff]   ;;  %v1152_v13 = vld [vmem:[#allocation9 + $0x18] ss:$28 sps:$4 sm:$0xff]  }
  0x81   :  { %1040 = vmatprep.subr.bf16.mxu1 %v1339_v0  ;;  %v1151_v62 = vld [vmem:[#allocation9 + $0x14] ss:$28 sps:$4 sm:$0xff]  }
  0x82   :  { %1021 = vmatpush3.bf16.msra.mxu0 %v1089_v5  ;;  %v1149_v12 = vld [vmem:[#allocation9 + $0x10] ss:$28 sps:$4 sm:$0xff]  }
  0x83   :  { %1022 = vmatprep.subr.bf16.mxu0 %v1339_v0 }
  0x84   :  { %1041 = vmatpush3.bf16.msra.mxu1 %v1097_v14 }
  0x85   :  { %1042 = vmatprep.subr.bf16.mxu1 %v1339_v0 }
  0x86   :  { %1023 = vmatpush3.bf16.msra.mxu0 %v1090_v6 }
  0x87   :  { %1024 = vmatprep.subr.bf16.mxu0 %v1339_v0 }
  0x88   :  { %1043 = vmatpush3.bf16.msra.mxu1 %v1098_v15  ;;  %v1155_v15 = vld [vmem:[#allocation9 + $0x4c] ss:$28 sps:$4 sm:$0xff]  }
  0x89   :  { %1044 = vmatprep.subr.bf16.mxu1 %v1339_v0 }
  0x8a   :  { %1025 = vmatpush3.bf16.msra.mxu0 %v1091_v7 }
  0x8b   :  { %1026 = vmatprep.subr.bf16.mxu0 %v1339_v0 }
  0x8c   :  { %1045 = vmatpush3.bf16.msra.mxu1 %v1099_v16  ;;  %v1153_v16 = vld [vmem:[#allocation9 + $0x48] ss:$28 sps:$4 sm:$0xff]  }
  0x8d   :  { %1046 = vmatprep.subr.bf16.mxu1 %v1339_v0 }
  0x8e   :  { %1027 = vmatpush3.bf16.msra.mxu0 %v1092_v8 }
  0x8f   :  { %731 = vmatprep.subr.bf16.mxu0 %v1103_v30  ;;  %v1175_v30 = vld [vmem:[#allocation9 + $0x164] ss:$28 sps:$4 sm:$0xff]  }
  0x90   :  { %1047 = vmatpush3.bf16.msra.mxu1 %v1100_v17  ;;  %v1156_v17 = vld [vmem:[#allocation9 + $0x50] ss:$28 sps:$4 sm:$0xff]  }
  0x91   :  { %1029 = vmatmul.mubr.bf16.vlgmr.msra.gmra.mrb[0].mxu0 %v103_v9  ;;  %772 = vmatprep.subr.bf16.mxu1 %v1106_v31  ;;  %v1173_v31 = vld [vmem:[#allocation9 + $0x160] ss:$28 sps:$4 sm:$0xff]  }
  0x92   :  { %732 = vmatpush1.bf16.msra.mxu0 %v1101_v32  ;;  %763 = vmatprep.mubr.bf16.mxu0 %v1341_v63  ;;  %v1176_v32 = vld [vmem:[#allocation9 + $0x168] ss:$28 sps:$4 sm:$0xff]  }
  0x93   :  { %733 = vmatprep.subr.bf16.mxu0 %v1109_v34  ;;  %v1177_v34 = vld [vmem:[#allocation9 + $0x198] ss:$28 sps:$4 sm:$0xff]  }
  0x96   :  { %734 = vmatpush1.bf16.msra.mxu0 %v1107_v36  ;;  %v408_v36 = vlaneseq }
  0x97   :  { %735 = vmatprep.subr.bf16.mxu0 %v1115_v38 }
  0x9a   :  { %736 = vmatpush1.bf16.msra.mxu0 %v1113_v40  ;;  %v406_v40 = vld [vmem:[#allocation10] sm:$0xff] }
  0x9b   :  { %737 = vmatprep.subr.bf16.mxu0 %v1121_v42 }
  0x9e   :  { %738 = vmatpush1.bf16.msra.mxu0 %v1119_v44 }
  0x9f   :  { %739 = vmatprep.subr.bf16.mxu0 %v1127_v46 }
  0xa2   :  { %740 = vmatpush1.bf16.msra.mxu0 %v1125_v48 }
  0xa3   :  { %741 = vmatprep.subr.bf16.mxu0 %v1133_v50 }
  0xa6   :  { %742 = vmatpush1.bf16.msra.mxu0 %v1131_v52 }
  0xa7   :  { %743 = vmatprep.subr.bf16.mxu0 %v1139_v54 }
  0xaa   :  { %744 = vmatpush1.bf16.msra.mxu0 %v1137_v56 }
  0xab   :  { %745 = vmatprep.subr.bf16.mxu0 %v1145_v58 }
  0xae   :  { %746 = vmatpush1.bf16.msra.mxu0 %v1143_v60 }
  0xaf   :  { %813 = vmatprep.subr.bf16.mxu0 %v1151_v62 }
 0x164   :  { %v209_v19 = vpop.f32.mrb[0].mxu0 }
 0x165   :  { %v210_v20 = vadd.f32 %v909_v18, %v209_v19  ;;  %v1030_v21 = vpop.f32.mrb[1].mxu0  ;;  %v1159_v18 = vld [vmem:[#allocation9 + $0x84] ss:$28 sps:$4 sm:$0xff]  }
 0x166   :  { %v212_v22 = vpop.f32.mrb[2].mxu0  ;;  %v1157_v19 = vld [vmem:[#allocation9 + $0x80] ss:$28 sps:$4 sm:$0xff]  }
 0x167   :  { %v918_v23 = vmul.f32 -1.442695, %v210_v20  ;;  %v1031_v24 = vpop.f32.mrb[3].mxu0  ;;  %v1163_v21 = vld [vmem:[#allocation9 + $0xbc] ss:$28 sps:$4 sm:$0xff]  }
 0x168   :  { %v1161_v22 = vld [vmem:[#allocation9 + $0xb8] ss:$28 sps:$4 sm:$0xff]  }
 0x169   :  { %1181 = vpow2.f32 %v918_v23  ;;  %v1164_v23 = vld [vmem:[#allocation9 + $0xc0] ss:$28 sps:$4 sm:$0xff]   ;;  %v1167_v24 = vld [vmem:[#allocation9 + $0xf4] ss:$28 sps:$4 sm:$0xff]  }
 0x173   :  { %v1182_v25 = vpop.eup %1181 }
 0x174   :  { %v218_v26 = vadd.f32 1.0, %v1182_v25  ;;  %v1165_v25 = vld [vmem:[#allocation9 + $0xf0] ss:$28 sps:$4 sm:$0xff]  }
 0x176   :  { %1183 = vrcp.f32 %v218_v26  ;;  %v1168_v26 = vld [vmem:[#allocation9 + $0xf8] ss:$28 sps:$4 sm:$0xff]  }
 0x180   :  { %v1184_v27 = vpop.eup %1183 }
 0x181   :  { %v221_v28 = vmul.f32 %v1184_v27, %v210_v20  ;;  %v1160_v20 = vld [vmem:[#allocation9 + $0x88] ss:$28 sps:$4 sm:$0xff]  }
 0x182   :  { %v1171_v27 = vld [vmem:[#allocation9 + $0x12c] ss:$28 sps:$4 sm:$0xff]  }
 0x183   :  { %v222_v29 = vpack.c.bf16 %v221_v28, %v221_v28  ;;  %v1169_v28 = vld [vmem:[#allocation9 + $0x128] ss:$28 sps:$4 sm:$0xff]  }
 0x185   :  { %1049 = vmatmul.mubr.bf16.vlgmr.msra.gmra.mrb[0].mxu1 %v222_v29  ;;  %v1172_v29 = vld [vmem:[#allocation9 + $0x130] ss:$28 sps:$4 sm:$0xff]  }
 0x186   :  { %773 = vmatpush1.bf16.msra.mxu1 %v1104_v33  ;;  %804 = vmatprep.mubr.bf16.mxu1 %v1341_v63  ;;  %v1179_v33 = vld [vmem:[#allocation9 + $0x19c] ss:$28 sps:$4 sm:$0xff]  }
 0x187   :  { %774 = vmatprep.subr.bf16.mxu1 %v1112_v35  ;;  %v1180_v35 = vld [vmem:[#allocation9 + $0x1a0] ss:$28 sps:$4 sm:$0xff]  }
 0x18a   :  { %775 = vmatpush1.bf16.msra.mxu1 %v1110_v37  ;;  %v409_v37 = vshrl.u32 %v408_v36, 7 }
 0x18b   :  { %776 = vmatprep.subr.bf16.mxu1 %v1118_v39 }
 0x18c   :  { %v410_v38 = vsub.s32 0, %v409_v37  ;;  %v418_v39 = vsub.s32 2, %v409_v37  ;;  %v422_v42 = vsub.s32 3, %v409_v37  ;;  %v426_v58 = vsub.s32 4, %v409_v37 }
 0x18d   :  { %v430_v60 = vsub.s32 5, %v409_v37 }
 0x18e   :  { %777 = vmatpush1.bf16.msra.mxu1 %v1116_v41  ;;  %v414_v41 = vsub.s32 1, %v409_v37  ;;  %v419_v44 = vrot.slane %v406_v40, %v418_v39  ;;  %v423_v46 = vrot.slane %v406_v40, %v422_v42 }
 0x18f   :  { %778 = vmatprep.subr.bf16.mxu1 %v1124_v43  ;;  %v411_v43 = vrot.slane %v406_v40, %v410_v38 }
 0x192   :  { %779 = vmatpush1.bf16.msra.mxu1 %v1122_v45  ;;  %v415_v45 = vrot.slane %v406_v40, %v414_v41 }
 0x193   :  { %780 = vmatprep.subr.bf16.mxu1 %v1130_v47 }
 0x196   :  { %781 = vmatpush1.bf16.msra.mxu1 %v1128_v49 }
 0x197   :  { %782 = vmatprep.subr.bf16.mxu1 %v1136_v51 }
 0x19a   :  { %783 = vmatpush1.bf16.msra.mxu1 %v1134_v53 }
 0x19b   :  { %784 = vmatprep.subr.bf16.mxu1 %v1142_v55 }
 0x19e   :  { %785 = vmatpush1.bf16.msra.mxu1 %v1140_v57 }
 0x19f   :  { %786 = vmatprep.subr.bf16.mxu1 %v1148_v59  ;;  %v434_v59 = vsub.s32 6, %v409_v37 }
 0x1a1   :  { %v435_v62 = vrot.slane %v406_v40, %v434_v59 }
 0x1a2   :  { %787 = vmatpush1.bf16.msra.mxu1 %v1146_v61  ;;  %v427_v61 = vrot.slane %v406_v40, %v426_v58 }
 0x1a3   :  { %1052 = vmatprep.subr.bf16.mxu1 %v1339_v0 }
 0x258   :  { %v328_v2 = vpop.f32.mrb[0].mxu1 }
 0x259   :  { %v329_v3 = vadd.f32 %v919_v1, %v328_v2  ;;  %v1050_v4 = vpop.f32.mrb[1].mxu1 }
 0x25a   :  { %v331_v5 = vpop.f32.mrb[2].mxu1 }
 0x25b   :  { %v928_v6 = vmul.f32 -1.442695, %v329_v3  ;;  %v1051_v7 = vpop.f32.mrb[3].mxu1 }
 0x25d   :  { %1185 = vpow2.f32 %v928_v6 }
 0x267   :  { %v1186_v8 = vpop.eup %1185 }
 0x268   :  { %v337_v9 = vadd.f32 1.0, %v1186_v8 }
 0x26a   :  { %1187 = vrcp.f32 %v337_v9 }
 0x274   :  { %v1188_v10 = vpop.eup %1187 }
 0x275   :  { %v340_v11 = vmul.f32 %v1188_v10, %v329_v3 }
 0x277   :  { %v341_v14 = vpack.c.bf16 %v340_v11, %v340_v11 }
 0x279   :  { %764 = vmatmul.mubr.bf16.vlgmr.msra.gmra.mrb[4].mxu0 %v341_v14  ;;  %805 = vmatmul.mubr.bf16.vlgmr.msra.gmra.mrb[4].mxu1 %v341_v14 }
 0x27a   :  { %814 = vmatpush1.bf16.msra.mxu0 %v1149_v12  ;;  %1053 = vmatpush3.bf16.msra.mxu1 %v1152_v13 }
 0x27b   :  { %815 = vmatprep.subr.bf16.mxu0 %v1155_v15  ;;  %1054 = vmatprep.subr.bf16.mxu1 %v1339_v0 }
 0x27c   :  { %845 = vmatprep.mubr.bf16.mxu0 %v1341_v63  ;;  %1068 = vmatprep.mubr.msk.bf16.mxu1 %vm1340_vm0, %v1339_v0  ;;  %v431_v63 = vrot.slane %v406_v40, %v430_v60 }
 0x27e   :  { %816 = vmatpush1.bf16.msra.mxu0 %v1153_v16  ;;  %1055 = vmatpush3.bf16.msra.mxu1 %v1156_v17 }
 0x27f   :  { %817 = vmatprep.subr.bf16.mxu0 %v1159_v18  ;;  %1056 = vmatprep.subr.bf16.mxu1 %v1339_v0 }
 0x282   :  { %818 = vmatpush1.bf16.msra.mxu0 %v1157_v19  ;;  %1057 = vmatpush3.bf16.msra.mxu1 %v1160_v20 }
 0x283   :  { %819 = vmatprep.subr.bf16.mxu0 %v1163_v21  ;;  %1058 = vmatprep.subr.bf16.mxu1 %v1339_v0 }
 0x286   :  { %820 = vmatpush1.bf16.msra.mxu0 %v1161_v22  ;;  %1059 = vmatpush3.bf16.msra.mxu1 %v1164_v23 }
 0x287   :  { %821 = vmatprep.subr.bf16.mxu0 %v1167_v24  ;;  %1060 = vmatprep.subr.bf16.mxu1 %v1339_v0 }
 0x28a   :  { %822 = vmatpush1.bf16.msra.mxu0 %v1165_v25  ;;  %1061 = vmatpush3.bf16.msra.mxu1 %v1168_v26 }
 0x28b   :  { %823 = vmatprep.subr.bf16.mxu0 %v1171_v27  ;;  %1062 = vmatprep.subr.bf16.mxu1 %v1339_v0 }
 0x28e   :  { %824 = vmatpush1.bf16.msra.mxu0 %v1169_v28  ;;  %1063 = vmatpush3.bf16.msra.mxu1 %v1172_v29 }
 0x28f   :  { %825 = vmatprep.subr.bf16.mxu0 %v1175_v30  ;;  %1064 = vmatprep.subr.bf16.mxu1 %v1339_v0 }
 0x292   :  { %826 = vmatpush1.bf16.msra.mxu0 %v1173_v31  ;;  %1065 = vmatpush3.bf16.msra.mxu1 %v1176_v32 }
 0x293   :  { %827 = vmatprep.subr.bf16.mxu0 %v1179_v33  ;;  %1066 = vmatprep.subr.bf16.mxu1 %v1339_v0 }
 0x296   :  { %828 = vmatpush1.bf16.msra.mxu0 %v1177_v34  ;;  %1067 = vmatpush3.bf16.msra.mxu1 %v1180_v35 }
 0x299   :  { %846 = vmatmul.mubr.bf16.vlgmr.msra.gmra.mrb[8].mxu0 %v341_v14  ;;  %1069 = vmatmul.mubr.bf16.vlgmr.msra.gmra.mrb[8].mxu1 %v341_v14 }
 0x34c   :  { %v765_v47 = vpop.f32.mrb[4].mxu0  ;;  %v806_v48 = vpop.f32.mrb[4].mxu1 }
 0x34d   :  { %v766_v49 = vadd.f32 %v765_v47, %v411_v43  ;;  %v807_v50 = vadd.f32 %v806_v48, %v419_v44  ;;  %v767_v0 = vpop.f32.mrb[5].mxu0  ;;  %v808_v51 = vpop.f32.mrb[5].mxu1 }
 0x34e   :  { %v768_v52 = vadd.f32 %v767_v0, %v415_v45  ;;  %v809_v53 = vadd.f32 %v808_v51, %v423_v46  ;;  %v769_v54 = vpop.f32.mrb[6].mxu0  ;;  %v810_v55 = vpop.f32.mrb[6].mxu1 }
 0x34f   :  { %894 = vst [vmem:[%s1515_s7] sm:$0xff] %v766_v49  ;;  %896 = vst [vmem:[%s1515_s7 + $0x10] sm:$0xff] %v807_v50  ;;  %v770_v56 = vpop.f32.mrb[7].mxu0  ;;  %v811_v57 = vpop.f32.mrb[7].mxu1 }
 0x350   :  { %895 = vst [vmem:[%s1515_s7 + $0x8] sm:$0xff] %v768_v52  ;;  %897 = vst [vmem:[%s1515_s7 + $0x18] sm:$0xff] %v809_v53 }
 0x36c   :  { %v847_v1 = vpop.f32.mrb[8].mxu0  ;;  %v888_v2 = vpop.f32.mrb[8].mxu1 }
 0x36d   :  { %v848_v3 = vadd.f32 %v847_v1, %v427_v61  ;;  %v889_v4 = vadd.f32 %v888_v2, %v435_v62  ;;  %v849_v5 = vpop.f32.mrb[9].mxu0  ;;  %v1070_v6 = vpop.f32.mrb[9].mxu1 }
 0x36e   :  { %v850_v7 = vadd.f32 %v849_v5, %v431_v63  ;;  %v851_v8 = vpop.f32.mrb[10].mxu0  ;;  %v891_v9 = vpop.f32.mrb[10].mxu1 }
 0x36f   :  { %898 = vst [vmem:[%s1515_s7 + $0x20] sm:$0xff] %v848_v3  ;;  %900 = vst [vmem:[%s1515_s7 + $0x30] sm:$0xff] %v889_v4  ;;  %v852_v10 = vpop.f32.mrb[11].mxu0  ;;  %v1071_v11 = vpop.f32.mrb[11].mxu1 }
 0x370   :  { %899 = vst [vmem:[%s1515_s7 + $0x28] sm:$0xff] %v850_v7 }
 0x371   :  { %905 = vsyncpa [#allocation3], 1 }
 0x372   :  { %906 = vsyncpa [#allocation5], 1 }
 0x373   :  { %907 = vsyncpa [#allocation8], 1 }
 0x374   :  { %908 = vsyncpa [#allocation11], 1 }

// kernel: dito_trainer_forward.28
= control target key start
LH: loop header
LB: loop body
LE: loop exit
PB: predicated region body
PF: predicated region fallthrough
CT: control target
= control target key end

     0   :  { %8 = vsyncpa [#allocation3], 0  ;;  %s885_s0 = inlined_call_operand.vmem [shape: bf16[2,32,128], index: 0, kind: input, shape index: {}]   ;;  %s886_s1 = inlined_call_operand.hbm [shape: bf16[128,128], index: 1, kind: input, shape index: {}]   ;;  %s887_s2 = inlined_call_operand.hbm [shape: f32[1,128], index: 2, kind: input, shape index: {}]   ;;  %s888_s3 = inlined_call_operand.vmem [shape: bf16[2,32,128], index: 3, kind: output, shape index: {}]  }
   0x1   :  { %9 = vsyncpa [#allocation5], 0  ;;  %s764_s12 = smov 0   ;;  %s766_s13 = smov 0  }
   0x2   :  { %s768_s14 = smov 0  }
   0x3 LB: > { %s506_s15 = sadd.s32 4294967295, %s738_s14   ;;  %s27_s16 = sadd.s32 1, %s734_s13  ;;  %s738_s14 = sphi %s768_s14, %s15_s14   ;;  %s734_s13 = sphi %s766_s13, %s898_s13   ;;  %s730_s12 = sphi %s764_s12, %s897_s12  }
   0x4   : > { %p29_p0 = scmp.ge.s32.totalorder %s27_s16, 2  ;;  %p508_p1 = scmp.ge.s32.totalorder %s738_s14, 1 }
   0x5   : > { %p128_p2 = scmp.lt.s32.totalorder %s738_s14, 3  ;;  %p789_p4 = scmp.eq.s32.totalorder %s506_s15, 0 }
   0x6   : > { %s900_s16 = smov (%p29_p0, %s27_s16), 0  ;;  %s740_s19 = smov [#allocation2]  }
   0x7   : > { %p785_p3 = pnand %p508_p1, %p128_p2  ;;  %s140_s20 = sshll.u32 %s740_s19, 4  ;;  %s141_s20 = int_to_ptr.vmem [resolvable:$true] %s140_s20 }
   0x8   : > { %s893_s18 = scalar_select %p789_p4, 1, 0 }
   0x9   : > { %s892_s17 = scalar_select %p785_p3, 1, 0 }
   0xa   : > { %p595_p5 = pneg %p785_p3  ;;  %s741_s22 = smov [#allocation4]  }
   0xb   : > { %s154_s23 = sshll.u32 %s741_s22, 4  ;;  %s652_s26 = scalar_lea.hbm %s886_s1, 1024  ;;  %s801_s23 = int_to_ptr.vmem [resolvable:$true] %s154_s23 }
   0xc   : > { %p797_p6 = pnand %p789_p4, %p595_p5  ;;  %p653_p7 = scmp.ne.s32.totalorder %s886_s1, %s652_s26 }
   0xd   : > { %p659_p11 = scmp.lt.u32.totalorder %s652_s26, %s886_s1 }
   0xe   : > { %p654_p8 = pneg %p797_p6 }
  0x10   : > { %p655_p9 = pnand %p654_p8, %p653_p7 }
  0x12   : > { %p656_p10 = pneg %p655_p9 }
  0x14   : > { %p661_p12 = pnand %p659_p11, %p656_p10 }
  0x16   : > { %664 = shalt.err (!%p661_p12)
}
  0x17   : > { %s665_s4 = scalar_lea.vmem %s141_s20, 1024  ;;  %p673_p2 = scmp.lt.s32.totalorder %s141_s20, %s141_s20 }
  0x18   : > { %p666_p13 = scmp.ne.s32.totalorder %s141_s20, %s665_s4  ;;  %p674_p5 = scmp.lt.s32.totalorder %s665_s4, %s665_s4 }
  0x1a   : > { %p668_p0 = pnand %p666_p13, %p654_p8  ;;  %p675_p4 = por %p674_p5, %p673_p2 }
  0x1c   : > { %p669_p1 = pneg %p668_p0 }
  0x1e   : > { %p676_p3 = pnand %p675_p4, %p669_p1 }
  0x20   : > { %679 = shalt.err (!%p676_p3)
}
  0x21   : > { %s742_s5 = smov 64   ;;  %s743_s6 = smov 4  }
  0x22   : > { %598 = dma.hbm_to_vmem [thread:$0]  (!%p797_p6), %s886_s1, 1024, %s141_s20, [#allocation3], %s742_s5, %s742_s5, %s743_s6  }
  0x23   : > { %s680_s11 = scalar_lea.hbm %s887_s2, 16 }
  0x24   : > { %p681_p7 = scmp.ne.s32.totalorder %s887_s2, %s680_s11  ;;  %p687_p9 = scmp.lt.u32.totalorder %s680_s11, %s887_s2 }
  0x26   : > { %p683_p3 = pnand %p681_p7, %p654_p8 }
  0x28   : > { %p684_p4 = pneg %p683_p3 }
  0x2a   : > { %p689_p10 = pnand %p687_p9, %p684_p4 }
  0x2c   : > { %692 = shalt.err (!%p689_p10)
}
  0x2d   : > { %s693_s20 = scalar_lea.vmem %s801_s23, 16  ;;  %s700_s25 = scalar_lea.vmem %s801_s23, 32 }
  0x2e   : > { %p694_p11 = scmp.ne.s32.totalorder %s801_s23, %s693_s20  ;;  %p701_p0 = scmp.lt.s32.totalorder %s801_s23, %s801_s23 }
  0x2f   : > { %p702_p1 = scmp.lt.s32.totalorder %s700_s25, %s693_s20 }
  0x30   : > { %p696_p12 = pnand %p694_p11, %p654_p8 }
  0x31   : > { %p703_p2 = por %p702_p1, %p701_p0 }
  0x32   : > { %p697_p13 = pneg %p696_p12 }
  0x34   : > { %p704_p5 = pnand %p703_p2, %p697_p13 }
  0x36   : > { %707 = shalt.err (!%p704_p5)
}
  0x37   : > { %601 = dma.hbm_to_vmem [thread:$0]  (!%p797_p6), %s887_s2, 16, %s801_s23, [#allocation5]  }
  0x38   : > { %p895_p7 = scmp.ne.s32.totalorder %s892_s17, 0 }
  0x39   : > { %p896_p8 = scmp.ne.s32.totalorder (!%p895_p7), %s893_s18, 0 }
  0x3a   : > { %175 = sbr.rel (%p895_p7) target bundleno = 339 (0x153), region = 32 }
  0x41   : > { %721 = dma.done.wait (%p896_p8), [#allocation3], 1024  }
  0x42   : > { %723 = vsyncadd (%p896_p8), [#allocation3], 4294966272 }
  0x43   : > { %725 = dma.done.wait (%p896_p8), [#allocation5], 16  }
  0x44   : > { %727 = vsyncadd (%p896_p8), [#allocation5], 4294967280  ;;  %p207_p3 = scmp.lt.s32.totalorder %s730_s12, 1  ;;  %v634_v0 = vld [vmem:[#allocation2] sm:$0xff]   ;;  %v635_v1 = vld [vmem:[#allocation2 + $0x8] sm:$0xff]  }
  0x45   : > { %567 = vmatprep.subr.bf16.mxu0 %v634_v0  ;;  %v636_v2 = vld [vmem:[#allocation2 + $0x10] sm:$0xff]   ;;  %v637_v3 = vld [vmem:[#allocation2 + $0x18] sm:$0xff]   ;;  %v638_v5 = vld [vmem:[#allocation2 + $0x20] sm:$0xff]  }
  0x46   : > { %s902_s12 = smov (!%p207_p3, %s730_s12), 1  ;;  %568 = vmatpush3.bf16.msra.mxu0 %v634_v0  ;;  %v639_v6 = vld [vmem:[#allocation2 + $0x28] sm:$0xff]   ;;  %v640_v7 = vld [vmem:[#allocation2 + $0x30] sm:$0xff]   ;;  %v641_v8 = vld [vmem:[#allocation2 + $0x38] sm:$0xff]  }
  0x47   : > { %s540_s17 = sshll.u32 %s902_s12, 4  ;;  %569 = vmatprep.subr.bf16.mxu0 %v635_v1  ;;  %v519_v10 = vld [vmem:[#allocation4] ss:$0 sm:$0xff] }
  0x48   : > { %s211_s18 = scalar_lea.vmem %s885_s0, %s540_s17  ;;  %s220_s30 = scalar_lea.vmem %s888_s3, %s540_s17 }
  0x49   : > { %v642_v4 = vld [vmem:[%s211_s18] sm:$0xff]   ;;  %v643_v9 = vld [vmem:[%s211_s18 + $0x8] sm:$0xff]  }
  0x4a   : > { %570 = vmatpush3.bf16.msra.mxu0 %v635_v1  ;;  %583 = vmatprep.mubr.bf16.mxu0 %v642_v4 }
  0x4b   : > { %571 = vmatprep.subr.bf16.mxu0 %v636_v2 }
  0x4e   : > { %572 = vmatpush3.bf16.msra.mxu0 %v636_v2 }
  0x4f   : > { %573 = vmatprep.subr.bf16.mxu0 %v637_v3 }
  0x52   : > { %574 = vmatpush3.bf16.msra.mxu0 %v637_v3 }
  0x53   : > { %575 = vmatprep.subr.bf16.mxu0 %v638_v5 }
  0x56   : > { %576 = vmatpush3.bf16.msra.mxu0 %v638_v5 }
  0x57   : > { %577 = vmatprep.subr.bf16.mxu0 %v639_v6 }
  0x5a   : > { %578 = vmatpush3.bf16.msra.mxu0 %v639_v6 }
  0x5b   : > { %579 = vmatprep.subr.bf16.mxu0 %v640_v7 }
  0x5e   : > { %580 = vmatpush3.bf16.msra.mxu0 %v640_v7 }
  0x5f   : > { %581 = vmatprep.subr.bf16.mxu0 %v641_v8 }
  0x62   : > { %582 = vmatpush3.bf16.msra.mxu0 %v641_v8 }
  0x65   : > { %584 = vmatmul.mubr.bf16.vlgmr.msra.gmra.mrb[0].mxu0 %v643_v9 }
 0x138   : > { %v585_v11 = vpop.f32.mrb[0].mxu0 }
 0x139   : > { %v353_v12 = vadd.f32 %v585_v11, %v519_v10  ;;  %v344_v13 = vpop.f32.mrb[1].mxu0 }
 0x13a   : > { %v345_v14 = vadd.f32 %v519_v10, %v344_v13  ;;  %v586_v15 = vpop.f32.mrb[2].mxu0 }
 0x13b   : > { %v365_v16 = vmin.f32 %v353_v12, 0.0  ;;  %v356_v17 = vadd.f32 %v586_v15, %v519_v10  ;;  %v347_v18 = vpop.f32.mrb[3].mxu0  ;;  %vm361_vm0 = vcmp.gt.f32.partialorder %v353_v12, 0.0 }
 0x13c   : > { %v363_v19 = vmin.f32 %v345_v14, 0.0  ;;  %v348_v20 = vadd.f32 %v519_v10, %v347_v18  ;;  %vm359_vm2 = vcmp.gt.f32.partialorder %v345_v14, 0.0 }
 0x13d   : > { %v371_v21 = vmul.f32 1.442695, %v365_v16  ;;  %v366_v22 = vmin.f32 %v356_v17, 0.0  ;;  %vm362_vm1 = vcmp.gt.f32.partialorder %v356_v17, 0.0 }
 0x13e   : > { %v367_v23 = vmul.f32 1.442695, %v363_v19  ;;  %v364_v24 = vmin.f32 %v348_v20, 0.0  ;;  %vm360_vm3 = vcmp.gt.f32.partialorder %v348_v20, 0.0 }
 0x13f   : > { %644 = vpow2.f32 %v371_v21  ;;  %v373_v25 = vmul.f32 1.442695, %v366_v22 }
 0x140   : > { %646 = vpow2.f32 %v367_v23  ;;  %v369_v26 = vmul.f32 1.442695, %v364_v24 }
 0x141   : > { %648 = vpow2.f32 %v373_v25 }
 0x142   : > { %650 = vpow2.f32 %v369_v26 }
 0x149   : > { %v645_v27 = vpop.eup %644 }
 0x14a   : > { %v647_v28 = vpop.eup %646  ;;  %v532_v29 = vadd.f32 -1.0, %v645_v27 }
 0x14b   : > { %v649_v30 = vpop.eup %648  ;;  %v530_v31 = vadd.f32 -1.0, %v647_v28 }
 0x14c   : > { %v651_v32 = vpop.eup %650  ;;  %v533_v33 = vadd.f32 -1.0, %v649_v30  ;;  %v381_v35 = vsel %vm361_vm0, %v353_v12, %v532_v29 }
 0x14d   : > { %v531_v34 = vadd.f32 -1.0, %v651_v32  ;;  %v379_v37 = vsel %vm359_vm2, %v345_v14, %v530_v31 }
 0x14e   : > { %v382_v36 = vsel %vm362_vm1, %v356_v17, %v533_v33 }
 0x14f   : > { %v554_v38 = vpack.c.bf16 %v382_v36, %v381_v35  ;;  %v380_v39 = vsel %vm360_vm3, %v348_v20, %v531_v34 }
 0x150   : > { %v549_v40 = vpack.c.bf16 %v380_v39, %v379_v37 }
 0x151   : > { %556 = vst [vmem:[%s220_s30 + $0x8] sm:$0xff] %v554_v38  }
 0x152   : > { %550 = vst [vmem:[%s220_s30] sm:$0xff] %v549_v40  }
 0x153 PF: > { %s15_s14 = sadd.s32 1, %s738_s14   ;;  %s897_s12 = smov %s734_s13 }
 0x154   : > { %p12_p6 = scmp.ge.s32.totalorder %s15_s14, 4   ;;  %s898_s13 = smov %s900_s16 }
 0x156   :  { %14 = sbr.rel (!%p12_p6) target bundleno = 3 (0x3), region = 71 }
 0x15d   :  { %433 = vsyncpa [#allocation3], 1 }
 0x15e   :  { %435 = vsyncpa [#allocation3 + $0x1], 1 }
 0x15f   :  { %436 = vsyncpa [#allocation5], 1 }

// kernel: dito_trainer_forward.29
= control target key start
LH: loop header
LB: loop body
LE: loop exit
PB: predicated region body
PF: predicated region fallthrough
CT: control target
= control target key end

     0   :  { %8 = vsyncpa [#allocation3], 0  ;;  %s905_s0 = inlined_call_operand.vmem [shape: bf16[2,16,256], index: 0, kind: input, shape index: {}]   ;;  %s906_s1 = inlined_call_operand.hbm [shape: bf16[256,128], index: 1, kind: input, shape index: {}]   ;;  %s907_s2 = inlined_call_operand.hbm [shape: f32[1,128], index: 2, kind: input, shape index: {}]   ;;  %s908_s3 = inlined_call_operand.vmem [shape: bf16[2,16,128], index: 3, kind: output, shape index: {}]  }
   0x1   :  { %9 = vsyncpa [#allocation5], 0  ;;  %s787_s12 = smov 0   ;;  %s789_s13 = smov 0  }
   0x2   :  { %s791_s14 = smov 0  }
   0x3 LB: > { %s536_s15 = sadd.s32 4294967295, %s761_s14   ;;  %s27_s16 = sadd.s32 1, %s757_s13  ;;  %s761_s14 = sphi %s791_s14, %s15_s14   ;;  %s757_s13 = sphi %s789_s13, %s918_s13   ;;  %s753_s12 = sphi %s787_s12, %s917_s12  }
   0x4   : > { %p29_p0 = scmp.ge.s32.totalorder %s27_s16, 2  ;;  %p538_p1 = scmp.ge.s32.totalorder %s761_s14, 1 }
   0x5   : > { %p128_p2 = scmp.lt.s32.totalorder %s761_s14, 3  ;;  %p812_p4 = scmp.eq.s32.totalorder %s536_s15, 0 }
   0x6   : > { %s920_s16 = smov (%p29_p0, %s27_s16), 0  ;;  %s763_s19 = smov [#allocation2]  }
   0x7   : > { %p808_p3 = pnand %p538_p1, %p128_p2  ;;  %s140_s20 = sshll.u32 %s763_s19, 4  ;;  %s141_s20 = int_to_ptr.vmem [resolvable:$true] %s140_s20 }
   0x8   : > { %s913_s18 = scalar_select %p812_p4, 1, 0 }
   0x9   : > { %s912_s17 = scalar_select %p808_p3, 1, 0 }
   0xa   : > { %p613_p5 = pneg %p808_p3  ;;  %s764_s22 = smov [#allocation4]  }
   0xb   : > { %s154_s23 = sshll.u32 %s764_s22, 4  ;;  %s675_s26 = scalar_lea.hbm %s906_s1, 2048  ;;  %s824_s23 = int_to_ptr.vmem [resolvable:$true] %s154_s23 }
   0xc   : > { %p820_p6 = pnand %p812_p4, %p613_p5  ;;  %p676_p7 = scmp.ne.s32.totalorder %s906_s1, %s675_s26 }
   0xd   : > { %p682_p11 = scmp.lt.u32.totalorder %s675_s26, %s906_s1 }
   0xe   : > { %p677_p8 = pneg %p820_p6 }
  0x10   : > { %p678_p9 = pnand %p677_p8, %p676_p7 }
  0x12   : > { %p679_p10 = pneg %p678_p9 }
  0x14   : > { %p684_p12 = pnand %p682_p11, %p679_p10 }
  0x16   : > { %687 = shalt.err (!%p684_p12)
}
  0x17   : > { %s688_s4 = scalar_lea.vmem %s141_s20, 2048  ;;  %p696_p2 = scmp.lt.s32.totalorder %s141_s20, %s141_s20 }
  0x18   : > { %p689_p13 = scmp.ne.s32.totalorder %s141_s20, %s688_s4  ;;  %p697_p5 = scmp.lt.s32.totalorder %s688_s4, %s688_s4 }
  0x1a   : > { %p691_p0 = pnand %p689_p13, %p677_p8  ;;  %p698_p4 = por %p697_p5, %p696_p2 }
  0x1c   : > { %p692_p1 = pneg %p691_p0 }
  0x1e   : > { %p699_p3 = pnand %p698_p4, %p692_p1 }
  0x20   : > { %702 = shalt.err (!%p699_p3)
}
  0x21   : > { %s765_s5 = smov 64   ;;  %s766_s6 = smov 4  }
  0x22   : > { %616 = dma.hbm_to_vmem [thread:$0]  (!%p820_p6), %s906_s1, 2048, %s141_s20, [#allocation3], %s765_s5, %s765_s5, %s766_s6  }
  0x23   : > { %s703_s11 = scalar_lea.hbm %s907_s2, 16 }
  0x24   : > { %p704_p7 = scmp.ne.s32.totalorder %s907_s2, %s703_s11  ;;  %p710_p9 = scmp.lt.u32.totalorder %s703_s11, %s907_s2 }
  0x26   : > { %p706_p3 = pnand %p704_p7, %p677_p8 }
  0x28   : > { %p707_p4 = pneg %p706_p3 }
  0x2a   : > { %p712_p10 = pnand %p710_p9, %p707_p4 }
  0x2c   : > { %715 = shalt.err (!%p712_p10)
}
  0x2d   : > { %s716_s20 = scalar_lea.vmem %s824_s23, 16  ;;  %s723_s25 = scalar_lea.vmem %s824_s23, 32 }
  0x2e   : > { %p717_p11 = scmp.ne.s32.totalorder %s824_s23, %s716_s20  ;;  %p724_p0 = scmp.lt.s32.totalorder %s824_s23, %s824_s23 }
  0x2f   : > { %p725_p1 = scmp.lt.s32.totalorder %s723_s25, %s716_s20 }
  0x30   : > { %p719_p12 = pnand %p717_p11, %p677_p8 }
  0x31   : > { %p726_p2 = por %p725_p1, %p724_p0 }
  0x32   : > { %p720_p13 = pneg %p719_p12 }
  0x34   : > { %p727_p5 = pnand %p726_p2, %p720_p13 }
  0x36   : > { %730 = shalt.err (!%p727_p5)
}
  0x37   : > { %619 = dma.hbm_to_vmem [thread:$0]  (!%p820_p6), %s907_s2, 16, %s824_s23, [#allocation5]  }
  0x38   : > { %p915_p7 = scmp.ne.s32.totalorder %s912_s17, 0 }
  0x39   : > { %p916_p8 = scmp.ne.s32.totalorder (!%p915_p7), %s913_s18, 0 }
  0x3a   : > { %175 = sbr.rel (%p915_p7) target bundleno = 341 (0x155), region = 32 }
  0x41   : > { %744 = dma.done.wait (%p916_p8), [#allocation3], 2048  }
  0x42   : > { %746 = vsyncadd (%p916_p8), [#allocation3], 4294965248 }
  0x43   : > { %748 = dma.done.wait (%p916_p8), [#allocation5], 16  }
  0x44   : > { %750 = vsyncadd (%p916_p8), [#allocation5], 4294967280  ;;  %v652_v0 = vld [vmem:[#allocation2 + $0x40] sm:$0xff]   ;;  %v654_v2 = vld [vmem:[#allocation2 + $0x48] sm:$0xff]   ;;  %p207_p6 = scmp.lt.s32.totalorder %s753_s12, 1 }
  0x45   : > { %v653_v1 = vld [vmem:[#allocation2] sm:$0xff]   ;;  %583 = vmatprep.subr.bf16.mxu0 %v652_v0  ;;  %v655_v3 = vld [vmem:[#allocation2 + $0x8] sm:$0xff]   ;;  %v656_v4 = vld [vmem:[#allocation2 + $0x50] sm:$0xff]  }
  0x46   : > { %584 = vmatpush3.bf16.msra.mxu0 %v653_v1  ;;  %v657_v5 = vld [vmem:[#allocation2 + $0x10] sm:$0xff]   ;;  %s922_s12 = smov (!%p207_p6, %s753_s12), 1  ;;  %v658_v6 = vld [vmem:[#allocation2 + $0x58] sm:$0xff]   ;;  %v660_v8 = vld [vmem:[#allocation2 + $0x60] sm:$0xff]  }
  0x47   : > { %585 = vmatprep.subr.bf16.mxu0 %v654_v2  ;;  %v659_v7 = vld [vmem:[#allocation2 + $0x18] sm:$0xff]   ;;  %s574_s17 = sshll.u32 %s922_s12, 4  ;;  %v661_v9 = vld [vmem:[#allocation2 + $0x20] sm:$0xff]   ;;  %v662_v10 = vld [vmem:[#allocation2 + $0x68] sm:$0xff]   ;;  %s575_s28 = sshll.u32 %s922_s12, 3 }
  0x48   : > { %s211_s23 = scalar_lea.vmem %s905_s0, %s574_s17  ;;  %v663_v12 = vld [vmem:[#allocation2 + $0x28] sm:$0xff]   ;;  %v664_v13 = vld [vmem:[#allocation2 + $0x70] sm:$0xff]   ;;  %v666_v15 = vld [vmem:[#allocation2 + $0x78] sm:$0xff]   ;;  %s220_s4 = scalar_lea.vmem %s908_s3, %s575_s28 }
  0x49   : > { %v670_v11 = vld [vmem:[%s211_s23 + $0x4] ss:$8 sps:$4 sm:$0xff]   ;;  %v665_v14 = vld [vmem:[#allocation2 + $0x30] sm:$0xff]   ;;  %v667_v16 = vld [vmem:[#allocation2 + $0x38] sm:$0xff]  }
  0x4a   : > { %586 = vmatpush3.bf16.msra.mxu0 %v655_v3  ;;  %402 = vmatprep.mubr.bf16.mxu0 %v670_v11  ;;  %v668_v17 = vld [vmem:[%s211_s23] ss:$8 sps:$4 sm:$0xff]  }
  0x4b   : > { %587 = vmatprep.subr.bf16.mxu0 %v656_v4  ;;  %v549_v19 = vld [vmem:[#allocation4] ss:$0 sm:$0xff] }
  0x4e   : > { %588 = vmatpush3.bf16.msra.mxu0 %v657_v5 }
  0x4f   : > { %589 = vmatprep.subr.bf16.mxu0 %v658_v6 }
  0x52   : > { %590 = vmatpush3.bf16.msra.mxu0 %v659_v7 }
  0x53   : > { %591 = vmatprep.subr.bf16.mxu0 %v660_v8 }
  0x56   : > { %592 = vmatpush3.bf16.msra.mxu0 %v661_v9 }
  0x57   : > { %593 = vmatprep.subr.bf16.mxu0 %v662_v10 }
  0x5a   : > { %594 = vmatpush3.bf16.msra.mxu0 %v663_v12 }
  0x5b   : > { %595 = vmatprep.subr.bf16.mxu0 %v664_v13 }
  0x5e   : > { %596 = vmatpush3.bf16.msra.mxu0 %v665_v14 }
  0x5f   : > { %597 = vmatprep.subr.bf16.mxu0 %v666_v15 }
  0x62   : > { %598 = vmatpush3.bf16.msra.mxu0 %v667_v16 }
  0x65   : > { %403 = vmatmul.mubr.bf16.vlgmr.msra.gmra.mrb[0].mxu0 %v668_v17 }
 0x138   : > { %v599_v18 = vpop.f32.mrb[0].mxu0 }
 0x139   : > { %v600_v20 = vpop.f32.mrb[1].mxu0 }
 0x13a   : > { %v601_v21 = vadd.f32 %v600_v20, %v599_v18  ;;  %v602_v22 = vpop.f32.mrb[2].mxu0 }
 0x13b   : > { %v603_v23 = vpop.f32.mrb[3].mxu0 }
 0x13c   : > { %v405_v24 = vadd.f32 %v601_v21, %v549_v19  ;;  %v604_v25 = vadd.f32 %v603_v23, %v602_v22 }
 0x13e   : > { %v413_v26 = vmin.f32 %v405_v24, 0.0  ;;  %v408_v27 = vadd.f32 %v604_v25, %v549_v19  ;;  %vm411_vm0 = vcmp.gt.f32.partialorder %v405_v24, 0.0 }
 0x140   : > { %v415_v28 = vmul.f32 1.442695, %v413_v26  ;;  %v414_v29 = vmin.f32 %v408_v27, 0.0  ;;  %vm412_vm1 = vcmp.gt.f32.partialorder %v408_v27, 0.0 }
 0x142   : > { %671 = vpow2.f32 %v415_v28  ;;  %v417_v30 = vmul.f32 1.442695, %v414_v29 }
 0x144   : > { %673 = vpow2.f32 %v417_v30 }
 0x14c   : > { %v672_v31 = vpop.eup %671 }
 0x14d   : > { %v568_v32 = vadd.f32 -1.0, %v672_v31 }
 0x14e   : > { %v674_v33 = vpop.eup %673 }
 0x14f   : > { %v569_v34 = vadd.f32 -1.0, %v674_v33  ;;  %v421_v35 = vsel %vm411_vm0, %v405_v24, %v568_v32 }
 0x151   : > { %v422_v36 = vsel %vm412_vm1, %v408_v27, %v569_v34 }
 0x152   : > { %v581_v37 = vpack.c.bf16 %v422_v36, %v421_v35 }
 0x154   : > { %582 = vst [vmem:[%s220_s4] sm:$0xff] %v581_v37  }
 0x155 PF: > { %s15_s14 = sadd.s32 1, %s761_s14   ;;  %s917_s12 = smov %s757_s13 }
 0x156   : > { %p12_p3 = scmp.ge.s32.totalorder %s15_s14, 4   ;;  %s918_s13 = smov %s920_s16 }
 0x158   :  { %14 = sbr.rel (!%p12_p3) target bundleno = 3 (0x3), region = 71 }
 0x15f   :  { %463 = vsyncpa [#allocation3], 1 }
 0x160   :  { %465 = vsyncpa [#allocation3 + $0x1], 1 }
 0x161   :  { %466 = vsyncpa [#allocation5], 1 }

// kernel: dito_trainer_forward.31
= control target key start
LH: loop header
LB: loop body
LE: loop exit
PB: predicated region body
PF: predicated region fallthrough
CT: control target
= control target key end

     0   :  { %8 = vsyncpa [#allocation3], 0  ;;  %s814_s0 = inlined_call_operand.vmem [shape: bf16[2,16,128], index: 0, kind: input, shape index: {}]   ;;  %s815_s1 = inlined_call_operand.hbm [shape: bf16[128,128], index: 1, kind: input, shape index: {}]   ;;  %s816_s2 = inlined_call_operand.hbm [shape: f32[1,128], index: 2, kind: input, shape index: {}]   ;;  %s817_s3 = inlined_call_operand.vmem [shape: bf16[2,16,128], index: 3, kind: output, shape index: {}]  }
   0x1   :  { %9 = vsyncpa [#allocation5], 0  ;;  %s693_s12 = smov 0   ;;  %s695_s13 = smov 0  }
   0x2   :  { %s697_s14 = smov 0  }
   0x3 LB: > { %s456_s15 = sadd.s32 4294967295, %s665_s14   ;;  %s27_s16 = sadd.s32 1, %s661_s13  ;;  %s665_s14 = sphi %s697_s14, %s15_s14   ;;  %s661_s13 = sphi %s695_s13, %s827_s13   ;;  %s657_s12 = sphi %s693_s12, %s826_s12  }
   0x4   : > { %p29_p0 = scmp.ge.s32.totalorder %s27_s16, 2  ;;  %p458_p1 = scmp.ge.s32.totalorder %s665_s14, 1 }
   0x5   : > { %p128_p2 = scmp.lt.s32.totalorder %s665_s14, 3  ;;  %p718_p4 = scmp.eq.s32.totalorder %s456_s15, 0 }
   0x6   : > { %s829_s16 = smov (%p29_p0, %s27_s16), 0  ;;  %s667_s19 = smov [#allocation2]  }
   0x7   : > { %p714_p3 = pnand %p458_p1, %p128_p2  ;;  %s140_s20 = sshll.u32 %s667_s19, 4  ;;  %s141_s20 = int_to_ptr.vmem [resolvable:$true] %s140_s20 }
   0x8   : > { %s822_s18 = scalar_select %p718_p4, 1, 0 }
   0x9   : > { %s821_s17 = scalar_select %p714_p3, 1, 0 }
   0xa   : > { %p529_p5 = pneg %p714_p3  ;;  %s668_s22 = smov [#allocation4]  }
   0xb   : > { %s154_s23 = sshll.u32 %s668_s22, 4  ;;  %s579_s26 = scalar_lea.hbm %s815_s1, 1024  ;;  %s730_s23 = int_to_ptr.vmem [resolvable:$true] %s154_s23 }
   0xc   : > { %p726_p6 = pnand %p718_p4, %p529_p5  ;;  %p580_p7 = scmp.ne.s32.totalorder %s815_s1, %s579_s26 }
   0xd   : > { %p586_p11 = scmp.lt.u32.totalorder %s579_s26, %s815_s1 }
   0xe   : > { %p581_p8 = pneg %p726_p6 }
  0x10   : > { %p582_p9 = pnand %p581_p8, %p580_p7 }
  0x12   : > { %p583_p10 = pneg %p582_p9 }
  0x14   : > { %p588_p12 = pnand %p586_p11, %p583_p10 }
  0x16   : > { %591 = shalt.err (!%p588_p12)
}
  0x17   : > { %s592_s4 = scalar_lea.vmem %s141_s20, 1024  ;;  %p600_p2 = scmp.lt.s32.totalorder %s141_s20, %s141_s20 }
  0x18   : > { %p593_p13 = scmp.ne.s32.totalorder %s141_s20, %s592_s4  ;;  %p601_p5 = scmp.lt.s32.totalorder %s592_s4, %s592_s4 }
  0x1a   : > { %p595_p0 = pnand %p593_p13, %p581_p8  ;;  %p602_p4 = por %p601_p5, %p600_p2 }
  0x1c   : > { %p596_p1 = pneg %p595_p0 }
  0x1e   : > { %p603_p3 = pnand %p602_p4, %p596_p1 }
  0x20   : > { %606 = shalt.err (!%p603_p3)
}
  0x21   : > { %s669_s5 = smov 64   ;;  %s670_s6 = smov 4  }
  0x22   : > { %532 = dma.hbm_to_vmem [thread:$0]  (!%p726_p6), %s815_s1, 1024, %s141_s20, [#allocation3], %s669_s5, %s669_s5, %s670_s6  }
  0x23   : > { %s607_s11 = scalar_lea.hbm %s816_s2, 16 }
  0x24   : > { %p608_p7 = scmp.ne.s32.totalorder %s816_s2, %s607_s11  ;;  %p614_p9 = scmp.lt.u32.totalorder %s607_s11, %s816_s2 }
  0x26   : > { %p610_p3 = pnand %p608_p7, %p581_p8 }
  0x28   : > { %p611_p4 = pneg %p610_p3 }
  0x2a   : > { %p616_p10 = pnand %p614_p9, %p611_p4 }
  0x2c   : > { %619 = shalt.err (!%p616_p10)
}
  0x2d   : > { %s620_s20 = scalar_lea.vmem %s730_s23, 16  ;;  %s627_s25 = scalar_lea.vmem %s730_s23, 32 }
  0x2e   : > { %p621_p11 = scmp.ne.s32.totalorder %s730_s23, %s620_s20  ;;  %p628_p0 = scmp.lt.s32.totalorder %s730_s23, %s730_s23 }
  0x2f   : > { %p629_p1 = scmp.lt.s32.totalorder %s627_s25, %s620_s20 }
  0x30   : > { %p623_p12 = pnand %p621_p11, %p581_p8 }
  0x31   : > { %p630_p2 = por %p629_p1, %p628_p0 }
  0x32   : > { %p624_p13 = pneg %p623_p12 }
  0x34   : > { %p631_p5 = pnand %p630_p2, %p624_p13 }
  0x36   : > { %634 = shalt.err (!%p631_p5)
}
  0x37   : > { %535 = dma.hbm_to_vmem [thread:$0]  (!%p726_p6), %s816_s2, 16, %s730_s23, [#allocation5]  }
  0x38   : > { %p824_p7 = scmp.ne.s32.totalorder %s821_s17, 0 }
  0x39   : > { %p825_p8 = scmp.ne.s32.totalorder (!%p824_p7), %s822_s18, 0 }
  0x3a   : > { %175 = sbr.rel (%p824_p7) target bundleno = 320 (0x140), region = 32 }
  0x41   : > { %648 = dma.done.wait (%p825_p8), [#allocation3], 1024  }
  0x42   : > { %650 = vsyncadd (%p825_p8), [#allocation3], 4294966272 }
  0x43   : > { %652 = dma.done.wait (%p825_p8), [#allocation5], 16  }
  0x44   : > { %654 = vsyncadd (%p825_p8), [#allocation5], 4294967280  ;;  %v671_v0 = vmov 0.0   ;;  %vm672_vm0 = vmmov 0   ;;  %p207_p6 = scmp.lt.s32.totalorder %s657_s12, 1  ;;  %v570_v1 = vld [vmem:[#allocation2] sm:$0xff]  }
  0x45   : > { %501 = vmatprep.subr.bf16.mxu0 %v671_v0  ;;  %517 = vmatprep.mubr.msk.bf16.mxu0 %vm672_vm0, %v671_v0  ;;  %v571_v2 = vld [vmem:[#allocation2 + $0x8] sm:$0xff]   ;;  %v572_v3 = vld [vmem:[#allocation2 + $0x10] sm:$0xff]   ;;  %v573_v4 = vld [vmem:[#allocation2 + $0x18] sm:$0xff]  }
  0x46   : > { %s831_s12 = smov (!%p207_p6, %s657_s12), 1  ;;  %502 = vmatpush3.bf16.msra.mxu0 %v570_v1  ;;  %v574_v5 = vld [vmem:[#allocation2 + $0x20] sm:$0xff]   ;;  %v575_v6 = vld [vmem:[#allocation2 + $0x28] sm:$0xff]   ;;  %v576_v7 = vld [vmem:[#allocation2 + $0x30] sm:$0xff]  }
  0x47   : > { %503 = vmatprep.subr.bf16.mxu0 %v671_v0  ;;  %s483_s17 = sshll.u32 %s831_s12, 3  ;;  %v577_v8 = vld [vmem:[#allocation2 + $0x38] sm:$0xff]   ;;  %v469_v10 = vld [vmem:[#allocation4] ss:$0 sm:$0xff] }
  0x48   : > { %s211_s23 = scalar_lea.vmem %s814_s0, %s483_s17  ;;  %s220_s30 = scalar_lea.vmem %s817_s3, %s483_s17 }
  0x49   : > { %v578_v9 = vld [vmem:[%s211_s23] sm:$0xff]  }
  0x4a   : > { %504 = vmatpush3.bf16.msra.mxu0 %v571_v2 }
  0x4b   : > { %505 = vmatprep.subr.bf16.mxu0 %v671_v0 }
  0x4e   : > { %506 = vmatpush3.bf16.msra.mxu0 %v572_v3 }
  0x4f   : > { %507 = vmatprep.subr.bf16.mxu0 %v671_v0 }
  0x52   : > { %508 = vmatpush3.bf16.msra.mxu0 %v573_v4 }
  0x53   : > { %509 = vmatprep.subr.bf16.mxu0 %v671_v0 }
  0x56   : > { %510 = vmatpush3.bf16.msra.mxu0 %v574_v5 }
  0x57   : > { %511 = vmatprep.subr.bf16.mxu0 %v671_v0 }
  0x5a   : > { %512 = vmatpush3.bf16.msra.mxu0 %v575_v6 }
  0x5b   : > { %513 = vmatprep.subr.bf16.mxu0 %v671_v0 }
  0x5e   : > { %514 = vmatpush3.bf16.msra.mxu0 %v576_v7 }
  0x5f   : > { %515 = vmatprep.subr.bf16.mxu0 %v671_v0 }
  0x62   : > { %516 = vmatpush3.bf16.msra.mxu0 %v577_v8 }
  0x65   : > { %518 = vmatmul.mubr.bf16.vlgmr.msra.gmra.mrb[0].mxu0 %v578_v9 }
 0x138   : > { %v336_v11 = vpop.f32.mrb[0].mxu0 }
 0x139   : > { %v519_v12 = vpop.f32.mrb[1].mxu0  ;;  %v337_v14 = vadd.f32 %v469_v10, %v336_v11 }
 0x13a   : > { %v339_v13 = vpop.f32.mrb[2].mxu0 }
 0x13b   : > { %v340_v15 = vadd.f32 %v469_v10, %v339_v13  ;;  %v520_v16 = vpop.f32.mrb[3].mxu0 }
 0x13d   : > { %v490_v17 = vpack.c.bf16 %v340_v15, %v337_v14 }
 0x13f   : > { %491 = vst [vmem:[%s220_s30] sm:$0xff] %v490_v17  }
 0x140 PF: > { %s15_s14 = sadd.s32 1, %s665_s14   ;;  %s826_s12 = smov %s661_s13 }
 0x141   : > { %p12_p3 = scmp.ge.s32.totalorder %s15_s14, 4   ;;  %s827_s13 = smov %s829_s16 }
 0x143   :  { %14 = sbr.rel (!%p12_p3) target bundleno = 3 (0x3), region = 71 }
 0x14a   :  { %383 = vsyncpa [#allocation3], 1 }
 0x14b   :  { %385 = vsyncpa [#allocation3 + $0x1], 1 }
 0x14c   :  { %386 = vsyncpa [#allocation5], 1 }

// kernel: dito_trainer_forward.30
= control target key start
LH: loop header
LB: loop body
LE: loop exit
PB: predicated region body
PF: predicated region fallthrough
CT: control target
= control target key end

     0   :  { %8 = vsyncpa [#allocation3], 0  ;;  %s1208_s0 = inlined_call_operand.vmem [shape: bf16[2,18,128], index: 0, kind: input, shape index: {}]   ;;  %s1209_s1 = inlined_call_operand.hbm [shape: bf16[384,128], index: 1, kind: input, shape index: {}]   ;;  %s1210_s2 = inlined_call_operand.hbm [shape: f32[1,128], index: 2, kind: input, shape index: {}]   ;;  %s1211_s3 = inlined_call_operand.vmem [shape: bf16[2,16,128], index: 3, kind: output, shape index: {}]  }
   0x1   :  { %9 = vsyncpa [#allocation5], 0  ;;  %s1054_s12 = smov 0   ;;  %s1056_s13 = smov 0  }
   0x2   :  { %s1058_s14 = smov 0  }
   0x3 LB: > { %s720_s15 = sadd.s32 4294967295, %s1026_s14   ;;  %s27_s16 = sadd.s32 1, %s1022_s13  ;;  %s1026_s14 = sphi %s1058_s14, %s15_s14   ;;  %s1022_s13 = sphi %s1056_s13, %s1221_s13   ;;  %s1018_s12 = sphi %s1054_s12, %s1220_s12  }
   0x4   : > { %p29_p0 = scmp.ge.s32.totalorder %s27_s16, 2  ;;  %p722_p1 = scmp.ge.s32.totalorder %s1026_s14, 1 }
   0x5   : > { %p128_p2 = scmp.lt.s32.totalorder %s1026_s14, 3  ;;  %p1079_p4 = scmp.eq.s32.totalorder %s720_s15, 0 }
   0x6   : > { %s1223_s16 = smov (%p29_p0, %s27_s16), 0  ;;  %s1028_s19 = smov [#allocation2]  }
   0x7   : > { %p1075_p3 = pnand %p722_p1, %p128_p2  ;;  %s140_s20 = sshll.u32 %s1028_s19, 4  ;;  %s141_s20 = int_to_ptr.vmem [resolvable:$true] %s140_s20 }
   0x8   : > { %s1216_s18 = scalar_select %p1079_p4, 1, 0 }
   0x9   : > { %s1215_s17 = scalar_select %p1075_p3, 1, 0 }
   0xa   : > { %p868_p5 = pneg %p1075_p3  ;;  %s1029_s22 = smov [#allocation4]  }
   0xb   : > { %s154_s23 = sshll.u32 %s1029_s22, 4  ;;  %s940_s26 = scalar_lea.hbm %s1209_s1, 3072  ;;  %s1091_s23 = int_to_ptr.vmem [resolvable:$true] %s154_s23 }
   0xc   : > { %p1087_p6 = pnand %p1079_p4, %p868_p5  ;;  %p941_p7 = scmp.ne.s32.totalorder %s1209_s1, %s940_s26 }
   0xd   : > { %p947_p11 = scmp.lt.u32.totalorder %s940_s26, %s1209_s1 }
   0xe   : > { %p942_p8 = pneg %p1087_p6 }
  0x10   : > { %p943_p9 = pnand %p942_p8, %p941_p7 }
  0x12   : > { %p944_p10 = pneg %p943_p9 }
  0x14   : > { %p949_p12 = pnand %p947_p11, %p944_p10 }
  0x16   : > { %952 = shalt.err (!%p949_p12)
}
  0x17   : > { %s953_s4 = scalar_lea.vmem %s141_s20, 3072  ;;  %p961_p2 = scmp.lt.s32.totalorder %s141_s20, %s141_s20 }
  0x18   : > { %p954_p13 = scmp.ne.s32.totalorder %s141_s20, %s953_s4  ;;  %p962_p5 = scmp.lt.s32.totalorder %s953_s4, %s953_s4 }
  0x1a   : > { %p956_p0 = pnand %p954_p13, %p942_p8  ;;  %p963_p4 = por %p962_p5, %p961_p2 }
  0x1c   : > { %p957_p1 = pneg %p956_p0 }
  0x1e   : > { %p964_p3 = pnand %p963_p4, %p957_p1 }
  0x20   : > { %967 = shalt.err (!%p964_p3)
}
  0x21   : > { %s1030_s5 = smov 64   ;;  %s1031_s6 = smov 4  }
  0x22   : > { %871 = dma.hbm_to_vmem [thread:$0]  (!%p1087_p6), %s1209_s1, 3072, %s141_s20, [#allocation3], %s1030_s5, %s1030_s5, %s1031_s6  }
  0x23   : > { %s968_s11 = scalar_lea.hbm %s1210_s2, 16 }
  0x24   : > { %p969_p7 = scmp.ne.s32.totalorder %s1210_s2, %s968_s11  ;;  %p975_p9 = scmp.lt.u32.totalorder %s968_s11, %s1210_s2 }
  0x26   : > { %p971_p3 = pnand %p969_p7, %p942_p8 }
  0x28   : > { %p972_p4 = pneg %p971_p3 }
  0x2a   : > { %p977_p10 = pnand %p975_p9, %p972_p4 }
  0x2c   : > { %980 = shalt.err (!%p977_p10)
}
  0x2d   : > { %s981_s20 = scalar_lea.vmem %s1091_s23, 16  ;;  %s988_s25 = scalar_lea.vmem %s1091_s23, 32 }
  0x2e   : > { %p982_p11 = scmp.ne.s32.totalorder %s1091_s23, %s981_s20  ;;  %p989_p0 = scmp.lt.s32.totalorder %s1091_s23, %s1091_s23 }
  0x2f   : > { %p990_p1 = scmp.lt.s32.totalorder %s988_s25, %s981_s20 }
  0x30   : > { %p984_p12 = pnand %p982_p11, %p942_p8 }
  0x31   : > { %p991_p2 = por %p990_p1, %p989_p0 }
  0x32   : > { %p985_p13 = pneg %p984_p12 }
  0x34   : > { %p992_p5 = pnand %p991_p2, %p985_p13 }
  0x36   : > { %995 = shalt.err (!%p992_p5)
}
  0x37   : > { %874 = dma.hbm_to_vmem [thread:$0]  (!%p1087_p6), %s1210_s2, 16, %s1091_s23, [#allocation5]  }
  0x38   : > { %p1218_p7 = scmp.ne.s32.totalorder %s1215_s17, 0 }
  0x39   : > { %p1219_p8 = scmp.ne.s32.totalorder (!%p1218_p7), %s1216_s18, 0 }
  0x3a   : > { %175 = sbr.rel (%p1218_p7) target bundleno = 664 (0x298), region = 32 }
  0x41   : > { %1009 = dma.done.wait (%p1219_p8), [#allocation3], 3072  }
  0x42   : > { %1011 = vsyncadd (%p1219_p8), [#allocation3], 4294964224 }
  0x43   : > { %1013 = dma.done.wait (%p1219_p8), [#allocation5], 16  }
  0x44   : > { %1015 = vsyncadd (%p1219_p8), [#allocation5], 4294967280  ;;  %v1032_v0 = vmov 0.0   ;;  %vm1033_vm0 = vmmov 0   ;;  %v909_v1 = vld [vmem:[#allocation2 + $0x40] sm:$0xff]   ;;  %p207_p6 = scmp.lt.s32.totalorder %s1018_s12, 1 }
  0x45   : > { %799 = vmatprep.subr.bf16.mxu0 %v1032_v0  ;;  %819 = vmatprep.subr.bf16.mxu1 %v1032_v0  ;;  %v910_v2 = vld [vmem:[#allocation2] sm:$0xff]   ;;  %v911_v3 = vld [vmem:[#allocation2 + $0x48] sm:$0xff]   ;;  %v913_v5 = vld [vmem:[#allocation2 + $0x50] sm:$0xff]   ;;  %vm266_vm1 = vsmask.f32 7424  ;;  %vm479_vm2 = vcmask 1046528  }
  0x46   : > { %815 = vmatprep.mubr.msk.bf16.mxu0 %vm1033_vm0, %v1032_v0  ;;  %835 = vmatprep.mubr.msk.bf16.mxu1 %vm1033_vm0, %v1032_v0  ;;  %v912_v4 = vld [vmem:[#allocation2 + $0x8] sm:$0xff]   ;;  %s1225_s12 = smov (!%p207_p6, %s1018_s12), 1  ;;  %v914_v6 = vld [vmem:[#allocation2 + $0x10] sm:$0xff]   ;;  %v915_v7 = vld [vmem:[#allocation2 + $0x58] sm:$0xff]  }
  0x47   : > { %800 = vmatpush3.bf16.msra.mxu0 %v909_v1  ;;  %820 = vmatpush3.bf16.msra.mxu1 %v910_v2  ;;  %s859_s17 = smul.u32 12, %s1225_s12  ;;  %v916_v8 = vld [vmem:[#allocation2 + $0x18] sm:$0xff]   ;;  %v917_v9 = vld [vmem:[#allocation2 + $0x60] sm:$0xff]   ;;  %v919_v13 = vld [vmem:[#allocation2 + $0x68] sm:$0xff]   ;;  %s764_s28 = sshll.u32 %s1225_s12, 3 }
  0x48   : > { %801 = vmatprep.subr.bf16.mxu0 %v1032_v0  ;;  %821 = vmatprep.subr.bf16.mxu1 %v1032_v0  ;;  %v918_v10 = vld [vmem:[#allocation2 + $0x20] sm:$0xff]   ;;  %v920_v16 = vld [vmem:[#allocation2 + $0x28] sm:$0xff]   ;;  %v921_v18 = vld [vmem:[#allocation2 + $0x70] sm:$0xff]   ;;  %s220_s4 = scalar_lea.vmem %s1211_s3, %s764_s28 }
  0x49   : > { %s1171_s23 = scalar_lea.vmem %s1208_s0, %s859_s17  ;;  %v922_v22 = vld [vmem:[#allocation2 + $0x30] sm:$0xff]   ;;  %v923_v23 = vld [vmem:[#allocation2 + $0x78] sm:$0xff]   ;;  %v927_v28 = vld [vmem:[#allocation2 + $0x80] sm:$0xff]  }
  0x4a   : > { %v223_v11 = vld [vmem:[%s1171_s23] sm:$0xf]  ;;  %v224_v12 = vld [vmem:[%s1171_s23 + $0x4] sm:$0xf]  ;;  %v924_v26 = vld [vmem:[#allocation2 + $0x38] sm:$0xff]  }
  0x4b   : > { %802 = vmatpush3.bf16.msra.mxu0 %v911_v3  ;;  %822 = vmatpush3.bf16.msra.mxu1 %v912_v4  ;;  %v732_v14 = vcombine.low %v223_v11, %v224_v12  ;;  %v926_v15 = vld [vmem:[%s1171_s23 + $0x8] ss:$0 sps:$4 sm:$0x11]   ;;  %v929_v30 = vld [vmem:[#allocation2 + $0x90] sm:$0xff]   ;;  %v930_v31 = vld [vmem:[#allocation2 + $0x98] sm:$0xff]  }
  0x4c   : > { %803 = vmatprep.subr.bf16.mxu0 %v1032_v0  ;;  %823 = vmatprep.subr.bf16.mxu1 %v1032_v0  ;;  %v275_v21 = vshll.u32 %v926_v15, 16  ;;  %v928_v29 = vld [vmem:[#allocation2 + $0x88] sm:$0xff]   ;;  %v931_v32 = vld [vmem:[#allocation2 + $0xa0] sm:$0xff]   ;;  %v933_v35 = vld [vmem:[#allocation2 + $0xb0] sm:$0xff]   ;;  %v481_v39 = vrot.slane %v926_v15, 1 }
  0x4d   : > { %v270_v17 = vshll.u32 %v732_v14, 16  ;;  %v268_v19 = vshrl.u32 %v732_v14, 16  ;;  %v932_v33 = vld [vmem:[#allocation2 + $0xa8] sm:$0xff]   ;;  %v459_v34 = vld [vmem:[%s1171_s23] sm:$0xe]  ;;  %v934_v37 = vld [vmem:[#allocation2 + $0xb8] sm:$0xff]  }
  0x4e   : > { %v277_v25 = vrot.slane %v275_v21, 1  ;;  %v750_v36 = vcombine.low %v459_v34, %v224_v12  ;;  %v759_v52 = vld [vmem:[#allocation4] ss:$0 sm:$0xff] }
  0x4f   : > { %804 = vmatpush3.bf16.msra.mxu0 %v913_v5  ;;  %824 = vmatpush3.bf16.msra.mxu1 %v914_v6  ;;  %v272_v20 = vrot.slane %v270_v17, 1 }
  0x50   : > { %805 = vmatprep.subr.bf16.mxu0 %v1032_v0  ;;  %825 = vmatprep.subr.bf16.mxu1 %v1032_v0  ;;  %v480_v38 = vrot.slane %v750_v36, 1 }
  0x51   : > { %v273_v24 = vor.u32 %v272_v20, %v268_v19 }
  0x52   : > { %v482_v40 = vsel %vm479_vm2, %v480_v38, %v481_v39 }
  0x53   : > { %806 = vmatpush3.bf16.msra.mxu0 %v915_v7  ;;  %826 = vmatpush3.bf16.msra.mxu1 %v916_v8  ;;  %v278_v27 = vsel %vm266_vm1, %v273_v24, %v277_v25 }
  0x54   : > { %807 = vmatprep.subr.bf16.mxu0 %v1032_v0  ;;  %827 = vmatprep.subr.bf16.mxu1 %v1032_v0 }
  0x57   : > { %808 = vmatpush3.bf16.msra.mxu0 %v917_v9  ;;  %828 = vmatpush3.bf16.msra.mxu1 %v918_v10 }
  0x58   : > { %809 = vmatprep.subr.bf16.mxu0 %v1032_v0  ;;  %829 = vmatprep.subr.bf16.mxu1 %v1032_v0 }
  0x5b   : > { %810 = vmatpush3.bf16.msra.mxu0 %v919_v13  ;;  %830 = vmatpush3.bf16.msra.mxu1 %v920_v16 }
  0x5c   : > { %811 = vmatprep.subr.bf16.mxu0 %v1032_v0  ;;  %831 = vmatprep.subr.bf16.mxu1 %v1032_v0 }
  0x5f   : > { %812 = vmatpush3.bf16.msra.mxu0 %v921_v18  ;;  %832 = vmatpush3.bf16.msra.mxu1 %v922_v22 }
  0x60   : > { %813 = vmatprep.subr.bf16.mxu0 %v1032_v0  ;;  %833 = vmatprep.subr.bf16.mxu1 %v1032_v0 }
  0x63   : > { %814 = vmatpush3.bf16.msra.mxu0 %v923_v23  ;;  %834 = vmatpush3.bf16.msra.mxu1 %v924_v26 }
  0x64   : > { %839 = vmatprep.subr.bf16.mxu0 %v1032_v0 }
  0x66   : > { %816 = vmatmul.mubr.bf16.vlgmr.msra.gmra.mrb[0].mxu0 %v278_v27  ;;  %836 = vmatmul.mubr.bf16.vlgmr.msra.gmra.mrb[0].mxu1 %v732_v14 }
  0x67   : > { %840 = vmatpush3.bf16.msra.mxu0 %v927_v28  ;;  %855 = vmatprep.mubr.msk.bf16.mxu0 %vm1033_vm0, %v1032_v0 }
  0x68   : > { %841 = vmatprep.subr.bf16.mxu0 %v1032_v0 }
  0x6b   : > { %842 = vmatpush3.bf16.msra.mxu0 %v928_v29 }
  0x6c   : > { %843 = vmatprep.subr.bf16.mxu0 %v1032_v0 }
  0x6f   : > { %844 = vmatpush3.bf16.msra.mxu0 %v929_v30 }
  0x70   : > { %845 = vmatprep.subr.bf16.mxu0 %v1032_v0 }
  0x73   : > { %846 = vmatpush3.bf16.msra.mxu0 %v930_v31 }
  0x74   : > { %847 = vmatprep.subr.bf16.mxu0 %v1032_v0 }
  0x77   : > { %848 = vmatpush3.bf16.msra.mxu0 %v931_v32 }
  0x78   : > { %849 = vmatprep.subr.bf16.mxu0 %v1032_v0 }
  0x7b   : > { %850 = vmatpush3.bf16.msra.mxu0 %v932_v33 }
  0x7c   : > { %851 = vmatprep.subr.bf16.mxu0 %v1032_v0 }
  0x7f   : > { %852 = vmatpush3.bf16.msra.mxu0 %v933_v35 }
  0x80   : > { %853 = vmatprep.subr.bf16.mxu0 %v1032_v0 }
  0x83   : > { %854 = vmatpush3.bf16.msra.mxu0 %v934_v37 }
  0x86   : > { %856 = vmatmul.mubr.bf16.vlgmr.msra.gmra.mrb[4].mxu0 %v482_v40 }
 0x139   : > { %v362_v41 = vpop.f32.mrb[0].mxu0  ;;  %v452_v42 = vpop.f32.mrb[0].mxu1 }
 0x13a   : > { %v817_v43 = vpop.f32.mrb[1].mxu0  ;;  %v453_v44 = vadd.f32 %v452_v42, %v362_v41  ;;  %v837_v45 = vpop.f32.mrb[1].mxu1 }
 0x13b   : > { %v365_v46 = vpop.f32.mrb[2].mxu0  ;;  %v455_v47 = vpop.f32.mrb[2].mxu1 }
 0x13c   : > { %v818_v48 = vpop.f32.mrb[3].mxu0  ;;  %v456_v49 = vadd.f32 %v455_v47, %v365_v46  ;;  %v838_v50 = vpop.f32.mrb[3].mxu1 }
 0x159   : > { %v566_v51 = vpop.f32.mrb[4].mxu0 }
 0x15a   : > { %v573_v53 = vadd.f32 %v566_v51, %v453_v44  ;;  %v857_v54 = vpop.f32.mrb[5].mxu0 }
 0x15b   : > { %v569_v55 = vpop.f32.mrb[6].mxu0 }
 0x15c   : > { %v574_v56 = vadd.f32 %v569_v55, %v456_v49  ;;  %v858_v57 = vpop.f32.mrb[7].mxu0  ;;  %v582_v58 = vadd.f32 %v759_v52, %v573_v53 }
 0x15e   : > { %584 = vadd.xlane.f32.xlu0 %v582_v58  ;;  %v583_v59 = vadd.f32 %v759_v52, %v574_v56 }
 0x162   : > { %586 = vadd.xlane.f32.xlu0 %v583_v59 }
 0x1eb   : > { %v585_v60 = vpop.xlane.xlu0 %584 }
 0x1ec   : > { %v589_v61 = vmul.f32 0.0078125, %v585_v60 }
 0x1ee   : > { %v591_v62 = vsub.f32 %v582_v58, %v589_v61 }
 0x1ef   : > { %v587_v63 = vpop.xlane.xlu0 %586 }
 0x1f0   : > { %v590_v0 = vmul.f32 0.0078125, %v587_v63  ;;  %v593_v1 = vmul.f32 %v591_v62, %v591_v62 }
 0x1f2   : > { %v592_v2 = vsub.f32 %v583_v59, %v590_v0  ;;  %595 = vadd.xlane.f32.xlu1 %v593_v1 }
 0x1f4   : > { %v594_v3 = vmul.f32 %v592_v2, %v592_v2 }
 0x1f6   : > { %597 = vadd.xlane.f32.xlu1 %v594_v3 }
 0x27f   : > { %v596_v4 = vpop.xlane.xlu1 %595 }
 0x280   : > { %v599_v5 = vmul.f32 0.0078125, %v596_v4 }
 0x282   : > { %v601_v6 = vadd.f32 1e-05, %v599_v5 }
 0x283   : > { %v598_v7 = vpop.xlane.xlu1 %597 }
 0x284   : > { %v600_v8 = vmul.f32 0.0078125, %v598_v7  ;;  %936 = vrsqrt.f32 %v601_v6 }
 0x286   : > { %v602_v9 = vadd.f32 1e-05, %v600_v8 }
 0x288   : > { %938 = vrsqrt.f32 %v602_v9 }
 0x28e   : > { %v937_v10 = vpop.eup %936 }
 0x28f   : > { %v605_v12 = vmul.f32 %v937_v10, %v591_v62 }
 0x292   : > { %v939_v11 = vpop.eup %938 }
 0x293   : > { %v606_v13 = vmul.f32 %v939_v11, %v592_v2 }
 0x295   : > { %v770_v14 = vpack.c.bf16 %v606_v13, %v605_v12 }
 0x297   : > { %771 = vst [vmem:[%s220_s4] sm:$0xff] %v770_v14  }
 0x298 PF: > { %s15_s14 = sadd.s32 1, %s1026_s14   ;;  %s1220_s12 = smov %s1022_s13 }
 0x299   : > { %p12_p3 = scmp.ge.s32.totalorder %s15_s14, 4   ;;  %s1221_s13 = smov %s1223_s16 }
 0x29b   :  { %14 = sbr.rel (!%p12_p3) target bundleno = 3 (0x3), region = 71 }
 0x2a2   :  { %647 = vsyncpa [#allocation3], 1 }
 0x2a3   :  { %649 = vsyncpa [#allocation3 + $0x1], 1 }
 0x2a4   :  { %650 = vsyncpa [#allocation5], 1 }

// kernel: dito_trainer_forward.32
= control target key start
LH: loop header
LB: loop body
LE: loop exit
PB: predicated region body
PF: predicated region fallthrough
CT: control target
= control target key end

     0   :  { %s956_s18 = smov 0   ;;  %s958_s19 = smov 0   ;;  %s1072_s0 = inlined_call_operand.vmem [shape: bf16[2,64,128], index: 0, kind: input, shape index: {}]   ;;  %s1073_s1 = inlined_call_operand.vmem [shape: bf16[128,128], index: 1, kind: input, shape index: {}]   ;;  %s1074_s2 = inlined_call_operand.vmem [shape: f32[1,128], index: 2, kind: input, shape index: {}]   ;;  %s1075_s3 = inlined_call_operand.vmem [shape: f32[2,1,128], index: 3, kind: input, shape index: {}]   ;;  %s1076_s4 = inlined_call_operand.vmem [shape: bf16[2,64,128], index: 4, kind: input, shape index: {}]   ;;  %s1077_s5 = inlined_call_operand.vmem [shape: bf16[2,64,128], index: 5, kind: output, shape index: {}]  }
   0x1   :  { %s960_s20 = smov 0  }
   0x2 LB: > { %s27_s21 = sadd.s32 1, %s920_s19  ;;  %p706_p0 = scmp.ge.s32.totalorder %s924_s20, 1  ;;  %s924_s20 = sphi %s960_s20, %s15_s20   ;;  %s920_s19 = sphi %s958_s19, %s1079_s19   ;;  %s916_s18 = sphi %s956_s18, %s1078_s18  }
   0x3   : > { %p29_p1 = scmp.ge.s32.totalorder %s27_s21, 2  ;;  %p226_p2 = scmp.lt.s32.totalorder %s924_s20, 3 }
   0x5   : > { %s1081_s21 = smov (%p29_p1, %s27_s21), 0  ;;  %p227_p3 = pnand %p706_p0, %p226_p2 }
   0x6   : > { %v874_v0 = vld [vmem:[%s1073_s1] sm:$0xff] (!%p227_p3)   ;;  %p270_p4 = scmp.lt.s32.totalorder (!%p227_p3), %s916_s18, 1  ;;  %v875_v1 = vld [vmem:[%s1073_s1 + $0x8] sm:$0xff] (!%p227_p3)   ;;  %v876_v2 = vld [vmem:[%s1073_s1 + $0x10] sm:$0xff] (!%p227_p3)  }
   0x7   : > { %230 = sbr.rel (%p227_p3) target bundleno = 285 (0x11d), region = 40  ;;  %810 = vmatprep.subr.bf16.mxu0 (!%p227_p3), %v874_v0  ;;  %834 = vmatprep.subr.bf16.mxu1 (!%p227_p3), %v874_v0  ;;  %v877_v3 = vld [vmem:[%s1073_s1 + $0x18] sm:$0xff] (!%p227_p3)   ;;  %v878_v6 = vld [vmem:[%s1073_s1 + $0x20] sm:$0xff] (!%p227_p3)   ;;  %v879_v7 = vld [vmem:[%s1073_s1 + $0x28] sm:$0xff] (!%p227_p3)  }
   0x8   : > { %811 = vmatpush3.bf16.msra.mxu0 (!%p227_p3), %v874_v0  ;;  %842 = vmatpush3.bf16.msra.mxu1 (!%p227_p3), %v874_v0  ;;  %v880_v8 = vld [vmem:[%s1073_s1 + $0x30] sm:$0xff] (!%p227_p3)   ;;  %v881_v9 = vld [vmem:[%s1073_s1 + $0x38] sm:$0xff] (!%p227_p3)   ;;  %v713_v12 = vld [vmem:[%s1074_s2] ss:$0 sm:$0xff] (!%p227_p3) }
   0x9   : > { %812 = vmatprep.subr.bf16.mxu0 (!%p227_p3), %v875_v1  ;;  %835 = vmatprep.subr.bf16.mxu1 (!%p227_p3), %v875_v1 }
   0xc   : > { %813 = vmatpush3.bf16.msra.mxu0 (!%p227_p3), %v875_v1  ;;  %843 = vmatpush3.bf16.msra.mxu1 (!%p227_p3), %v875_v1 }
   0xd   : > { %814 = vmatprep.subr.bf16.mxu0 (!%p227_p3), %v876_v2  ;;  %836 = vmatprep.subr.bf16.mxu1 (!%p227_p3), %v876_v2 }
   0xe   : > { %s1083_s18 = smov (!%p270_p4, %s916_s18), 1 }
   0xf   : > { %s986_s28 = sshll.u32 %s1083_s18, 5  ;;  %s277_s29 = scalar_lea.vmem %s1075_s3, %s1083_s18 }
  0x10   : > { %s992_s6 = scalar_lea.vmem %s1072_s0, %s986_s28  ;;  %815 = vmatpush3.bf16.msra.mxu0 %v876_v2  ;;  %844 = vmatpush3.bf16.msra.mxu1 %v876_v2  ;;  %s286_s25 = scalar_lea.vmem %s1076_s4, %s986_s28  ;;  %v734_v53 = vld [vmem:[%s277_s29] ss:$0 sm:$0xff] }
  0x11   : > { %v882_v4 = vld [vmem:[%s992_s6] sm:$0xff]   ;;  %v883_v5 = vld [vmem:[%s992_s6 + $0x10] sm:$0xff]   ;;  %816 = vmatprep.subr.bf16.mxu0 %v877_v3  ;;  %837 = vmatprep.subr.bf16.mxu1 %v877_v3  ;;  %v884_v10 = vld [vmem:[%s992_s6 + $0x8] sm:$0xff]  }
  0x12   : > { %826 = vmatprep.mubr.bf16.mxu0 %v882_v4  ;;  %830 = vmatprep.mubr.bf16.mxu1 %v883_v5  ;;  %v885_v11 = vld [vmem:[%s992_s6 + $0x18] sm:$0xff]   ;;  %v792_v45 = vld [vmem:[%s286_s25 + $0x8] sm:$0xff]   ;;  %v757_v47 = vld [vmem:[%s286_s25] sm:$0xff]   ;;  %s296_s6 = scalar_lea.vmem %s1077_s5, %s986_s28 }
  0x13   : > { %v794_v46 = vld [vmem:[%s286_s25 + $0x18] sm:$0xff]   ;;  %v793_v48 = vld [vmem:[%s286_s25 + $0x10] sm:$0xff]   ;;  %v762_v50 = vunpack.c.l.bf16 %v792_v45  ;;  %v758_v55 = vunpack.c.l.bf16 %v757_v47  ;;  %v763_v59 = vunpack.c.h.bf16 %v792_v45  ;;  %v759_v0 = vunpack.c.h.bf16 %v757_v47 }
  0x14   : > { %817 = vmatpush3.bf16.msra.mxu0 %v877_v3  ;;  %845 = vmatpush3.bf16.msra.mxu1 %v877_v3  ;;  %v770_v54 = vunpack.c.l.bf16 %v794_v46  ;;  %v766_v56 = vunpack.c.l.bf16 %v793_v48  ;;  %v771_v60 = vunpack.c.h.bf16 %v794_v46 }
  0x15   : > { %818 = vmatprep.subr.bf16.mxu0 %v878_v6  ;;  %838 = vmatprep.subr.bf16.mxu1 %v878_v6 }
  0x18   : > { %819 = vmatpush3.bf16.msra.mxu0 %v878_v6  ;;  %846 = vmatpush3.bf16.msra.mxu1 %v878_v6 }
  0x19   : > { %820 = vmatprep.subr.bf16.mxu0 %v879_v7  ;;  %839 = vmatprep.subr.bf16.mxu1 %v879_v7 }
  0x1c   : > { %821 = vmatpush3.bf16.msra.mxu0 %v879_v7  ;;  %847 = vmatpush3.bf16.msra.mxu1 %v879_v7 }
  0x1d   : > { %822 = vmatprep.subr.bf16.mxu0 %v880_v8  ;;  %840 = vmatprep.subr.bf16.mxu1 %v880_v8 }
  0x20   : > { %823 = vmatpush3.bf16.msra.mxu0 %v880_v8  ;;  %848 = vmatpush3.bf16.msra.mxu1 %v880_v8 }
  0x21   : > { %824 = vmatprep.subr.bf16.mxu0 %v881_v9  ;;  %841 = vmatprep.subr.bf16.mxu1 %v881_v9 }
  0x24   : > { %825 = vmatpush3.bf16.msra.mxu0 %v881_v9  ;;  %849 = vmatpush3.bf16.msra.mxu1 %v881_v9 }
  0x27   : > { %827 = vmatmul.mubr.bf16.vlgmr.msra.gmra.mrb[0].mxu0 %v884_v10  ;;  %831 = vmatmul.mubr.bf16.vlgmr.msra.gmra.mrb[0].mxu1 %v885_v11 }
  0xfa   : > { %v828_v13 = vpop.f32.mrb[0].mxu0  ;;  %v832_v14 = vpop.f32.mrb[0].mxu1 }
  0xfb   : > { %v445_v15 = vadd.f32 %v828_v13, %v713_v12  ;;  %v1016_v16 = vadd.f32 %v832_v14, %v713_v12  ;;  %v436_v17 = vpop.f32.mrb[1].mxu0  ;;  %v452_v18 = vpop.f32.mrb[1].mxu1 }
  0xfc   : > { %v1018_v19 = vadd.f32 %v713_v12, %v436_v17  ;;  %v1020_v20 = vadd.f32 %v713_v12, %v452_v18  ;;  %v829_v21 = vpop.f32.mrb[2].mxu0  ;;  %v833_v22 = vpop.f32.mrb[2].mxu1 }
  0xfd   : > { %v477_v23 = vmin.f32 %v445_v15, 0.0  ;;  %v481_v24 = vmin.f32 %v1016_v16, 0.0  ;;  %v439_v25 = vpop.f32.mrb[3].mxu0  ;;  %v455_v26 = vpop.f32.mrb[3].mxu1  ;;  %v1025_v31 = vadd.f32 %v829_v21, %v713_v12  ;;  %v1027_v32 = vadd.f32 %v833_v22, %v713_v12 }
  0xfe   : > { %v475_v27 = vmin.f32 %v1018_v19, 0.0  ;;  %v479_v28 = vmin.f32 %v1020_v20, 0.0  ;;  %v1029_v35 = vadd.f32 %v713_v12, %v439_v25  ;;  %v1031_v36 = vadd.f32 %v713_v12, %v455_v26 }
  0xff   : > { %v487_v29 = vmul.f32 1.442695, %v477_v23  ;;  %v495_v30 = vmul.f32 1.442695, %v481_v24  ;;  %v478_v37 = vmin.f32 %v1025_v31, 0.0  ;;  %v482_v38 = vmin.f32 %v1027_v32, 0.0 }
 0x100   : > { %v483_v33 = vmul.f32 1.442695, %v475_v27  ;;  %v491_v34 = vmul.f32 1.442695, %v479_v28  ;;  %v476_v39 = vmin.f32 %v1029_v35, 0.0  ;;  %v480_v41 = vmin.f32 %v1031_v36, 0.0 }
 0x101   : > { %886 = vpow2.f32 %v487_v29  ;;  %v489_v40 = vmul.f32 1.442695, %v478_v37  ;;  %v497_v42 = vmul.f32 1.442695, %v482_v38  ;;  %vm469_vm0 = vcmp.gt.f32.partialorder %v445_v15, 0.0 }
 0x102   : > { %888 = vpow2.f32 %v495_v30  ;;  %v485_v43 = vmul.f32 1.442695, %v476_v39  ;;  %v493_v44 = vmul.f32 1.442695, %v480_v41  ;;  %vm473_vm1 = vcmp.gt.f32.partialorder %v1016_v16, 0.0 }
 0x103   : > { %890 = vpow2.f32 %v483_v33  ;;  %vm467_vm2 = vcmp.gt.f32.partialorder %v1018_v19, 0.0  ;;  %vm471_vm3 = vcmp.gt.f32.partialorder %v1020_v20, 0.0  ;;  %vm470_vm4 = vcmp.gt.f32.partialorder %v1025_v31, 0.0 }
 0x104   : > { %892 = vpow2.f32 %v491_v34  ;;  %vm474_vm5 = vcmp.gt.f32.partialorder %v1027_v32, 0.0  ;;  %vm468_vm6 = vcmp.gt.f32.partialorder %v1029_v35, 0.0  ;;  %vm472_vm7 = vcmp.gt.f32.partialorder %v1031_v36, 0.0 }
 0x105   : > { %894 = vpow2.f32 %v489_v40  ;;  %v767_v22 = vunpack.c.h.bf16 %v793_v48 }
 0x106   : > { %896 = vpow2.f32 %v497_v42 }
 0x107   : > { %898 = vpow2.f32 %v485_v43 }
 0x108   : > { %900 = vpow2.f32 %v493_v44 }
 0x10b   : > { %v887_v49 = vpop.eup %886 }
 0x10c   : > { %v889_v51 = vpop.eup %888  ;;  %v728_v52 = vadd.f32 -1.0, %v887_v49 }
 0x10d   : > { %v891_v57 = vpop.eup %890  ;;  %v732_v58 = vadd.f32 -1.0, %v889_v51 }
 0x10e   : > { %v893_v61 = vpop.eup %892  ;;  %v509_v62 = vsel %vm469_vm0, %v445_v15, %v728_v52  ;;  %v726_v63 = vadd.f32 -1.0, %v891_v57 }
 0x10f   : > { %v895_v1 = vpop.eup %894  ;;  %v524_v2 = vadd.f32 %v734_v53, %v509_v62  ;;  %v513_v3 = vsel %vm473_vm1, %v1016_v16, %v732_v58  ;;  %v730_v4 = vadd.f32 -1.0, %v893_v61 }
 0x110   : > { %v897_v5 = vpop.eup %896  ;;  %v528_v6 = vadd.f32 %v734_v53, %v513_v3  ;;  %v507_v7 = vsel %vm467_vm2, %v1018_v19, %v726_v63  ;;  %v729_v8 = vadd.f32 -1.0, %v895_v1 }
 0x111   : > { %v899_v9 = vpop.eup %898  ;;  %v522_v10 = vadd.f32 %v734_v53, %v507_v7  ;;  %v511_v11 = vsel %vm471_vm3, %v1020_v20, %v730_v4  ;;  %v733_v12 = vadd.f32 -1.0, %v897_v5  ;;  %v548_v23 = vadd.f32 %v762_v50, %v524_v2 }
 0x112   : > { %v901_v13 = vpop.eup %900  ;;  %v526_v14 = vadd.f32 %v734_v53, %v511_v11  ;;  %v510_v15 = vsel %vm470_vm4, %v1025_v31, %v729_v8  ;;  %v727_v16 = vadd.f32 -1.0, %v899_v9  ;;  %v552_v27 = vadd.f32 %v770_v54, %v528_v6 }
 0x113   : > { %v525_v17 = vadd.f32 %v734_v53, %v510_v15  ;;  %v514_v18 = vsel %vm474_vm5, %v1027_v32, %v733_v12  ;;  %v731_v19 = vadd.f32 -1.0, %v901_v13  ;;  %v546_v30 = vadd.f32 %v758_v55, %v522_v10 }
 0x114   : > { %v529_v21 = vadd.f32 %v734_v53, %v514_v18  ;;  %v508_v20 = vsel %vm468_vm6, %v1029_v35, %v727_v16  ;;  %v550_v33 = vadd.f32 %v766_v56, %v526_v14 }
 0x115   : > { %v549_v24 = vadd.f32 %v763_v59, %v525_v17  ;;  %v523_v25 = vadd.f32 %v734_v53, %v508_v20  ;;  %v512_v26 = vsel %vm472_vm7, %v1031_v36, %v731_v19 }
 0x116   : > { %v553_v28 = vadd.f32 %v771_v60, %v529_v21  ;;  %v527_v29 = vadd.f32 %v734_v53, %v512_v26 }
 0x117   : > { %v780_v31 = vpack.c.bf16 %v549_v24, %v548_v23  ;;  %v547_v32 = vadd.f32 %v759_v0, %v523_v25 }
 0x118   : > { %v790_v34 = vpack.c.bf16 %v553_v28, %v552_v27  ;;  %v551_v35 = vadd.f32 %v767_v22, %v527_v29 }
 0x119   : > { %795 = vst [vmem:[%s296_s6 + $0x8] sm:$0xff] %v780_v31   ;;  %v775_v37 = vpack.c.bf16 %v547_v32, %v546_v30 }
 0x11a   : > { %797 = vst [vmem:[%s296_s6 + $0x18] sm:$0xff] %v790_v34   ;;  %v785_v38 = vpack.c.bf16 %v551_v35, %v550_v33 }
 0x11b   : > { %776 = vst [vmem:[%s296_s6] sm:$0xff] %v775_v37  }
 0x11c   : > { %796 = vst [vmem:[%s296_s6 + $0x10] sm:$0xff] %v785_v38  }
 0x11d PF: > { %s15_s20 = sadd.s32 1, %s924_s20   ;;  %s1078_s18 = smov %s920_s19 }
 0x11e   : > { %p12_p5 = scmp.ge.s32.totalorder %s15_s20, 4   ;;  %s1079_s19 = smov %s1081_s21 }
 0x120   :  { %14 = sbr.rel (!%p12_p5) target bundleno = 2 (0x2), region = 76 }

// kernel: dito_trainer_forward.33
= control target key start
LH: loop header
LB: loop body
LE: loop exit
PB: predicated region body
PF: predicated region fallthrough
CT: control target
= control target key end

     0   :  { %s1152_s15 = smov 0   ;;  %s1154_s16 = smov 0   ;;  %s1364_s0 = inlined_call_operand.vmem [shape: bf16[2,32,384], index: 0, kind: input, shape index: {}]   ;;  %s1365_s1 = inlined_call_operand.vmem [shape: bf16[384,256], index: 1, kind: input, shape index: {}]   ;;  %s1366_s2 = inlined_call_operand.vmem [shape: f32[1,256], index: 2, kind: input, shape index: {}]   ;;  %s1367_s3 = inlined_call_operand.vmem [shape: f32[2,1,256], index: 3, kind: input, shape index: {}]   ;;  %s1368_s4 = inlined_call_operand.vmem [shape: bf16[2,32,256], index: 4, kind: output, shape index: {}]  }
   0x1   :  { %s1156_s17 = smov 0  }
   0x2 LB: > { %s26_s18 = sadd.s32 1, %s1120_s16  ;;  %p886_p0 = scmp.ge.s32.totalorder %s1124_s17, 1  ;;  %s1124_s17 = sphi %s1156_s17, %s14_s17   ;;  %s1120_s16 = sphi %s1154_s16, %s1370_s16   ;;  %s1116_s15 = sphi %s1152_s15, %s1369_s15  }
   0x3   : > { %p28_p1 = scmp.ge.s32.totalorder %s26_s18, 2  ;;  %p185_p2 = scmp.lt.s32.totalorder %s1124_s17, 3 }
   0x5   : > { %s1372_s18 = smov (%p28_p1, %s26_s18), 0  ;;  %p186_p3 = pnand %p886_p0, %p185_p2 }
   0x6   : > { %v1006_v0 = vld [vmem:[%s1365_s1 + $0x4] ss:$8 sps:$4 sm:$0xff] (!%p186_p3)   ;;  %v1008_v1 = vld [vmem:[%s1365_s1] ss:$8 sps:$4 sm:$0xff] (!%p186_p3)   ;;  %v1126_v2 = vmov (!%p186_p3), 0   ;;  %p220_p4 = scmp.lt.s32.totalorder (!%p186_p3), %s1116_s15, 1  ;;  %v299_v59 = vlaneseq (!%p186_p3) }
   0x7   : > { %189 = sbr.rel (%p186_p3) target bundleno = 321 (0x141), region = 36  ;;  %666 = vmatprep.mubr.bf16.mxu0 (!%p186_p3), %v1126_v2  ;;  %581 = vmatprep.subr.bf16.mxu1 (!%p186_p3), %v1006_v0  ;;  %v1009_v3 = vld [vmem:[%s1365_s1 + $0x14] ss:$8 sps:$4 sm:$0xff] (!%p186_p3)   ;;  %v1011_v4 = vld [vmem:[%s1365_s1 + $0x10] ss:$8 sps:$4 sm:$0xff] (!%p186_p3)  }
   0x8   : > { %582 = vmatpush1.bf16.msra.mxu1 (!%p186_p3), %v1008_v1  ;;  %v1012_v5 = vld [vmem:[%s1365_s1 + $0x24] ss:$8 sps:$4 sm:$0xff] (!%p186_p3)   ;;  %v1014_v6 = vld [vmem:[%s1365_s1 + $0x20] ss:$8 sps:$4 sm:$0xff] (!%p186_p3)   ;;  %v1015_v7 = vld [vmem:[%s1365_s1 + $0x34] ss:$8 sps:$4 sm:$0xff] (!%p186_p3)  }
   0x9   : > { %583 = vmatprep.subr.bf16.mxu1 (!%p186_p3), %v1009_v3  ;;  %v1017_v8 = vld [vmem:[%s1365_s1 + $0x30] ss:$8 sps:$4 sm:$0xff] (!%p186_p3)   ;;  %v1030_v9 = vld [vmem:[%s1365_s1 + $0x104] ss:$8 sps:$4 sm:$0xff] (!%p186_p3)   ;;  %v1034_v11 = vld [vmem:[%s1365_s1 + $0x100] ss:$8 sps:$4 sm:$0xff] (!%p186_p3)  }
   0xa   : > { %v1018_v10 = vld [vmem:[%s1365_s1 + $0x44] ss:$8 sps:$4 sm:$0xff] (!%p186_p3)   ;;  %634 = vmatprep.subr.bf16.mxu0 (!%p186_p3), %v1030_v9  ;;  %v1036_v12 = vld [vmem:[%s1365_s1 + $0x114] ss:$8 sps:$4 sm:$0xff] (!%p186_p3)   ;;  %v1020_v13 = vld [vmem:[%s1365_s1 + $0x40] ss:$8 sps:$4 sm:$0xff] (!%p186_p3)  }
   0xb   : > { %635 = vmatpush1.bf16.msra.mxu0 (!%p186_p3), %v1034_v11  ;;  %v1021_v14 = vld [vmem:[%s1365_s1 + $0x54] ss:$8 sps:$4 sm:$0xff] (!%p186_p3)   ;;  %v1040_v15 = vld [vmem:[%s1365_s1 + $0x110] ss:$8 sps:$4 sm:$0xff] (!%p186_p3)   ;;  %v1042_v16 = vld [vmem:[%s1365_s1 + $0x124] ss:$8 sps:$4 sm:$0xff] (!%p186_p3)  }
   0xc   : > { %584 = vmatpush1.bf16.msra.mxu1 (!%p186_p3), %v1011_v4  ;;  %636 = vmatprep.subr.bf16.mxu0 (!%p186_p3), %v1036_v12  ;;  %v1023_v17 = vld [vmem:[%s1365_s1 + $0x50] ss:$8 sps:$4 sm:$0xff] (!%p186_p3)   ;;  %v1046_v18 = vld [vmem:[%s1365_s1 + $0x120] ss:$8 sps:$4 sm:$0xff] (!%p186_p3)   ;;  %v1048_v19 = vld [vmem:[%s1365_s1 + $0x134] ss:$8 sps:$4 sm:$0xff] (!%p186_p3)  }
   0xd   : > { %585 = vmatprep.subr.bf16.mxu1 (!%p186_p3), %v1012_v5  ;;  %v1024_v20 = vld [vmem:[%s1365_s1 + $0x64] ss:$8 sps:$4 sm:$0xff] (!%p186_p3)   ;;  %v1052_v21 = vld [vmem:[%s1365_s1 + $0x130] ss:$8 sps:$4 sm:$0xff] (!%p186_p3)   ;;  %v1026_v22 = vld [vmem:[%s1365_s1 + $0x60] ss:$8 sps:$4 sm:$0xff] (!%p186_p3)  }
   0xe   : > { %s1374_s15 = smov (!%p220_p4, %s1116_s15), 1  ;;  %v1054_v23 = vld [vmem:[%s1365_s1 + $0x144] ss:$8 sps:$4 sm:$0xff]   ;;  %v1027_v24 = vld [vmem:[%s1365_s1 + $0x74] ss:$8 sps:$4 sm:$0xff]   ;;  %v1334_v62 = vshrl.u32 %v299_v59, 7 }
   0xf   : > { %637 = vmatpush1.bf16.msra.mxu0 %v1040_v15  ;;  %v1029_v25 = vld [vmem:[%s1365_s1 + $0x70] ss:$8 sps:$4 sm:$0xff]   ;;  %v1058_v26 = vld [vmem:[%s1365_s1 + $0x140] ss:$8 sps:$4 sm:$0xff]   ;;  %s980_s27 = smul.u32 48, %s1374_s15  ;;  %s959_s12 = sshll.u32 %s1374_s15, 5 }
  0x10   : > { %586 = vmatpush1.bf16.msra.mxu1 %v1014_v6  ;;  %638 = vmatprep.subr.bf16.mxu0 %v1042_v16  ;;  %v1060_v27 = vld [vmem:[%s1365_s1 + $0x154] ss:$8 sps:$4 sm:$0xff]   ;;  %v1032_v28 = vld [vmem:[%s1365_s1 + $0x84] ss:$8 sps:$4 sm:$0xff]   ;;  %v1064_v29 = vld [vmem:[%s1365_s1 + $0x150] ss:$8 sps:$4 sm:$0xff]   ;;  %s1349_s19 = scalar_lea.vmem %s1368_s4, %s959_s12 }
  0x11   : > { %587 = vmatprep.subr.bf16.mxu1 %v1015_v7  ;;  %s1268_s10 = scalar_lea.vmem %s1364_s0, %s980_s27  ;;  %v1035_v30 = vld [vmem:[%s1365_s1 + $0x80] ss:$8 sps:$4 sm:$0xff]   ;;  %v1066_v31 = vld [vmem:[%s1365_s1 + $0x164] ss:$8 sps:$4 sm:$0xff]   ;;  %v1038_v32 = vld [vmem:[%s1365_s1 + $0x94] ss:$8 sps:$4 sm:$0xff]  }
  0x12   : > { %v1041_v33 = vld [vmem:[%s1365_s1 + $0x90] ss:$8 sps:$4 sm:$0xff]   ;;  %v1070_v35 = vld [vmem:[%s1365_s1 + $0x160] ss:$8 sps:$4 sm:$0xff]   ;;  %v1072_v36 = vld [vmem:[%s1365_s1 + $0x174] ss:$8 sps:$4 sm:$0xff]  }
  0x13   : > { %639 = vmatpush1.bf16.msra.mxu0 %v1046_v18  ;;  %v1080_v34 = vld [vmem:[%s1268_s10 + $0x4] ss:$12 sps:$4 sm:$0xff]   ;;  %v1047_v39 = vld [vmem:[%s1365_s1 + $0xa0] ss:$8 sps:$4 sm:$0xff]   ;;  %v1050_v40 = vld [vmem:[%s1365_s1 + $0xb4] ss:$8 sps:$4 sm:$0xff]  }
  0x14   : > { %588 = vmatpush1.bf16.msra.mxu1 %v1017_v8  ;;  %640 = vmatprep.subr.bf16.mxu0 %v1048_v19  ;;  %v1044_v37 = vld [vmem:[%s1365_s1 + $0xa4] ss:$8 sps:$4 sm:$0xff]   ;;  %v1076_v38 = vld [vmem:[%s1365_s1 + $0x170] ss:$8 sps:$4 sm:$0xff]   ;;  %v1081_v41 = vld [vmem:[%s1268_s10 + $0x8] ss:$12 sps:$4 sm:$0xff]  }
  0x15   : > { %589 = vmatprep.subr.bf16.mxu1 %v1018_v10  ;;  %613 = vmatprep.mubr.bf16.mxu1 %v1080_v34  ;;  %v1053_v42 = vld [vmem:[%s1365_s1 + $0xb0] ss:$8 sps:$4 sm:$0xff]   ;;  %v1056_v43 = vld [vmem:[%s1365_s1 + $0xc4] ss:$8 sps:$4 sm:$0xff]   ;;  %v1059_v44 = vld [vmem:[%s1365_s1 + $0xc0] ss:$8 sps:$4 sm:$0xff]  }
  0x16   : > { %v1062_v45 = vld [vmem:[%s1365_s1 + $0xd4] ss:$8 sps:$4 sm:$0xff]   ;;  %v1084_v46 = vld [vmem:[%s1268_s10 + $0x20] ss:$12 sps:$4 sm:$0xff]   ;;  %v1065_v47 = vld [vmem:[%s1365_s1 + $0xd0] ss:$8 sps:$4 sm:$0xff]  }
  0x17   : > { %641 = vmatpush1.bf16.msra.mxu0 %v1052_v21  ;;  %v1068_v48 = vld [vmem:[%s1365_s1 + $0xe4] ss:$8 sps:$4 sm:$0xff]   ;;  %v1071_v49 = vld [vmem:[%s1365_s1 + $0xe0] ss:$8 sps:$4 sm:$0xff]   ;;  %v1074_v50 = vld [vmem:[%s1365_s1 + $0xf4] ss:$8 sps:$4 sm:$0xff]  }
  0x18   : > { %590 = vmatpush1.bf16.msra.mxu1 %v1020_v13  ;;  %642 = vmatprep.subr.bf16.mxu0 %v1054_v23  ;;  %v1077_v51 = vld [vmem:[%s1365_s1 + $0xf0] ss:$8 sps:$4 sm:$0xff]   ;;  %v1078_v52 = vld [vmem:[%s1268_s10] ss:$12 sps:$4 sm:$0xff]   ;;  %v1082_v53 = vld [vmem:[%s1268_s10 + $0x1c] ss:$12 sps:$4 sm:$0xff]  }
  0x19   : > { %591 = vmatprep.subr.bf16.mxu1 %v1021_v14  ;;  %v1085_v54 = vld [vmem:[%s1268_s10 + $0x18] ss:$12 sps:$4 sm:$0xff]   ;;  %v301_v1 = vsub.s32 0, %v1334_v62  ;;  %v305_v3 = vsub.s32 1, %v1334_v62  ;;  %s888_s10 = sshll.u32 %s1374_s15, 1 }
  0x1a   : > { %s228_s11 = scalar_lea.vmem %s1367_s3, %s888_s10 }
  0x1b   : > { %643 = vmatpush1.bf16.msra.mxu0 %v1058_v26 }
  0x1c   : > { %592 = vmatpush1.bf16.msra.mxu1 %v1023_v17  ;;  %644 = vmatprep.subr.bf16.mxu0 %v1060_v27 }
  0x1d   : > { %593 = vmatprep.subr.bf16.mxu1 %v1024_v20 }
  0x1f   : > { %645 = vmatpush1.bf16.msra.mxu0 %v1064_v29 }
  0x20   : > { %594 = vmatpush1.bf16.msra.mxu1 %v1026_v22  ;;  %646 = vmatprep.subr.bf16.mxu0 %v1066_v31 }
  0x21   : > { %595 = vmatprep.subr.bf16.mxu1 %v1027_v24 }
  0x23   : > { %647 = vmatpush1.bf16.msra.mxu0 %v1070_v35 }
  0x24   : > { %596 = vmatpush1.bf16.msra.mxu1 %v1029_v25  ;;  %648 = vmatprep.subr.bf16.mxu0 %v1072_v36 }
  0x25   : > { %597 = vmatprep.subr.bf16.mxu1 %v1032_v28 }
  0x27   : > { %649 = vmatpush1.bf16.msra.mxu0 %v1076_v38 }
  0x28   : > { %598 = vmatpush1.bf16.msra.mxu1 %v1035_v30 }
  0x29   : > { %599 = vmatprep.subr.bf16.mxu1 %v1038_v32 }
  0x2a   : > { %667 = vmatmul.mubr.bf16.vlgmr.msra.gmra.mrb[0].mxu0 %v1081_v41 }
  0x2b   : > { %676 = vmatprep.mubr.bf16.mxu0 %v1126_v2  ;;  %v297_v2 = vld [vmem:[%s1366_s2] sm:$0x3] }
  0x2c   : > { %600 = vmatpush1.bf16.msra.mxu1 %v1041_v33  ;;  %v302_v4 = vrot.slane %v297_v2, %v301_v1  ;;  %v306_v5 = vrot.slane %v297_v2, %v305_v3 }
  0x2d   : > { %601 = vmatprep.subr.bf16.mxu1 %v1044_v37 }
  0x30   : > { %602 = vmatpush1.bf16.msra.mxu1 %v1047_v39 }
  0x31   : > { %603 = vmatprep.subr.bf16.mxu1 %v1050_v40 }
  0x32   : > { %677 = vmatmul.mubr.bf16.gmra.mrb[4].mxu0 %v1084_v46 }
  0x34   : > { %604 = vmatpush1.bf16.msra.mxu1 %v1053_v42  ;;  %v735_v42 = vld [vmem:[%s228_s11] sm:$0x3] }
  0x35   : > { %605 = vmatprep.subr.bf16.mxu1 %v1056_v43 }
  0x38   : > { %606 = vmatpush1.bf16.msra.mxu1 %v1059_v44 }
  0x39   : > { %607 = vmatprep.subr.bf16.mxu1 %v1062_v45 }
  0x3c   : > { %608 = vmatpush1.bf16.msra.mxu1 %v1065_v47 }
  0x3d   : > { %609 = vmatprep.subr.bf16.mxu1 %v1068_v48  ;;  %v740_v48 = vrot.slane %v735_v42, %v301_v1 }
  0x40   : > { %610 = vmatpush1.bf16.msra.mxu1 %v1071_v49 }
  0x41   : > { %611 = vmatprep.subr.bf16.mxu1 %v1074_v50 }
  0x44   : > { %612 = vmatpush1.bf16.msra.mxu1 %v1077_v51  ;;  %v744_v51 = vrot.slane %v735_v42, %v305_v3 }
  0x47   : > { %614 = vmatmul.mubr.bf16.vlgmr.msra.gmra.mrb[0].mxu1 %v1078_v52 }
  0x48   : > { %623 = vmatprep.mubr.bf16.mxu1 %v1082_v53 }
  0x4f   : > { %624 = vmatmul.mubr.bf16.gmra.mrb[4].mxu1 %v1085_v54 }
  0xfd   : > { %v668_v55 = vpop.f32.mrb[0].mxu0 }
  0xfe   : > { %v670_v56 = vpop.f32.mrb[1].mxu0 }
  0xff   : > { %v672_v57 = vpop.f32.mrb[2].mxu0 }
 0x100   : > { %v674_v58 = vpop.f32.mrb[3].mxu0 }
 0x105   : > { %v678_v60 = vpop.f32.mrb[4].mxu0 }
 0x106   : > { %v680_v61 = vpop.f32.mrb[5].mxu0 }
 0x107   : > { %v682_v63 = vpop.f32.mrb[6].mxu0 }
 0x108   : > { %v684_v0 = vpop.f32.mrb[7].mxu0 }
 0x11a   : > { %v615_v6 = vpop.f32.mrb[0].mxu1 }
 0x11b   : > { %v616_v7 = vadd.f32 %v615_v6, %v302_v4  ;;  %v617_v8 = vpop.f32.mrb[1].mxu1 }
 0x11c   : > { %v618_v9 = vadd.f32 %v617_v8, %v306_v5  ;;  %v619_v10 = vpop.f32.mrb[2].mxu1 }
 0x11d   : > { %v669_v11 = vadd.f32 %v668_v55, %v616_v7  ;;  %v620_v12 = vadd.f32 %v619_v10, %v302_v4  ;;  %v621_v13 = vpop.f32.mrb[3].mxu1 }
 0x11e   : > { %v671_v14 = vadd.f32 %v670_v56, %v618_v9  ;;  %v622_v15 = vadd.f32 %v621_v13, %v306_v5 }
 0x11f   : > { %v695_v16 = vmin.f32 %v669_v11, 0.0  ;;  %v673_v17 = vadd.f32 %v672_v57, %v620_v12  ;;  %vm687_vm0 = vcmp.gt.f32.partialorder %v669_v11, 0.0 }
 0x120   : > { %v696_v18 = vmin.f32 %v671_v14, 0.0  ;;  %v675_v19 = vadd.f32 %v674_v58, %v622_v15  ;;  %vm688_vm1 = vcmp.gt.f32.partialorder %v671_v14, 0.0 }
 0x121   : > { %v703_v20 = vmul.f32 1.442695, %v695_v16  ;;  %v697_v21 = vmin.f32 %v673_v17, 0.0  ;;  %vm689_vm2 = vcmp.gt.f32.partialorder %v673_v17, 0.0 }
 0x122   : > { %v705_v22 = vmul.f32 1.442695, %v696_v18  ;;  %v698_v23 = vmin.f32 %v675_v19, 0.0  ;;  %v625_v24 = vpop.f32.mrb[4].mxu1  ;;  %vm690_vm3 = vcmp.gt.f32.partialorder %v675_v19, 0.0 }
 0x123   : > { %1086 = vpow2.f32 %v703_v20  ;;  %v707_v25 = vmul.f32 1.442695, %v697_v21  ;;  %v626_v26 = vadd.f32 %v625_v24, %v302_v4  ;;  %v627_v27 = vpop.f32.mrb[5].mxu1 }
 0x124   : > { %1088 = vpow2.f32 %v705_v22  ;;  %v709_v28 = vmul.f32 1.442695, %v698_v23  ;;  %v628_v29 = vadd.f32 %v627_v27, %v306_v5  ;;  %v629_v30 = vpop.f32.mrb[6].mxu1 }
 0x125   : > { %1090 = vpow2.f32 %v707_v25  ;;  %v679_v31 = vadd.f32 %v678_v60, %v626_v26  ;;  %v630_v32 = vadd.f32 %v629_v30, %v302_v4  ;;  %v631_v33 = vpop.f32.mrb[7].mxu1 }
 0x126   : > { %1092 = vpow2.f32 %v709_v28  ;;  %v681_v34 = vadd.f32 %v680_v61, %v628_v29  ;;  %v632_v35 = vadd.f32 %v631_v33, %v306_v5 }
 0x127   : > { %v699_v36 = vmin.f32 %v679_v31, 0.0  ;;  %v683_v37 = vadd.f32 %v682_v63, %v630_v32  ;;  %vm691_vm4 = vcmp.gt.f32.partialorder %v679_v31, 0.0 }
 0x128   : > { %v700_v38 = vmin.f32 %v681_v34, 0.0  ;;  %v685_v39 = vadd.f32 %v684_v0, %v632_v35  ;;  %vm692_vm5 = vcmp.gt.f32.partialorder %v681_v34, 0.0 }
 0x129   : > { %v711_v40 = vmul.f32 1.442695, %v699_v36  ;;  %v701_v41 = vmin.f32 %v683_v37, 0.0  ;;  %vm693_vm6 = vcmp.gt.f32.partialorder %v683_v37, 0.0 }
 0x12a   : > { %v713_v43 = vmul.f32 1.442695, %v700_v38  ;;  %v702_v44 = vmin.f32 %v685_v39, 0.0  ;;  %vm694_vm7 = vcmp.gt.f32.partialorder %v685_v39, 0.0 }
 0x12b   : > { %1094 = vpow2.f32 %v711_v40  ;;  %v715_v45 = vmul.f32 1.442695, %v701_v41 }
 0x12c   : > { %1096 = vpow2.f32 %v713_v43  ;;  %v717_v46 = vmul.f32 1.442695, %v702_v44 }
 0x12d   : > { %v1087_v47 = vpop.eup %1086  ;;  %1098 = vpow2.f32 %v715_v45 }
 0x12e   : > { %v1089_v49 = vpop.eup %1088  ;;  %v945_v50 = vadd.f32 -1.0, %v1087_v47  ;;  %1100 = vpow2.f32 %v717_v46 }
 0x12f   : > { %v1091_v52 = vpop.eup %1090  ;;  %v946_v53 = vadd.f32 -1.0, %v1089_v49 }
 0x130   : > { %v1093_v54 = vpop.eup %1092  ;;  %v727_v55 = vsel %vm687_vm0, %v669_v11, %v945_v50  ;;  %v947_v56 = vadd.f32 -1.0, %v1091_v52 }
 0x131   : > { %v747_v57 = vadd.f32 %v740_v48, %v727_v55  ;;  %v728_v58 = vsel %vm688_vm1, %v671_v14, %v946_v53  ;;  %v948_v59 = vadd.f32 -1.0, %v1093_v54 }
 0x132   : > { %v748_v60 = vadd.f32 %v744_v51, %v728_v58  ;;  %v729_v61 = vsel %vm689_vm2, %v673_v17, %v947_v56 }
 0x133   : > { %v749_v62 = vadd.f32 %v740_v48, %v729_v61  ;;  %v730_v63 = vsel %vm690_vm3, %v675_v19, %v948_v59 }
 0x134   : > { %v960_v0 = vpack.c.bf16 %v748_v60, %v747_v57  ;;  %v750_v1 = vadd.f32 %v744_v51, %v730_v63 }
 0x135   : > { %v1095_v2 = vpop.eup %1094 }
 0x136   : > { %v1097_v3 = vpop.eup %1096  ;;  %779 = vst [vmem:[%s1349_s19] sm:$0xff] %v960_v0  ;;  %v961_v4 = vpack.c.bf16 %v750_v1, %v749_v62  ;;  %v949_v5 = vadd.f32 -1.0, %v1095_v2 }
 0x137   : > { %v1099_v6 = vpop.eup %1098  ;;  %v950_v7 = vadd.f32 -1.0, %v1097_v3 }
 0x138   : > { %v1101_v8 = vpop.eup %1100  ;;  %780 = vst [vmem:[%s1349_s19 + $0x8] sm:$0xff] %v961_v4  ;;  %v731_v9 = vsel %vm691_vm4, %v679_v31, %v949_v5  ;;  %v951_v10 = vadd.f32 -1.0, %v1099_v6 }
 0x139   : > { %v751_v11 = vadd.f32 %v740_v48, %v731_v9  ;;  %v732_v12 = vsel %vm692_vm5, %v681_v34, %v950_v7  ;;  %v952_v13 = vadd.f32 -1.0, %v1101_v8 }
 0x13a   : > { %v752_v14 = vadd.f32 %v744_v51, %v732_v12  ;;  %v733_v15 = vsel %vm693_vm6, %v683_v37, %v951_v10 }
 0x13b   : > { %v753_v16 = vadd.f32 %v740_v48, %v733_v15  ;;  %v734_v17 = vsel %vm694_vm7, %v685_v39, %v952_v13 }
 0x13c   : > { %v962_v18 = vpack.c.bf16 %v752_v14, %v751_v11  ;;  %v754_v19 = vadd.f32 %v744_v51, %v734_v17 }
 0x13e   : > { %781 = vst [vmem:[%s1349_s19 + $0x10] sm:$0xff] %v962_v18  ;;  %v963_v20 = vpack.c.bf16 %v754_v19, %v753_v16 }
 0x140   : > { %782 = vst [vmem:[%s1349_s19 + $0x18] sm:$0xff] %v963_v20 }
 0x141 PF: > { %s14_s17 = sadd.s32 1, %s1124_s17   ;;  %s1369_s15 = smov %s1120_s16 }
 0x142   : > { %p11_p5 = scmp.ge.s32.totalorder %s14_s17, 4   ;;  %s1370_s16 = smov %s1372_s18 }
 0x144   :  { %13 = sbr.rel (!%p11_p5) target bundleno = 2 (0x2), region = 69 }

// kernel: dito_trainer_forward.34
= control target key start
LH: loop header
LB: loop body
LE: loop exit
PB: predicated region body
PF: predicated region fallthrough
CT: control target
= control target key end

     0   :  { %s2550_s15 = smov 0   ;;  %s2552_s16 = smov 0   ;;  %s3208_s0 = inlined_call_operand.vmem [shape: bf16[2,16,768], index: 0, kind: input, shape index: {}]   ;;  %s3209_s1 = inlined_call_operand.vmem [shape: bf16[768,512], index: 1, kind: input, shape index: {}]   ;;  %s3210_s2 = inlined_call_operand.vmem [shape: f32[1,512], index: 2, kind: input, shape index: {}]   ;;  %s3211_s3 = inlined_call_operand.vmem [shape: f32[2,1,512], index: 3, kind: input, shape index: {}]   ;;  %s3212_s4 = inlined_call_operand.vmem [shape: bf16[2,16,512], index: 4, kind: output, shape index: {}]  }
   0x1   :  { %s2554_s17 = smov 0  }
   0x2 LB: > { %s26_s18 = sadd.s32 1, %s2519_s16  ;;  %p1917_p0 = scmp.ge.s32.totalorder %s2523_s17, 1  ;;  %s2523_s17 = sphi %s2554_s17, %s14_s17   ;;  %s2519_s16 = sphi %s2552_s16, %s3214_s16   ;;  %s2515_s15 = sphi %s2550_s15, %s3213_s15  }
   0x3   : > { %p28_p1 = scmp.ge.s32.totalorder %s26_s18, 2  ;;  %p185_p2 = scmp.lt.s32.totalorder %s2523_s17, 3 }
   0x5   : > { %s3216_s18 = smov (%p28_p1, %s26_s18), 0  ;;  %p186_p3 = pnand %p1917_p0, %p185_p2 }
   0x6   : > { %v2188_v0 = vld [vmem:[%s3209_s1 + $0x4] ss:$16 sps:$4 sm:$0xff] (!%p186_p3)   ;;  %v2190_v1 = vld [vmem:[%s3209_s1 + $0xc] ss:$16 sps:$4 sm:$0xff] (!%p186_p3)   ;;  %v2192_v2 = vld [vmem:[%s3209_s1] ss:$16 sps:$4 sm:$0xff] (!%p186_p3)  }
   0x7   : > { %189 = sbr.rel (%p186_p3) target bundleno = 443 (0x1bb), region = 36  ;;  %1450 = vmatprep.subr.bf16.mxu0 (!%p186_p3), %v2188_v0  ;;  %v2193_v3 = vld [vmem:[%s3209_s1 + $0x8] ss:$16 sps:$4 sm:$0xff] (!%p186_p3)   ;;  %1579 = vmatprep.subr.bf16.mxu1 (!%p186_p3), %v2190_v1  ;;  %v2194_v4 = vld [vmem:[%s3209_s1 + $0x24] ss:$16 sps:$4 sm:$0xff] (!%p186_p3)   ;;  %p220_p4 = scmp.lt.s32.totalorder (!%p186_p3), %s2515_s15, 1 }
   0x8   : > { %1451 = vmatpush1.bf16.msra.mxu0 (!%p186_p3), %v2192_v2  ;;  %1580 = vmatpush1.bf16.msra.mxu1 (!%p186_p3), %v2193_v3  ;;  %v2196_v5 = vld [vmem:[%s3209_s1 + $0x2c] ss:$16 sps:$4 sm:$0xff] (!%p186_p3)   ;;  %v2198_v6 = vld [vmem:[%s3209_s1 + $0x20] ss:$16 sps:$4 sm:$0xff] (!%p186_p3)   ;;  %v2199_v7 = vld [vmem:[%s3209_s1 + $0x28] ss:$16 sps:$4 sm:$0xff] (!%p186_p3)  }
   0x9   : > { %1452 = vmatprep.subr.bf16.mxu0 (!%p186_p3), %v2194_v4  ;;  %1581 = vmatprep.subr.bf16.mxu1 (!%p186_p3), %v2196_v5  ;;  %v2200_v8 = vld [vmem:[%s3209_s1 + $0x44] ss:$16 sps:$4 sm:$0xff] (!%p186_p3)   ;;  %v2202_v9 = vld [vmem:[%s3209_s1 + $0x4c] ss:$16 sps:$4 sm:$0xff] (!%p186_p3)   ;;  %v2204_v10 = vld [vmem:[%s3209_s1 + $0x40] ss:$16 sps:$4 sm:$0xff] (!%p186_p3)  }
   0xa   : > { %v2205_v11 = vld [vmem:[%s3209_s1 + $0x48] ss:$16 sps:$4 sm:$0xff] (!%p186_p3)   ;;  %v2206_v12 = vld [vmem:[%s3209_s1 + $0x64] ss:$16 sps:$4 sm:$0xff] (!%p186_p3)   ;;  %v2208_v13 = vld [vmem:[%s3209_s1 + $0x6c] ss:$16 sps:$4 sm:$0xff] (!%p186_p3)  }
   0xb   : > { %v2210_v14 = vld [vmem:[%s3209_s1 + $0x60] ss:$16 sps:$4 sm:$0xff] (!%p186_p3)   ;;  %v2211_v15 = vld [vmem:[%s3209_s1 + $0x68] ss:$16 sps:$4 sm:$0xff] (!%p186_p3)   ;;  %v2212_v16 = vld [vmem:[%s3209_s1 + $0x84] ss:$16 sps:$4 sm:$0xff] (!%p186_p3)  }
   0xc   : > { %1453 = vmatpush1.bf16.msra.mxu0 (!%p186_p3), %v2198_v6  ;;  %1582 = vmatpush1.bf16.msra.mxu1 (!%p186_p3), %v2199_v7  ;;  %v2214_v17 = vld [vmem:[%s3209_s1 + $0x8c] ss:$16 sps:$4 sm:$0xff] (!%p186_p3)   ;;  %v2216_v18 = vld [vmem:[%s3209_s1 + $0x80] ss:$16 sps:$4 sm:$0xff] (!%p186_p3)   ;;  %v2217_v19 = vld [vmem:[%s3209_s1 + $0x88] ss:$16 sps:$4 sm:$0xff] (!%p186_p3)  }
   0xd   : > { %1454 = vmatprep.subr.bf16.mxu0 (!%p186_p3), %v2200_v8  ;;  %1583 = vmatprep.subr.bf16.mxu1 (!%p186_p3), %v2202_v9  ;;  %v2218_v20 = vld [vmem:[%s3209_s1 + $0xa4] ss:$16 sps:$4 sm:$0xff] (!%p186_p3)   ;;  %v2220_v21 = vld [vmem:[%s3209_s1 + $0xac] ss:$16 sps:$4 sm:$0xff] (!%p186_p3)   ;;  %v2222_v22 = vld [vmem:[%s3209_s1 + $0xa0] ss:$16 sps:$4 sm:$0xff] (!%p186_p3)  }
   0xe   : > { %v2223_v23 = vld [vmem:[%s3209_s1 + $0xa8] ss:$16 sps:$4 sm:$0xff]   ;;  %v2224_v24 = vld [vmem:[%s3209_s1 + $0xc4] ss:$16 sps:$4 sm:$0xff]   ;;  %v2226_v25 = vld [vmem:[%s3209_s1 + $0xcc] ss:$16 sps:$4 sm:$0xff]  }
   0xf   : > { %v2228_v26 = vld [vmem:[%s3209_s1 + $0xc0] ss:$16 sps:$4 sm:$0xff]   ;;  %v2229_v27 = vld [vmem:[%s3209_s1 + $0xc8] ss:$16 sps:$4 sm:$0xff]   ;;  %v2230_v28 = vld [vmem:[%s3209_s1 + $0xe4] ss:$16 sps:$4 sm:$0xff]  }
  0x10   : > { %1455 = vmatpush1.bf16.msra.mxu0 %v2204_v10  ;;  %1584 = vmatpush1.bf16.msra.mxu1 %v2205_v11  ;;  %v2232_v29 = vld [vmem:[%s3209_s1 + $0xec] ss:$16 sps:$4 sm:$0xff]   ;;  %v2234_v30 = vld [vmem:[%s3209_s1 + $0xe0] ss:$16 sps:$4 sm:$0xff]   ;;  %v2235_v31 = vld [vmem:[%s3209_s1 + $0xe8] ss:$16 sps:$4 sm:$0xff]  }
  0x11   : > { %1456 = vmatprep.subr.bf16.mxu0 %v2206_v12  ;;  %1585 = vmatprep.subr.bf16.mxu1 %v2208_v13  ;;  %v2236_v32 = vld [vmem:[%s3209_s1 + $0x104] ss:$16 sps:$4 sm:$0xff]   ;;  %v2238_v33 = vld [vmem:[%s3209_s1 + $0x10c] ss:$16 sps:$4 sm:$0xff]   ;;  %v2240_v34 = vld [vmem:[%s3209_s1 + $0x100] ss:$16 sps:$4 sm:$0xff]  }
  0x12   : > { %v2241_v35 = vld [vmem:[%s3209_s1 + $0x108] ss:$16 sps:$4 sm:$0xff]   ;;  %v2242_v36 = vld [vmem:[%s3209_s1 + $0x124] ss:$16 sps:$4 sm:$0xff]   ;;  %s3218_s15 = smov (!%p220_p4, %s2515_s15), 1 }
  0x13   : > { %v2244_v37 = vld [vmem:[%s3209_s1 + $0x12c] ss:$16 sps:$4 sm:$0xff]   ;;  %v2246_v38 = vld [vmem:[%s3209_s1 + $0x120] ss:$16 sps:$4 sm:$0xff]   ;;  %v2247_v39 = vld [vmem:[%s3209_s1 + $0x128] ss:$16 sps:$4 sm:$0xff]  }
  0x14   : > { %1457 = vmatpush1.bf16.msra.mxu0 %v2210_v14  ;;  %1586 = vmatpush1.bf16.msra.mxu1 %v2211_v15  ;;  %v2248_v40 = vld [vmem:[%s3209_s1 + $0x144] ss:$16 sps:$4 sm:$0xff]   ;;  %s2163_s9 = smul.u32 48, %s3218_s15  ;;  %v2250_v41 = vld [vmem:[%s3209_s1 + $0x14c] ss:$16 sps:$4 sm:$0xff]   ;;  %s2134_s30 = sshll.u32 %s3218_s15, 5 }
  0x15   : > { %1458 = vmatprep.subr.bf16.mxu0 %v2212_v16  ;;  %1587 = vmatprep.subr.bf16.mxu1 %v2214_v17  ;;  %v2252_v42 = vld [vmem:[%s3209_s1 + $0x140] ss:$16 sps:$4 sm:$0xff]   ;;  %v2253_v43 = vld [vmem:[%s3209_s1 + $0x148] ss:$16 sps:$4 sm:$0xff]   ;;  %v2254_v44 = vld [vmem:[%s3209_s1 + $0x164] ss:$16 sps:$4 sm:$0xff]  }
  0x16   : > { %s2713_s24 = scalar_lea.vmem %s3208_s0, %s2163_s9  ;;  %v2256_v45 = vld [vmem:[%s3209_s1 + $0x16c] ss:$16 sps:$4 sm:$0xff]   ;;  %v2258_v46 = vld [vmem:[%s3209_s1 + $0x160] ss:$16 sps:$4 sm:$0xff]   ;;  %v2259_v47 = vld [vmem:[%s3209_s1 + $0x168] ss:$16 sps:$4 sm:$0xff]  }
  0x17   : > { %v2286_v48 = vld [vmem:[%s2713_s24 + $0x4] ss:$24 sps:$4 sm:$0xff]   ;;  %v2264_v51 = vld [vmem:[%s3209_s1 + $0x180] ss:$16 sps:$4 sm:$0xff]   ;;  %v2265_v52 = vld [vmem:[%s3209_s1 + $0x188] ss:$16 sps:$4 sm:$0xff]  }
  0x18   : > { %1459 = vmatpush1.bf16.msra.mxu0 %v2216_v18  ;;  %1588 = vmatpush1.bf16.msra.mxu1 %v2217_v19  ;;  %v2260_v49 = vld [vmem:[%s3209_s1 + $0x184] ss:$16 sps:$4 sm:$0xff]   ;;  %v2262_v50 = vld [vmem:[%s3209_s1 + $0x18c] ss:$16 sps:$4 sm:$0xff]   ;;  %v2270_v55 = vld [vmem:[%s3209_s1 + $0x1a0] ss:$16 sps:$4 sm:$0xff]  }
  0x19   : > { %1460 = vmatprep.subr.bf16.mxu0 %v2218_v20  ;;  %1589 = vmatprep.subr.bf16.mxu1 %v2220_v21  ;;  %v2266_v53 = vld [vmem:[%s3209_s1 + $0x1a4] ss:$16 sps:$4 sm:$0xff]   ;;  %v2268_v54 = vld [vmem:[%s3209_s1 + $0x1ac] ss:$16 sps:$4 sm:$0xff]   ;;  %v2271_v56 = vld [vmem:[%s3209_s1 + $0x1a8] ss:$16 sps:$4 sm:$0xff]  }
  0x1a   : > { %1482 = vmatprep.mubr.bf16.mxu0 %v2286_v48  ;;  %1611 = vmatprep.mubr.bf16.mxu1 %v2286_v48  ;;  %v2272_v57 = vld [vmem:[%s3209_s1 + $0x1c4] ss:$16 sps:$4 sm:$0xff]   ;;  %v2274_v58 = vld [vmem:[%s3209_s1 + $0x1cc] ss:$16 sps:$4 sm:$0xff]   ;;  %v2276_v59 = vld [vmem:[%s3209_s1 + $0x1c0] ss:$16 sps:$4 sm:$0xff]  }
  0x1b   : > { %v2277_v60 = vld [vmem:[%s3209_s1 + $0x1c8] ss:$16 sps:$4 sm:$0xff]   ;;  %v2278_v61 = vld [vmem:[%s3209_s1 + $0x1e4] ss:$16 sps:$4 sm:$0xff]   ;;  %v2280_v62 = vld [vmem:[%s3209_s1 + $0x1ec] ss:$16 sps:$4 sm:$0xff]  }
  0x1c   : > { %1461 = vmatpush1.bf16.msra.mxu0 %v2222_v22  ;;  %1590 = vmatpush1.bf16.msra.mxu1 %v2223_v23  ;;  %v2282_v63 = vld [vmem:[%s3209_s1 + $0x1e0] ss:$16 sps:$4 sm:$0xff]   ;;  %v2283_v0 = vld [vmem:[%s3209_s1 + $0x1e8] ss:$16 sps:$4 sm:$0xff]   ;;  %v2289_v1 = vld [vmem:[%s3209_s1 + $0x204] ss:$16 sps:$4 sm:$0xff]  }
  0x1d   : > { %1462 = vmatprep.subr.bf16.mxu0 %v2224_v24  ;;  %1591 = vmatprep.subr.bf16.mxu1 %v2226_v25  ;;  %v2292_v2 = vld [vmem:[%s3209_s1 + $0x20c] ss:$16 sps:$4 sm:$0xff]   ;;  %v2284_v3 = vld [vmem:[%s2713_s24] ss:$24 sps:$4 sm:$0xff]   ;;  %v2295_v6 = vld [vmem:[%s3209_s1 + $0x224] ss:$16 sps:$4 sm:$0xff]  }
  0x1e   : > { %v2287_v4 = vld [vmem:[%s3209_s1 + $0x200] ss:$16 sps:$4 sm:$0xff]   ;;  %v2290_v5 = vld [vmem:[%s3209_s1 + $0x208] ss:$16 sps:$4 sm:$0xff]   ;;  %v2298_v7 = vld [vmem:[%s3209_s1 + $0x22c] ss:$16 sps:$4 sm:$0xff]  }
  0x1f   : > { %v2293_v8 = vld [vmem:[%s3209_s1 + $0x220] ss:$16 sps:$4 sm:$0xff]   ;;  %v2296_v9 = vld [vmem:[%s3209_s1 + $0x228] ss:$16 sps:$4 sm:$0xff]   ;;  %v2301_v10 = vld [vmem:[%s3209_s1 + $0x244] ss:$16 sps:$4 sm:$0xff]  }
  0x20   : > { %1463 = vmatpush1.bf16.msra.mxu0 %v2228_v26  ;;  %1592 = vmatpush1.bf16.msra.mxu1 %v2229_v27  ;;  %v2304_v11 = vld [vmem:[%s3209_s1 + $0x24c] ss:$16 sps:$4 sm:$0xff]   ;;  %v2299_v12 = vld [vmem:[%s3209_s1 + $0x240] ss:$16 sps:$4 sm:$0xff]   ;;  %v2302_v13 = vld [vmem:[%s3209_s1 + $0x248] ss:$16 sps:$4 sm:$0xff]  }
  0x21   : > { %1464 = vmatprep.subr.bf16.mxu0 %v2230_v28  ;;  %1593 = vmatprep.subr.bf16.mxu1 %v2232_v29  ;;  %v2307_v14 = vld [vmem:[%s3209_s1 + $0x264] ss:$16 sps:$4 sm:$0xff]   ;;  %v2310_v15 = vld [vmem:[%s3209_s1 + $0x26c] ss:$16 sps:$4 sm:$0xff]   ;;  %v2305_v16 = vld [vmem:[%s3209_s1 + $0x260] ss:$16 sps:$4 sm:$0xff]  }
  0x22   : > { %v2308_v17 = vld [vmem:[%s3209_s1 + $0x268] ss:$16 sps:$4 sm:$0xff]   ;;  %v2313_v18 = vld [vmem:[%s3209_s1 + $0x284] ss:$16 sps:$4 sm:$0xff]   ;;  %v2316_v19 = vld [vmem:[%s3209_s1 + $0x28c] ss:$16 sps:$4 sm:$0xff]  }
  0x23   : > { %v2311_v20 = vld [vmem:[%s3209_s1 + $0x280] ss:$16 sps:$4 sm:$0xff]   ;;  %v2314_v21 = vld [vmem:[%s3209_s1 + $0x288] ss:$16 sps:$4 sm:$0xff]   ;;  %v2319_v22 = vld [vmem:[%s3209_s1 + $0x2a4] ss:$16 sps:$4 sm:$0xff]  }
  0x24   : > { %1465 = vmatpush1.bf16.msra.mxu0 %v2234_v30  ;;  %1594 = vmatpush1.bf16.msra.mxu1 %v2235_v31  ;;  %v2322_v23 = vld [vmem:[%s3209_s1 + $0x2ac] ss:$16 sps:$4 sm:$0xff]   ;;  %v2317_v24 = vld [vmem:[%s3209_s1 + $0x2a0] ss:$16 sps:$4 sm:$0xff]   ;;  %v2320_v25 = vld [vmem:[%s3209_s1 + $0x2a8] ss:$16 sps:$4 sm:$0xff]  }
  0x25   : > { %1466 = vmatprep.subr.bf16.mxu0 %v2236_v32  ;;  %1595 = vmatprep.subr.bf16.mxu1 %v2238_v33  ;;  %v2325_v26 = vld [vmem:[%s3209_s1 + $0x2c4] ss:$16 sps:$4 sm:$0xff]   ;;  %v2328_v27 = vld [vmem:[%s3209_s1 + $0x2cc] ss:$16 sps:$4 sm:$0xff]   ;;  %v2323_v28 = vld [vmem:[%s3209_s1 + $0x2c0] ss:$16 sps:$4 sm:$0xff]  }
  0x26   : > { %v2326_v29 = vld [vmem:[%s3209_s1 + $0x2c8] ss:$16 sps:$4 sm:$0xff]   ;;  %v2385_v30 = vld [vmem:[%s2713_s24 + $0xc] ss:$24 sps:$4 sm:$0xff]   ;;  %v2329_v33 = vld [vmem:[%s3209_s1 + $0x2e0] ss:$16 sps:$4 sm:$0xff]  }
  0x27   : > { %v2331_v31 = vld [vmem:[%s3209_s1 + $0x2e4] ss:$16 sps:$4 sm:$0xff]   ;;  %v2334_v32 = vld [vmem:[%s3209_s1 + $0x2ec] ss:$16 sps:$4 sm:$0xff]  }
  0x28   : > { %1467 = vmatpush1.bf16.msra.mxu0 %v2240_v34  ;;  %1596 = vmatpush1.bf16.msra.mxu1 %v2241_v35  ;;  %v2332_v34 = vld [vmem:[%s3209_s1 + $0x2e8] ss:$16 sps:$4 sm:$0xff]   ;;  %v2337_v35 = vld [vmem:[%s3209_s1 + $0x304] ss:$16 sps:$4 sm:$0xff]   ;;  %v2358_v48 = vld [vmem:[%s3209_s1 + $0x36c] ss:$16 sps:$4 sm:$0xff]  }
  0x29   : > { %1468 = vmatprep.subr.bf16.mxu0 %v2242_v36  ;;  %1597 = vmatprep.subr.bf16.mxu1 %v2244_v37  ;;  %v2340_v36 = vld [vmem:[%s3209_s1 + $0x30c] ss:$16 sps:$4 sm:$0xff]   ;;  %v2335_v37 = vld [vmem:[%s3209_s1 + $0x300] ss:$16 sps:$4 sm:$0xff]  }
  0x2c   : > { %1469 = vmatpush1.bf16.msra.mxu0 %v2246_v38  ;;  %1598 = vmatpush1.bf16.msra.mxu1 %v2247_v39  ;;  %v2338_v38 = vld [vmem:[%s3209_s1 + $0x308] ss:$16 sps:$4 sm:$0xff]   ;;  %v2343_v39 = vld [vmem:[%s3209_s1 + $0x324] ss:$16 sps:$4 sm:$0xff]  }
  0x2d   : > { %1470 = vmatprep.subr.bf16.mxu0 %v2248_v40  ;;  %1599 = vmatprep.subr.bf16.mxu1 %v2250_v41  ;;  %v2346_v40 = vld [vmem:[%s3209_s1 + $0x32c] ss:$16 sps:$4 sm:$0xff]   ;;  %v2341_v41 = vld [vmem:[%s3209_s1 + $0x320] ss:$16 sps:$4 sm:$0xff]  }
  0x30   : > { %1471 = vmatpush1.bf16.msra.mxu0 %v2252_v42  ;;  %1600 = vmatpush1.bf16.msra.mxu1 %v2253_v43  ;;  %v2344_v42 = vld [vmem:[%s3209_s1 + $0x328] ss:$16 sps:$4 sm:$0xff]   ;;  %v2349_v43 = vld [vmem:[%s3209_s1 + $0x344] ss:$16 sps:$4 sm:$0xff]  }
  0x31   : > { %1472 = vmatprep.subr.bf16.mxu0 %v2254_v44  ;;  %1601 = vmatprep.subr.bf16.mxu1 %v2256_v45  ;;  %v2352_v44 = vld [vmem:[%s3209_s1 + $0x34c] ss:$16 sps:$4 sm:$0xff]   ;;  %v2347_v45 = vld [vmem:[%s3209_s1 + $0x340] ss:$16 sps:$4 sm:$0xff]  }
  0x34   : > { %1473 = vmatpush1.bf16.msra.mxu0 %v2258_v46  ;;  %1602 = vmatpush1.bf16.msra.mxu1 %v2259_v47  ;;  %v2350_v46 = vld [vmem:[%s3209_s1 + $0x348] ss:$16 sps:$4 sm:$0xff]   ;;  %v2355_v47 = vld [vmem:[%s3209_s1 + $0x364] ss:$16 sps:$4 sm:$0xff]  }
  0x35   : > { %1474 = vmatprep.subr.bf16.mxu0 %v2260_v49  ;;  %1603 = vmatprep.subr.bf16.mxu1 %v2262_v50  ;;  %v2353_v49 = vld [vmem:[%s3209_s1 + $0x360] ss:$16 sps:$4 sm:$0xff]   ;;  %v2356_v50 = vld [vmem:[%s3209_s1 + $0x368] ss:$16 sps:$4 sm:$0xff]  }
  0x38   : > { %1475 = vmatpush1.bf16.msra.mxu0 %v2264_v51  ;;  %1604 = vmatpush1.bf16.msra.mxu1 %v2265_v52  ;;  %v2361_v51 = vld [vmem:[%s3209_s1 + $0x384] ss:$16 sps:$4 sm:$0xff]   ;;  %v2364_v52 = vld [vmem:[%s3209_s1 + $0x38c] ss:$16 sps:$4 sm:$0xff]  }
  0x39   : > { %1476 = vmatprep.subr.bf16.mxu0 %v2266_v53  ;;  %1605 = vmatprep.subr.bf16.mxu1 %v2268_v54  ;;  %v2359_v53 = vld [vmem:[%s3209_s1 + $0x380] ss:$16 sps:$4 sm:$0xff]   ;;  %v2362_v54 = vld [vmem:[%s3209_s1 + $0x388] ss:$16 sps:$4 sm:$0xff]  }
  0x3c   : > { %1477 = vmatpush1.bf16.msra.mxu0 %v2270_v55  ;;  %1606 = vmatpush1.bf16.msra.mxu1 %v2271_v56  ;;  %v2367_v55 = vld [vmem:[%s3209_s1 + $0x3a4] ss:$16 sps:$4 sm:$0xff]   ;;  %v2370_v56 = vld [vmem:[%s3209_s1 + $0x3ac] ss:$16 sps:$4 sm:$0xff]  }
  0x3d   : > { %1478 = vmatprep.subr.bf16.mxu0 %v2272_v57  ;;  %1607 = vmatprep.subr.bf16.mxu1 %v2274_v58  ;;  %v2365_v57 = vld [vmem:[%s3209_s1 + $0x3a0] ss:$16 sps:$4 sm:$0xff]   ;;  %v2368_v58 = vld [vmem:[%s3209_s1 + $0x3a8] ss:$16 sps:$4 sm:$0xff]  }
  0x40   : > { %1479 = vmatpush1.bf16.msra.mxu0 %v2276_v59  ;;  %1608 = vmatpush1.bf16.msra.mxu1 %v2277_v60  ;;  %v2373_v59 = vld [vmem:[%s3209_s1 + $0x3c4] ss:$16 sps:$4 sm:$0xff]   ;;  %v2376_v60 = vld [vmem:[%s3209_s1 + $0x3cc] ss:$16 sps:$4 sm:$0xff]  }
  0x41   : > { %1480 = vmatprep.subr.bf16.mxu0 %v2278_v61  ;;  %1609 = vmatprep.subr.bf16.mxu1 %v2280_v62  ;;  %v2371_v61 = vld [vmem:[%s3209_s1 + $0x3c0] ss:$16 sps:$4 sm:$0xff]   ;;  %v2374_v62 = vld [vmem:[%s3209_s1 + $0x3c8] ss:$16 sps:$4 sm:$0xff]  }
  0x44   : > { %1481 = vmatpush1.bf16.msra.mxu0 %v2282_v63  ;;  %1610 = vmatpush1.bf16.msra.mxu1 %v2283_v0  ;;  %v2379_v63 = vld [vmem:[%s3209_s1 + $0x3e4] ss:$16 sps:$4 sm:$0xff]   ;;  %v2382_v0 = vld [vmem:[%s3209_s1 + $0x3ec] ss:$16 sps:$4 sm:$0xff]  }
  0x45   : > { %1493 = vmatprep.subr.bf16.mxu0 %v2289_v1  ;;  %1622 = vmatprep.subr.bf16.mxu1 %v2292_v2  ;;  %v2377_v1 = vld [vmem:[%s3209_s1 + $0x3e0] ss:$16 sps:$4 sm:$0xff]   ;;  %v2380_v2 = vld [vmem:[%s3209_s1 + $0x3e8] ss:$16 sps:$4 sm:$0xff]  }
  0x47   : > { %1483 = vmatmul.mubr.bf16.vlgmr.msra.gmra.mrb[0].mxu0 %v2284_v3  ;;  %1612 = vmatmul.mubr.bf16.vlgmr.msra.gmra.mrb[0].mxu1 %v2284_v3  ;;  %v2388_v3 = vld [vmem:[%s3209_s1 + $0x404] ss:$16 sps:$4 sm:$0xff]  }
  0x48   : > { %1494 = vmatpush1.bf16.msra.mxu0 %v2287_v4  ;;  %1623 = vmatpush1.bf16.msra.mxu1 %v2290_v5  ;;  %v2391_v4 = vld [vmem:[%s3209_s1 + $0x40c] ss:$16 sps:$4 sm:$0xff]   ;;  %v2383_v5 = vld [vmem:[%s2713_s24 + $0x8] ss:$24 sps:$4 sm:$0xff]  }
  0x49   : > { %1495 = vmatprep.subr.bf16.mxu0 %v2295_v6  ;;  %1624 = vmatprep.subr.bf16.mxu1 %v2298_v7  ;;  %v2386_v6 = vld [vmem:[%s3209_s1 + $0x400] ss:$16 sps:$4 sm:$0xff]   ;;  %v2389_v7 = vld [vmem:[%s3209_s1 + $0x408] ss:$16 sps:$4 sm:$0xff]  }
  0x4a   : > { %1525 = vmatprep.mubr.bf16.mxu0 %v2385_v30  ;;  %1654 = vmatprep.mubr.bf16.mxu1 %v2385_v30  ;;  %v2427_v30 = vld [vmem:[%s3209_s1 + $0x4cc] ss:$16 sps:$4 sm:$0xff]  }
  0x4c   : > { %1496 = vmatpush1.bf16.msra.mxu0 %v2293_v8  ;;  %1625 = vmatpush1.bf16.msra.mxu1 %v2296_v9  ;;  %v2394_v8 = vld [vmem:[%s3209_s1 + $0x424] ss:$16 sps:$4 sm:$0xff]   ;;  %v2397_v9 = vld [vmem:[%s3209_s1 + $0x42c] ss:$16 sps:$4 sm:$0xff]  }
  0x4d   : > { %1497 = vmatprep.subr.bf16.mxu0 %v2301_v10  ;;  %1626 = vmatprep.subr.bf16.mxu1 %v2304_v11  ;;  %v2484_v10 = vld [vmem:[%s2713_s24 + $0x14] ss:$24 sps:$4 sm:$0xff]   ;;  %v2392_v11 = vld [vmem:[%s3209_s1 + $0x420] ss:$16 sps:$4 sm:$0xff]  }
  0x50   : > { %1498 = vmatpush1.bf16.msra.mxu0 %v2299_v12  ;;  %1627 = vmatpush1.bf16.msra.mxu1 %v2302_v13  ;;  %v2395_v12 = vld [vmem:[%s3209_s1 + $0x428] ss:$16 sps:$4 sm:$0xff]   ;;  %v2400_v13 = vld [vmem:[%s3209_s1 + $0x444] ss:$16 sps:$4 sm:$0xff]  }
  0x51   : > { %1499 = vmatprep.subr.bf16.mxu0 %v2307_v14  ;;  %1628 = vmatprep.subr.bf16.mxu1 %v2310_v15  ;;  %v2403_v14 = vld [vmem:[%s3209_s1 + $0x44c] ss:$16 sps:$4 sm:$0xff]   ;;  %v2398_v15 = vld [vmem:[%s3209_s1 + $0x440] ss:$16 sps:$4 sm:$0xff]  }
  0x54   : > { %1500 = vmatpush1.bf16.msra.mxu0 %v2305_v16  ;;  %1629 = vmatpush1.bf16.msra.mxu1 %v2308_v17  ;;  %v2401_v16 = vld [vmem:[%s3209_s1 + $0x448] ss:$16 sps:$4 sm:$0xff]   ;;  %v2406_v17 = vld [vmem:[%s3209_s1 + $0x464] ss:$16 sps:$4 sm:$0xff]  }
  0x55   : > { %1501 = vmatprep.subr.bf16.mxu0 %v2313_v18  ;;  %1630 = vmatprep.subr.bf16.mxu1 %v2316_v19  ;;  %v2409_v18 = vld [vmem:[%s3209_s1 + $0x46c] ss:$16 sps:$4 sm:$0xff]   ;;  %v2404_v19 = vld [vmem:[%s3209_s1 + $0x460] ss:$16 sps:$4 sm:$0xff]  }
  0x58   : > { %1502 = vmatpush1.bf16.msra.mxu0 %v2311_v20  ;;  %1631 = vmatpush1.bf16.msra.mxu1 %v2314_v21  ;;  %v2407_v20 = vld [vmem:[%s3209_s1 + $0x468] ss:$16 sps:$4 sm:$0xff]   ;;  %v2412_v21 = vld [vmem:[%s3209_s1 + $0x484] ss:$16 sps:$4 sm:$0xff]  }
  0x59   : > { %1503 = vmatprep.subr.bf16.mxu0 %v2319_v22  ;;  %1632 = vmatprep.subr.bf16.mxu1 %v2322_v23  ;;  %v2415_v22 = vld [vmem:[%s3209_s1 + $0x48c] ss:$16 sps:$4 sm:$0xff]   ;;  %v2410_v23 = vld [vmem:[%s3209_s1 + $0x480] ss:$16 sps:$4 sm:$0xff]  }
  0x5c   : > { %1504 = vmatpush1.bf16.msra.mxu0 %v2317_v24  ;;  %1633 = vmatpush1.bf16.msra.mxu1 %v2320_v25  ;;  %v2413_v24 = vld [vmem:[%s3209_s1 + $0x488] ss:$16 sps:$4 sm:$0xff]   ;;  %v2418_v25 = vld [vmem:[%s3209_s1 + $0x4a4] ss:$16 sps:$4 sm:$0xff]  }
  0x5d   : > { %1505 = vmatprep.subr.bf16.mxu0 %v2325_v26  ;;  %1634 = vmatprep.subr.bf16.mxu1 %v2328_v27  ;;  %v2421_v26 = vld [vmem:[%s3209_s1 + $0x4ac] ss:$16 sps:$4 sm:$0xff]   ;;  %v2416_v27 = vld [vmem:[%s3209_s1 + $0x4a0] ss:$16 sps:$4 sm:$0xff]  }
  0x60   : > { %1506 = vmatpush1.bf16.msra.mxu0 %v2323_v28  ;;  %1635 = vmatpush1.bf16.msra.mxu1 %v2326_v29  ;;  %v2419_v28 = vld [vmem:[%s3209_s1 + $0x4a8] ss:$16 sps:$4 sm:$0xff]   ;;  %v2424_v29 = vld [vmem:[%s3209_s1 + $0x4c4] ss:$16 sps:$4 sm:$0xff]  }
  0x61   : > { %1507 = vmatprep.subr.bf16.mxu0 %v2331_v31  ;;  %1636 = vmatprep.subr.bf16.mxu1 %v2334_v32  ;;  %v2422_v31 = vld [vmem:[%s3209_s1 + $0x4c0] ss:$16 sps:$4 sm:$0xff]   ;;  %v2425_v32 = vld [vmem:[%s3209_s1 + $0x4c8] ss:$16 sps:$4 sm:$0xff]  }
  0x64   : > { %1508 = vmatpush1.bf16.msra.mxu0 %v2329_v33  ;;  %1637 = vmatpush1.bf16.msra.mxu1 %v2332_v34  ;;  %v2430_v33 = vld [vmem:[%s3209_s1 + $0x4e4] ss:$16 sps:$4 sm:$0xff]   ;;  %v2433_v34 = vld [vmem:[%s3209_s1 + $0x4ec] ss:$16 sps:$4 sm:$0xff]  }
  0x65   : > { %1509 = vmatprep.subr.bf16.mxu0 %v2337_v35  ;;  %1638 = vmatprep.subr.bf16.mxu1 %v2340_v36  ;;  %v2428_v35 = vld [vmem:[%s3209_s1 + $0x4e0] ss:$16 sps:$4 sm:$0xff]   ;;  %v2431_v36 = vld [vmem:[%s3209_s1 + $0x4e8] ss:$16 sps:$4 sm:$0xff]  }
  0x68   : > { %1510 = vmatpush1.bf16.msra.mxu0 %v2335_v37  ;;  %1639 = vmatpush1.bf16.msra.mxu1 %v2338_v38  ;;  %v2436_v37 = vld [vmem:[%s3209_s1 + $0x504] ss:$16 sps:$4 sm:$0xff]   ;;  %v2439_v38 = vld [vmem:[%s3209_s1 + $0x50c] ss:$16 sps:$4 sm:$0xff]  }
  0x69   : > { %1511 = vmatprep.subr.bf16.mxu0 %v2343_v39  ;;  %1640 = vmatprep.subr.bf16.mxu1 %v2346_v40  ;;  %v2434_v39 = vld [vmem:[%s3209_s1 + $0x500] ss:$16 sps:$4 sm:$0xff]   ;;  %v2437_v40 = vld [vmem:[%s3209_s1 + $0x508] ss:$16 sps:$4 sm:$0xff]  }
  0x6c   : > { %1512 = vmatpush1.bf16.msra.mxu0 %v2341_v41  ;;  %1641 = vmatpush1.bf16.msra.mxu1 %v2344_v42  ;;  %v2442_v41 = vld [vmem:[%s3209_s1 + $0x524] ss:$16 sps:$4 sm:$0xff]   ;;  %v2445_v42 = vld [vmem:[%s3209_s1 + $0x52c] ss:$16 sps:$4 sm:$0xff]  }
  0x6d   : > { %1513 = vmatprep.subr.bf16.mxu0 %v2349_v43  ;;  %1642 = vmatprep.subr.bf16.mxu1 %v2352_v44  ;;  %v2440_v43 = vld [vmem:[%s3209_s1 + $0x520] ss:$16 sps:$4 sm:$0xff]   ;;  %v2443_v44 = vld [vmem:[%s3209_s1 + $0x528] ss:$16 sps:$4 sm:$0xff]  }
  0x70   : > { %1514 = vmatpush1.bf16.msra.mxu0 %v2347_v45  ;;  %1643 = vmatpush1.bf16.msra.mxu1 %v2350_v46  ;;  %v2448_v45 = vld [vmem:[%s3209_s1 + $0x544] ss:$16 sps:$4 sm:$0xff]   ;;  %v2451_v46 = vld [vmem:[%s3209_s1 + $0x54c] ss:$16 sps:$4 sm:$0xff]  }
  0x71   : > { %1515 = vmatprep.subr.bf16.mxu0 %v2355_v47  ;;  %1644 = vmatprep.subr.bf16.mxu1 %v2358_v48  ;;  %v2446_v47 = vld [vmem:[%s3209_s1 + $0x540] ss:$16 sps:$4 sm:$0xff]   ;;  %v2449_v48 = vld [vmem:[%s3209_s1 + $0x548] ss:$16 sps:$4 sm:$0xff]  }
  0x74   : > { %1516 = vmatpush1.bf16.msra.mxu0 %v2353_v49  ;;  %1645 = vmatpush1.bf16.msra.mxu1 %v2356_v50  ;;  %v2454_v49 = vld [vmem:[%s3209_s1 + $0x564] ss:$16 sps:$4 sm:$0xff]   ;;  %v2457_v50 = vld [vmem:[%s3209_s1 + $0x56c] ss:$16 sps:$4 sm:$0xff]  }
  0x75   : > { %1517 = vmatprep.subr.bf16.mxu0 %v2361_v51  ;;  %1646 = vmatprep.subr.bf16.mxu1 %v2364_v52  ;;  %v2452_v51 = vld [vmem:[%s3209_s1 + $0x560] ss:$16 sps:$4 sm:$0xff]   ;;  %v2455_v52 = vld [vmem:[%s3209_s1 + $0x568] ss:$16 sps:$4 sm:$0xff]  }
  0x78   : > { %1518 = vmatpush1.bf16.msra.mxu0 %v2359_v53  ;;  %1647 = vmatpush1.bf16.msra.mxu1 %v2362_v54  ;;  %v2460_v53 = vld [vmem:[%s3209_s1 + $0x584] ss:$16 sps:$4 sm:$0xff]   ;;  %v2463_v54 = vld [vmem:[%s3209_s1 + $0x58c] ss:$16 sps:$4 sm:$0xff]  }
  0x79   : > { %1519 = vmatprep.subr.bf16.mxu0 %v2367_v55  ;;  %1648 = vmatprep.subr.bf16.mxu1 %v2370_v56  ;;  %v2458_v55 = vld [vmem:[%s3209_s1 + $0x580] ss:$16 sps:$4 sm:$0xff]   ;;  %v2461_v56 = vld [vmem:[%s3209_s1 + $0x588] ss:$16 sps:$4 sm:$0xff]  }
  0x7c   : > { %1520 = vmatpush1.bf16.msra.mxu0 %v2365_v57  ;;  %1649 = vmatpush1.bf16.msra.mxu1 %v2368_v58  ;;  %v2466_v57 = vld [vmem:[%s3209_s1 + $0x5a4] ss:$16 sps:$4 sm:$0xff]   ;;  %v2469_v58 = vld [vmem:[%s3209_s1 + $0x5ac] ss:$16 sps:$4 sm:$0xff]  }
  0x7d   : > { %1521 = vmatprep.subr.bf16.mxu0 %v2373_v59  ;;  %1650 = vmatprep.subr.bf16.mxu1 %v2376_v60  ;;  %v2464_v59 = vld [vmem:[%s3209_s1 + $0x5a0] ss:$16 sps:$4 sm:$0xff]   ;;  %v2467_v60 = vld [vmem:[%s3209_s1 + $0x5a8] ss:$16 sps:$4 sm:$0xff]  }
  0x80   : > { %1522 = vmatpush1.bf16.msra.mxu0 %v2371_v61  ;;  %1651 = vmatpush1.bf16.msra.mxu1 %v2374_v62  ;;  %v2472_v61 = vld [vmem:[%s3209_s1 + $0x5c4] ss:$16 sps:$4 sm:$0xff]   ;;  %v2475_v62 = vld [vmem:[%s3209_s1 + $0x5cc] ss:$16 sps:$4 sm:$0xff]  }
  0x81   : > { %1523 = vmatprep.subr.bf16.mxu0 %v2379_v63  ;;  %1652 = vmatprep.subr.bf16.mxu1 %v2382_v0  ;;  %v2470_v63 = vld [vmem:[%s3209_s1 + $0x5c0] ss:$16 sps:$4 sm:$0xff]   ;;  %v2473_v0 = vld [vmem:[%s3209_s1 + $0x5c8] ss:$16 sps:$4 sm:$0xff]  }
  0x84   : > { %1524 = vmatpush1.bf16.msra.mxu0 %v2377_v1  ;;  %1653 = vmatpush1.bf16.msra.mxu1 %v2380_v2  ;;  %v2478_v1 = vld [vmem:[%s3209_s1 + $0x5e4] ss:$16 sps:$4 sm:$0xff]   ;;  %v2481_v2 = vld [vmem:[%s3209_s1 + $0x5ec] ss:$16 sps:$4 sm:$0xff]  }
  0x85   : > { %1536 = vmatprep.subr.bf16.mxu0 %v2388_v3  ;;  %1665 = vmatprep.subr.bf16.mxu1 %v2391_v4  ;;  %v2476_v3 = vld [vmem:[%s3209_s1 + $0x5e0] ss:$16 sps:$4 sm:$0xff]   ;;  %v2479_v4 = vld [vmem:[%s3209_s1 + $0x5e8] ss:$16 sps:$4 sm:$0xff]  }
  0x87   : > { %1526 = vmatmul.mubr.bf16.vlgmr.msra.gmra.mrb[0].mxu0 %v2383_v5  ;;  %1655 = vmatmul.mubr.bf16.vlgmr.msra.gmra.mrb[0].mxu1 %v2383_v5  ;;  %v2482_v5 = vld [vmem:[%s2713_s24 + $0x10] ss:$24 sps:$4 sm:$0xff]   ;;  %s1919_s24 = sshll.u32 %s3218_s15, 2  ;;  %s238_s15 = scalar_lea.vmem %s3212_s4, %s2134_s30 }
  0x88   : > { %1537 = vmatpush1.bf16.msra.mxu0 %v2386_v6  ;;  %1666 = vmatpush1.bf16.msra.mxu1 %v2389_v7  ;;  %v440_v6 = vlaneseq  ;;  %s228_s29 = scalar_lea.vmem %s3211_s3, %s1919_s24 }
  0x89   : > { %1538 = vmatprep.subr.bf16.mxu0 %v2394_v8  ;;  %1667 = vmatprep.subr.bf16.mxu1 %v2397_v9 }
  0x8a   : > { %1568 = vmatprep.mubr.bf16.mxu0 %v2484_v10  ;;  %1697 = vmatprep.mubr.bf16.mxu1 %v2484_v10  ;;  %v3162_v7 = vshrl.u32 %v440_v6, 7  ;;  %v438_v10 = vld [vmem:[%s3210_s2] sm:$0xf] }
  0x8c   : > { %1539 = vmatpush1.bf16.msra.mxu0 %v2392_v11  ;;  %1668 = vmatpush1.bf16.msra.mxu1 %v2395_v12  ;;  %v442_v8 = vsub.s32 0, %v3162_v7  ;;  %v450_v9 = vsub.s32 2, %v3162_v7  ;;  %v446_v11 = vsub.s32 1, %v3162_v7  ;;  %v454_v12 = vsub.s32 3, %v3162_v7 }
  0x8d   : > { %1540 = vmatprep.subr.bf16.mxu0 %v2400_v13  ;;  %1669 = vmatprep.subr.bf16.mxu1 %v2403_v14 }
  0x8e   : > { %v443_v13 = vrot.slane %v438_v10, %v442_v8  ;;  %v451_v14 = vrot.slane %v438_v10, %v450_v9 }
  0x90   : > { %1541 = vmatpush1.bf16.msra.mxu0 %v2398_v15  ;;  %1670 = vmatpush1.bf16.msra.mxu1 %v2401_v16  ;;  %v447_v15 = vrot.slane %v438_v10, %v446_v11  ;;  %v455_v16 = vrot.slane %v438_v10, %v454_v12 }
  0x91   : > { %1542 = vmatprep.subr.bf16.mxu0 %v2406_v17  ;;  %1671 = vmatprep.subr.bf16.mxu1 %v2409_v18 }
  0x94   : > { %1543 = vmatpush1.bf16.msra.mxu0 %v2404_v19  ;;  %1672 = vmatpush1.bf16.msra.mxu1 %v2407_v20 }
  0x95   : > { %1544 = vmatprep.subr.bf16.mxu0 %v2412_v21  ;;  %1673 = vmatprep.subr.bf16.mxu1 %v2415_v22 }
  0x98   : > { %1545 = vmatpush1.bf16.msra.mxu0 %v2410_v23  ;;  %1674 = vmatpush1.bf16.msra.mxu1 %v2413_v24 }
  0x99   : > { %1546 = vmatprep.subr.bf16.mxu0 %v2418_v25  ;;  %1675 = vmatprep.subr.bf16.mxu1 %v2421_v26 }
  0x9c   : > { %1547 = vmatpush1.bf16.msra.mxu0 %v2416_v27  ;;  %1676 = vmatpush1.bf16.msra.mxu1 %v2419_v28 }
  0x9d   : > { %1548 = vmatprep.subr.bf16.mxu0 %v2424_v29  ;;  %1677 = vmatprep.subr.bf16.mxu1 %v2427_v30 }
  0xa0   : > { %1549 = vmatpush1.bf16.msra.mxu0 %v2422_v31  ;;  %1678 = vmatpush1.bf16.msra.mxu1 %v2425_v32 }
  0xa1   : > { %1550 = vmatprep.subr.bf16.mxu0 %v2430_v33  ;;  %1679 = vmatprep.subr.bf16.mxu1 %v2433_v34 }
  0xa4   : > { %1551 = vmatpush1.bf16.msra.mxu0 %v2428_v35  ;;  %1680 = vmatpush1.bf16.msra.mxu1 %v2431_v36 }
  0xa5   : > { %1552 = vmatprep.subr.bf16.mxu0 %v2436_v37  ;;  %1681 = vmatprep.subr.bf16.mxu1 %v2439_v38 }
  0xa8   : > { %1553 = vmatpush1.bf16.msra.mxu0 %v2434_v39  ;;  %1682 = vmatpush1.bf16.msra.mxu1 %v2437_v40 }
  0xa9   : > { %1554 = vmatprep.subr.bf16.mxu0 %v2442_v41  ;;  %1683 = vmatprep.subr.bf16.mxu1 %v2445_v42 }
  0xac   : > { %1555 = vmatpush1.bf16.msra.mxu0 %v2440_v43  ;;  %1684 = vmatpush1.bf16.msra.mxu1 %v2443_v44 }
  0xad   : > { %1556 = vmatprep.subr.bf16.mxu0 %v2448_v45  ;;  %1685 = vmatprep.subr.bf16.mxu1 %v2451_v46 }
  0xb0   : > { %1557 = vmatpush1.bf16.msra.mxu0 %v2446_v47  ;;  %1686 = vmatpush1.bf16.msra.mxu1 %v2449_v48 }
  0xb1   : > { %1558 = vmatprep.subr.bf16.mxu0 %v2454_v49  ;;  %1687 = vmatprep.subr.bf16.mxu1 %v2457_v50  ;;  %v1756_v49 = vld [vmem:[%s228_s29] sm:$0xf] }
  0xb4   : > { %1559 = vmatpush1.bf16.msra.mxu0 %v2452_v51  ;;  %1688 = vmatpush1.bf16.msra.mxu1 %v2455_v52  ;;  %v1761_v51 = vrot.slane %v1756_v49, %v442_v8 }
  0xb5   : > { %1560 = vmatprep.subr.bf16.mxu0 %v2460_v53  ;;  %1689 = vmatprep.subr.bf16.mxu1 %v2463_v54  ;;  %v1769_v54 = vrot.slane %v1756_v49, %v450_v9 }
  0xb8   : > { %1561 = vmatpush1.bf16.msra.mxu0 %v2458_v55  ;;  %1690 = vmatpush1.bf16.msra.mxu1 %v2461_v56 }
  0xb9   : > { %1562 = vmatprep.subr.bf16.mxu0 %v2466_v57  ;;  %1691 = vmatprep.subr.bf16.mxu1 %v2469_v58  ;;  %v1765_v57 = vrot.slane %v1756_v49, %v446_v11  ;;  %v1773_v58 = vrot.slane %v1756_v49, %v454_v12 }
  0xbc   : > { %1563 = vmatpush1.bf16.msra.mxu0 %v2464_v59  ;;  %1692 = vmatpush1.bf16.msra.mxu1 %v2467_v60 }
  0xbd   : > { %1564 = vmatprep.subr.bf16.mxu0 %v2472_v61  ;;  %1693 = vmatprep.subr.bf16.mxu1 %v2475_v62 }
  0xc0   : > { %1565 = vmatpush1.bf16.msra.mxu0 %v2470_v63  ;;  %1694 = vmatpush1.bf16.msra.mxu1 %v2473_v0 }
  0xc1   : > { %1566 = vmatprep.subr.bf16.mxu0 %v2478_v1  ;;  %1695 = vmatprep.subr.bf16.mxu1 %v2481_v2 }
  0xc4   : > { %1567 = vmatpush1.bf16.msra.mxu0 %v2476_v3  ;;  %1696 = vmatpush1.bf16.msra.mxu1 %v2479_v4 }
  0xc7   : > { %1569 = vmatmul.mubr.bf16.vlgmr.msra.gmra.mrb[0].mxu0 %v2482_v5  ;;  %1698 = vmatmul.mubr.bf16.vlgmr.msra.gmra.mrb[0].mxu1 %v2482_v5 }
 0x19a   : > { %v1570_v17 = vpop.f32.mrb[0].mxu0  ;;  %v1699_v18 = vpop.f32.mrb[0].mxu1 }
 0x19b   : > { %v2139_v19 = vadd.f32 %v1570_v17, %v443_v13  ;;  %v2143_v20 = vadd.f32 %v1699_v18, %v451_v14  ;;  %v1572_v21 = vpop.f32.mrb[1].mxu0  ;;  %v1701_v22 = vpop.f32.mrb[1].mxu1 }
 0x19c   : > { %v2140_v23 = vadd.f32 %v1572_v21, %v447_v15  ;;  %v3171_v24 = vadd.f32 %v1701_v22, %v455_v16  ;;  %v1574_v25 = vpop.f32.mrb[2].mxu0  ;;  %v1703_v26 = vpop.f32.mrb[2].mxu1 }
 0x19d   : > { %v1716_v27 = vmin.f32 %v2139_v19, 0.0  ;;  %v1718_v28 = vmin.f32 %v2143_v20, 0.0  ;;  %v1576_v29 = vpop.f32.mrb[3].mxu0  ;;  %v1705_v30 = vpop.f32.mrb[3].mxu1  ;;  %v2141_v35 = vadd.f32 %v1574_v25, %v443_v13  ;;  %v3174_v36 = vadd.f32 %v1703_v26, %v451_v14 }
 0x19e   : > { %v1717_v31 = vmin.f32 %v2140_v23, 0.0  ;;  %v1719_v32 = vmin.f32 %v3171_v24, 0.0  ;;  %v3176_v39 = vadd.f32 %v1576_v29, %v447_v15  ;;  %v3178_v40 = vadd.f32 %v1705_v30, %v455_v16 }
 0x19f   : > { %v1724_v33 = vmul.f32 1.442695, %v1716_v27  ;;  %v1728_v34 = vmul.f32 1.442695, %v1718_v28  ;;  %v1720_v41 = vmin.f32 %v2141_v35, 0.0  ;;  %v1722_v42 = vmin.f32 %v3174_v36, 0.0 }
 0x1a0   : > { %v1726_v37 = vmul.f32 1.442695, %v1717_v31  ;;  %v1730_v38 = vmul.f32 1.442695, %v1719_v32  ;;  %v1721_v43 = vmin.f32 %v3176_v39, 0.0  ;;  %v1723_v45 = vmin.f32 %v3178_v40, 0.0 }
 0x1a1   : > { %2485 = vpow2.f32 %v1724_v33  ;;  %v1732_v44 = vmul.f32 1.442695, %v1720_v41  ;;  %v1736_v46 = vmul.f32 1.442695, %v1722_v42  ;;  %vm1708_vm0 = vcmp.gt.f32.partialorder %v2139_v19, 0.0 }
 0x1a2   : > { %2487 = vpow2.f32 %v1728_v34  ;;  %v1734_v47 = vmul.f32 1.442695, %v1721_v43  ;;  %v1738_v48 = vmul.f32 1.442695, %v1723_v45  ;;  %vm1710_vm1 = vcmp.gt.f32.partialorder %v2143_v20, 0.0 }
 0x1a3   : > { %2489 = vpow2.f32 %v1726_v37  ;;  %vm1709_vm2 = vcmp.gt.f32.partialorder %v2140_v23, 0.0  ;;  %vm1711_vm3 = vcmp.gt.f32.partialorder %v3171_v24, 0.0  ;;  %vm1712_vm4 = vcmp.gt.f32.partialorder %v2141_v35, 0.0 }
 0x1a4   : > { %2491 = vpow2.f32 %v1730_v38  ;;  %vm1714_vm5 = vcmp.gt.f32.partialorder %v3174_v36, 0.0  ;;  %vm1713_vm6 = vcmp.gt.f32.partialorder %v3176_v39, 0.0  ;;  %vm1715_vm7 = vcmp.gt.f32.partialorder %v3178_v40, 0.0 }
 0x1a5   : > { %2493 = vpow2.f32 %v1732_v44 }
 0x1a6   : > { %2495 = vpow2.f32 %v1736_v46 }
 0x1a7   : > { %2497 = vpow2.f32 %v1734_v47 }
 0x1a8   : > { %2499 = vpow2.f32 %v1738_v48 }
 0x1ab   : > { %v2486_v50 = vpop.eup %2485 }
 0x1ac   : > { %v2488_v52 = vpop.eup %2487  ;;  %v2120_v53 = vadd.f32 -1.0, %v2486_v50 }
 0x1ad   : > { %v2490_v55 = vpop.eup %2489  ;;  %v2122_v56 = vadd.f32 -1.0, %v2488_v52 }
 0x1ae   : > { %v2492_v59 = vpop.eup %2491  ;;  %v1748_v60 = vsel %vm1708_vm0, %v2139_v19, %v2120_v53  ;;  %v2121_v61 = vadd.f32 -1.0, %v2490_v55 }
 0x1af   : > { %v2494_v62 = vpop.eup %2493  ;;  %v1778_v63 = vadd.f32 %v1761_v51, %v1748_v60  ;;  %v1750_v0 = vsel %vm1710_vm1, %v2143_v20, %v2122_v56  ;;  %v2123_v1 = vadd.f32 -1.0, %v2492_v59 }
 0x1b0   : > { %v2496_v2 = vpop.eup %2495  ;;  %v1780_v3 = vadd.f32 %v1769_v54, %v1750_v0  ;;  %v1749_v4 = vsel %vm1709_vm2, %v2140_v23, %v2121_v61  ;;  %v2124_v5 = vadd.f32 -1.0, %v2494_v62 }
 0x1b1   : > { %v2498_v6 = vpop.eup %2497  ;;  %v1779_v7 = vadd.f32 %v1765_v57, %v1749_v4  ;;  %v1751_v8 = vsel %vm1711_vm3, %v3171_v24, %v2123_v1  ;;  %v2126_v9 = vadd.f32 -1.0, %v2496_v2 }
 0x1b2   : > { %v2500_v10 = vpop.eup %2499  ;;  %v1781_v11 = vadd.f32 %v1773_v58, %v1751_v8  ;;  %v1752_v12 = vsel %vm1712_vm4, %v2141_v35, %v2124_v5  ;;  %v2125_v13 = vadd.f32 -1.0, %v2498_v6 }
 0x1b3   : > { %v2135_v14 = vpack.c.bf16 %v1779_v7, %v1778_v63  ;;  %v1782_v15 = vadd.f32 %v1761_v51, %v1752_v12  ;;  %v1754_v16 = vsel %vm1714_vm5, %v3174_v36, %v2126_v9  ;;  %v2127_v17 = vadd.f32 -1.0, %v2500_v10 }
 0x1b4   : > { %v2136_v18 = vpack.c.bf16 %v1781_v11, %v1780_v3  ;;  %v1784_v19 = vadd.f32 %v1769_v54, %v1754_v16  ;;  %v1753_v20 = vsel %vm1713_vm6, %v3176_v39, %v2125_v13 }
 0x1b5   : > { %1810 = vst [vmem:[%s238_s15] sm:$0xff] %v2135_v14  ;;  %v1783_v21 = vadd.f32 %v1765_v57, %v1753_v20  ;;  %v1755_v22 = vsel %vm1715_vm7, %v3178_v40, %v2127_v17 }
 0x1b6   : > { %1811 = vst [vmem:[%s238_s15 + $0x8] sm:$0xff] %v2136_v18  ;;  %v1785_v23 = vadd.f32 %v1773_v58, %v1755_v22 }
 0x1b7   : > { %v2137_v24 = vpack.c.bf16 %v1783_v21, %v1782_v15 }
 0x1b8   : > { %v2138_v25 = vpack.c.bf16 %v1785_v23, %v1784_v19 }
 0x1b9   : > { %1812 = vst [vmem:[%s238_s15 + $0x10] sm:$0xff] %v2137_v24 }
 0x1ba   : > { %1813 = vst [vmem:[%s238_s15 + $0x18] sm:$0xff] %v2138_v25 }
 0x1bb PF: > { %s14_s17 = sadd.s32 1, %s2523_s17   ;;  %s3213_s15 = smov %s2519_s16 }
 0x1bc   : > { %p11_p5 = scmp.ge.s32.totalorder %s14_s17, 4   ;;  %s3214_s16 = smov %s3216_s18 }
 0x1be   :  { %13 = sbr.rel (!%p11_p5) target bundleno = 2 (0x2), region = 69 }

// kernel: dito_trainer_forward.35
= control target key start
LH: loop header
LB: loop body
LE: loop exit
PB: predicated region body
PF: predicated region fallthrough
CT: control target
= control target key end

     0   :  { %s4473_s12 = smov 0   ;;  %s4475_s13 = smov 0   ;;  %s5759_s0 = inlined_call_operand.vmem [shape: bf16[2,18,512], index: 0, kind: input, shape index: {}]   ;;  %s5760_s1 = inlined_call_operand.vmem [shape: bf16[1536,512], index: 1, kind: input, shape index: {}]   ;;  %s5761_s2 = inlined_call_operand.vmem [shape: f32[1,512], index: 2, kind: input, shape index: {}]   ;;  %s5762_s3 = inlined_call_operand.vmem [shape: bf16[2,16,512], index: 3, kind: output, shape index: {}]  }
   0x1   :  { %s4477_s14 = smov 0  }
   0x2 LB: > { %s25_s15 = sadd.s32 1, %s4447_s13  ;;  %p3339_p0 = scmp.ge.s32.totalorder %s4451_s14, 1  ;;  %s4451_s14 = sphi %s4477_s14, %s13_s14   ;;  %s4447_s13 = sphi %s4475_s13, %s5764_s13   ;;  %s4443_s12 = sphi %s4473_s12, %s5763_s12  }
   0x3   : > { %p27_p1 = scmp.ge.s32.totalorder %s25_s15, 2  ;;  %p151_p2 = scmp.lt.s32.totalorder %s4451_s14, 3 }
   0x5   : > { %s5766_s15 = smov (%p27_p1, %s25_s15), 0  ;;  %p152_p3 = pnand %p3339_p0, %p151_p2 }
   0x6   : > { %v3823_v0 = vld [vmem:[%s5760_s1 + $0x404] ss:$16 sps:$4 sm:$0xff] (!%p152_p3)   ;;  %v3825_v1 = vld [vmem:[%s5760_s1 + $0x40c] ss:$16 sps:$4 sm:$0xff] (!%p152_p3)   ;;  %v3827_v2 = vld [vmem:[%s5760_s1 + $0x400] ss:$16 sps:$4 sm:$0xff] (!%p152_p3)  }
   0x7   : > { %155 = sbr.rel (%p152_p3) target bundleno = 633 (0x279), region = 32  ;;  %1177 = vmatprep.subr.bf16.mxu0 (!%p152_p3), %v3823_v0  ;;  %v3828_v3 = vld [vmem:[%s5760_s1 + $0x408] ss:$16 sps:$4 sm:$0xff] (!%p152_p3)   ;;  %1263 = vmatprep.subr.bf16.mxu1 (!%p152_p3), %v3825_v1  ;;  %v3829_v4 = vld [vmem:[%s5760_s1 + $0x424] ss:$16 sps:$4 sm:$0xff] (!%p152_p3)   ;;  %p180_p4 = scmp.lt.s32.totalorder (!%p152_p3), %s4443_s12, 1 }
   0x8   : > { %1178 = vmatpush1.bf16.msra.mxu0 (!%p152_p3), %v3827_v2  ;;  %1264 = vmatpush1.bf16.msra.mxu1 (!%p152_p3), %v3828_v3  ;;  %v3831_v5 = vld [vmem:[%s5760_s1 + $0x42c] ss:$16 sps:$4 sm:$0xff] (!%p152_p3)   ;;  %v3833_v6 = vld [vmem:[%s5760_s1 + $0x420] ss:$16 sps:$4 sm:$0xff] (!%p152_p3)   ;;  %v3834_v7 = vld [vmem:[%s5760_s1 + $0x428] ss:$16 sps:$4 sm:$0xff] (!%p152_p3)  }
   0x9   : > { %1179 = vmatprep.subr.bf16.mxu0 (!%p152_p3), %v3829_v4  ;;  %1265 = vmatprep.subr.bf16.mxu1 (!%p152_p3), %v3831_v5  ;;  %v3835_v8 = vld [vmem:[%s5760_s1 + $0x444] ss:$16 sps:$4 sm:$0xff] (!%p152_p3)   ;;  %v3837_v9 = vld [vmem:[%s5760_s1 + $0x44c] ss:$16 sps:$4 sm:$0xff] (!%p152_p3)   ;;  %v3839_v10 = vld [vmem:[%s5760_s1 + $0x440] ss:$16 sps:$4 sm:$0xff] (!%p152_p3)  }
   0xa   : > { %v3840_v11 = vld [vmem:[%s5760_s1 + $0x448] ss:$16 sps:$4 sm:$0xff] (!%p152_p3)   ;;  %v3841_v12 = vld [vmem:[%s5760_s1 + $0x464] ss:$16 sps:$4 sm:$0xff] (!%p152_p3)   ;;  %v3843_v13 = vld [vmem:[%s5760_s1 + $0x46c] ss:$16 sps:$4 sm:$0xff] (!%p152_p3)  }
   0xb   : > { %v3845_v14 = vld [vmem:[%s5760_s1 + $0x460] ss:$16 sps:$4 sm:$0xff] (!%p152_p3)   ;;  %v3846_v15 = vld [vmem:[%s5760_s1 + $0x468] ss:$16 sps:$4 sm:$0xff] (!%p152_p3)   ;;  %v3847_v16 = vld [vmem:[%s5760_s1 + $0x484] ss:$16 sps:$4 sm:$0xff] (!%p152_p3)  }
   0xc   : > { %1180 = vmatpush1.bf16.msra.mxu0 (!%p152_p3), %v3833_v6  ;;  %1266 = vmatpush1.bf16.msra.mxu1 (!%p152_p3), %v3834_v7  ;;  %v3849_v17 = vld [vmem:[%s5760_s1 + $0x48c] ss:$16 sps:$4 sm:$0xff] (!%p152_p3)   ;;  %v3851_v18 = vld [vmem:[%s5760_s1 + $0x480] ss:$16 sps:$4 sm:$0xff] (!%p152_p3)   ;;  %v3852_v19 = vld [vmem:[%s5760_s1 + $0x488] ss:$16 sps:$4 sm:$0xff] (!%p152_p3)  }
   0xd   : > { %1181 = vmatprep.subr.bf16.mxu0 (!%p152_p3), %v3835_v8  ;;  %1267 = vmatprep.subr.bf16.mxu1 (!%p152_p3), %v3837_v9  ;;  %v3853_v20 = vld [vmem:[%s5760_s1 + $0x4a4] ss:$16 sps:$4 sm:$0xff] (!%p152_p3)   ;;  %v3855_v21 = vld [vmem:[%s5760_s1 + $0x4ac] ss:$16 sps:$4 sm:$0xff] (!%p152_p3)   ;;  %v3857_v22 = vld [vmem:[%s5760_s1 + $0x4a0] ss:$16 sps:$4 sm:$0xff] (!%p152_p3)  }
   0xe   : > { %v3858_v23 = vld [vmem:[%s5760_s1 + $0x4a8] ss:$16 sps:$4 sm:$0xff]   ;;  %v3859_v24 = vld [vmem:[%s5760_s1 + $0x4c4] ss:$16 sps:$4 sm:$0xff]   ;;  %v3861_v25 = vld [vmem:[%s5760_s1 + $0x4cc] ss:$16 sps:$4 sm:$0xff]  }
   0xf   : > { %v3863_v26 = vld [vmem:[%s5760_s1 + $0x4c0] ss:$16 sps:$4 sm:$0xff]   ;;  %v3864_v27 = vld [vmem:[%s5760_s1 + $0x4c8] ss:$16 sps:$4 sm:$0xff]   ;;  %v3865_v28 = vld [vmem:[%s5760_s1 + $0x4e4] ss:$16 sps:$4 sm:$0xff]  }
  0x10   : > { %1182 = vmatpush1.bf16.msra.mxu0 %v3839_v10  ;;  %1268 = vmatpush1.bf16.msra.mxu1 %v3840_v11  ;;  %v3867_v29 = vld [vmem:[%s5760_s1 + $0x4ec] ss:$16 sps:$4 sm:$0xff]   ;;  %v3869_v30 = vld [vmem:[%s5760_s1 + $0x4e0] ss:$16 sps:$4 sm:$0xff]   ;;  %v3870_v31 = vld [vmem:[%s5760_s1 + $0x4e8] ss:$16 sps:$4 sm:$0xff]  }
  0x11   : > { %1183 = vmatprep.subr.bf16.mxu0 %v3841_v12  ;;  %1269 = vmatprep.subr.bf16.mxu1 %v3843_v13  ;;  %v3871_v32 = vld [vmem:[%s5760_s1 + $0x504] ss:$16 sps:$4 sm:$0xff]   ;;  %v3873_v33 = vld [vmem:[%s5760_s1 + $0x50c] ss:$16 sps:$4 sm:$0xff]   ;;  %v3875_v34 = vld [vmem:[%s5760_s1 + $0x500] ss:$16 sps:$4 sm:$0xff]  }
  0x12   : > { %v3876_v35 = vld [vmem:[%s5760_s1 + $0x508] ss:$16 sps:$4 sm:$0xff]   ;;  %s5768_s12 = smov (!%p180_p4, %s4443_s12), 1  ;;  %v3877_v36 = vld [vmem:[%s5760_s1 + $0x524] ss:$16 sps:$4 sm:$0xff]   ;;  %vm2305_vm1 = vcmask 1046528  }
  0x13   : > { %v3879_v37 = vld [vmem:[%s5760_s1 + $0x52c] ss:$16 sps:$4 sm:$0xff]   ;;  %v3881_v38 = vld [vmem:[%s5760_s1 + $0x520] ss:$16 sps:$4 sm:$0xff]   ;;  %s3798_s25 = smul.u32 48, %s5768_s12  ;;  %s3753_s5 = sshll.u32 %s5768_s12, 5 }
  0x14   : > { %1184 = vmatpush1.bf16.msra.mxu0 %v3845_v14  ;;  %1270 = vmatpush1.bf16.msra.mxu1 %v3846_v15  ;;  %v3882_v39 = vld [vmem:[%s5760_s1 + $0x528] ss:$16 sps:$4 sm:$0xff]   ;;  %v3883_v40 = vld [vmem:[%s5760_s1 + $0x544] ss:$16 sps:$4 sm:$0xff]   ;;  %v3885_v41 = vld [vmem:[%s5760_s1 + $0x54c] ss:$16 sps:$4 sm:$0xff]   ;;  %s194_s8 = scalar_lea.vmem %s5762_s3, %s3753_s5 }
  0x15   : > { %1185 = vmatprep.subr.bf16.mxu0 %v3847_v16  ;;  %1271 = vmatprep.subr.bf16.mxu1 %v3849_v17  ;;  %v3887_v42 = vld [vmem:[%s5760_s1 + $0x540] ss:$16 sps:$4 sm:$0xff]   ;;  %v3888_v43 = vld [vmem:[%s5760_s1 + $0x548] ss:$16 sps:$4 sm:$0xff]   ;;  %s4633_s11 = scalar_lea.vmem %s5759_s0, %s3798_s25  ;;  %v3889_v44 = vld [vmem:[%s5760_s1 + $0x564] ss:$16 sps:$4 sm:$0xff]  }
  0x16   : > { %v3891_v45 = vld [vmem:[%s5760_s1 + $0x56c] ss:$16 sps:$4 sm:$0xff]   ;;  %v3893_v46 = vld [vmem:[%s5760_s1 + $0x560] ss:$16 sps:$4 sm:$0xff]   ;;  %v3894_v50 = vld [vmem:[%s5760_s1 + $0x568] ss:$16 sps:$4 sm:$0xff]  }
  0x17   : > { %v196_v47 = vld [vmem:[%s4633_s11] sm:$0xff]  ;;  %v198_v48 = vld [vmem:[%s4633_s11 + $0x10] sm:$0xff]  ;;  %v3897_v54 = vld [vmem:[%s5760_s1 + $0x58c] ss:$16 sps:$4 sm:$0xff]   ;;  %vm484_vm0 = vsmask.f32 7424 }
  0x18   : > { %1186 = vmatpush1.bf16.msra.mxu0 %v3851_v18  ;;  %1272 = vmatpush1.bf16.msra.mxu1 %v3852_v19  ;;  %v328_v49 = vld [vmem:[%s4633_s11 + $0x20] sm:$0x11]  ;;  %v4653_v52 = vcombine.high %v196_v47, %v198_v48  ;;  %v3900_v59 = vld [vmem:[%s5760_s1 + $0x588] ss:$16 sps:$4 sm:$0xff]   ;;  %v4669_v62 = vcombine.low %v196_v47, %v198_v48  ;;  %v3903_v0 = vld [vmem:[%s5760_s1 + $0x5ac] ss:$16 sps:$4 sm:$0xff]  }
  0x19   : > { %1187 = vmatprep.subr.bf16.mxu0 %v3853_v20  ;;  %1273 = vmatprep.subr.bf16.mxu1 %v3855_v21  ;;  %v3895_v51 = vld [vmem:[%s5760_s1 + $0x584] ss:$16 sps:$4 sm:$0xff]   ;;  %v4655_v53 = vcombine.high %v328_v49, %v328_v49  ;;  %v3899_v58 = vld [vmem:[%s5760_s1 + $0x580] ss:$16 sps:$4 sm:$0xff]   ;;  %v3906_v3 = vld [vmem:[%s5760_s1 + $0x5a8] ss:$16 sps:$4 sm:$0xff]   ;;  %v4684_v5 = vcombine.low %v328_v49, %v328_v49 }
  0x1a   : > { %v498_v55 = vshrl.u32 %v4653_v52, 16  ;;  %v500_v56 = vshll.u32 %v4653_v52, 16  ;;  %v3901_v63 = vld [vmem:[%s5760_s1 + $0x5a4] ss:$16 sps:$4 sm:$0xff]   ;;  %v3905_v2 = vld [vmem:[%s5760_s1 + $0x5a0] ss:$16 sps:$4 sm:$0xff]  }
  0x1b   : > { %v505_v57 = vshll.u32 %v4655_v53, 16  ;;  %v488_v6 = vshll.u32 %v4669_v62, 16  ;;  %v3907_v7 = vld [vmem:[%s5760_s1 + $0x5c4] ss:$16 sps:$4 sm:$0xff]   ;;  %v3909_v8 = vld [vmem:[%s5760_s1 + $0x5cc] ss:$16 sps:$4 sm:$0xff]  }
  0x1c   : > { %1188 = vmatpush1.bf16.msra.mxu0 %v3857_v22  ;;  %1274 = vmatpush1.bf16.msra.mxu1 %v3858_v23  ;;  %v502_v60 = vrot.slane %v500_v56, 1  ;;  %v3911_v9 = vld [vmem:[%s5760_s1 + $0x5c0] ss:$16 sps:$4 sm:$0xff]   ;;  %v3912_v10 = vld [vmem:[%s5760_s1 + $0x5c8] ss:$16 sps:$4 sm:$0xff]   ;;  %v486_v11 = vshrl.u32 %v4669_v62, 16 }
  0x1d   : > { %1189 = vmatprep.subr.bf16.mxu0 %v3859_v24  ;;  %1275 = vmatprep.subr.bf16.mxu1 %v3861_v25  ;;  %v507_v61 = vrot.slane %v505_v57, 1  ;;  %v490_v12 = vrot.slane %v488_v6, 1  ;;  %v493_v13 = vshll.u32 %v4684_v5, 16  ;;  %v3913_v14 = vld [vmem:[%s5760_s1 + $0x5e4] ss:$16 sps:$4 sm:$0xff]   ;;  %v4799_v49 = vld [vmem:[%s4633_s11 + $0x8] sm:$0xff] }
  0x1e   : > { %v503_v1 = vor.u32 %v502_v60, %v498_v55  ;;  %v3915_v15 = vld [vmem:[%s5760_s1 + $0x5ec] ss:$16 sps:$4 sm:$0xff]   ;;  %v3917_v16 = vld [vmem:[%s5760_s1 + $0x5e0] ss:$16 sps:$4 sm:$0xff]   ;;  %v3918_v17 = vld [vmem:[%s5760_s1 + $0x5e8] ss:$16 sps:$4 sm:$0xff]  }
  0x1f   : > { %v491_v18 = vor.u32 %v490_v12, %v486_v11  ;;  %v495_v19 = vrot.slane %v493_v13, 1  ;;  %v3923_v20 = vld [vmem:[%s5760_s1 + $0x604] ss:$16 sps:$4 sm:$0xff]   ;;  %v3926_v21 = vld [vmem:[%s5760_s1 + $0x60c] ss:$16 sps:$4 sm:$0xff]  }
  0x20   : > { %1190 = vmatpush1.bf16.msra.mxu0 %v3863_v26  ;;  %1276 = vmatpush1.bf16.msra.mxu1 %v3864_v27  ;;  %v508_v4 = vsel %vm484_vm0, %v503_v1, %v507_v61  ;;  %v3921_v22 = vld [vmem:[%s5760_s1 + $0x600] ss:$16 sps:$4 sm:$0xff]   ;;  %v3924_v23 = vld [vmem:[%s5760_s1 + $0x608] ss:$16 sps:$4 sm:$0xff]   ;;  %v3931_v25 = vld [vmem:[%s5760_s1 + $0x624] ss:$16 sps:$4 sm:$0xff]  }
  0x21   : > { %1191 = vmatprep.subr.bf16.mxu0 %v3865_v28  ;;  %1277 = vmatprep.subr.bf16.mxu1 %v3867_v29  ;;  %v496_v24 = vsel %vm484_vm0, %v491_v18, %v495_v19  ;;  %v3934_v26 = vld [vmem:[%s5760_s1 + $0x62c] ss:$16 sps:$4 sm:$0xff]   ;;  %v3929_v27 = vld [vmem:[%s5760_s1 + $0x620] ss:$16 sps:$4 sm:$0xff]   ;;  %v3932_v28 = vld [vmem:[%s5760_s1 + $0x628] ss:$16 sps:$4 sm:$0xff]  }
  0x22   : > { %1209 = vmatprep.mubr.bf16.mxu0 %v508_v4  ;;  %1295 = vmatprep.mubr.bf16.mxu1 %v508_v4  ;;  %v3937_v29 = vld [vmem:[%s5760_s1 + $0x644] ss:$16 sps:$4 sm:$0xff]   ;;  %v3959_v47 = vld [vmem:[%s5760_s1 + $0x6c0] ss:$16 sps:$4 sm:$0xff]   ;;  %v3962_v48 = vld [vmem:[%s5760_s1 + $0x6c8] ss:$16 sps:$4 sm:$0xff]  }
  0x23   : > { %v3967_v55 = vld [vmem:[%s5760_s1 + $0x6e4] ss:$16 sps:$4 sm:$0xff]   ;;  %v3970_v56 = vld [vmem:[%s5760_s1 + $0x6ec] ss:$16 sps:$4 sm:$0xff]   ;;  %v3965_v60 = vld [vmem:[%s5760_s1 + $0x6e0] ss:$16 sps:$4 sm:$0xff]  }
  0x24   : > { %1192 = vmatpush1.bf16.msra.mxu0 %v3869_v30  ;;  %1278 = vmatpush1.bf16.msra.mxu1 %v3870_v31  ;;  %v3940_v30 = vld [vmem:[%s5760_s1 + $0x64c] ss:$16 sps:$4 sm:$0xff]   ;;  %v3935_v31 = vld [vmem:[%s5760_s1 + $0x640] ss:$16 sps:$4 sm:$0xff]   ;;  %v3968_v61 = vld [vmem:[%s5760_s1 + $0x6e8] ss:$16 sps:$4 sm:$0xff]  }
  0x25   : > { %1193 = vmatprep.subr.bf16.mxu0 %v3871_v32  ;;  %1279 = vmatprep.subr.bf16.mxu1 %v3873_v33  ;;  %v3938_v32 = vld [vmem:[%s5760_s1 + $0x648] ss:$16 sps:$4 sm:$0xff]   ;;  %v3943_v33 = vld [vmem:[%s5760_s1 + $0x664] ss:$16 sps:$4 sm:$0xff]   ;;  %v3976_v1 = vld [vmem:[%s5760_s1 + $0x70c] ss:$16 sps:$4 sm:$0xff]  }
  0x26   : > { %v3971_v6 = vld [vmem:[%s5760_s1 + $0x700] ss:$16 sps:$4 sm:$0xff]   ;;  %v3980_v12 = vld [vmem:[%s5760_s1 + $0x728] ss:$16 sps:$4 sm:$0xff]   ;;  %v3985_v13 = vld [vmem:[%s5760_s1 + $0x744] ss:$16 sps:$4 sm:$0xff]  }
  0x27   : > { %v3977_v11 = vld [vmem:[%s5760_s1 + $0x720] ss:$16 sps:$4 sm:$0xff]   ;;  %v3994_v18 = vld [vmem:[%s5760_s1 + $0x76c] ss:$16 sps:$4 sm:$0xff]  }
  0x28   : > { %1194 = vmatpush1.bf16.msra.mxu0 %v3875_v34  ;;  %1280 = vmatpush1.bf16.msra.mxu1 %v3876_v35  ;;  %v3946_v34 = vld [vmem:[%s5760_s1 + $0x66c] ss:$16 sps:$4 sm:$0xff]   ;;  %v3941_v35 = vld [vmem:[%s5760_s1 + $0x660] ss:$16 sps:$4 sm:$0xff]  }
  0x29   : > { %1195 = vmatprep.subr.bf16.mxu0 %v3877_v36  ;;  %1281 = vmatprep.subr.bf16.mxu1 %v3879_v37  ;;  %v3944_v36 = vld [vmem:[%s5760_s1 + $0x668] ss:$16 sps:$4 sm:$0xff]   ;;  %v3949_v37 = vld [vmem:[%s5760_s1 + $0x684] ss:$16 sps:$4 sm:$0xff]   ;;  %v3989_v19 = vld [vmem:[%s5760_s1 + $0x760] ss:$16 sps:$4 sm:$0xff]  }
  0x2c   : > { %1196 = vmatpush1.bf16.msra.mxu0 %v3881_v38  ;;  %1282 = vmatpush1.bf16.msra.mxu1 %v3882_v39  ;;  %v3952_v38 = vld [vmem:[%s5760_s1 + $0x68c] ss:$16 sps:$4 sm:$0xff]   ;;  %v3947_v39 = vld [vmem:[%s5760_s1 + $0x680] ss:$16 sps:$4 sm:$0xff]  }
  0x2d   : > { %1197 = vmatprep.subr.bf16.mxu0 %v3883_v40  ;;  %1283 = vmatprep.subr.bf16.mxu1 %v3885_v41  ;;  %v3950_v40 = vld [vmem:[%s5760_s1 + $0x688] ss:$16 sps:$4 sm:$0xff]   ;;  %v3955_v41 = vld [vmem:[%s5760_s1 + $0x6a4] ss:$16 sps:$4 sm:$0xff]  }
  0x30   : > { %1198 = vmatpush1.bf16.msra.mxu0 %v3887_v42  ;;  %1284 = vmatpush1.bf16.msra.mxu1 %v3888_v43  ;;  %v3958_v42 = vld [vmem:[%s5760_s1 + $0x6ac] ss:$16 sps:$4 sm:$0xff]   ;;  %v3953_v43 = vld [vmem:[%s5760_s1 + $0x6a0] ss:$16 sps:$4 sm:$0xff]  }
  0x31   : > { %1199 = vmatprep.subr.bf16.mxu0 %v3889_v44  ;;  %1285 = vmatprep.subr.bf16.mxu1 %v3891_v45  ;;  %v3956_v44 = vld [vmem:[%s5760_s1 + $0x6a8] ss:$16 sps:$4 sm:$0xff]   ;;  %v3961_v45 = vld [vmem:[%s5760_s1 + $0x6c4] ss:$16 sps:$4 sm:$0xff]  }
  0x34   : > { %1200 = vmatpush1.bf16.msra.mxu0 %v3893_v46  ;;  %1286 = vmatpush1.bf16.msra.mxu1 %v3894_v50  ;;  %v3964_v46 = vld [vmem:[%s5760_s1 + $0x6cc] ss:$16 sps:$4 sm:$0xff]  }
  0x35   : > { %1201 = vmatprep.subr.bf16.mxu0 %v3895_v51  ;;  %1287 = vmatprep.subr.bf16.mxu1 %v3897_v54  ;;  %v4802_v50 = vld [vmem:[%s4633_s11 + $0x18] sm:$0xff]  ;;  %v4805_v51 = vld [vmem:[%s4633_s11 + $0x28] sm:$0x11] }
  0x36   : > { %v4809_v54 = vcombine.high %v4799_v49, %v4802_v50  ;;  %v4819_v57 = vcombine.high %v4805_v51, %v4805_v51 }
  0x38   : > { %1202 = vmatpush1.bf16.msra.mxu0 %v3899_v58  ;;  %1288 = vmatpush1.bf16.msra.mxu1 %v3900_v59  ;;  %v522_v58 = vshrl.u32 %v4809_v54, 16  ;;  %v524_v59 = vshll.u32 %v4809_v54, 16 }
  0x39   : > { %1203 = vmatprep.subr.bf16.mxu0 %v3901_v63  ;;  %1289 = vmatprep.subr.bf16.mxu1 %v3903_v0  ;;  %v529_v63 = vshll.u32 %v4819_v57, 16  ;;  %v3973_v0 = vld [vmem:[%s5760_s1 + $0x704] ss:$16 sps:$4 sm:$0xff]  }
  0x3c   : > { %1204 = vmatpush1.bf16.msra.mxu0 %v3905_v2  ;;  %1290 = vmatpush1.bf16.msra.mxu1 %v3906_v3  ;;  %v526_v2 = vrot.slane %v524_v59, 1  ;;  %v531_v3 = vrot.slane %v529_v63, 1  ;;  %v4040_v59 = vld [vmem:[%s5760_s1 + $0x4c] ss:$16 sps:$4 sm:$0xff]   ;;  %v4043_v63 = vld [vmem:[%s5760_s1 + $0x64] ss:$16 sps:$4 sm:$0xff]  }
  0x3d   : > { %1205 = vmatprep.subr.bf16.mxu0 %v3907_v7  ;;  %1291 = vmatprep.subr.bf16.mxu1 %v3909_v8  ;;  %v3974_v7 = vld [vmem:[%s5760_s1 + $0x708] ss:$16 sps:$4 sm:$0xff]   ;;  %v3979_v8 = vld [vmem:[%s5760_s1 + $0x724] ss:$16 sps:$4 sm:$0xff]  }
  0x3e   : > { %v527_v4 = vor.u32 %v526_v2, %v522_v58  ;;  %v4037_v58 = vld [vmem:[%s5760_s1 + $0x44] ss:$16 sps:$4 sm:$0xff]  }
  0x3f   : > { %v4049_v2 = vld [vmem:[%s5760_s1 + $0x84] ss:$16 sps:$4 sm:$0xff]  }
  0x40   : > { %1206 = vmatpush1.bf16.msra.mxu0 %v3911_v9  ;;  %1292 = vmatpush1.bf16.msra.mxu1 %v3912_v10  ;;  %v532_v9 = vsel %vm484_vm0, %v527_v4, %v531_v3  ;;  %v3982_v10 = vld [vmem:[%s5760_s1 + $0x72c] ss:$16 sps:$4 sm:$0xff]   ;;  %v4047_v4 = vld [vmem:[%s5760_s1 + $0x80] ss:$16 sps:$4 sm:$0xff]  }
  0x41   : > { %1207 = vmatprep.subr.bf16.mxu0 %v3913_v14  ;;  %1293 = vmatprep.subr.bf16.mxu1 %v3915_v15  ;;  %v3988_v14 = vld [vmem:[%s5760_s1 + $0x74c] ss:$16 sps:$4 sm:$0xff]   ;;  %v3983_v15 = vld [vmem:[%s5760_s1 + $0x740] ss:$16 sps:$4 sm:$0xff]  }
  0x42   : > { %v4052_v3 = vld [vmem:[%s5760_s1 + $0x8c] ss:$16 sps:$4 sm:$0xff]  }
  0x44   : > { %1208 = vmatpush1.bf16.msra.mxu0 %v3917_v16  ;;  %1294 = vmatpush1.bf16.msra.mxu1 %v3918_v17  ;;  %v3986_v16 = vld [vmem:[%s5760_s1 + $0x748] ss:$16 sps:$4 sm:$0xff]   ;;  %v3991_v17 = vld [vmem:[%s5760_s1 + $0x764] ss:$16 sps:$4 sm:$0xff]  }
  0x45   : > { %1220 = vmatprep.subr.bf16.mxu0 %v3923_v20  ;;  %1306 = vmatprep.subr.bf16.mxu1 %v3926_v21  ;;  %v3992_v20 = vld [vmem:[%s5760_s1 + $0x768] ss:$16 sps:$4 sm:$0xff]   ;;  %v3997_v21 = vld [vmem:[%s5760_s1 + $0x784] ss:$16 sps:$4 sm:$0xff]  }
  0x47   : > { %1210 = vmatmul.mubr.bf16.vlgmr.msra.gmra.mrb[0].mxu0 %v496_v24  ;;  %1296 = vmatmul.mubr.bf16.vlgmr.msra.gmra.mrb[0].mxu1 %v496_v24  ;;  %v3998_v24 = vld [vmem:[%s5760_s1 + $0x788] ss:$16 sps:$4 sm:$0xff]  }
  0x48   : > { %1221 = vmatpush1.bf16.msra.mxu0 %v3921_v22  ;;  %1307 = vmatpush1.bf16.msra.mxu1 %v3924_v23  ;;  %v4000_v22 = vld [vmem:[%s5760_s1 + $0x78c] ss:$16 sps:$4 sm:$0xff]   ;;  %v3995_v23 = vld [vmem:[%s5760_s1 + $0x780] ss:$16 sps:$4 sm:$0xff]  }
  0x49   : > { %1222 = vmatprep.subr.bf16.mxu0 %v3931_v25  ;;  %1308 = vmatprep.subr.bf16.mxu1 %v3934_v26  ;;  %v4003_v25 = vld [vmem:[%s5760_s1 + $0x7a4] ss:$16 sps:$4 sm:$0xff]   ;;  %v4896_v26 = vcombine.low %v4799_v49, %v4802_v50 }
  0x4a   : > { %1252 = vmatprep.mubr.bf16.mxu0 %v532_v9  ;;  %1338 = vmatprep.mubr.bf16.mxu1 %v532_v9  ;;  %v4031_v50 = vld [vmem:[%s5760_s1 + $0x24] ss:$16 sps:$4 sm:$0xff]   ;;  %v4053_v9 = vld [vmem:[%s5760_s1 + $0xa0] ss:$16 sps:$4 sm:$0xff]  }
  0x4c   : > { %1223 = vmatpush1.bf16.msra.mxu0 %v3929_v27  ;;  %1309 = vmatpush1.bf16.msra.mxu1 %v3932_v28  ;;  %v4006_v27 = vld [vmem:[%s5760_s1 + $0x7ac] ss:$16 sps:$4 sm:$0xff]   ;;  %v4001_v28 = vld [vmem:[%s5760_s1 + $0x7a0] ss:$16 sps:$4 sm:$0xff]  }
  0x4d   : > { %1224 = vmatprep.subr.bf16.mxu0 %v3937_v29  ;;  %1310 = vmatprep.subr.bf16.mxu1 %v3940_v30  ;;  %v4004_v29 = vld [vmem:[%s5760_s1 + $0x7a8] ss:$16 sps:$4 sm:$0xff]   ;;  %v4009_v30 = vld [vmem:[%s5760_s1 + $0x7c4] ss:$16 sps:$4 sm:$0xff]  }
  0x50   : > { %1225 = vmatpush1.bf16.msra.mxu0 %v3935_v31  ;;  %1311 = vmatpush1.bf16.msra.mxu1 %v3938_v32  ;;  %v4912_v31 = vcombine.low %v4805_v51, %v4805_v51  ;;  %v512_v32 = vshll.u32 %v4896_v26, 16  ;;  %v4034_v51 = vld [vmem:[%s5760_s1 + $0x2c] ss:$16 sps:$4 sm:$0xff]  }
  0x51   : > { %1226 = vmatprep.subr.bf16.mxu0 %v3943_v33  ;;  %1312 = vmatprep.subr.bf16.mxu1 %v3946_v34  ;;  %v4012_v33 = vld [vmem:[%s5760_s1 + $0x7cc] ss:$16 sps:$4 sm:$0xff]   ;;  %v4007_v34 = vld [vmem:[%s5760_s1 + $0x7c0] ss:$16 sps:$4 sm:$0xff]  }
  0x54   : > { %1227 = vmatpush1.bf16.msra.mxu0 %v3941_v35  ;;  %1313 = vmatpush1.bf16.msra.mxu1 %v3944_v36  ;;  %v4010_v35 = vld [vmem:[%s5760_s1 + $0x7c8] ss:$16 sps:$4 sm:$0xff]   ;;  %v4015_v36 = vld [vmem:[%s5760_s1 + $0x7e4] ss:$16 sps:$4 sm:$0xff]  }
  0x55   : > { %1228 = vmatprep.subr.bf16.mxu0 %v3949_v37  ;;  %1314 = vmatprep.subr.bf16.mxu1 %v3952_v38  ;;  %v510_v37 = vshrl.u32 %v4896_v26, 16  ;;  %v514_v38 = vrot.slane %v512_v32, 1  ;;  %v4086_v32 = vld [vmem:[%s5760_s1 + $0x148] ss:$16 sps:$4 sm:$0xff]  }
  0x58   : > { %1229 = vmatpush1.bf16.msra.mxu0 %v3947_v39  ;;  %1315 = vmatpush1.bf16.msra.mxu1 %v3950_v40  ;;  %v517_v39 = vshll.u32 %v4912_v31, 16  ;;  %v4018_v40 = vld [vmem:[%s5760_s1 + $0x7ec] ss:$16 sps:$4 sm:$0xff]  }
  0x59   : > { %1230 = vmatprep.subr.bf16.mxu0 %v3955_v41  ;;  %1316 = vmatprep.subr.bf16.mxu1 %v3958_v42  ;;  %v4013_v41 = vld [vmem:[%s5760_s1 + $0x7e0] ss:$16 sps:$4 sm:$0xff]   ;;  %v4016_v42 = vld [vmem:[%s5760_s1 + $0x7e8] ss:$16 sps:$4 sm:$0xff]  }
  0x5c   : > { %1231 = vmatpush1.bf16.msra.mxu0 %v3953_v43  ;;  %1317 = vmatpush1.bf16.msra.mxu1 %v3956_v44  ;;  %v4023_v43 = vld [vmem:[%s5760_s1 + $0x4] ss:$16 sps:$4 sm:$0xff]   ;;  %v515_v44 = vor.u32 %v514_v38, %v510_v37  ;;  %v4100_v38 = vld [vmem:[%s5760_s1 + $0x18c] ss:$16 sps:$4 sm:$0xff]  }
  0x5d   : > { %1232 = vmatprep.subr.bf16.mxu0 %v3961_v45  ;;  %1318 = vmatprep.subr.bf16.mxu1 %v3964_v46  ;;  %v519_v45 = vrot.slane %v517_v39, 1  ;;  %v4026_v46 = vld [vmem:[%s5760_s1 + $0xc] ss:$16 sps:$4 sm:$0xff]   ;;  %v4097_v37 = vld [vmem:[%s5760_s1 + $0x184] ss:$16 sps:$4 sm:$0xff]  }
  0x5e   : > { %v4095_v39 = vld [vmem:[%s5760_s1 + $0x180] ss:$16 sps:$4 sm:$0xff]  }
  0x5f   : > { %v520_v49 = vsel %vm484_vm0, %v515_v44, %v519_v45  ;;  %v4104_v44 = vld [vmem:[%s5760_s1 + $0x1a8] ss:$16 sps:$4 sm:$0xff]   ;;  %v4109_v45 = vld [vmem:[%s5760_s1 + $0x1c4] ss:$16 sps:$4 sm:$0xff]  }
  0x60   : > { %1233 = vmatpush1.bf16.msra.mxu0 %v3959_v47  ;;  %1319 = vmatpush1.bf16.msra.mxu1 %v3962_v48  ;;  %v4021_v47 = vld [vmem:[%s5760_s1] ss:$16 sps:$4 sm:$0xff]   ;;  %v4024_v48 = vld [vmem:[%s5760_s1 + $0x8] ss:$16 sps:$4 sm:$0xff]  }
  0x61   : > { %1234 = vmatprep.subr.bf16.mxu0 %v3967_v55  ;;  %1320 = vmatprep.subr.bf16.mxu1 %v3970_v56  ;;  %v4029_v55 = vld [vmem:[%s5760_s1 + $0x20] ss:$16 sps:$4 sm:$0xff]   ;;  %v4032_v56 = vld [vmem:[%s5760_s1 + $0x28] ss:$16 sps:$4 sm:$0xff]  }
  0x64   : > { %1235 = vmatpush1.bf16.msra.mxu0 %v3965_v60  ;;  %1321 = vmatpush1.bf16.msra.mxu1 %v3968_v61  ;;  %v4035_v60 = vld [vmem:[%s5760_s1 + $0x40] ss:$16 sps:$4 sm:$0xff]   ;;  %v4038_v61 = vld [vmem:[%s5760_s1 + $0x48] ss:$16 sps:$4 sm:$0xff]  }
  0x65   : > { %1236 = vmatprep.subr.bf16.mxu0 %v3973_v0  ;;  %1322 = vmatprep.subr.bf16.mxu1 %v3976_v1  ;;  %v4041_v0 = vld [vmem:[%s5760_s1 + $0x60] ss:$16 sps:$4 sm:$0xff]   ;;  %v4044_v1 = vld [vmem:[%s5760_s1 + $0x68] ss:$16 sps:$4 sm:$0xff]  }
  0x68   : > { %1237 = vmatpush1.bf16.msra.mxu0 %v3971_v6  ;;  %1323 = vmatpush1.bf16.msra.mxu1 %v3974_v7  ;;  %v4050_v6 = vld [vmem:[%s5760_s1 + $0x88] ss:$16 sps:$4 sm:$0xff]   ;;  %v4055_v7 = vld [vmem:[%s5760_s1 + $0xa4] ss:$16 sps:$4 sm:$0xff]  }
  0x69   : > { %1238 = vmatprep.subr.bf16.mxu0 %v3979_v8  ;;  %1324 = vmatprep.subr.bf16.mxu1 %v3982_v10  ;;  %v4058_v8 = vld [vmem:[%s5760_s1 + $0xac] ss:$16 sps:$4 sm:$0xff]   ;;  %v4056_v10 = vld [vmem:[%s5760_s1 + $0xa8] ss:$16 sps:$4 sm:$0xff]  }
  0x6c   : > { %1239 = vmatpush1.bf16.msra.mxu0 %v3977_v11  ;;  %1325 = vmatpush1.bf16.msra.mxu1 %v3980_v12  ;;  %v4061_v11 = vld [vmem:[%s5760_s1 + $0xc4] ss:$16 sps:$4 sm:$0xff]   ;;  %v4064_v12 = vld [vmem:[%s5760_s1 + $0xcc] ss:$16 sps:$4 sm:$0xff]  }
  0x6d   : > { %1240 = vmatprep.subr.bf16.mxu0 %v3985_v13  ;;  %1326 = vmatprep.subr.bf16.mxu1 %v3988_v14  ;;  %v4059_v13 = vld [vmem:[%s5760_s1 + $0xc0] ss:$16 sps:$4 sm:$0xff]   ;;  %v4062_v14 = vld [vmem:[%s5760_s1 + $0xc8] ss:$16 sps:$4 sm:$0xff]  }
  0x70   : > { %1241 = vmatpush1.bf16.msra.mxu0 %v3983_v15  ;;  %1327 = vmatpush1.bf16.msra.mxu1 %v3986_v16  ;;  %v4067_v15 = vld [vmem:[%s5760_s1 + $0xe4] ss:$16 sps:$4 sm:$0xff]   ;;  %v4070_v16 = vld [vmem:[%s5760_s1 + $0xec] ss:$16 sps:$4 sm:$0xff]  }
  0x71   : > { %1242 = vmatprep.subr.bf16.mxu0 %v3991_v17  ;;  %1328 = vmatprep.subr.bf16.mxu1 %v3994_v18  ;;  %v4065_v17 = vld [vmem:[%s5760_s1 + $0xe0] ss:$16 sps:$4 sm:$0xff]   ;;  %v4068_v18 = vld [vmem:[%s5760_s1 + $0xe8] ss:$16 sps:$4 sm:$0xff]  }
  0x74   : > { %1243 = vmatpush1.bf16.msra.mxu0 %v3989_v19  ;;  %1329 = vmatpush1.bf16.msra.mxu1 %v3992_v20  ;;  %v4073_v19 = vld [vmem:[%s5760_s1 + $0x104] ss:$16 sps:$4 sm:$0xff]   ;;  %v4076_v20 = vld [vmem:[%s5760_s1 + $0x10c] ss:$16 sps:$4 sm:$0xff]  }
  0x75   : > { %1244 = vmatprep.subr.bf16.mxu0 %v3997_v21  ;;  %1330 = vmatprep.subr.bf16.mxu1 %v4000_v22  ;;  %v4071_v21 = vld [vmem:[%s5760_s1 + $0x100] ss:$16 sps:$4 sm:$0xff]   ;;  %v4074_v22 = vld [vmem:[%s5760_s1 + $0x108] ss:$16 sps:$4 sm:$0xff]  }
  0x78   : > { %1245 = vmatpush1.bf16.msra.mxu0 %v3995_v23  ;;  %1331 = vmatpush1.bf16.msra.mxu1 %v3998_v24  ;;  %v4079_v23 = vld [vmem:[%s5760_s1 + $0x124] ss:$16 sps:$4 sm:$0xff]   ;;  %v4082_v24 = vld [vmem:[%s5760_s1 + $0x12c] ss:$16 sps:$4 sm:$0xff]  }
  0x79   : > { %1246 = vmatprep.subr.bf16.mxu0 %v4003_v25  ;;  %1332 = vmatprep.subr.bf16.mxu1 %v4006_v27  ;;  %v4077_v25 = vld [vmem:[%s5760_s1 + $0x120] ss:$16 sps:$4 sm:$0xff]   ;;  %v4080_v27 = vld [vmem:[%s5760_s1 + $0x128] ss:$16 sps:$4 sm:$0xff]  }
  0x7c   : > { %1247 = vmatpush1.bf16.msra.mxu0 %v4001_v28  ;;  %1333 = vmatpush1.bf16.msra.mxu1 %v4004_v29  ;;  %v4085_v28 = vld [vmem:[%s5760_s1 + $0x144] ss:$16 sps:$4 sm:$0xff]   ;;  %v4088_v29 = vld [vmem:[%s5760_s1 + $0x14c] ss:$16 sps:$4 sm:$0xff]  }
  0x7d   : > { %1248 = vmatprep.subr.bf16.mxu0 %v4009_v30  ;;  %1334 = vmatprep.subr.bf16.mxu1 %v4012_v33  ;;  %v4083_v30 = vld [vmem:[%s5760_s1 + $0x140] ss:$16 sps:$4 sm:$0xff]   ;;  %v4091_v33 = vld [vmem:[%s5760_s1 + $0x164] ss:$16 sps:$4 sm:$0xff]  }
  0x80   : > { %1249 = vmatpush1.bf16.msra.mxu0 %v4007_v34  ;;  %1335 = vmatpush1.bf16.msra.mxu1 %v4010_v35  ;;  %v4094_v34 = vld [vmem:[%s5760_s1 + $0x16c] ss:$16 sps:$4 sm:$0xff]   ;;  %v4089_v35 = vld [vmem:[%s5760_s1 + $0x160] ss:$16 sps:$4 sm:$0xff]  }
  0x81   : > { %1250 = vmatprep.subr.bf16.mxu0 %v4015_v36  ;;  %1336 = vmatprep.subr.bf16.mxu1 %v4018_v40  ;;  %v4092_v36 = vld [vmem:[%s5760_s1 + $0x168] ss:$16 sps:$4 sm:$0xff]  }
  0x82   : > { %v4098_v40 = vld [vmem:[%s5760_s1 + $0x188] ss:$16 sps:$4 sm:$0xff]  }
  0x84   : > { %1251 = vmatpush1.bf16.msra.mxu0 %v4013_v41  ;;  %1337 = vmatpush1.bf16.msra.mxu1 %v4016_v42  ;;  %v4103_v41 = vld [vmem:[%s5760_s1 + $0x1a4] ss:$16 sps:$4 sm:$0xff]   ;;  %v4106_v42 = vld [vmem:[%s5760_s1 + $0x1ac] ss:$16 sps:$4 sm:$0xff]  }
  0x85   : > { %1993 = vmatprep.subr.bf16.mxu0 %v4023_v43  ;;  %2079 = vmatprep.subr.bf16.mxu1 %v4026_v46  ;;  %v4101_v43 = vld [vmem:[%s5760_s1 + $0x1a0] ss:$16 sps:$4 sm:$0xff]   ;;  %v4112_v46 = vld [vmem:[%s5760_s1 + $0x1cc] ss:$16 sps:$4 sm:$0xff]  }
  0x87   : > { %1253 = vmatmul.mubr.bf16.vlgmr.msra.gmra.mrb[0].mxu0 %v520_v49  ;;  %1339 = vmatmul.mubr.bf16.vlgmr.msra.gmra.mrb[0].mxu1 %v520_v49  ;;  %v4115_v49 = vld [vmem:[%s5760_s1 + $0x1e4] ss:$16 sps:$4 sm:$0xff]  }
  0x88   : > { %1994 = vmatpush1.bf16.msra.mxu0 %v4021_v47  ;;  %2080 = vmatpush1.bf16.msra.mxu1 %v4024_v48  ;;  %v4107_v47 = vld [vmem:[%s5760_s1 + $0x1c0] ss:$16 sps:$4 sm:$0xff]   ;;  %v4110_v48 = vld [vmem:[%s5760_s1 + $0x1c8] ss:$16 sps:$4 sm:$0xff]  }
  0x89   : > { %1995 = vmatprep.subr.bf16.mxu0 %v4031_v50  ;;  %2081 = vmatprep.subr.bf16.mxu1 %v4034_v51  ;;  %v4118_v50 = vld [vmem:[%s5760_s1 + $0x1ec] ss:$16 sps:$4 sm:$0xff]   ;;  %v4113_v51 = vld [vmem:[%s5760_s1 + $0x1e0] ss:$16 sps:$4 sm:$0xff]  }
  0x8a   : > { %2025 = vmatprep.mubr.bf16.mxu0 %v4653_v52  ;;  %2111 = vmatprep.mubr.bf16.mxu1 %v4653_v52  ;;  %v4046_v52 = vld [vmem:[%s5760_s1 + $0x6c] ss:$16 sps:$4 sm:$0xff]  }
  0x8c   : > { %1996 = vmatpush1.bf16.msra.mxu0 %v4029_v55  ;;  %2082 = vmatpush1.bf16.msra.mxu1 %v4032_v56  ;;  %v4116_v55 = vld [vmem:[%s5760_s1 + $0x1e8] ss:$16 sps:$4 sm:$0xff]   ;;  %v4121_v56 = vld [vmem:[%s5760_s1 + $0x204] ss:$16 sps:$4 sm:$0xff]  }
  0x8d   : > { %1997 = vmatprep.subr.bf16.mxu0 %v4037_v58  ;;  %2083 = vmatprep.subr.bf16.mxu1 %v4040_v59  ;;  %v4124_v58 = vld [vmem:[%s5760_s1 + $0x20c] ss:$16 sps:$4 sm:$0xff]   ;;  %v4119_v59 = vld [vmem:[%s5760_s1 + $0x200] ss:$16 sps:$4 sm:$0xff]  }
  0x90   : > { %1998 = vmatpush1.bf16.msra.mxu0 %v4035_v60  ;;  %2084 = vmatpush1.bf16.msra.mxu1 %v4038_v61  ;;  %v4122_v60 = vld [vmem:[%s5760_s1 + $0x208] ss:$16 sps:$4 sm:$0xff]   ;;  %v4127_v61 = vld [vmem:[%s5760_s1 + $0x224] ss:$16 sps:$4 sm:$0xff]  }
  0x91   : > { %1999 = vmatprep.subr.bf16.mxu0 %v4043_v63  ;;  %2085 = vmatprep.subr.bf16.mxu1 %v4046_v52  ;;  %v4130_v63 = vld [vmem:[%s5760_s1 + $0x22c] ss:$16 sps:$4 sm:$0xff]   ;;  %v4125_v52 = vld [vmem:[%s5760_s1 + $0x220] ss:$16 sps:$4 sm:$0xff]  }
  0x94   : > { %2000 = vmatpush1.bf16.msra.mxu0 %v4041_v0  ;;  %2086 = vmatpush1.bf16.msra.mxu1 %v4044_v1  ;;  %v4128_v0 = vld [vmem:[%s5760_s1 + $0x228] ss:$16 sps:$4 sm:$0xff]   ;;  %v4133_v1 = vld [vmem:[%s5760_s1 + $0x244] ss:$16 sps:$4 sm:$0xff]  }
  0x95   : > { %2001 = vmatprep.subr.bf16.mxu0 %v4049_v2  ;;  %2087 = vmatprep.subr.bf16.mxu1 %v4052_v3  ;;  %v4131_v2 = vld [vmem:[%s5760_s1 + $0x240] ss:$16 sps:$4 sm:$0xff]   ;;  %v4134_v3 = vld [vmem:[%s5760_s1 + $0x248] ss:$16 sps:$4 sm:$0xff]  }
  0x98   : > { %2002 = vmatpush1.bf16.msra.mxu0 %v4047_v4  ;;  %2088 = vmatpush1.bf16.msra.mxu1 %v4050_v6  ;;  %v4139_v4 = vld [vmem:[%s5760_s1 + $0x264] ss:$16 sps:$4 sm:$0xff]   ;;  %v4137_v6 = vld [vmem:[%s5760_s1 + $0x260] ss:$16 sps:$4 sm:$0xff]  }
  0x99   : > { %2003 = vmatprep.subr.bf16.mxu0 %v4055_v7  ;;  %2089 = vmatprep.subr.bf16.mxu1 %v4058_v8  ;;  %v4140_v7 = vld [vmem:[%s5760_s1 + $0x268] ss:$16 sps:$4 sm:$0xff]   ;;  %v4145_v8 = vld [vmem:[%s5760_s1 + $0x284] ss:$16 sps:$4 sm:$0xff]  }
  0x9c   : > { %2004 = vmatpush1.bf16.msra.mxu0 %v4053_v9  ;;  %2090 = vmatpush1.bf16.msra.mxu1 %v4056_v10  ;;  %v4148_v9 = vld [vmem:[%s5760_s1 + $0x28c] ss:$16 sps:$4 sm:$0xff]   ;;  %v4143_v10 = vld [vmem:[%s5760_s1 + $0x280] ss:$16 sps:$4 sm:$0xff]  }
  0x9d   : > { %2005 = vmatprep.subr.bf16.mxu0 %v4061_v11  ;;  %2091 = vmatprep.subr.bf16.mxu1 %v4064_v12  ;;  %v4146_v11 = vld [vmem:[%s5760_s1 + $0x288] ss:$16 sps:$4 sm:$0xff]   ;;  %v4151_v12 = vld [vmem:[%s5760_s1 + $0x2a4] ss:$16 sps:$4 sm:$0xff]  }
  0xa0   : > { %2006 = vmatpush1.bf16.msra.mxu0 %v4059_v13  ;;  %2092 = vmatpush1.bf16.msra.mxu1 %v4062_v14  ;;  %v4154_v13 = vld [vmem:[%s5760_s1 + $0x2ac] ss:$16 sps:$4 sm:$0xff]   ;;  %v4149_v14 = vld [vmem:[%s5760_s1 + $0x2a0] ss:$16 sps:$4 sm:$0xff]  }
  0xa1   : > { %2007 = vmatprep.subr.bf16.mxu0 %v4067_v15  ;;  %2093 = vmatprep.subr.bf16.mxu1 %v4070_v16  ;;  %v4152_v15 = vld [vmem:[%s5760_s1 + $0x2a8] ss:$16 sps:$4 sm:$0xff]   ;;  %v4157_v16 = vld [vmem:[%s5760_s1 + $0x2c4] ss:$16 sps:$4 sm:$0xff]  }
  0xa4   : > { %2008 = vmatpush1.bf16.msra.mxu0 %v4065_v17  ;;  %2094 = vmatpush1.bf16.msra.mxu1 %v4068_v18  ;;  %v4160_v17 = vld [vmem:[%s5760_s1 + $0x2cc] ss:$16 sps:$4 sm:$0xff]   ;;  %v4155_v18 = vld [vmem:[%s5760_s1 + $0x2c0] ss:$16 sps:$4 sm:$0xff]  }
  0xa5   : > { %2009 = vmatprep.subr.bf16.mxu0 %v4073_v19  ;;  %2095 = vmatprep.subr.bf16.mxu1 %v4076_v20  ;;  %v4158_v19 = vld [vmem:[%s5760_s1 + $0x2c8] ss:$16 sps:$4 sm:$0xff]   ;;  %v4163_v20 = vld [vmem:[%s5760_s1 + $0x2e4] ss:$16 sps:$4 sm:$0xff]  }
  0xa8   : > { %2010 = vmatpush1.bf16.msra.mxu0 %v4071_v21  ;;  %2096 = vmatpush1.bf16.msra.mxu1 %v4074_v22  ;;  %v4166_v21 = vld [vmem:[%s5760_s1 + $0x2ec] ss:$16 sps:$4 sm:$0xff]   ;;  %v4161_v22 = vld [vmem:[%s5760_s1 + $0x2e0] ss:$16 sps:$4 sm:$0xff]  }
  0xa9   : > { %2011 = vmatprep.subr.bf16.mxu0 %v4079_v23  ;;  %2097 = vmatprep.subr.bf16.mxu1 %v4082_v24  ;;  %v4164_v23 = vld [vmem:[%s5760_s1 + $0x2e8] ss:$16 sps:$4 sm:$0xff]   ;;  %v4169_v24 = vld [vmem:[%s5760_s1 + $0x304] ss:$16 sps:$4 sm:$0xff]  }
  0xac   : > { %2012 = vmatpush1.bf16.msra.mxu0 %v4077_v25  ;;  %2098 = vmatpush1.bf16.msra.mxu1 %v4080_v27  ;;  %v4172_v25 = vld [vmem:[%s5760_s1 + $0x30c] ss:$16 sps:$4 sm:$0xff]   ;;  %v4167_v27 = vld [vmem:[%s5760_s1 + $0x300] ss:$16 sps:$4 sm:$0xff]  }
  0xad   : > { %2013 = vmatprep.subr.bf16.mxu0 %v4085_v28  ;;  %2099 = vmatprep.subr.bf16.mxu1 %v4088_v29  ;;  %v4170_v28 = vld [vmem:[%s5760_s1 + $0x308] ss:$16 sps:$4 sm:$0xff]   ;;  %v4175_v29 = vld [vmem:[%s5760_s1 + $0x324] ss:$16 sps:$4 sm:$0xff]  }
  0xb0   : > { %2014 = vmatpush1.bf16.msra.mxu0 %v4083_v30  ;;  %2100 = vmatpush1.bf16.msra.mxu1 %v4086_v32  ;;  %v4178_v30 = vld [vmem:[%s5760_s1 + $0x32c] ss:$16 sps:$4 sm:$0xff]   ;;  %v4173_v32 = vld [vmem:[%s5760_s1 + $0x320] ss:$16 sps:$4 sm:$0xff]  }
  0xb1   : > { %2015 = vmatprep.subr.bf16.mxu0 %v4091_v33  ;;  %2101 = vmatprep.subr.bf16.mxu1 %v4094_v34  ;;  %v4176_v33 = vld [vmem:[%s5760_s1 + $0x328] ss:$16 sps:$4 sm:$0xff]   ;;  %v4181_v34 = vld [vmem:[%s5760_s1 + $0x344] ss:$16 sps:$4 sm:$0xff]  }
  0xb4   : > { %2016 = vmatpush1.bf16.msra.mxu0 %v4089_v35  ;;  %2102 = vmatpush1.bf16.msra.mxu1 %v4092_v36  ;;  %v4184_v35 = vld [vmem:[%s5760_s1 + $0x34c] ss:$16 sps:$4 sm:$0xff]   ;;  %v4179_v36 = vld [vmem:[%s5760_s1 + $0x340] ss:$16 sps:$4 sm:$0xff]  }
  0xb5   : > { %2017 = vmatprep.subr.bf16.mxu0 %v4097_v37  ;;  %2103 = vmatprep.subr.bf16.mxu1 %v4100_v38  ;;  %v4182_v37 = vld [vmem:[%s5760_s1 + $0x348] ss:$16 sps:$4 sm:$0xff]   ;;  %v4187_v38 = vld [vmem:[%s5760_s1 + $0x364] ss:$16 sps:$4 sm:$0xff]  }
  0xb8   : > { %2018 = vmatpush1.bf16.msra.mxu0 %v4095_v39  ;;  %2104 = vmatpush1.bf16.msra.mxu1 %v4098_v40  ;;  %v4190_v39 = vld [vmem:[%s5760_s1 + $0x36c] ss:$16 sps:$4 sm:$0xff]   ;;  %v4185_v40 = vld [vmem:[%s5760_s1 + $0x360] ss:$16 sps:$4 sm:$0xff]  }
  0xb9   : > { %2019 = vmatprep.subr.bf16.mxu0 %v4103_v41  ;;  %2105 = vmatprep.subr.bf16.mxu1 %v4106_v42  ;;  %v4188_v41 = vld [vmem:[%s5760_s1 + $0x368] ss:$16 sps:$4 sm:$0xff]   ;;  %v4193_v42 = vld [vmem:[%s5760_s1 + $0x384] ss:$16 sps:$4 sm:$0xff]  }
  0xbc   : > { %2020 = vmatpush1.bf16.msra.mxu0 %v4101_v43  ;;  %2106 = vmatpush1.bf16.msra.mxu1 %v4104_v44  ;;  %v4196_v43 = vld [vmem:[%s5760_s1 + $0x38c] ss:$16 sps:$4 sm:$0xff]   ;;  %v4191_v44 = vld [vmem:[%s5760_s1 + $0x380] ss:$16 sps:$4 sm:$0xff]  }
  0xbd   : > { %2021 = vmatprep.subr.bf16.mxu0 %v4109_v45  ;;  %2107 = vmatprep.subr.bf16.mxu1 %v4112_v46  ;;  %v4194_v45 = vld [vmem:[%s5760_s1 + $0x388] ss:$16 sps:$4 sm:$0xff]   ;;  %v4199_v46 = vld [vmem:[%s5760_s1 + $0x3a4] ss:$16 sps:$4 sm:$0xff]  }
  0xc0   : > { %2022 = vmatpush1.bf16.msra.mxu0 %v4107_v47  ;;  %2108 = vmatpush1.bf16.msra.mxu1 %v4110_v48  ;;  %v4202_v47 = vld [vmem:[%s5760_s1 + $0x3ac] ss:$16 sps:$4 sm:$0xff]   ;;  %v4197_v48 = vld [vmem:[%s5760_s1 + $0x3a0] ss:$16 sps:$4 sm:$0xff]  }
  0xc1   : > { %2023 = vmatprep.subr.bf16.mxu0 %v4115_v49  ;;  %2109 = vmatprep.subr.bf16.mxu1 %v4118_v50  ;;  %v4200_v49 = vld [vmem:[%s5760_s1 + $0x3a8] ss:$16 sps:$4 sm:$0xff]   ;;  %v4205_v50 = vld [vmem:[%s5760_s1 + $0x3c4] ss:$16 sps:$4 sm:$0xff]  }
  0xc4   : > { %2024 = vmatpush1.bf16.msra.mxu0 %v4113_v51  ;;  %2110 = vmatpush1.bf16.msra.mxu1 %v4116_v55  ;;  %v4208_v51 = vld [vmem:[%s5760_s1 + $0x3cc] ss:$16 sps:$4 sm:$0xff]   ;;  %v4203_v55 = vld [vmem:[%s5760_s1 + $0x3c0] ss:$16 sps:$4 sm:$0xff]  }
  0xc5   : > { %2036 = vmatprep.subr.bf16.mxu0 %v4121_v56  ;;  %2122 = vmatprep.subr.bf16.mxu1 %v4124_v58  ;;  %v4206_v56 = vld [vmem:[%s5760_s1 + $0x3c8] ss:$16 sps:$4 sm:$0xff]   ;;  %v4211_v58 = vld [vmem:[%s5760_s1 + $0x3e4] ss:$16 sps:$4 sm:$0xff]  }
  0xc7   : > { %2026 = vmatmul.mubr.bf16.vlgmr.msra.gmra.mrb[0].mxu0 %v4669_v62  ;;  %2112 = vmatmul.mubr.bf16.vlgmr.msra.gmra.mrb[0].mxu1 %v4669_v62  ;;  %v4136_v62 = vld [vmem:[%s5760_s1 + $0x24c] ss:$16 sps:$4 sm:$0xff]  }
  0xc8   : > { %2037 = vmatpush1.bf16.msra.mxu0 %v4119_v59  ;;  %2123 = vmatpush1.bf16.msra.mxu1 %v4122_v60  ;;  %v5321_v59 = vld [vmem:[%s4633_s11] sm:$0xee]  ;;  %v4214_v60 = vld [vmem:[%s5760_s1 + $0x3ec] ss:$16 sps:$4 sm:$0xff]  }
  0xc9   : > { %2038 = vmatprep.subr.bf16.mxu0 %v4127_v61  ;;  %2124 = vmatprep.subr.bf16.mxu1 %v4130_v63  ;;  %v4209_v61 = vld [vmem:[%s5760_s1 + $0x3e0] ss:$16 sps:$4 sm:$0xff]   ;;  %v4212_v63 = vld [vmem:[%s5760_s1 + $0x3e8] ss:$16 sps:$4 sm:$0xff]  }
  0xca   : > { %2068 = vmatprep.mubr.bf16.mxu0 %v4809_v54  ;;  %2154 = vmatprep.mubr.bf16.mxu1 %v4809_v54  ;;  %v4142_v54 = vld [vmem:[%s5760_s1 + $0x26c] ss:$16 sps:$4 sm:$0xff]  }
  0xcc   : > { %2039 = vmatpush1.bf16.msra.mxu0 %v4125_v52  ;;  %2125 = vmatpush1.bf16.msra.mxu1 %v4128_v0  ;;  %v5333_v52 = vld [vmem:[%s4633_s11 + $0x10] sm:$0xff] }
  0xcd   : > { %2040 = vmatprep.subr.bf16.mxu0 %v4133_v1  ;;  %2126 = vmatprep.subr.bf16.mxu1 %v4136_v62  ;;  %v3608_v0 = vcombine.high %v5321_v59, %v5333_v52  ;;  %v4217_v1 = vld [vmem:[%s5760_s1 + $0x804] ss:$16 sps:$4 sm:$0xff]   ;;  %v4220_v62 = vld [vmem:[%s5760_s1 + $0x80c] ss:$16 sps:$4 sm:$0xff]  }
  0xd0   : > { %2041 = vmatpush1.bf16.msra.mxu0 %v4131_v2  ;;  %2127 = vmatpush1.bf16.msra.mxu1 %v4134_v3  ;;  %v4215_v2 = vld [vmem:[%s5760_s1 + $0x800] ss:$16 sps:$4 sm:$0xff]   ;;  %v4218_v3 = vld [vmem:[%s5760_s1 + $0x808] ss:$16 sps:$4 sm:$0xff]  }
  0xd1   : > { %2042 = vmatprep.subr.bf16.mxu0 %v4139_v4  ;;  %2128 = vmatprep.subr.bf16.mxu1 %v4142_v54  ;;  %v2309_v4 = vrot.slane %v3608_v0, 1  ;;  %v2310_v54 = vrot.slane %v4655_v53, 1  ;;  %v4221_v53 = vld [vmem:[%s5760_s1 + $0x820] ss:$16 sps:$4 sm:$0xff]   ;;  %v4296_v0 = vld [vmem:[%s5760_s1 + $0x9a8] ss:$16 sps:$4 sm:$0xff]  }
  0xd4   : > { %2043 = vmatpush1.bf16.msra.mxu0 %v4137_v6  ;;  %2129 = vmatpush1.bf16.msra.mxu1 %v4140_v7  ;;  %v4223_v6 = vld [vmem:[%s5760_s1 + $0x824] ss:$16 sps:$4 sm:$0xff]   ;;  %v4226_v7 = vld [vmem:[%s5760_s1 + $0x82c] ss:$16 sps:$4 sm:$0xff]  }
  0xd5   : > { %2044 = vmatprep.subr.bf16.mxu0 %v4145_v8  ;;  %2130 = vmatprep.subr.bf16.mxu1 %v4148_v9  ;;  %v2311_v8 = vsel %vm2305_vm1, %v2309_v4, %v2310_v54  ;;  %v4224_v9 = vld [vmem:[%s5760_s1 + $0x828] ss:$16 sps:$4 sm:$0xff]   ;;  %v3607_v4 = vcombine.low %v5321_v59, %v5333_v52  ;;  %v4305_v59 = vld [vmem:[%s5760_s1 + $0x9e0] ss:$16 sps:$4 sm:$0xff]  }
  0xd6   : > { %v5524_v54 = vld [vmem:[%s4633_s11 + $0x8] sm:$0xee] }
  0xd7   : > { %v4308_v52 = vld [vmem:[%s5760_s1 + $0x9e8] ss:$16 sps:$4 sm:$0xff]  }
  0xd8   : > { %2045 = vmatpush1.bf16.msra.mxu0 %v4143_v10  ;;  %2131 = vmatpush1.bf16.msra.mxu1 %v4146_v11  ;;  %v4229_v10 = vld [vmem:[%s5760_s1 + $0x844] ss:$16 sps:$4 sm:$0xff]   ;;  %v4227_v11 = vld [vmem:[%s5760_s1 + $0x840] ss:$16 sps:$4 sm:$0xff]  }
  0xd9   : > { %2046 = vmatprep.subr.bf16.mxu0 %v4151_v12  ;;  %2132 = vmatprep.subr.bf16.mxu1 %v4154_v13  ;;  %v4230_v12 = vld [vmem:[%s5760_s1 + $0x848] ss:$16 sps:$4 sm:$0xff]   ;;  %v4235_v13 = vld [vmem:[%s5760_s1 + $0x864] ss:$16 sps:$4 sm:$0xff]  }
  0xdc   : > { %2047 = vmatpush1.bf16.msra.mxu0 %v4149_v14  ;;  %2133 = vmatpush1.bf16.msra.mxu1 %v4152_v15  ;;  %v4238_v14 = vld [vmem:[%s5760_s1 + $0x86c] ss:$16 sps:$4 sm:$0xff]   ;;  %v4233_v15 = vld [vmem:[%s5760_s1 + $0x860] ss:$16 sps:$4 sm:$0xff]  }
  0xdd   : > { %2048 = vmatprep.subr.bf16.mxu0 %v4157_v16  ;;  %2134 = vmatprep.subr.bf16.mxu1 %v4160_v17  ;;  %v4236_v16 = vld [vmem:[%s5760_s1 + $0x868] ss:$16 sps:$4 sm:$0xff]   ;;  %v4241_v17 = vld [vmem:[%s5760_s1 + $0x884] ss:$16 sps:$4 sm:$0xff]  }
  0xe0   : > { %2049 = vmatpush1.bf16.msra.mxu0 %v4155_v18  ;;  %2135 = vmatpush1.bf16.msra.mxu1 %v4158_v19  ;;  %v4244_v18 = vld [vmem:[%s5760_s1 + $0x88c] ss:$16 sps:$4 sm:$0xff]   ;;  %v4239_v19 = vld [vmem:[%s5760_s1 + $0x880] ss:$16 sps:$4 sm:$0xff]  }
  0xe1   : > { %2050 = vmatprep.subr.bf16.mxu0 %v4163_v20  ;;  %2136 = vmatprep.subr.bf16.mxu1 %v4166_v21  ;;  %v4242_v20 = vld [vmem:[%s5760_s1 + $0x888] ss:$16 sps:$4 sm:$0xff]   ;;  %v4247_v21 = vld [vmem:[%s5760_s1 + $0x8a4] ss:$16 sps:$4 sm:$0xff]  }
  0xe4   : > { %2051 = vmatpush1.bf16.msra.mxu0 %v4161_v22  ;;  %2137 = vmatpush1.bf16.msra.mxu1 %v4164_v23  ;;  %v4250_v22 = vld [vmem:[%s5760_s1 + $0x8ac] ss:$16 sps:$4 sm:$0xff]   ;;  %v4245_v23 = vld [vmem:[%s5760_s1 + $0x8a0] ss:$16 sps:$4 sm:$0xff]  }
  0xe5   : > { %2052 = vmatprep.subr.bf16.mxu0 %v4169_v24  ;;  %2138 = vmatprep.subr.bf16.mxu1 %v4172_v25  ;;  %v4248_v24 = vld [vmem:[%s5760_s1 + $0x8a8] ss:$16 sps:$4 sm:$0xff]   ;;  %v4253_v25 = vld [vmem:[%s5760_s1 + $0x8c4] ss:$16 sps:$4 sm:$0xff]  }
  0xe8   : > { %2053 = vmatpush1.bf16.msra.mxu0 %v4167_v27  ;;  %2139 = vmatpush1.bf16.msra.mxu1 %v4170_v28  ;;  %v4256_v27 = vld [vmem:[%s5760_s1 + $0x8cc] ss:$16 sps:$4 sm:$0xff]   ;;  %v4251_v28 = vld [vmem:[%s5760_s1 + $0x8c0] ss:$16 sps:$4 sm:$0xff]  }
  0xe9   : > { %2054 = vmatprep.subr.bf16.mxu0 %v4175_v29  ;;  %2140 = vmatprep.subr.bf16.mxu1 %v4178_v30  ;;  %v4254_v29 = vld [vmem:[%s5760_s1 + $0x8c8] ss:$16 sps:$4 sm:$0xff]   ;;  %v4259_v30 = vld [vmem:[%s5760_s1 + $0x8e4] ss:$16 sps:$4 sm:$0xff]  }
  0xec   : > { %2055 = vmatpush1.bf16.msra.mxu0 %v4173_v32  ;;  %2141 = vmatpush1.bf16.msra.mxu1 %v4176_v33  ;;  %v4262_v32 = vld [vmem:[%s5760_s1 + $0x8ec] ss:$16 sps:$4 sm:$0xff]   ;;  %v4257_v33 = vld [vmem:[%s5760_s1 + $0x8e0] ss:$16 sps:$4 sm:$0xff]  }
  0xed   : > { %2056 = vmatprep.subr.bf16.mxu0 %v4181_v34  ;;  %2142 = vmatprep.subr.bf16.mxu1 %v4184_v35  ;;  %v4260_v34 = vld [vmem:[%s5760_s1 + $0x8e8] ss:$16 sps:$4 sm:$0xff]   ;;  %v4265_v35 = vld [vmem:[%s5760_s1 + $0x904] ss:$16 sps:$4 sm:$0xff]  }
  0xf0   : > { %2057 = vmatpush1.bf16.msra.mxu0 %v4179_v36  ;;  %2143 = vmatpush1.bf16.msra.mxu1 %v4182_v37  ;;  %v4268_v36 = vld [vmem:[%s5760_s1 + $0x90c] ss:$16 sps:$4 sm:$0xff]   ;;  %v4263_v37 = vld [vmem:[%s5760_s1 + $0x900] ss:$16 sps:$4 sm:$0xff]  }
  0xf1   : > { %2058 = vmatprep.subr.bf16.mxu0 %v4187_v38  ;;  %2144 = vmatprep.subr.bf16.mxu1 %v4190_v39  ;;  %v4266_v38 = vld [vmem:[%s5760_s1 + $0x908] ss:$16 sps:$4 sm:$0xff]   ;;  %v4271_v39 = vld [vmem:[%s5760_s1 + $0x924] ss:$16 sps:$4 sm:$0xff]  }
  0xf4   : > { %2059 = vmatpush1.bf16.msra.mxu0 %v4185_v40  ;;  %2145 = vmatpush1.bf16.msra.mxu1 %v4188_v41  ;;  %v4274_v40 = vld [vmem:[%s5760_s1 + $0x92c] ss:$16 sps:$4 sm:$0xff]   ;;  %v4269_v41 = vld [vmem:[%s5760_s1 + $0x920] ss:$16 sps:$4 sm:$0xff]  }
  0xf5   : > { %2060 = vmatprep.subr.bf16.mxu0 %v4193_v42  ;;  %2146 = vmatprep.subr.bf16.mxu1 %v4196_v43  ;;  %v4272_v42 = vld [vmem:[%s5760_s1 + $0x928] ss:$16 sps:$4 sm:$0xff]   ;;  %v4277_v43 = vld [vmem:[%s5760_s1 + $0x944] ss:$16 sps:$4 sm:$0xff]  }
  0xf8   : > { %2061 = vmatpush1.bf16.msra.mxu0 %v4191_v44  ;;  %2147 = vmatpush1.bf16.msra.mxu1 %v4194_v45  ;;  %v4280_v44 = vld [vmem:[%s5760_s1 + $0x94c] ss:$16 sps:$4 sm:$0xff]   ;;  %v4275_v45 = vld [vmem:[%s5760_s1 + $0x940] ss:$16 sps:$4 sm:$0xff]  }
  0xf9   : > { %2062 = vmatprep.subr.bf16.mxu0 %v4199_v46  ;;  %2148 = vmatprep.subr.bf16.mxu1 %v4202_v47  ;;  %v4278_v46 = vld [vmem:[%s5760_s1 + $0x948] ss:$16 sps:$4 sm:$0xff]   ;;  %v4283_v47 = vld [vmem:[%s5760_s1 + $0x964] ss:$16 sps:$4 sm:$0xff]  }
  0xfc   : > { %2063 = vmatpush1.bf16.msra.mxu0 %v4197_v48  ;;  %2149 = vmatpush1.bf16.msra.mxu1 %v4200_v49  ;;  %v4286_v48 = vld [vmem:[%s5760_s1 + $0x96c] ss:$16 sps:$4 sm:$0xff]   ;;  %v4281_v49 = vld [vmem:[%s5760_s1 + $0x960] ss:$16 sps:$4 sm:$0xff]  }
  0xfd   : > { %2064 = vmatprep.subr.bf16.mxu0 %v4205_v50  ;;  %2150 = vmatprep.subr.bf16.mxu1 %v4208_v51  ;;  %v4284_v50 = vld [vmem:[%s5760_s1 + $0x968] ss:$16 sps:$4 sm:$0xff]   ;;  %v4289_v51 = vld [vmem:[%s5760_s1 + $0x984] ss:$16 sps:$4 sm:$0xff]  }
 0x100   : > { %2065 = vmatpush1.bf16.msra.mxu0 %v4203_v55  ;;  %2151 = vmatpush1.bf16.msra.mxu1 %v4206_v56  ;;  %v4292_v55 = vld [vmem:[%s5760_s1 + $0x98c] ss:$16 sps:$4 sm:$0xff]   ;;  %v4287_v56 = vld [vmem:[%s5760_s1 + $0x980] ss:$16 sps:$4 sm:$0xff]  }
 0x101   : > { %2066 = vmatprep.subr.bf16.mxu0 %v4211_v58  ;;  %2152 = vmatprep.subr.bf16.mxu1 %v4214_v60  ;;  %v4290_v58 = vld [vmem:[%s5760_s1 + $0x988] ss:$16 sps:$4 sm:$0xff]   ;;  %v4295_v60 = vld [vmem:[%s5760_s1 + $0x9a4] ss:$16 sps:$4 sm:$0xff]  }
 0x104   : > { %2067 = vmatpush1.bf16.msra.mxu0 %v4209_v61  ;;  %2153 = vmatpush1.bf16.msra.mxu1 %v4212_v63  ;;  %v4298_v61 = vld [vmem:[%s5760_s1 + $0x9ac] ss:$16 sps:$4 sm:$0xff]   ;;  %v4293_v63 = vld [vmem:[%s5760_s1 + $0x9a0] ss:$16 sps:$4 sm:$0xff]  }
 0x105   : > { %2962 = vmatprep.subr.bf16.mxu0 %v4217_v1  ;;  %3048 = vmatprep.subr.bf16.mxu1 %v4220_v62  ;;  %v4301_v1 = vld [vmem:[%s5760_s1 + $0x9c4] ss:$16 sps:$4 sm:$0xff]   ;;  %v4304_v62 = vld [vmem:[%s5760_s1 + $0x9cc] ss:$16 sps:$4 sm:$0xff]  }
 0x107   : > { %2069 = vmatmul.mubr.bf16.vlgmr.msra.gmra.mrb[0].mxu0 %v4896_v26  ;;  %2155 = vmatmul.mubr.bf16.vlgmr.msra.gmra.mrb[0].mxu1 %v4896_v26  ;;  %v4232_v26 = vld [vmem:[%s5760_s1 + $0x84c] ss:$16 sps:$4 sm:$0xff]  }
 0x108   : > { %2963 = vmatpush1.bf16.msra.mxu0 %v4215_v2  ;;  %3049 = vmatpush1.bf16.msra.mxu1 %v4218_v3  ;;  %v4299_v2 = vld [vmem:[%s5760_s1 + $0x9c0] ss:$16 sps:$4 sm:$0xff]   ;;  %v4302_v3 = vld [vmem:[%s5760_s1 + $0x9c8] ss:$16 sps:$4 sm:$0xff]  }
 0x109   : > { %2964 = vmatprep.subr.bf16.mxu0 %v4223_v6  ;;  %3050 = vmatprep.subr.bf16.mxu1 %v4226_v7  ;;  %v4307_v6 = vld [vmem:[%s5760_s1 + $0x9e4] ss:$16 sps:$4 sm:$0xff]   ;;  %v4310_v7 = vld [vmem:[%s5760_s1 + $0x9ec] ss:$16 sps:$4 sm:$0xff]  }
 0x10a   : > { %2994 = vmatprep.mubr.bf16.mxu0 %v2311_v8  ;;  %3080 = vmatprep.mubr.bf16.mxu1 %v2311_v8  ;;  %v5533_v8 = vld [vmem:[%s4633_s11 + $0x18] sm:$0xff] }
 0x10c   : > { %2965 = vmatpush1.bf16.msra.mxu0 %v4221_v53  ;;  %3051 = vmatpush1.bf16.msra.mxu1 %v4224_v9  ;;  %v3610_v53 = vcombine.high %v5524_v54, %v5533_v8  ;;  %v2306_v9 = vrot.slane %v3607_v4, 1  ;;  %v4390_v4 = vld [vmem:[%s5760_s1 + $0xb8c] ss:$16 sps:$4 sm:$0xff]  }
 0x10d   : > { %2966 = vmatprep.subr.bf16.mxu0 %v4229_v10  ;;  %3052 = vmatprep.subr.bf16.mxu1 %v4232_v26  ;;  %v2307_v10 = vrot.slane %v4684_v5, 1  ;;  %v4314_v26 = vld [vmem:[%s5760_s1 + $0xa04] ss:$16 sps:$4 sm:$0xff]   ;;  %v4315_v5 = vld [vmem:[%s5760_s1 + $0xa08] ss:$16 sps:$4 sm:$0xff]  }
 0x110   : > { %2967 = vmatpush1.bf16.msra.mxu0 %v4227_v11  ;;  %3053 = vmatpush1.bf16.msra.mxu1 %v4230_v12  ;;  %v4317_v11 = vld [vmem:[%s5760_s1 + $0xa0c] ss:$16 sps:$4 sm:$0xff]   ;;  %v2315_v12 = vrot.slane %v3610_v53, 1  ;;  %v4393_v53 = vld [vmem:[%s5760_s1 + $0xba4] ss:$16 sps:$4 sm:$0xff]  }
 0x111   : > { %2968 = vmatprep.subr.bf16.mxu0 %v4235_v13  ;;  %3054 = vmatprep.subr.bf16.mxu1 %v4238_v14  ;;  %v2316_v13 = vrot.slane %v4819_v57, 1  ;;  %v4312_v14 = vld [vmem:[%s5760_s1 + $0xa00] ss:$16 sps:$4 sm:$0xff]   ;;  %v4324_v57 = vld [vmem:[%s5760_s1 + $0xa2c] ss:$16 sps:$4 sm:$0xff]  }
 0x114   : > { %2969 = vmatpush1.bf16.msra.mxu0 %v4233_v15  ;;  %3055 = vmatpush1.bf16.msra.mxu1 %v4236_v16  ;;  %v2308_v15 = vsel %vm2305_vm1, %v2306_v9, %v2307_v10  ;;  %v4321_v16 = vld [vmem:[%s5760_s1 + $0xa24] ss:$16 sps:$4 sm:$0xff]   ;;  %v4394_v9 = vld [vmem:[%s5760_s1 + $0xba8] ss:$16 sps:$4 sm:$0xff]  }
 0x115   : > { %2970 = vmatprep.subr.bf16.mxu0 %v4241_v17  ;;  %3056 = vmatprep.subr.bf16.mxu1 %v4244_v18  ;;  %v2317_v17 = vsel %vm2305_vm1, %v2315_v12, %v2316_v13  ;;  %v4319_v18 = vld [vmem:[%s5760_s1 + $0xa20] ss:$16 sps:$4 sm:$0xff]   ;;  %v4399_v10 = vld [vmem:[%s5760_s1 + $0xbc4] ss:$16 sps:$4 sm:$0xff]   ;;  %v4400_v12 = vld [vmem:[%s5760_s1 + $0xbc8] ss:$16 sps:$4 sm:$0xff]   ;;  %v3609_v13 = vcombine.low %v5524_v54, %v5533_v8 }
 0x116   : > { %v4406_v54 = vld [vmem:[%s5760_s1 + $0xbe8] ss:$16 sps:$4 sm:$0xff]  }
 0x117   : > { %v2312_v8 = vrot.slane %v3609_v13, 1 }
 0x118   : > { %2971 = vmatpush1.bf16.msra.mxu0 %v4239_v19  ;;  %3057 = vmatpush1.bf16.msra.mxu1 %v4242_v20  ;;  %v4322_v19 = vld [vmem:[%s5760_s1 + $0xa28] ss:$16 sps:$4 sm:$0xff]   ;;  %v4327_v20 = vld [vmem:[%s5760_s1 + $0xa44] ss:$16 sps:$4 sm:$0xff]  }
 0x119   : > { %2972 = vmatprep.subr.bf16.mxu0 %v4247_v21  ;;  %3058 = vmatprep.subr.bf16.mxu1 %v4250_v22  ;;  %v4330_v21 = vld [vmem:[%s5760_s1 + $0xa4c] ss:$16 sps:$4 sm:$0xff]   ;;  %v4325_v22 = vld [vmem:[%s5760_s1 + $0xa40] ss:$16 sps:$4 sm:$0xff]  }
 0x11c   : > { %2973 = vmatpush1.bf16.msra.mxu0 %v4245_v23  ;;  %3059 = vmatpush1.bf16.msra.mxu1 %v4248_v24  ;;  %v4328_v23 = vld [vmem:[%s5760_s1 + $0xa48] ss:$16 sps:$4 sm:$0xff]   ;;  %v4333_v24 = vld [vmem:[%s5760_s1 + $0xa64] ss:$16 sps:$4 sm:$0xff]  }
 0x11d   : > { %2974 = vmatprep.subr.bf16.mxu0 %v4253_v25  ;;  %3060 = vmatprep.subr.bf16.mxu1 %v4256_v27  ;;  %v4336_v25 = vld [vmem:[%s5760_s1 + $0xa6c] ss:$16 sps:$4 sm:$0xff]   ;;  %v4331_v27 = vld [vmem:[%s5760_s1 + $0xa60] ss:$16 sps:$4 sm:$0xff]  }
 0x120   : > { %2975 = vmatpush1.bf16.msra.mxu0 %v4251_v28  ;;  %3061 = vmatpush1.bf16.msra.mxu1 %v4254_v29  ;;  %v4334_v28 = vld [vmem:[%s5760_s1 + $0xa68] ss:$16 sps:$4 sm:$0xff]   ;;  %v4339_v29 = vld [vmem:[%s5760_s1 + $0xa84] ss:$16 sps:$4 sm:$0xff]  }
 0x121   : > { %2976 = vmatprep.subr.bf16.mxu0 %v4259_v30  ;;  %3062 = vmatprep.subr.bf16.mxu1 %v4262_v32  ;;  %v4342_v30 = vld [vmem:[%s5760_s1 + $0xa8c] ss:$16 sps:$4 sm:$0xff]   ;;  %v4337_v32 = vld [vmem:[%s5760_s1 + $0xa80] ss:$16 sps:$4 sm:$0xff]  }
 0x124   : > { %2977 = vmatpush1.bf16.msra.mxu0 %v4257_v33  ;;  %3063 = vmatpush1.bf16.msra.mxu1 %v4260_v34  ;;  %v4340_v33 = vld [vmem:[%s5760_s1 + $0xa88] ss:$16 sps:$4 sm:$0xff]   ;;  %v4345_v34 = vld [vmem:[%s5760_s1 + $0xaa4] ss:$16 sps:$4 sm:$0xff]  }
 0x125   : > { %2978 = vmatprep.subr.bf16.mxu0 %v4265_v35  ;;  %3064 = vmatprep.subr.bf16.mxu1 %v4268_v36  ;;  %v4348_v35 = vld [vmem:[%s5760_s1 + $0xaac] ss:$16 sps:$4 sm:$0xff]   ;;  %v4343_v36 = vld [vmem:[%s5760_s1 + $0xaa0] ss:$16 sps:$4 sm:$0xff]  }
 0x128   : > { %2979 = vmatpush1.bf16.msra.mxu0 %v4263_v37  ;;  %3065 = vmatpush1.bf16.msra.mxu1 %v4266_v38  ;;  %v4346_v37 = vld [vmem:[%s5760_s1 + $0xaa8] ss:$16 sps:$4 sm:$0xff]   ;;  %v4351_v38 = vld [vmem:[%s5760_s1 + $0xac4] ss:$16 sps:$4 sm:$0xff]  }
 0x129   : > { %2980 = vmatprep.subr.bf16.mxu0 %v4271_v39  ;;  %3066 = vmatprep.subr.bf16.mxu1 %v4274_v40  ;;  %v4354_v39 = vld [vmem:[%s5760_s1 + $0xacc] ss:$16 sps:$4 sm:$0xff]   ;;  %v4349_v40 = vld [vmem:[%s5760_s1 + $0xac0] ss:$16 sps:$4 sm:$0xff]  }
 0x12c   : > { %2981 = vmatpush1.bf16.msra.mxu0 %v4269_v41  ;;  %3067 = vmatpush1.bf16.msra.mxu1 %v4272_v42  ;;  %v4352_v41 = vld [vmem:[%s5760_s1 + $0xac8] ss:$16 sps:$4 sm:$0xff]   ;;  %v4357_v42 = vld [vmem:[%s5760_s1 + $0xae4] ss:$16 sps:$4 sm:$0xff]  }
 0x12d   : > { %2982 = vmatprep.subr.bf16.mxu0 %v4277_v43  ;;  %3068 = vmatprep.subr.bf16.mxu1 %v4280_v44  ;;  %v4360_v43 = vld [vmem:[%s5760_s1 + $0xaec] ss:$16 sps:$4 sm:$0xff]   ;;  %v4355_v44 = vld [vmem:[%s5760_s1 + $0xae0] ss:$16 sps:$4 sm:$0xff]  }
 0x130   : > { %2983 = vmatpush1.bf16.msra.mxu0 %v4275_v45  ;;  %3069 = vmatpush1.bf16.msra.mxu1 %v4278_v46  ;;  %v4358_v45 = vld [vmem:[%s5760_s1 + $0xae8] ss:$16 sps:$4 sm:$0xff]   ;;  %v4363_v46 = vld [vmem:[%s5760_s1 + $0xb04] ss:$16 sps:$4 sm:$0xff]  }
 0x131   : > { %2984 = vmatprep.subr.bf16.mxu0 %v4283_v47  ;;  %3070 = vmatprep.subr.bf16.mxu1 %v4286_v48  ;;  %v4366_v47 = vld [vmem:[%s5760_s1 + $0xb0c] ss:$16 sps:$4 sm:$0xff]   ;;  %v4361_v48 = vld [vmem:[%s5760_s1 + $0xb00] ss:$16 sps:$4 sm:$0xff]  }
 0x134   : > { %2985 = vmatpush1.bf16.msra.mxu0 %v4281_v49  ;;  %3071 = vmatpush1.bf16.msra.mxu1 %v4284_v50  ;;  %v4364_v49 = vld [vmem:[%s5760_s1 + $0xb08] ss:$16 sps:$4 sm:$0xff]   ;;  %v4369_v50 = vld [vmem:[%s5760_s1 + $0xb24] ss:$16 sps:$4 sm:$0xff]  }
 0x135   : > { %2986 = vmatprep.subr.bf16.mxu0 %v4289_v51  ;;  %3072 = vmatprep.subr.bf16.mxu1 %v4292_v55  ;;  %v4372_v51 = vld [vmem:[%s5760_s1 + $0xb2c] ss:$16 sps:$4 sm:$0xff]   ;;  %v4367_v55 = vld [vmem:[%s5760_s1 + $0xb20] ss:$16 sps:$4 sm:$0xff]  }
 0x138   : > { %2987 = vmatpush1.bf16.msra.mxu0 %v4287_v56  ;;  %3073 = vmatpush1.bf16.msra.mxu1 %v4290_v58  ;;  %v4370_v56 = vld [vmem:[%s5760_s1 + $0xb28] ss:$16 sps:$4 sm:$0xff]   ;;  %v4375_v58 = vld [vmem:[%s5760_s1 + $0xb44] ss:$16 sps:$4 sm:$0xff]  }
 0x139   : > { %2988 = vmatprep.subr.bf16.mxu0 %v4295_v60  ;;  %3074 = vmatprep.subr.bf16.mxu1 %v4298_v61  ;;  %v4378_v60 = vld [vmem:[%s5760_s1 + $0xb4c] ss:$16 sps:$4 sm:$0xff]   ;;  %v4373_v61 = vld [vmem:[%s5760_s1 + $0xb40] ss:$16 sps:$4 sm:$0xff]  }
 0x13c   : > { %2989 = vmatpush1.bf16.msra.mxu0 %v4293_v63  ;;  %3075 = vmatpush1.bf16.msra.mxu1 %v4296_v0  ;;  %v4376_v63 = vld [vmem:[%s5760_s1 + $0xb48] ss:$16 sps:$4 sm:$0xff]   ;;  %v4381_v0 = vld [vmem:[%s5760_s1 + $0xb64] ss:$16 sps:$4 sm:$0xff]  }
 0x13d   : > { %2990 = vmatprep.subr.bf16.mxu0 %v4301_v1  ;;  %3076 = vmatprep.subr.bf16.mxu1 %v4304_v62  ;;  %v4384_v1 = vld [vmem:[%s5760_s1 + $0xb6c] ss:$16 sps:$4 sm:$0xff]   ;;  %v4379_v62 = vld [vmem:[%s5760_s1 + $0xb60] ss:$16 sps:$4 sm:$0xff]  }
 0x140   : > { %2991 = vmatpush1.bf16.msra.mxu0 %v4299_v2  ;;  %3077 = vmatpush1.bf16.msra.mxu1 %v4302_v3  ;;  %v4382_v2 = vld [vmem:[%s5760_s1 + $0xb68] ss:$16 sps:$4 sm:$0xff]   ;;  %v4387_v3 = vld [vmem:[%s5760_s1 + $0xb84] ss:$16 sps:$4 sm:$0xff]  }
 0x141   : > { %2992 = vmatprep.subr.bf16.mxu0 %v4307_v6  ;;  %3078 = vmatprep.subr.bf16.mxu1 %v4310_v7  ;;  %v4385_v6 = vld [vmem:[%s5760_s1 + $0xb80] ss:$16 sps:$4 sm:$0xff]   ;;  %v4388_v7 = vld [vmem:[%s5760_s1 + $0xb88] ss:$16 sps:$4 sm:$0xff]  }
 0x144   : > { %2993 = vmatpush1.bf16.msra.mxu0 %v4305_v59  ;;  %3079 = vmatpush1.bf16.msra.mxu1 %v4308_v52  ;;  %v4396_v59 = vld [vmem:[%s5760_s1 + $0xbac] ss:$16 sps:$4 sm:$0xff]   ;;  %v4391_v52 = vld [vmem:[%s5760_s1 + $0xba0] ss:$16 sps:$4 sm:$0xff]  }
 0x145   : > { %3005 = vmatprep.subr.bf16.mxu0 %v4314_v26  ;;  %3091 = vmatprep.subr.bf16.mxu1 %v4317_v11  ;;  %v4402_v26 = vld [vmem:[%s5760_s1 + $0xbcc] ss:$16 sps:$4 sm:$0xff]   ;;  %v4397_v11 = vld [vmem:[%s5760_s1 + $0xbc0] ss:$16 sps:$4 sm:$0xff]  }
 0x147   : > { %2995 = vmatmul.mubr.bf16.vlgmr.msra.gmra.mrb[0].mxu0 %v2308_v15  ;;  %3081 = vmatmul.mubr.bf16.vlgmr.msra.gmra.mrb[0].mxu1 %v2308_v15  ;;  %v4403_v15 = vld [vmem:[%s5760_s1 + $0xbe0] ss:$16 sps:$4 sm:$0xff]  }
 0x148   : > { %3006 = vmatpush1.bf16.msra.mxu0 %v4312_v14  ;;  %3092 = vmatpush1.bf16.msra.mxu1 %v4315_v5  ;;  %v4405_v14 = vld [vmem:[%s5760_s1 + $0xbe4] ss:$16 sps:$4 sm:$0xff]   ;;  %v4408_v5 = vld [vmem:[%s5760_s1 + $0xbec] ss:$16 sps:$4 sm:$0xff]  }
 0x149   : > { %3007 = vmatprep.subr.bf16.mxu0 %v4321_v16  ;;  %3093 = vmatprep.subr.bf16.mxu1 %v4324_v57  ;;  %v2313_v16 = vrot.slane %v4912_v31, 1 }
 0x14a   : > { %3037 = vmatprep.mubr.bf16.mxu0 %v2317_v17  ;;  %3123 = vmatprep.mubr.bf16.mxu1 %v2317_v17  ;;  %v3144_v17 = vlaneseq }
 0x14b   : > { %v2314_v57 = vsel %vm2305_vm1, %v2312_v8, %v2313_v16 }
 0x14c   : > { %3008 = vmatpush1.bf16.msra.mxu0 %v4319_v18  ;;  %3094 = vmatpush1.bf16.msra.mxu1 %v4322_v19  ;;  %v3145_v18 = vshrl.u32 %v3144_v17, 7 }
 0x14d   : > { %3009 = vmatprep.subr.bf16.mxu0 %v4327_v20  ;;  %3095 = vmatprep.subr.bf16.mxu1 %v4330_v21  ;;  %v3142_v21 = vld [vmem:[%s5761_s2] sm:$0xf] }
 0x14e   : > { %v3146_v19 = vsub.s32 0, %v3145_v18  ;;  %v3154_v20 = vsub.s32 2, %v3145_v18 }
 0x150   : > { %3010 = vmatpush1.bf16.msra.mxu0 %v4325_v22  ;;  %3096 = vmatpush1.bf16.msra.mxu1 %v4328_v23  ;;  %v3150_v22 = vsub.s32 1, %v3145_v18  ;;  %v3158_v23 = vsub.s32 3, %v3145_v18  ;;  %v3155_v31 = vrot.slane %v3142_v21, %v3154_v20 }
 0x151   : > { %3011 = vmatprep.subr.bf16.mxu0 %v4333_v24  ;;  %3097 = vmatprep.subr.bf16.mxu1 %v4336_v25  ;;  %v3147_v24 = vrot.slane %v3142_v21, %v3146_v19 }
 0x152   : > { %v3151_v25 = vrot.slane %v3142_v21, %v3150_v22 }
 0x154   : > { %3012 = vmatpush1.bf16.msra.mxu0 %v4331_v27  ;;  %3098 = vmatpush1.bf16.msra.mxu1 %v4334_v28  ;;  %v3159_v27 = vrot.slane %v3142_v21, %v3158_v23 }
 0x155   : > { %3013 = vmatprep.subr.bf16.mxu0 %v4339_v29  ;;  %3099 = vmatprep.subr.bf16.mxu1 %v4342_v30 }
 0x158   : > { %3014 = vmatpush1.bf16.msra.mxu0 %v4337_v32  ;;  %3100 = vmatpush1.bf16.msra.mxu1 %v4340_v33 }
 0x159   : > { %3015 = vmatprep.subr.bf16.mxu0 %v4345_v34  ;;  %3101 = vmatprep.subr.bf16.mxu1 %v4348_v35 }
 0x15c   : > { %3016 = vmatpush1.bf16.msra.mxu0 %v4343_v36  ;;  %3102 = vmatpush1.bf16.msra.mxu1 %v4346_v37 }
 0x15d   : > { %3017 = vmatprep.subr.bf16.mxu0 %v4351_v38  ;;  %3103 = vmatprep.subr.bf16.mxu1 %v4354_v39 }
 0x160   : > { %3018 = vmatpush1.bf16.msra.mxu0 %v4349_v40  ;;  %3104 = vmatpush1.bf16.msra.mxu1 %v4352_v41 }
 0x161   : > { %3019 = vmatprep.subr.bf16.mxu0 %v4357_v42  ;;  %3105 = vmatprep.subr.bf16.mxu1 %v4360_v43 }
 0x164   : > { %3020 = vmatpush1.bf16.msra.mxu0 %v4355_v44  ;;  %3106 = vmatpush1.bf16.msra.mxu1 %v4358_v45 }
 0x165   : > { %3021 = vmatprep.subr.bf16.mxu0 %v4363_v46  ;;  %3107 = vmatprep.subr.bf16.mxu1 %v4366_v47 }
 0x168   : > { %3022 = vmatpush1.bf16.msra.mxu0 %v4361_v48  ;;  %3108 = vmatpush1.bf16.msra.mxu1 %v4364_v49 }
 0x169   : > { %3023 = vmatprep.subr.bf16.mxu0 %v4369_v50  ;;  %3109 = vmatprep.subr.bf16.mxu1 %v4372_v51 }
 0x16c   : > { %3024 = vmatpush1.bf16.msra.mxu0 %v4367_v55  ;;  %3110 = vmatpush1.bf16.msra.mxu1 %v4370_v56 }
 0x16d   : > { %3025 = vmatprep.subr.bf16.mxu0 %v4375_v58  ;;  %3111 = vmatprep.subr.bf16.mxu1 %v4378_v60 }
 0x170   : > { %3026 = vmatpush1.bf16.msra.mxu0 %v4373_v61  ;;  %3112 = vmatpush1.bf16.msra.mxu1 %v4376_v63 }
 0x171   : > { %3027 = vmatprep.subr.bf16.mxu0 %v4381_v0  ;;  %3113 = vmatprep.subr.bf16.mxu1 %v4384_v1 }
 0x174   : > { %3028 = vmatpush1.bf16.msra.mxu0 %v4379_v62  ;;  %3114 = vmatpush1.bf16.msra.mxu1 %v4382_v2 }
 0x175   : > { %3029 = vmatprep.subr.bf16.mxu0 %v4387_v3  ;;  %3115 = vmatprep.subr.bf16.mxu1 %v4390_v4 }
 0x178   : > { %3030 = vmatpush1.bf16.msra.mxu0 %v4385_v6  ;;  %3116 = vmatpush1.bf16.msra.mxu1 %v4388_v7 }
 0x179   : > { %3031 = vmatprep.subr.bf16.mxu0 %v4393_v53  ;;  %3117 = vmatprep.subr.bf16.mxu1 %v4396_v59 }
 0x17c   : > { %3032 = vmatpush1.bf16.msra.mxu0 %v4391_v52  ;;  %3118 = vmatpush1.bf16.msra.mxu1 %v4394_v9 }
 0x17d   : > { %3033 = vmatprep.subr.bf16.mxu0 %v4399_v10  ;;  %3119 = vmatprep.subr.bf16.mxu1 %v4402_v26 }
 0x180   : > { %3034 = vmatpush1.bf16.msra.mxu0 %v4397_v11  ;;  %3120 = vmatpush1.bf16.msra.mxu1 %v4400_v12 }
 0x181   : > { %3035 = vmatprep.subr.bf16.mxu0 %v4405_v14  ;;  %3121 = vmatprep.subr.bf16.mxu1 %v4408_v5 }
 0x184   : > { %3036 = vmatpush1.bf16.msra.mxu0 %v4403_v15  ;;  %3122 = vmatpush1.bf16.msra.mxu1 %v4406_v54 }
 0x187   : > { %3038 = vmatmul.mubr.bf16.vlgmr.msra.gmra.mrb[0].mxu0 %v2314_v57  ;;  %3124 = vmatmul.mubr.bf16.vlgmr.msra.gmra.mrb[0].mxu1 %v2314_v57 }
 0x25a   : > { %v3039_v28 = vpop.f32.mrb[0].mxu0  ;;  %v3125_v29 = vpop.f32.mrb[0].mxu1 }
 0x25b   : > { %v3164_v30 = vadd.f32 %v3147_v24, %v3039_v28  ;;  %v3166_v32 = vadd.f32 %v3155_v31, %v3125_v29  ;;  %v3041_v33 = vpop.f32.mrb[1].mxu0  ;;  %v3127_v34 = vpop.f32.mrb[1].mxu1 }
 0x25c   : > { %v3165_v35 = vadd.f32 %v3151_v25, %v3041_v33  ;;  %v3167_v36 = vadd.f32 %v3159_v27, %v3127_v34  ;;  %v3043_v37 = vpop.f32.mrb[2].mxu0  ;;  %v3129_v38 = vpop.f32.mrb[2].mxu1 }
 0x25d   : > { %v3180_v39 = vmin.f32 %v3164_v30, 0.0  ;;  %v3182_v40 = vmin.f32 %v3166_v32, 0.0  ;;  %v3045_v41 = vpop.f32.mrb[3].mxu0  ;;  %v3131_v42 = vpop.f32.mrb[3].mxu1  ;;  %v3168_v47 = vadd.f32 %v3147_v24, %v3043_v37  ;;  %v3170_v48 = vadd.f32 %v3155_v31, %v3129_v38 }
 0x25e   : > { %v3181_v43 = vmin.f32 %v3165_v35, 0.0  ;;  %v3183_v44 = vmin.f32 %v3167_v36, 0.0  ;;  %v3169_v51 = vadd.f32 %v3151_v25, %v3045_v41  ;;  %v3171_v55 = vadd.f32 %v3159_v27, %v3131_v42 }
 0x25f   : > { %v3188_v45 = vmul.f32 1.442695, %v3180_v39  ;;  %v3192_v46 = vmul.f32 1.442695, %v3182_v40  ;;  %v3184_v56 = vmin.f32 %v3168_v47, 0.0  ;;  %v3186_v58 = vmin.f32 %v3170_v48, 0.0 }
 0x260   : > { %v3190_v49 = vmul.f32 1.442695, %v3181_v43  ;;  %v3194_v50 = vmul.f32 1.442695, %v3183_v44  ;;  %v3185_v60 = vmin.f32 %v3169_v51, 0.0  ;;  %v3187_v63 = vmin.f32 %v3171_v55, 0.0 }
 0x261   : > { %4411 = vpow2.f32 %v3188_v45  ;;  %v3196_v61 = vmul.f32 1.442695, %v3184_v56  ;;  %v3200_v0 = vmul.f32 1.442695, %v3186_v58  ;;  %vm3172_vm2 = vcmp.gt.f32.partialorder %v3164_v30, 0.0 }
 0x262   : > { %4413 = vpow2.f32 %v3192_v46  ;;  %v3198_v1 = vmul.f32 1.442695, %v3185_v60  ;;  %v3202_v62 = vmul.f32 1.442695, %v3187_v63  ;;  %vm3174_vm3 = vcmp.gt.f32.partialorder %v3166_v32, 0.0 }
 0x263   : > { %4415 = vpow2.f32 %v3190_v49  ;;  %vm3173_vm4 = vcmp.gt.f32.partialorder %v3165_v35, 0.0  ;;  %vm3175_vm5 = vcmp.gt.f32.partialorder %v3167_v36, 0.0  ;;  %vm3176_vm6 = vcmp.gt.f32.partialorder %v3168_v47, 0.0 }
 0x264   : > { %4417 = vpow2.f32 %v3194_v50  ;;  %vm3178_vm7 = vcmp.gt.f32.partialorder %v3170_v48, 0.0  ;;  %vm3177_vm8 = vcmp.gt.f32.partialorder %v3169_v51, 0.0  ;;  %vm3179_vm9 = vcmp.gt.f32.partialorder %v3171_v55, 0.0 }
 0x265   : > { %4419 = vpow2.f32 %v3196_v61 }
 0x266   : > { %4421 = vpow2.f32 %v3200_v0 }
 0x267   : > { %4423 = vpow2.f32 %v3198_v1 }
 0x268   : > { %4425 = vpow2.f32 %v3202_v62 }
 0x26b   : > { %v4412_v2 = vpop.eup %4411 }
 0x26c   : > { %v4414_v3 = vpop.eup %4413  ;;  %v3739_v4 = vadd.f32 -1.0, %v4412_v2 }
 0x26d   : > { %v4416_v6 = vpop.eup %4415  ;;  %v3741_v7 = vadd.f32 -1.0, %v4414_v3 }
 0x26e   : > { %v4418_v53 = vpop.eup %4417  ;;  %v3212_v59 = vsel %vm3172_vm2, %v3164_v30, %v3739_v4  ;;  %v3740_v52 = vadd.f32 -1.0, %v4416_v6 }
 0x26f   : > { %v4420_v9 = vpop.eup %4419  ;;  %v3214_v10 = vsel %vm3174_vm3, %v3166_v32, %v3741_v7  ;;  %v3742_v26 = vadd.f32 -1.0, %v4418_v53 }
 0x270   : > { %v4422_v11 = vpop.eup %4421  ;;  %v3213_v12 = vsel %vm3173_vm4, %v3165_v35, %v3740_v52  ;;  %v3743_v13 = vadd.f32 -1.0, %v4420_v9 }
 0x271   : > { %v4424_v14 = vpop.eup %4423  ;;  %v3754_v5 = vpack.c.bf16 %v3213_v12, %v3212_v59  ;;  %v3215_v15 = vsel %vm3175_vm5, %v3167_v36, %v3742_v26  ;;  %v3745_v54 = vadd.f32 -1.0, %v4422_v11 }
 0x272   : > { %v4426_v8 = vpop.eup %4425  ;;  %v3755_v16 = vpack.c.bf16 %v3215_v15, %v3214_v10  ;;  %v3216_v57 = vsel %vm3176_vm6, %v3168_v47, %v3743_v13  ;;  %v3744_v17 = vadd.f32 -1.0, %v4424_v14 }
 0x273   : > { %3244 = vst [vmem:[%s194_s8] sm:$0xff] %v3754_v5  ;;  %v3218_v18 = vsel %vm3178_vm7, %v3170_v48, %v3745_v54  ;;  %v3746_v19 = vadd.f32 -1.0, %v4426_v8 }
 0x274   : > { %3245 = vst [vmem:[%s194_s8 + $0x8] sm:$0xff] %v3755_v16  ;;  %v3217_v20 = vsel %vm3177_vm8, %v3169_v51, %v3744_v17 }
 0x275   : > { %v3756_v21 = vpack.c.bf16 %v3217_v20, %v3216_v57  ;;  %v3219_v22 = vsel %vm3179_vm9, %v3171_v55, %v3746_v19 }
 0x276   : > { %v3757_v23 = vpack.c.bf16 %v3219_v22, %v3218_v18 }
 0x277   : > { %3246 = vst [vmem:[%s194_s8 + $0x10] sm:$0xff] %v3756_v21 }
 0x278   : > { %3247 = vst [vmem:[%s194_s8 + $0x18] sm:$0xff] %v3757_v23 }
 0x279 PF: > { %s13_s14 = sadd.s32 1, %s4451_s14   ;;  %s5763_s12 = smov %s4447_s13 }
 0x27a   : > { %p10_p5 = scmp.ge.s32.totalorder %s13_s14, 4   ;;  %s5764_s13 = smov %s5766_s15 }
 0x27c   :  { %12 = sbr.rel (!%p10_p5) target bundleno = 2 (0x2), region = 62 }

// kernel: dito_trainer_forward.36
= control target key start
LH: loop header
LB: loop body
LE: loop exit
PB: predicated region body
PF: predicated region fallthrough
CT: control target
= control target key end

     0   :  { %s2829_s15 = smov 0   ;;  %s2831_s16 = smov 0   ;;  %s3636_s0 = inlined_call_operand.vmem [shape: bf16[2,34,512], index: 0, kind: input, shape index: {}]   ;;  %s3637_s1 = inlined_call_operand.vmem [shape: bf16[1536,256], index: 1, kind: input, shape index: {}]   ;;  %s3638_s2 = inlined_call_operand.vmem [shape: f32[1,256], index: 2, kind: input, shape index: {}]   ;;  %s3639_s3 = inlined_call_operand.vmem [shape: bf16[2,32,256], index: 3, kind: input, shape index: {}]   ;;  %s3640_s4 = inlined_call_operand.vmem [shape: bf16[2,32,256], index: 4, kind: output, shape index: {}]  }
   0x1   :  { %s2833_s17 = smov 0  }
   0x2 LB: > { %s26_s18 = sadd.s32 1, %s2798_s16  ;;  %p2158_p0 = scmp.ge.s32.totalorder %s2802_s17, 1  ;;  %s2802_s17 = sphi %s2833_s17, %s14_s17   ;;  %s2798_s16 = sphi %s2831_s16, %s3642_s16   ;;  %s2794_s15 = sphi %s2829_s15, %s3641_s15  }
   0x3   : > { %p28_p1 = scmp.ge.s32.totalorder %s26_s18, 2  ;;  %p194_p2 = scmp.lt.s32.totalorder %s2802_s17, 3 }
   0x5   : > { %s3644_s18 = smov (%p28_p1, %s26_s18), 0  ;;  %p195_p3 = pnand %p2158_p0, %p194_p2 }
   0x6   : > { %v2457_v0 = vld [vmem:[%s3637_s1 + $0x204] ss:$8 sps:$4 sm:$0xff] (!%p195_p3)   ;;  %v2461_v2 = vld [vmem:[%s3637_s1 + $0x200] ss:$8 sps:$4 sm:$0xff] (!%p195_p3)   ;;  %v2463_v4 = vld [vmem:[%s3637_s1 + $0x214] ss:$8 sps:$4 sm:$0xff] (!%p195_p3)  }
   0x7   : > { %198 = sbr.rel (%p195_p3) target bundleno = 450 (0x1c2), region = 36  ;;  %v2459_v1 = vld [vmem:[%s3637_s1 + $0x104] ss:$8 sps:$4 sm:$0xff] (!%p195_p3)   ;;  %851 = vmatprep.subr.bf16.mxu1 (!%p195_p3), %v2457_v0  ;;  %v2462_v3 = vld [vmem:[%s3637_s1 + $0x100] ss:$8 sps:$4 sm:$0xff] (!%p195_p3)   ;;  %p235_p4 = scmp.lt.s32.totalorder (!%p195_p3), %s2794_s15, 1 }
   0x8   : > { %1338 = vmatprep.subr.bf16.mxu0 (!%p195_p3), %v2459_v1  ;;  %852 = vmatpush1.bf16.msra.mxu1 (!%p195_p3), %v2461_v2  ;;  %v2465_v5 = vld [vmem:[%s3637_s1 + $0x114] ss:$8 sps:$4 sm:$0xff] (!%p195_p3)   ;;  %v2467_v6 = vld [vmem:[%s3637_s1 + $0x210] ss:$8 sps:$4 sm:$0xff] (!%p195_p3)   ;;  %v2469_v8 = vld [vmem:[%s3637_s1 + $0x224] ss:$8 sps:$4 sm:$0xff] (!%p195_p3)  }
   0x9   : > { %1339 = vmatpush1.bf16.msra.mxu0 (!%p195_p3), %v2462_v3  ;;  %853 = vmatprep.subr.bf16.mxu1 (!%p195_p3), %v2463_v4  ;;  %v2468_v7 = vld [vmem:[%s3637_s1 + $0x110] ss:$8 sps:$4 sm:$0xff] (!%p195_p3)   ;;  %v2471_v9 = vld [vmem:[%s3637_s1 + $0x124] ss:$8 sps:$4 sm:$0xff] (!%p195_p3)   ;;  %v2473_v10 = vld [vmem:[%s3637_s1 + $0x220] ss:$8 sps:$4 sm:$0xff] (!%p195_p3)  }
   0xa   : > { %1340 = vmatprep.subr.bf16.mxu0 (!%p195_p3), %v2465_v5  ;;  %v2474_v11 = vld [vmem:[%s3637_s1 + $0x120] ss:$8 sps:$4 sm:$0xff] (!%p195_p3)   ;;  %v2475_v12 = vld [vmem:[%s3637_s1 + $0x234] ss:$8 sps:$4 sm:$0xff] (!%p195_p3)   ;;  %v2479_v14 = vld [vmem:[%s3637_s1 + $0x230] ss:$8 sps:$4 sm:$0xff] (!%p195_p3)  }
   0xb   : > { %v2477_v13 = vld [vmem:[%s3637_s1 + $0x134] ss:$8 sps:$4 sm:$0xff] (!%p195_p3)   ;;  %v2480_v15 = vld [vmem:[%s3637_s1 + $0x130] ss:$8 sps:$4 sm:$0xff] (!%p195_p3)   ;;  %v2481_v16 = vld [vmem:[%s3637_s1 + $0x244] ss:$8 sps:$4 sm:$0xff] (!%p195_p3)  }
   0xc   : > { %854 = vmatpush1.bf16.msra.mxu1 (!%p195_p3), %v2467_v6  ;;  %v2483_v17 = vld [vmem:[%s3637_s1 + $0x144] ss:$8 sps:$4 sm:$0xff] (!%p195_p3)   ;;  %v2485_v18 = vld [vmem:[%s3637_s1 + $0x240] ss:$8 sps:$4 sm:$0xff] (!%p195_p3)   ;;  %v2487_v20 = vld [vmem:[%s3637_s1 + $0x254] ss:$8 sps:$4 sm:$0xff] (!%p195_p3)  }
   0xd   : > { %1341 = vmatpush1.bf16.msra.mxu0 (!%p195_p3), %v2468_v7  ;;  %855 = vmatprep.subr.bf16.mxu1 (!%p195_p3), %v2469_v8  ;;  %v2486_v19 = vld [vmem:[%s3637_s1 + $0x140] ss:$8 sps:$4 sm:$0xff] (!%p195_p3)   ;;  %v2489_v21 = vld [vmem:[%s3637_s1 + $0x154] ss:$8 sps:$4 sm:$0xff] (!%p195_p3)   ;;  %v2491_v22 = vld [vmem:[%s3637_s1 + $0x250] ss:$8 sps:$4 sm:$0xff] (!%p195_p3)  }
   0xe   : > { %1342 = vmatprep.subr.bf16.mxu0 %v2471_v9  ;;  %v2492_v23 = vld [vmem:[%s3637_s1 + $0x150] ss:$8 sps:$4 sm:$0xff]   ;;  %v2493_v24 = vld [vmem:[%s3637_s1 + $0x264] ss:$8 sps:$4 sm:$0xff]   ;;  %v2497_v26 = vld [vmem:[%s3637_s1 + $0x260] ss:$8 sps:$4 sm:$0xff]  }
   0xf   : > { %v2495_v25 = vld [vmem:[%s3637_s1 + $0x164] ss:$8 sps:$4 sm:$0xff]   ;;  %v2498_v27 = vld [vmem:[%s3637_s1 + $0x160] ss:$8 sps:$4 sm:$0xff]   ;;  %v2499_v28 = vld [vmem:[%s3637_s1 + $0x274] ss:$8 sps:$4 sm:$0xff]  }
  0x10   : > { %856 = vmatpush1.bf16.msra.mxu1 %v2473_v10  ;;  %v2501_v29 = vld [vmem:[%s3637_s1 + $0x174] ss:$8 sps:$4 sm:$0xff]   ;;  %v2503_v30 = vld [vmem:[%s3637_s1 + $0x270] ss:$8 sps:$4 sm:$0xff]   ;;  %v2505_v32 = vld [vmem:[%s3637_s1 + $0x284] ss:$8 sps:$4 sm:$0xff]  }
  0x11   : > { %1343 = vmatpush1.bf16.msra.mxu0 %v2474_v11  ;;  %857 = vmatprep.subr.bf16.mxu1 %v2475_v12  ;;  %v2504_v31 = vld [vmem:[%s3637_s1 + $0x170] ss:$8 sps:$4 sm:$0xff]   ;;  %v2507_v33 = vld [vmem:[%s3637_s1 + $0x184] ss:$8 sps:$4 sm:$0xff]   ;;  %v2509_v34 = vld [vmem:[%s3637_s1 + $0x280] ss:$8 sps:$4 sm:$0xff]  }
  0x12   : > { %1344 = vmatprep.subr.bf16.mxu0 %v2477_v13  ;;  %v2510_v35 = vld [vmem:[%s3637_s1 + $0x180] ss:$8 sps:$4 sm:$0xff]   ;;  %s3646_s15 = smov (!%p235_p4, %s2794_s15), 1  ;;  %v2511_v36 = vld [vmem:[%s3637_s1 + $0x294] ss:$8 sps:$4 sm:$0xff]   ;;  %vm1467_vm1 = vcmask 1046528  }
  0x13   : > { %v2513_v37 = vld [vmem:[%s3637_s1 + $0x194] ss:$8 sps:$4 sm:$0xff]   ;;  %v2515_v38 = vld [vmem:[%s3637_s1 + $0x290] ss:$8 sps:$4 sm:$0xff]   ;;  %s2432_s5 = smul.u32 80, %s3646_s15 }
  0x14   : > { %858 = vmatpush1.bf16.msra.mxu1 %v2479_v14  ;;  %v2516_v39 = vld [vmem:[%s3637_s1 + $0x190] ss:$8 sps:$4 sm:$0xff]   ;;  %v2517_v40 = vld [vmem:[%s3637_s1 + $0x2a4] ss:$8 sps:$4 sm:$0xff]   ;;  %v2521_v42 = vld [vmem:[%s3637_s1 + $0x2a0] ss:$8 sps:$4 sm:$0xff]  }
  0x15   : > { %1345 = vmatpush1.bf16.msra.mxu0 %v2480_v15  ;;  %859 = vmatprep.subr.bf16.mxu1 %v2481_v16  ;;  %v2519_v41 = vld [vmem:[%s3637_s1 + $0x1a4] ss:$8 sps:$4 sm:$0xff]   ;;  %v2522_v43 = vld [vmem:[%s3637_s1 + $0x1a0] ss:$8 sps:$4 sm:$0xff]   ;;  %s2989_s22 = scalar_lea.vmem %s3636_s0, %s2432_s5  ;;  %v2523_v44 = vld [vmem:[%s3637_s1 + $0x2b4] ss:$8 sps:$4 sm:$0xff]  }
  0x16   : > { %1346 = vmatprep.subr.bf16.mxu0 %v2483_v17  ;;  %v2525_v45 = vld [vmem:[%s3637_s1 + $0x1b4] ss:$8 sps:$4 sm:$0xff]   ;;  %v2527_v46 = vld [vmem:[%s3637_s1 + $0x2b0] ss:$8 sps:$4 sm:$0xff]   ;;  %v262_v48 = vld [vmem:[%s2989_s22] sm:$0xff] }
  0x17   : > { %v2528_v47 = vld [vmem:[%s3637_s1 + $0x1b0] ss:$8 sps:$4 sm:$0xff]   ;;  %v3011_v51 = vld [vmem:[%s2989_s22 + $0x24] ss:$16 sps:$4 sm:$0xff]   ;;  %v263_v54 = vld [vmem:[%s2989_s22 + $0x8] sm:$0xff] }
  0x18   : > { %860 = vmatpush1.bf16.msra.mxu1 %v2485_v18  ;;  %v3005_v49 = vld [vmem:[%s2989_s22 + $0x10] sm:$0xff]  ;;  %v2529_v52 = vld [vmem:[%s3637_s1 + $0x2c4] ss:$8 sps:$4 sm:$0xff]   ;;  %v463_v57 = vshll.u32 %v3011_v51, 16  ;;  %v3024_v58 = vld [vmem:[%s2989_s22 + $0x18] sm:$0xff] }
  0x19   : > { %1347 = vmatpush1.bf16.msra.mxu0 %v2486_v19  ;;  %861 = vmatprep.subr.bf16.mxu1 %v2487_v20  ;;  %v3008_v50 = vcombine.high %v262_v48, %v3005_v49  ;;  %v2531_v53 = vld [vmem:[%s3637_s1 + $0x1c4] ss:$8 sps:$4 sm:$0xff]   ;;  %v2533_v59 = vld [vmem:[%s3637_s1 + $0x2c0] ss:$8 sps:$4 sm:$0xff]   ;;  %v3030_v60 = vcombine.high %v263_v54, %v3024_v58  ;;  %v3038_v0 = vcombine.low %v262_v48, %v3005_v49  ;;  %v2535_v1 = vld [vmem:[%s3637_s1 + $0x2d4] ss:$8 sps:$4 sm:$0xff]  }
  0x1a   : > { %1348 = vmatprep.subr.bf16.mxu0 %v2489_v21  ;;  %v2534_v61 = vld [vmem:[%s3637_s1 + $0x1c0] ss:$8 sps:$4 sm:$0xff]   ;;  %v3035_v63 = vrot.slane %v463_v57, 1  ;;  %v2537_v2 = vld [vmem:[%s3637_s1 + $0x1d4] ss:$8 sps:$4 sm:$0xff]  }
  0x1b   : > { %v456_v55 = vshrl.u32 %v3008_v50, 16  ;;  %v458_v56 = vshll.u32 %v3008_v50, 16  ;;  %vm442_vm0 = vsmask.f32 7424  ;;  %1370 = vmatprep.mubr.bf16.mxu0 %v3030_v60  ;;  %v2539_v4 = vld [vmem:[%s3637_s1 + $0x2d0] ss:$8 sps:$4 sm:$0xff]  }
  0x1c   : > { %862 = vmatpush1.bf16.msra.mxu1 %v2491_v22  ;;  %v2540_v5 = vld [vmem:[%s3637_s1 + $0x1d0] ss:$8 sps:$4 sm:$0xff]   ;;  %v2541_v6 = vld [vmem:[%s3637_s1 + $0x2e4] ss:$8 sps:$4 sm:$0xff]   ;;  %v446_v9 = vshll.u32 %v3038_v0, 16  ;;  %v444_v14 = vshrl.u32 %v3038_v0, 16 }
  0x1d   : > { %1349 = vmatpush1.bf16.msra.mxu0 %v2492_v23  ;;  %863 = vmatprep.subr.bf16.mxu1 %v2493_v24  ;;  %v460_v62 = vrot.slane %v458_v56, 1  ;;  %v3059_v8 = vld [vmem:[%s2989_s22 + $0x20] ss:$16 sps:$4 sm:$0xff]   ;;  %v2543_v10 = vld [vmem:[%s3637_s1 + $0x1e4] ss:$8 sps:$4 sm:$0xff]  }
  0x1e   : > { %1350 = vmatprep.subr.bf16.mxu0 %v2495_v25  ;;  %v2545_v11 = vld [vmem:[%s3637_s1 + $0x2e0] ss:$8 sps:$4 sm:$0xff]   ;;  %v2547_v13 = vld [vmem:[%s3637_s1 + $0x2f4] ss:$8 sps:$4 sm:$0xff]   ;;  %v448_v15 = vrot.slane %v446_v9, 1  ;;  %v451_v16 = vshll.u32 %v3059_v8, 16 }
  0x1f   : > { %v461_v3 = vor.u32 %v460_v62, %v456_v55  ;;  %v2546_v12 = vld [vmem:[%s3637_s1 + $0x1e0] ss:$8 sps:$4 sm:$0xff]   ;;  %v2549_v17 = vld [vmem:[%s3637_s1 + $0x1f4] ss:$8 sps:$4 sm:$0xff]   ;;  %v2551_v18 = vld [vmem:[%s3637_s1 + $0x2f0] ss:$8 sps:$4 sm:$0xff]  }
  0x20   : > { %864 = vmatpush1.bf16.msra.mxu1 %v2497_v26  ;;  %v2552_v19 = vld [vmem:[%s3637_s1 + $0x1f0] ss:$8 sps:$4 sm:$0xff]   ;;  %v2558_v20 = vld [vmem:[%s3637_s1 + $0x304] ss:$8 sps:$4 sm:$0xff]   ;;  %v449_v21 = vor.u32 %v448_v15, %v444_v14  ;;  %v3088_v22 = vrot.slane %v451_v16, 1  ;;  %v3100_v26 = vcombine.low %v263_v54, %v3024_v58  ;;  %v491_v54 = vshrl.u32 %v3059_v8, 16 }
  0x21   : > { %1351 = vmatpush1.bf16.msra.mxu0 %v2498_v27  ;;  %865 = vmatprep.subr.bf16.mxu1 %v2499_v28  ;;  %v466_v7 = vsel %vm442_vm0, %v461_v3, %v3035_v63  ;;  %v2562_v23 = vld [vmem:[%s3637_s1 + $0x404] ss:$8 sps:$4 sm:$0xff]   ;;  %v2556_v24 = vld [vmem:[%s3637_s1 + $0x300] ss:$8 sps:$4 sm:$0xff]   ;;  %v2568_v28 = vld [vmem:[%s3637_s1 + $0x314] ss:$8 sps:$4 sm:$0xff]  }
  0x22   : > { %1352 = vmatprep.subr.bf16.mxu0 %v2501_v29  ;;  %883 = vmatprep.mubr.bf16.mxu1 %v466_v7  ;;  %v2560_v25 = vld [vmem:[%s3637_s1 + $0x400] ss:$8 sps:$4 sm:$0xff]   ;;  %v454_v27 = vsel %vm442_vm0, %v449_v21, %v3088_v22  ;;  %v2571_v29 = vld [vmem:[%s3637_s1 + $0x414] ss:$8 sps:$4 sm:$0xff]   ;;  %v2593_v48 = vld [vmem:[%s3637_s1 + $0x450] ss:$8 sps:$4 sm:$0xff]  }
  0x23   : > { %v2598_v55 = vld [vmem:[%s3637_s1 + $0x364] ss:$8 sps:$4 sm:$0xff]   ;;  %v480_v62 = vshrl.u32 %v3030_v60, 16  ;;  %v2599_v3 = vld [vmem:[%s3637_s1 + $0x460] ss:$8 sps:$4 sm:$0xff]  }
  0x24   : > { %866 = vmatpush1.bf16.msra.mxu1 %v2503_v30  ;;  %v2566_v30 = vld [vmem:[%s3637_s1 + $0x310] ss:$8 sps:$4 sm:$0xff]   ;;  %v2601_v56 = vld [vmem:[%s3637_s1 + $0x464] ss:$8 sps:$4 sm:$0xff]  }
  0x25   : > { %1353 = vmatpush1.bf16.msra.mxu0 %v2504_v31  ;;  %867 = vmatprep.subr.bf16.mxu1 %v2505_v32  ;;  %v2569_v31 = vld [vmem:[%s3637_s1 + $0x410] ss:$8 sps:$4 sm:$0xff]   ;;  %v2574_v32 = vld [vmem:[%s3637_s1 + $0x324] ss:$8 sps:$4 sm:$0xff]  }
  0x26   : > { %1354 = vmatprep.subr.bf16.mxu0 %v2507_v33  ;;  %v2577_v33 = vld [vmem:[%s3637_s1 + $0x424] ss:$8 sps:$4 sm:$0xff]  }
  0x27   : > { %v2613_v21 = vld [vmem:[%s3637_s1 + $0x484] ss:$8 sps:$4 sm:$0xff]  }
  0x28   : > { %868 = vmatpush1.bf16.msra.mxu1 %v2509_v34  ;;  %v2572_v34 = vld [vmem:[%s3637_s1 + $0x320] ss:$8 sps:$4 sm:$0xff]  }
  0x29   : > { %1355 = vmatpush1.bf16.msra.mxu0 %v2510_v35  ;;  %869 = vmatprep.subr.bf16.mxu1 %v2511_v36  ;;  %v2575_v35 = vld [vmem:[%s3637_s1 + $0x420] ss:$8 sps:$4 sm:$0xff]   ;;  %v2580_v36 = vld [vmem:[%s3637_s1 + $0x334] ss:$8 sps:$4 sm:$0xff]  }
  0x2a   : > { %1356 = vmatprep.subr.bf16.mxu0 %v2513_v37  ;;  %v2583_v37 = vld [vmem:[%s3637_s1 + $0x434] ss:$8 sps:$4 sm:$0xff]  }
  0x2c   : > { %870 = vmatpush1.bf16.msra.mxu1 %v2515_v38  ;;  %v2578_v38 = vld [vmem:[%s3637_s1 + $0x330] ss:$8 sps:$4 sm:$0xff]  }
  0x2d   : > { %1357 = vmatpush1.bf16.msra.mxu0 %v2516_v39  ;;  %871 = vmatprep.subr.bf16.mxu1 %v2517_v40  ;;  %v2581_v39 = vld [vmem:[%s3637_s1 + $0x430] ss:$8 sps:$4 sm:$0xff]   ;;  %v2586_v40 = vld [vmem:[%s3637_s1 + $0x344] ss:$8 sps:$4 sm:$0xff]  }
  0x2e   : > { %1358 = vmatprep.subr.bf16.mxu0 %v2519_v41  ;;  %v2589_v41 = vld [vmem:[%s3637_s1 + $0x444] ss:$8 sps:$4 sm:$0xff]  }
  0x30   : > { %872 = vmatpush1.bf16.msra.mxu1 %v2521_v42  ;;  %v2584_v42 = vld [vmem:[%s3637_s1 + $0x340] ss:$8 sps:$4 sm:$0xff]  }
  0x31   : > { %1359 = vmatpush1.bf16.msra.mxu0 %v2522_v43  ;;  %873 = vmatprep.subr.bf16.mxu1 %v2523_v44  ;;  %v2587_v43 = vld [vmem:[%s3637_s1 + $0x440] ss:$8 sps:$4 sm:$0xff]   ;;  %v2592_v44 = vld [vmem:[%s3637_s1 + $0x354] ss:$8 sps:$4 sm:$0xff]  }
  0x32   : > { %1360 = vmatprep.subr.bf16.mxu0 %v2525_v45  ;;  %v2595_v45 = vld [vmem:[%s3637_s1 + $0x454] ss:$8 sps:$4 sm:$0xff]  }
  0x34   : > { %874 = vmatpush1.bf16.msra.mxu1 %v2527_v46  ;;  %v482_v46 = vshll.u32 %v3030_v60, 16  ;;  %v3194_v60 = vld [vmem:[%s2989_s22 + $0x28] ss:$16 sps:$4 sm:$0xff]  }
  0x35   : > { %1361 = vmatpush1.bf16.msra.mxu0 %v2528_v47  ;;  %875 = vmatprep.subr.bf16.mxu1 %v2529_v52  ;;  %v2590_v47 = vld [vmem:[%s3637_s1 + $0x350] ss:$8 sps:$4 sm:$0xff]   ;;  %v499_v52 = vshrl.u32 %v3011_v51, 16 }
  0x36   : > { %1362 = vmatprep.subr.bf16.mxu0 %v2531_v53  ;;  %v334_v53 = vld [vmem:[%s2989_s22 + $0x40] sm:$0x11] }
  0x37   : > { %v3175_v57 = vcombine.high %v334_v53, %v334_v53 }
  0x38   : > { %876 = vmatpush1.bf16.msra.mxu1 %v2533_v59  ;;  %v3177_v59 = vcombine.low %v334_v53, %v334_v53  ;;  %v2641_v53 = vld [vmem:[%s3637_s1 + $0x4d0] ss:$8 sps:$4 sm:$0xff]  }
  0x39   : > { %1363 = vmatpush1.bf16.msra.mxu0 %v2534_v61  ;;  %877 = vmatprep.subr.bf16.mxu1 %v2535_v1  ;;  %v3180_v61 = vld [vmem:[%s2989_s22 + $0x2c] ss:$16 sps:$4 sm:$0xff]   ;;  %v484_v1 = vrot.slane %v482_v46, 1 }
  0x3a   : > { %1364 = vmatprep.subr.bf16.mxu0 %v2537_v2  ;;  %v2596_v2 = vld [vmem:[%s3637_s1 + $0x360] ss:$8 sps:$4 sm:$0xff]   ;;  %v495_v7 = vshll.u32 %v3177_v59, 16  ;;  %v487_v9 = vshll.u32 %v3180_v61, 16  ;;  %v2640_v46 = vld [vmem:[%s3637_s1 + $0x3d4] ss:$8 sps:$4 sm:$0xff]  }
  0x3b   : > { %v485_v15 = vor.u32 %v484_v1, %v480_v62  ;;  %v2645_v1 = vld [vmem:[%s3637_s1 + $0x3e0] ss:$8 sps:$4 sm:$0xff]  }
  0x3c   : > { %878 = vmatpush1.bf16.msra.mxu1 %v2539_v4  ;;  %v501_v4 = vor.u32 %v499_v52, %v3035_v63  ;;  %v2607_v63 = vld [vmem:[%s3637_s1 + $0x474] ss:$8 sps:$4 sm:$0xff]   ;;  %v3209_v16 = vrot.slane %v487_v9, 1  ;;  %v2638_v52 = vld [vmem:[%s3637_s1 + $0x3d0] ss:$8 sps:$4 sm:$0xff]  }
  0x3d   : > { %1365 = vmatpush1.bf16.msra.mxu0 %v2540_v5  ;;  %879 = vmatprep.subr.bf16.mxu1 %v2541_v6  ;;  %v503_v5 = vshll.u32 %v3175_v57, 16  ;;  %v493_v6 = vor.u32 %v491_v54, %v3088_v22  ;;  %v2647_v54 = vld [vmem:[%s3637_s1 + $0x3e4] ss:$8 sps:$4 sm:$0xff]  }
  0x3e   : > { %1366 = vmatprep.subr.bf16.mxu0 %v2543_v10  ;;  %v2604_v10 = vld [vmem:[%s3637_s1 + $0x374] ss:$8 sps:$4 sm:$0xff]  }
  0x40   : > { %880 = vmatpush1.bf16.msra.mxu1 %v2545_v11  ;;  %v505_v11 = vrot.slane %v503_v5, 1  ;;  %v2660_v5 = vld [vmem:[%s3637_s1 + $0x4f4] ss:$8 sps:$4 sm:$0xff]  }
  0x41   : > { %1367 = vmatpush1.bf16.msra.mxu0 %v2546_v12  ;;  %881 = vmatprep.subr.bf16.mxu1 %v2547_v13  ;;  %v497_v12 = vrot.slane %v495_v7, 1  ;;  %v2602_v13 = vld [vmem:[%s3637_s1 + $0x370] ss:$8 sps:$4 sm:$0xff]  }
  0x42   : > { %1368 = vmatprep.subr.bf16.mxu0 %v2549_v17  ;;  %v506_v14 = vsel %vm442_vm0, %v501_v4, %v505_v11  ;;  %v2605_v17 = vld [vmem:[%s3637_s1 + $0x470] ss:$8 sps:$4 sm:$0xff]   ;;  %v475_v4 = vshll.u32 %v3194_v60, 16  ;;  %v2663_v11 = vld [vmem:[%s3637_s1 + $0x4] ss:$8 sps:$4 sm:$0xff]  }
  0x44   : > { %882 = vmatpush1.bf16.msra.mxu1 %v2551_v18  ;;  %v498_v18 = vsel %vm442_vm0, %v493_v6, %v497_v12  ;;  %v2655_v6 = vld [vmem:[%s3637_s1 + $0x3f0] ss:$8 sps:$4 sm:$0xff]   ;;  %v2668_v12 = vld [vmem:[%s3637_s1 + $0x504] ss:$8 sps:$4 sm:$0xff]  }
  0x45   : > { %1369 = vmatpush1.bf16.msra.mxu0 %v2552_v19  ;;  %904 = vmatprep.subr.bf16.mxu1 %v2558_v20  ;;  %v3216_v19 = vld [vmem:[%s2989_s22] sm:$0xee] }
  0x46   : > { %1816 = vmatprep.subr.bf16.mxu0 %v2562_v23  ;;  %v2610_v20 = vld [vmem:[%s3637_s1 + $0x384] ss:$8 sps:$4 sm:$0xff]   ;;  %v2305_v22 = vcombine.high %v3216_v19, %v3005_v49  ;;  %v1472_v23 = vrot.slane %v3011_v51, 1 }
  0x47   : > { %884 = vmatmul.mubr.bf16.vlgmr.msra.gmra.mrb[0].mxu1 %v454_v27  ;;  %v2608_v27 = vld [vmem:[%s3637_s1 + $0x380] ss:$8 sps:$4 sm:$0xff]   ;;  %v2680_v51 = vld [vmem:[%s3637_s1 + $0x524] ss:$8 sps:$4 sm:$0xff]  }
  0x48   : > { %1371 = vmatmul.mubr.bf16.vlgmr.msra.gmra.mrb[0].mxu0 %v3100_v26  ;;  %905 = vmatpush1.bf16.msra.mxu1 %v2556_v24  ;;  %v490_v24 = vsel %vm442_vm0, %v485_v15, %v3209_v16  ;;  %v2666_v15 = vld [vmem:[%s3637_s1 + $0x500] ss:$8 sps:$4 sm:$0xff]  }
  0x49   : > { %1817 = vmatpush1.bf16.msra.mxu0 %v2560_v25  ;;  %906 = vmatprep.subr.bf16.mxu1 %v2568_v28  ;;  %v1471_v25 = vrot.slane %v2305_v22, 1  ;;  %v2611_v28 = vld [vmem:[%s3637_s1 + $0x480] ss:$8 sps:$4 sm:$0xff]   ;;  %v507_v22 = vshrl.u32 %v3194_v60, 16 }
  0x4a   : > { %1818 = vmatprep.subr.bf16.mxu0 %v2571_v29  ;;  %1380 = vmatprep.mubr.bf16.mxu0 %v3180_v61  ;;  %v2616_v29 = vld [vmem:[%s3637_s1 + $0x394] ss:$8 sps:$4 sm:$0xff]  }
  0x4b   : > { %893 = vmatprep.mubr.bf16.mxu1 %v506_v14  ;;  %v515_v14 = vshrl.u32 %v3180_v61, 16 }
  0x4c   : > { %907 = vmatpush1.bf16.msra.mxu1 %v2566_v30  ;;  %v2619_v30 = vld [vmem:[%s3637_s1 + $0x494] ss:$8 sps:$4 sm:$0xff]  }
  0x4d   : > { %1819 = vmatpush1.bf16.msra.mxu0 %v2569_v31  ;;  %908 = vmatprep.subr.bf16.mxu1 %v2574_v32  ;;  %v1473_v31 = vsel %vm1467_vm1, %v1471_v25, %v1472_v23  ;;  %v2614_v32 = vld [vmem:[%s3637_s1 + $0x390] ss:$8 sps:$4 sm:$0xff]  }
  0x4e   : > { %1820 = vmatprep.subr.bf16.mxu0 %v2577_v33  ;;  %v2617_v33 = vld [vmem:[%s3637_s1 + $0x490] ss:$8 sps:$4 sm:$0xff]  }
  0x4f   : > { %894 = vmatmul.mubr.bf16.gmra.mrb[4].mxu1 %v498_v18 }
  0x50   : > { %909 = vmatpush1.bf16.msra.mxu1 %v2572_v34  ;;  %1381 = vmatmul.mubr.bf16.gmra.mrb[4].mxu0 %v3194_v60  ;;  %v2622_v34 = vld [vmem:[%s3637_s1 + $0x3a4] ss:$8 sps:$4 sm:$0xff]  }
  0x51   : > { %1821 = vmatpush1.bf16.msra.mxu0 %v2575_v35  ;;  %910 = vmatprep.subr.bf16.mxu1 %v2580_v36  ;;  %v2625_v35 = vld [vmem:[%s3637_s1 + $0x4a4] ss:$8 sps:$4 sm:$0xff]   ;;  %v2620_v36 = vld [vmem:[%s3637_s1 + $0x3a0] ss:$8 sps:$4 sm:$0xff]  }
  0x52   : > { %1822 = vmatprep.subr.bf16.mxu0 %v2583_v37  ;;  %936 = vmatprep.mubr.bf16.mxu1 %v490_v24  ;;  %v2623_v37 = vld [vmem:[%s3637_s1 + $0x4a0] ss:$8 sps:$4 sm:$0xff]   ;;  %v2674_v24 = vld [vmem:[%s3637_s1 + $0x514] ss:$8 sps:$4 sm:$0xff]  }
  0x53   : > { %1848 = vmatprep.mubr.bf16.mxu0 %v1473_v31 }
  0x54   : > { %911 = vmatpush1.bf16.msra.mxu1 %v2578_v38  ;;  %v2628_v38 = vld [vmem:[%s3637_s1 + $0x3b4] ss:$8 sps:$4 sm:$0xff]  }
  0x55   : > { %1823 = vmatpush1.bf16.msra.mxu0 %v2581_v39  ;;  %912 = vmatprep.subr.bf16.mxu1 %v2586_v40  ;;  %v2631_v39 = vld [vmem:[%s3637_s1 + $0x4b4] ss:$8 sps:$4 sm:$0xff]   ;;  %v2626_v40 = vld [vmem:[%s3637_s1 + $0x3b0] ss:$8 sps:$4 sm:$0xff]  }
  0x56   : > { %1824 = vmatprep.subr.bf16.mxu0 %v2589_v41  ;;  %v2629_v41 = vld [vmem:[%s3637_s1 + $0x4b0] ss:$8 sps:$4 sm:$0xff]  }
  0x58   : > { %913 = vmatpush1.bf16.msra.mxu1 %v2584_v42  ;;  %v2634_v42 = vld [vmem:[%s3637_s1 + $0x3c4] ss:$8 sps:$4 sm:$0xff]  }
  0x59   : > { %1825 = vmatpush1.bf16.msra.mxu0 %v2587_v43  ;;  %914 = vmatprep.subr.bf16.mxu1 %v2592_v44  ;;  %v2637_v43 = vld [vmem:[%s3637_s1 + $0x4c4] ss:$8 sps:$4 sm:$0xff]   ;;  %v2632_v44 = vld [vmem:[%s3637_s1 + $0x3c0] ss:$8 sps:$4 sm:$0xff]  }
  0x5a   : > { %1826 = vmatprep.subr.bf16.mxu0 %v2595_v45  ;;  %v2635_v45 = vld [vmem:[%s3637_s1 + $0x4c0] ss:$8 sps:$4 sm:$0xff]  }
  0x5c   : > { %915 = vmatpush1.bf16.msra.mxu1 %v2590_v47  ;;  %v2643_v47 = vld [vmem:[%s3637_s1 + $0x4d4] ss:$8 sps:$4 sm:$0xff]  }
  0x5d   : > { %1827 = vmatpush1.bf16.msra.mxu0 %v2593_v48  ;;  %916 = vmatprep.subr.bf16.mxu1 %v2598_v55  ;;  %v470_v48 = vshll.u32 %v3100_v26, 16  ;;  %v2652_v55 = vld [vmem:[%s3637_s1 + $0x4e4] ss:$8 sps:$4 sm:$0xff]  }
  0x5e   : > { %1828 = vmatprep.subr.bf16.mxu0 %v2601_v56  ;;  %v468_v56 = vshrl.u32 %v3100_v26, 16  ;;  %v2657_v26 = vld [vmem:[%s3637_s1 + $0x3f4] ss:$8 sps:$4 sm:$0xff]  }
  0x5f   : > { %v472_v62 = vrot.slane %v470_v48, 1 }
  0x60   : > { %917 = vmatpush1.bf16.msra.mxu1 %v2596_v2  ;;  %v2650_v2 = vld [vmem:[%s3637_s1 + $0x4e0] ss:$8 sps:$4 sm:$0xff]  }
  0x61   : > { %1829 = vmatpush1.bf16.msra.mxu0 %v2599_v3  ;;  %918 = vmatprep.subr.bf16.mxu1 %v2604_v10  ;;  %v2304_v3 = vcombine.low %v3216_v19, %v3005_v49  ;;  %v2658_v49 = vld [vmem:[%s3637_s1 + $0x4f0] ss:$8 sps:$4 sm:$0xff]   ;;  %v473_v9 = vor.u32 %v472_v62, %v468_v56  ;;  %v477_v10 = vrot.slane %v475_v4, 1  ;;  %v2689_v56 = vld [vmem:[%s3637_s1 + $0x44] ss:$8 sps:$4 sm:$0xff]  }
  0x62   : > { %1830 = vmatprep.subr.bf16.mxu0 %v2607_v63  ;;  %v1469_v63 = vrot.slane %v3059_v8, 1  ;;  %v2692_v62 = vld [vmem:[%s3637_s1 + $0x544] ss:$8 sps:$4 sm:$0xff]   ;;  %v2693_v4 = vld [vmem:[%s3637_s1 + $0x50] ss:$8 sps:$4 sm:$0xff]  }
  0x63   : > { %v1468_v7 = vrot.slane %v2304_v3, 1  ;;  %v478_v18 = vsel %vm442_vm0, %v473_v9, %v477_v10  ;;  %v2695_v3 = vld [vmem:[%s3637_s1 + $0x54] ss:$8 sps:$4 sm:$0xff]  }
  0x64   : > { %919 = vmatpush1.bf16.msra.mxu1 %v2602_v13  ;;  %v2661_v13 = vld [vmem:[%s3637_s1] ss:$8 sps:$4 sm:$0xff]   ;;  %v2707_v9 = vld [vmem:[%s3637_s1 + $0x74] ss:$8 sps:$4 sm:$0xff]  }
  0x65   : > { %1831 = vmatpush1.bf16.msra.mxu0 %v2605_v17  ;;  %920 = vmatprep.subr.bf16.mxu1 %v2610_v20  ;;  %v1482_v17 = vrot.slane %v3175_v57, 1  ;;  %v1470_v19 = vsel %vm1467_vm1, %v1468_v7, %v1469_v63  ;;  %v2671_v20 = vld [vmem:[%s3637_s1 + $0x14] ss:$8 sps:$4 sm:$0xff]   ;;  %v2702_v7 = vld [vmem:[%s3637_s1 + $0x560] ss:$8 sps:$4 sm:$0xff]  }
  0x66   : > { %1832 = vmatprep.subr.bf16.mxu0 %v2613_v21  ;;  %v335_v21 = vld [vmem:[%s2989_s22 + $0x48] sm:$0x11] }
  0x67   : > { %v3352_v57 = vcombine.high %v335_v21, %v335_v21  ;;  %v2174_v25 = vcombine.low %v335_v21, %v335_v21  ;;  %v1483_v31 = vsel %vm1467_vm1, %v1472_v23, %v1482_v17  ;;  %v2719_v17 = vld [vmem:[%s3637_s1 + $0x94] ss:$8 sps:$4 sm:$0xff]   ;;  %v2725_v21 = vld [vmem:[%s3637_s1 + $0xa4] ss:$8 sps:$4 sm:$0xff]  }
  0x68   : > { %921 = vmatpush1.bf16.msra.mxu1 %v2608_v27  ;;  %v2669_v27 = vld [vmem:[%s3637_s1 + $0x10] ss:$8 sps:$4 sm:$0xff]  }
  0x69   : > { %1833 = vmatpush1.bf16.msra.mxu0 %v2611_v28  ;;  %922 = vmatprep.subr.bf16.mxu1 %v2616_v29  ;;  %v517_v28 = vor.u32 %v515_v14, %v3209_v16  ;;  %v2672_v29 = vld [vmem:[%s3637_s1 + $0x510] ss:$8 sps:$4 sm:$0xff]   ;;  %v2677_v16 = vld [vmem:[%s3637_s1 + $0x24] ss:$8 sps:$4 sm:$0xff]   ;;  %v2711_v14 = vld [vmem:[%s3637_s1 + $0x80] ss:$8 sps:$4 sm:$0xff]  }
  0x6a   : > { %1834 = vmatprep.subr.bf16.mxu0 %v2619_v30  ;;  %v519_v30 = vshll.u32 %v3352_v57, 16 }
  0x6c   : > { %923 = vmatpush1.bf16.msra.mxu1 %v2614_v32  ;;  %v511_v32 = vshll.u32 %v2174_v25, 16  ;;  %v521_v23 = vrot.slane %v519_v30, 1  ;;  %v2732_v30 = vld [vmem:[%s3637_s1 + $0x5b0] ss:$8 sps:$4 sm:$0xff]  }
  0x6d   : > { %1835 = vmatpush1.bf16.msra.mxu0 %v2617_v33  ;;  %924 = vmatprep.subr.bf16.mxu1 %v2622_v34  ;;  %v1480_v33 = vrot.slane %v3177_v59, 1  ;;  %v509_v34 = vor.u32 %v507_v22, %v477_v10  ;;  %v1392_v59 = vld [vmem:[%s2989_s22 + $0x8] sm:$0xee]  ;;  %v2710_v10 = vld [vmem:[%s3637_s1 + $0x574] ss:$8 sps:$4 sm:$0xff]  }
  0x6e   : > { %1836 = vmatprep.subr.bf16.mxu0 %v2625_v35  ;;  %v1475_v35 = vrot.slane %v3194_v60, 1  ;;  %v2307_v60 = vcombine.high %v1392_v59, %v3024_v58  ;;  %v2728_v22 = vld [vmem:[%s3637_s1 + $0x5a4] ss:$8 sps:$4 sm:$0xff]  }
  0x70   : > { %925 = vmatpush1.bf16.msra.mxu1 %v2620_v36  ;;  %v1484_v36 = vrot.slane %v2174_v25, 1  ;;  %v1477_v48 = vrot.slane %v2307_v60, 1  ;;  %v2726_v25 = vld [vmem:[%s3637_s1 + $0x5a0] ss:$8 sps:$4 sm:$0xff]   ;;  %v2760_v60 = vld [vmem:[%s3637_s1 + $0x5f4] ss:$8 sps:$4 sm:$0xff]  }
  0x71   : > { %1837 = vmatpush1.bf16.msra.mxu0 %v2623_v37  ;;  %926 = vmatprep.subr.bf16.mxu1 %v2628_v38  ;;  %v513_v37 = vrot.slane %v511_v32, 1  ;;  %v2740_v32 = vld [vmem:[%s3637_s1 + $0x5c4] ss:$8 sps:$4 sm:$0xff]  }
  0x72   : > { %1838 = vmatprep.subr.bf16.mxu0 %v2631_v39  ;;  %v3375_v38 = vsel %vm1467_vm1, %v1475_v35, %v1484_v36  ;;  %v522_v39 = vsel %vm442_vm0, %v517_v28, %v521_v23  ;;  %v2734_v28 = vld [vmem:[%s3637_s1 + $0x5b4] ss:$8 sps:$4 sm:$0xff]   ;;  %v2741_v36 = vld [vmem:[%s3637_s1 + $0xd0] ss:$8 sps:$4 sm:$0xff]   ;;  %v2751_v23 = vld [vmem:[%s3637_s1 + $0xe4] ss:$8 sps:$4 sm:$0xff]  }
  0x74   : > { %927 = vmatpush1.bf16.msra.mxu1 %v2626_v40  ;;  %v2306_v40 = vcombine.low %v1392_v59, %v3024_v58  ;;  %v2683_v58 = vld [vmem:[%s3637_s1 + $0x34] ss:$8 sps:$4 sm:$0xff]   ;;  %v2749_v59 = vld [vmem:[%s3637_s1 + $0xe0] ss:$8 sps:$4 sm:$0xff]  }
  0x75   : > { %1839 = vmatpush1.bf16.msra.mxu0 %v2629_v41  ;;  %928 = vmatprep.subr.bf16.mxu1 %v2634_v42  ;;  %v1478_v41 = vrot.slane %v3180_v61, 1  ;;  %v2675_v42 = vld [vmem:[%s3637_s1 + $0x20] ss:$8 sps:$4 sm:$0xff]  }
  0x76   : > { %1840 = vmatprep.subr.bf16.mxu0 %v2637_v43  ;;  %v2678_v43 = vld [vmem:[%s3637_s1 + $0x520] ss:$8 sps:$4 sm:$0xff]  }
  0x77   : > { %v1930_v61 = vld [vmem:[%s3638_s2] sm:$0x3] }
  0x78   : > { %929 = vmatpush1.bf16.msra.mxu1 %v2632_v44  ;;  %v514_v44 = vsel %vm442_vm0, %v509_v34, %v513_v37  ;;  %v2743_v34 = vld [vmem:[%s3637_s1 + $0xd4] ss:$8 sps:$4 sm:$0xff]   ;;  %v2754_v37 = vld [vmem:[%s3637_s1 + $0x5e4] ss:$8 sps:$4 sm:$0xff]  }
  0x79   : > { %1841 = vmatpush1.bf16.msra.mxu0 %v2635_v45  ;;  %930 = vmatprep.subr.bf16.mxu1 %v2640_v46  ;;  %v1481_v45 = vsel %vm1467_vm1, %v1469_v63, %v1480_v33  ;;  %v2686_v46 = vld [vmem:[%s3637_s1 + $0x534] ss:$8 sps:$4 sm:$0xff]   ;;  %v2705_v63 = vld [vmem:[%s3637_s1 + $0x70] ss:$8 sps:$4 sm:$0xff]   ;;  %v2735_v33 = vld [vmem:[%s3637_s1 + $0xc0] ss:$8 sps:$4 sm:$0xff]  }
  0x7a   : > { %1842 = vmatprep.subr.bf16.mxu0 %v2643_v47  ;;  %v1474_v47 = vrot.slane %v2306_v40, 1  ;;  %v2757_v40 = vld [vmem:[%s3637_s1 + $0xf4] ss:$8 sps:$4 sm:$0xff]  }
  0x7c   : > { %931 = vmatpush1.bf16.msra.mxu1 %v2638_v52  ;;  %v1479_v52 = vsel %vm1467_vm1, %v1477_v48, %v1478_v41 }
  0x7d   : > { %1843 = vmatpush1.bf16.msra.mxu0 %v2641_v53  ;;  %932 = vmatprep.subr.bf16.mxu1 %v2647_v54  ;;  %v3399_v53 = vsel %vm1467_vm1, %v1474_v47, %v1475_v35  ;;  %v2681_v54 = vld [vmem:[%s3637_s1 + $0x30] ss:$8 sps:$4 sm:$0xff]   ;;  %v2746_v35 = vld [vmem:[%s3637_s1 + $0x5d4] ss:$8 sps:$4 sm:$0xff]  }
  0x7e   : > { %1844 = vmatprep.subr.bf16.mxu0 %v2652_v55  ;;  %v2684_v55 = vld [vmem:[%s3637_s1 + $0x530] ss:$8 sps:$4 sm:$0xff]  }
  0x80   : > { %933 = vmatpush1.bf16.msra.mxu1 %v2645_v1  ;;  %v2687_v1 = vld [vmem:[%s3637_s1 + $0x40] ss:$8 sps:$4 sm:$0xff]  }
  0x81   : > { %1845 = vmatpush1.bf16.msra.mxu0 %v2650_v2  ;;  %934 = vmatprep.subr.bf16.mxu1 %v2657_v26  ;;  %v2690_v2 = vld [vmem:[%s3637_s1 + $0x540] ss:$8 sps:$4 sm:$0xff]   ;;  %v2696_v26 = vld [vmem:[%s3637_s1 + $0x550] ss:$8 sps:$4 sm:$0xff]  }
  0x82   : > { %1846 = vmatprep.subr.bf16.mxu0 %v2660_v5  ;;  %v2701_v5 = vld [vmem:[%s3637_s1 + $0x64] ss:$8 sps:$4 sm:$0xff]  }
  0x84   : > { %935 = vmatpush1.bf16.msra.mxu1 %v2655_v6  ;;  %v2704_v6 = vld [vmem:[%s3637_s1 + $0x564] ss:$8 sps:$4 sm:$0xff]  }
  0x85   : > { %1847 = vmatpush1.bf16.msra.mxu0 %v2658_v49  ;;  %1285 = vmatprep.subr.bf16.mxu1 %v2663_v11  ;;  %v2699_v49 = vld [vmem:[%s3637_s1 + $0x60] ss:$8 sps:$4 sm:$0xff]   ;;  %v2708_v11 = vld [vmem:[%s3637_s1 + $0x570] ss:$8 sps:$4 sm:$0xff]  }
  0x86   : > { %1869 = vmatprep.subr.bf16.mxu0 %v2668_v12  ;;  %v2713_v12 = vld [vmem:[%s3637_s1 + $0x84] ss:$8 sps:$4 sm:$0xff]  }
  0x87   : > { %937 = vmatmul.mubr.bf16.vlgmr.msra.gmra.mrb[0].mxu1 %v478_v18  ;;  %v2722_v18 = vld [vmem:[%s3637_s1 + $0x594] ss:$8 sps:$4 sm:$0xff]  }
  0x88   : > { %1849 = vmatmul.mubr.bf16.vlgmr.msra.gmra.mrb[0].mxu0 %v1470_v19  ;;  %1286 = vmatpush1.bf16.msra.mxu1 %v2661_v13  ;;  %v2716_v13 = vld [vmem:[%s3637_s1 + $0x584] ss:$8 sps:$4 sm:$0xff]   ;;  %v2717_v19 = vld [vmem:[%s3637_s1 + $0x90] ss:$8 sps:$4 sm:$0xff]  }
  0x89   : > { %1870 = vmatpush1.bf16.msra.mxu0 %v2666_v15  ;;  %1287 = vmatprep.subr.bf16.mxu1 %v2671_v20  ;;  %v2714_v15 = vld [vmem:[%s3637_s1 + $0x580] ss:$8 sps:$4 sm:$0xff]   ;;  %v2720_v20 = vld [vmem:[%s3637_s1 + $0x590] ss:$8 sps:$4 sm:$0xff]  }
  0x8a   : > { %1871 = vmatprep.subr.bf16.mxu0 %v2674_v24  ;;  %1858 = vmatprep.mubr.bf16.mxu0 %v1483_v31  ;;  %v2723_v24 = vld [vmem:[%s3637_s1 + $0xa0] ss:$8 sps:$4 sm:$0xff]   ;;  %v2737_v31 = vld [vmem:[%s3637_s1 + $0xc4] ss:$8 sps:$4 sm:$0xff]  }
  0x8b   : > { %946 = vmatprep.mubr.bf16.mxu1 %v522_v39  ;;  %v2752_v39 = vld [vmem:[%s3637_s1 + $0x5e0] ss:$8 sps:$4 sm:$0xff]  }
  0x8c   : > { %1288 = vmatpush1.bf16.msra.mxu1 %v2669_v27  ;;  %v2731_v27 = vld [vmem:[%s3637_s1 + $0xb4] ss:$8 sps:$4 sm:$0xff]  }
  0x8d   : > { %1872 = vmatpush1.bf16.msra.mxu0 %v2672_v29  ;;  %1289 = vmatprep.subr.bf16.mxu1 %v2677_v16  ;;  %v2729_v29 = vld [vmem:[%s3637_s1 + $0xb0] ss:$8 sps:$4 sm:$0xff]   ;;  %v2738_v16 = vld [vmem:[%s3637_s1 + $0x5c0] ss:$8 sps:$4 sm:$0xff]  }
  0x8e   : > { %1873 = vmatprep.subr.bf16.mxu0 %v2680_v51  ;;  %v2744_v51 = vld [vmem:[%s3637_s1 + $0x5d0] ss:$8 sps:$4 sm:$0xff]  }
  0x8f   : > { %947 = vmatmul.mubr.bf16.gmra.mrb[4].mxu1 %v514_v44  ;;  %v1486_v44 = vrot.slane %v3352_v57, 1 }
  0x90   : > { %1859 = vmatmul.mubr.bf16.gmra.mrb[4].mxu0 %v1481_v45  ;;  %1290 = vmatpush1.bf16.msra.mxu1 %v2675_v42  ;;  %v2755_v42 = vld [vmem:[%s3637_s1 + $0xf0] ss:$8 sps:$4 sm:$0xff]  }
  0x91   : > { %1874 = vmatpush1.bf16.msra.mxu0 %v2678_v43  ;;  %1291 = vmatprep.subr.bf16.mxu1 %v2683_v58  ;;  %v2758_v43 = vld [vmem:[%s3637_s1 + $0x5f0] ss:$8 sps:$4 sm:$0xff]   ;;  %v1487_v45 = vsel %vm1467_vm1, %v1478_v41, %v1486_v44  ;;  %v2779_v58 = vld [vmem:[%s2989_s22 + $0x24] ss:$16 sps:$4 sm:$0xff]   ;;  %s2386_s22 = sshll.u32 %s3646_s15, 5 }
  0x92   : > { %1875 = vmatprep.subr.bf16.mxu0 %v2686_v46  ;;  %1317 = vmatprep.mubr.bf16.mxu1 %v3008_v50  ;;  %v2698_v50 = vld [vmem:[%s3637_s1 + $0x554] ss:$8 sps:$4 sm:$0xff]   ;;  %v1932_v46 = vlaneseq  ;;  %s3586_s29 = scalar_lea.vmem %s3639_s3, %s2386_s22  ;;  %s3611_s6 = scalar_lea.vmem %s3640_s4, %s2386_s22 }
  0x93   : > { %1901 = vmatprep.mubr.bf16.mxu0 %v1479_v52 }
  0x94   : > { %1292 = vmatpush1.bf16.msra.mxu1 %v2681_v54  ;;  %v1933_v47 = vshrl.u32 %v1932_v46, 7 }
  0x95   : > { %1876 = vmatpush1.bf16.msra.mxu0 %v2684_v55  ;;  %1293 = vmatprep.subr.bf16.mxu1 %v2689_v56 }
  0x96   : > { %1877 = vmatprep.subr.bf16.mxu0 %v2692_v62  ;;  %v1934_v57 = vsub.s32 0, %v1933_v47  ;;  %v1938_v48 = vsub.s32 1, %v1933_v47 }
  0x98   : > { %1294 = vmatpush1.bf16.msra.mxu1 %v2687_v1  ;;  %v1935_v41 = vrot.slane %v1930_v61, %v1934_v57  ;;  %v1939_v54 = vrot.slane %v1930_v61, %v1938_v48 }
  0x99   : > { %1878 = vmatpush1.bf16.msra.mxu0 %v2690_v2  ;;  %1295 = vmatprep.subr.bf16.mxu1 %v2695_v3 }
  0x9a   : > { %1879 = vmatprep.subr.bf16.mxu0 %v2698_v50 }
  0x9c   : > { %1296 = vmatpush1.bf16.msra.mxu1 %v2693_v4 }
  0x9d   : > { %1880 = vmatpush1.bf16.msra.mxu0 %v2696_v26  ;;  %1297 = vmatprep.subr.bf16.mxu1 %v2701_v5 }
  0x9e   : > { %1881 = vmatprep.subr.bf16.mxu0 %v2704_v6 }
  0xa0   : > { %1298 = vmatpush1.bf16.msra.mxu1 %v2699_v49 }
  0xa1   : > { %1882 = vmatpush1.bf16.msra.mxu0 %v2702_v7  ;;  %1299 = vmatprep.subr.bf16.mxu1 %v2707_v9 }
  0xa2   : > { %1883 = vmatprep.subr.bf16.mxu0 %v2710_v10 }
  0xa4   : > { %1300 = vmatpush1.bf16.msra.mxu1 %v2705_v63 }
  0xa5   : > { %1884 = vmatpush1.bf16.msra.mxu0 %v2708_v11  ;;  %1301 = vmatprep.subr.bf16.mxu1 %v2713_v12 }
  0xa6   : > { %1885 = vmatprep.subr.bf16.mxu0 %v2716_v13 }
  0xa8   : > { %1302 = vmatpush1.bf16.msra.mxu1 %v2711_v14 }
  0xa9   : > { %1886 = vmatpush1.bf16.msra.mxu0 %v2714_v15  ;;  %1303 = vmatprep.subr.bf16.mxu1 %v2719_v17 }
  0xaa   : > { %1887 = vmatprep.subr.bf16.mxu0 %v2722_v18 }
  0xac   : > { %1304 = vmatpush1.bf16.msra.mxu1 %v2717_v19 }
  0xad   : > { %1888 = vmatpush1.bf16.msra.mxu0 %v2720_v20  ;;  %1305 = vmatprep.subr.bf16.mxu1 %v2725_v21 }
  0xae   : > { %1889 = vmatprep.subr.bf16.mxu0 %v2728_v22 }
  0xb0   : > { %1306 = vmatpush1.bf16.msra.mxu1 %v2723_v24 }
  0xb1   : > { %1890 = vmatpush1.bf16.msra.mxu0 %v2726_v25  ;;  %1307 = vmatprep.subr.bf16.mxu1 %v2731_v27 }
  0xb2   : > { %1891 = vmatprep.subr.bf16.mxu0 %v2734_v28 }
  0xb4   : > { %1308 = vmatpush1.bf16.msra.mxu1 %v2729_v29 }
  0xb5   : > { %1892 = vmatpush1.bf16.msra.mxu0 %v2732_v30  ;;  %1309 = vmatprep.subr.bf16.mxu1 %v2737_v31 }
  0xb6   : > { %1893 = vmatprep.subr.bf16.mxu0 %v2740_v32 }
  0xb8   : > { %1310 = vmatpush1.bf16.msra.mxu1 %v2735_v33 }
  0xb9   : > { %1894 = vmatpush1.bf16.msra.mxu0 %v2738_v16  ;;  %1311 = vmatprep.subr.bf16.mxu1 %v2743_v34 }
  0xba   : > { %1895 = vmatprep.subr.bf16.mxu0 %v2746_v35 }
  0xbc   : > { %1312 = vmatpush1.bf16.msra.mxu1 %v2741_v36  ;;  %v1998_v36 = vld [vmem:[%s3586_s29] sm:$0xff] }
  0xbd   : > { %1896 = vmatpush1.bf16.msra.mxu0 %v2744_v51  ;;  %1313 = vmatprep.subr.bf16.mxu1 %v2751_v23  ;;  %v2003_v44 = vunpack.c.h.bf16 %v1998_v36 }
  0xbe   : > { %1897 = vmatprep.subr.bf16.mxu0 %v2754_v37 }
  0xc0   : > { %1314 = vmatpush1.bf16.msra.mxu1 %v2749_v59  ;;  %v1999_v59 = vld [vmem:[%s3586_s29 + $0x8] sm:$0xff] }
  0xc1   : > { %1898 = vmatpush1.bf16.msra.mxu0 %v2752_v39  ;;  %1315 = vmatprep.subr.bf16.mxu1 %v2757_v40  ;;  %v2004_v46 = vunpack.c.l.bf16 %v1999_v59  ;;  %v2005_v48 = vunpack.c.h.bf16 %v1999_v59 }
  0xc2   : > { %1899 = vmatprep.subr.bf16.mxu0 %v2760_v60  ;;  %v2002_v60 = vunpack.c.l.bf16 %v1998_v36 }
  0xc4   : > { %1316 = vmatpush1.bf16.msra.mxu1 %v2755_v42 }
  0xc5   : > { %1900 = vmatpush1.bf16.msra.mxu0 %v2758_v43 }
  0xc7   : > { %1318 = vmatmul.mubr.bf16.vlgmr.msra.gmra.mrb[0].mxu1 %v3038_v0 }
  0xc8   : > { %1902 = vmatmul.mubr.bf16.vlgmr.msra.gmra.mrb[0].mxu0 %v3399_v53  ;;  %1327 = vmatprep.mubr.bf16.mxu1 %v2779_v58 }
  0xc9   : > { %1911 = vmatprep.mubr.bf16.mxu0 %v1487_v45 }
  0xcf   : > { %1328 = vmatmul.mubr.bf16.gmra.mrb[4].mxu1 %v3059_v8 }
  0xd0   : > { %1912 = vmatmul.mubr.bf16.gmra.mrb[4].mxu0 %v3375_v38 }
 0x19a   : > { %v1319_v52 = vpop.f32.mrb[0].mxu1 }
 0x19b   : > { %v1903_v0 = vpop.f32.mrb[0].mxu0  ;;  %v1321_v55 = vpop.f32.mrb[1].mxu1 }
 0x19c   : > { %v2392_v53 = vadd.f32 %v1903_v0, %v1319_v52  ;;  %v1905_v56 = vpop.f32.mrb[1].mxu0  ;;  %v1323_v1 = vpop.f32.mrb[2].mxu1 }
 0x19d   : > { %v2393_v62 = vadd.f32 %v1905_v56, %v1321_v55  ;;  %v1907_v8 = vpop.f32.mrb[2].mxu0  ;;  %v1325_v3 = vpop.f32.mrb[3].mxu1  ;;  %v2000_v55 = vld [vmem:[%s3586_s29 + $0x10] sm:$0xff] }
 0x19e   : > { %v3564_v2 = vadd.f32 %v2392_v53, %v1935_v41  ;;  %v2394_v38 = vadd.f32 %v1907_v8, %v1323_v1  ;;  %v1909_v50 = vpop.f32.mrb[3].mxu0 }
 0x19f   : > { %v3566_v4 = vadd.f32 %v2393_v62, %v1939_v54  ;;  %v2395_v26 = vadd.f32 %v1909_v50, %v1325_v3  ;;  %v2006_v3 = vunpack.c.l.bf16 %v2000_v55 }
 0x1a0   : > { %v1958_v5 = vmin.f32 %v3564_v2, 0.0  ;;  %v3569_v6 = vadd.f32 %v2394_v38, %v1935_v41  ;;  %vm1950_vm2 = vcmp.gt.f32.partialorder %v3564_v2, 0.0 }
 0x1a1   : > { %v1959_v49 = vmin.f32 %v3566_v4, 0.0  ;;  %v3572_v7 = vadd.f32 %v2395_v26, %v1939_v54  ;;  %vm1951_vm3 = vcmp.gt.f32.partialorder %v3566_v4, 0.0 }
 0x1a2   : > { %v1966_v9 = vmul.f32 1.442695, %v1958_v5  ;;  %v1960_v10 = vmin.f32 %v3569_v6, 0.0  ;;  %v1329_v12 = vpop.f32.mrb[4].mxu1  ;;  %vm1952_vm4 = vcmp.gt.f32.partialorder %v3569_v6, 0.0  ;;  %v2007_v5 = vunpack.c.h.bf16 %v2000_v55 }
 0x1a3   : > { %v1968_v63 = vmul.f32 1.442695, %v1959_v49  ;;  %v1961_v11 = vmin.f32 %v3572_v7, 0.0  ;;  %v1913_v13 = vpop.f32.mrb[4].mxu0  ;;  %v1331_v17 = vpop.f32.mrb[5].mxu1  ;;  %vm1953_vm5 = vcmp.gt.f32.partialorder %v3572_v7, 0.0 }
 0x1a4   : > { %2763 = vpow2.f32 %v1966_v9  ;;  %v1970_v14 = vmul.f32 1.442695, %v1960_v10  ;;  %v2396_v15 = vadd.f32 %v1913_v13, %v1329_v12  ;;  %v1915_v18 = vpop.f32.mrb[5].mxu0  ;;  %v1333_v21 = vpop.f32.mrb[6].mxu1 }
 0x1a5   : > { %2765 = vpow2.f32 %v1968_v63  ;;  %v1972_v19 = vmul.f32 1.442695, %v1961_v11  ;;  %v2397_v20 = vadd.f32 %v1915_v18, %v1331_v17  ;;  %v1917_v22 = vpop.f32.mrb[6].mxu0  ;;  %v1335_v27 = vpop.f32.mrb[7].mxu1 }
 0x1a6   : > { %2767 = vpow2.f32 %v1970_v14  ;;  %v3577_v24 = vadd.f32 %v2396_v15, %v1935_v41  ;;  %v2398_v25 = vadd.f32 %v1917_v22, %v1333_v21  ;;  %v1919_v28 = vpop.f32.mrb[7].mxu0 }
 0x1a7   : > { %2769 = vpow2.f32 %v1972_v19  ;;  %v3579_v29 = vadd.f32 %v2397_v20, %v1939_v54  ;;  %v2399_v30 = vadd.f32 %v1919_v28, %v1335_v27 }
 0x1a8   : > { %v1962_v31 = vmin.f32 %v3577_v24, 0.0  ;;  %v3589_v32 = vadd.f32 %v2398_v25, %v1935_v41  ;;  %vm1954_vm6 = vcmp.gt.f32.partialorder %v3577_v24, 0.0 }
 0x1a9   : > { %v1963_v33 = vmin.f32 %v3579_v29, 0.0  ;;  %v3592_v16 = vadd.f32 %v2399_v30, %v1939_v54  ;;  %vm1955_vm7 = vcmp.gt.f32.partialorder %v3579_v29, 0.0 }
 0x1aa   : > { %v1974_v34 = vmul.f32 1.442695, %v1962_v31  ;;  %v1964_v35 = vmin.f32 %v3589_v32, 0.0  ;;  %vm1956_vm8 = vcmp.gt.f32.partialorder %v3589_v32, 0.0 }
 0x1ab   : > { %v1976_v51 = vmul.f32 1.442695, %v1963_v33  ;;  %v1965_v23 = vmin.f32 %v3592_v16, 0.0  ;;  %vm1957_vm9 = vcmp.gt.f32.partialorder %v3592_v16, 0.0 }
 0x1ac   : > { %2771 = vpow2.f32 %v1974_v34  ;;  %v1978_v37 = vmul.f32 1.442695, %v1964_v35 }
 0x1ad   : > { %2773 = vpow2.f32 %v1976_v51  ;;  %v1980_v39 = vmul.f32 1.442695, %v1965_v23 }
 0x1ae   : > { %v2764_v40 = vpop.eup %2763  ;;  %2775 = vpow2.f32 %v1978_v37 }
 0x1af   : > { %v2766_v42 = vpop.eup %2765  ;;  %v2372_v43 = vadd.f32 -1.0, %v2764_v40  ;;  %2777 = vpow2.f32 %v1980_v39 }
 0x1b0   : > { %v2768_v45 = vpop.eup %2767  ;;  %v2373_v58 = vadd.f32 -1.0, %v2766_v42 }
 0x1b1   : > { %v2770_v47 = vpop.eup %2769  ;;  %v1990_v57 = vsel %vm1950_vm2, %v3564_v2, %v2372_v43  ;;  %v2374_v61 = vadd.f32 -1.0, %v2768_v45  ;;  %v2001_v2 = vld [vmem:[%s3586_s29 + $0x18] sm:$0xff] }
 0x1b2   : > { %v2010_v41 = vadd.f32 %v2002_v60, %v1990_v57  ;;  %v1991_v52 = vsel %vm1951_vm3, %v3566_v4, %v2373_v58  ;;  %v2375_v0 = vadd.f32 -1.0, %v2770_v47  ;;  %v2008_v9 = vunpack.c.l.bf16 %v2001_v2 }
 0x1b3   : > { %v2011_v54 = vadd.f32 %v2003_v44, %v1991_v52  ;;  %v1992_v53 = vsel %vm1952_vm4, %v3569_v6, %v2374_v61  ;;  %v2009_v11 = vunpack.c.h.bf16 %v2001_v2 }
 0x1b4   : > { %v2012_v56 = vadd.f32 %v2004_v46, %v1992_v53  ;;  %v1993_v62 = vsel %vm1953_vm5, %v3572_v7, %v2375_v0 }
 0x1b5   : > { %v2388_v1 = vpack.c.bf16 %v2011_v54, %v2010_v41  ;;  %v2013_v8 = vadd.f32 %v2005_v48, %v1993_v62 }
 0x1b6   : > { %v2772_v38 = vpop.eup %2771 }
 0x1b7   : > { %v2774_v50 = vpop.eup %2773  ;;  %2042 = vst [vmem:[%s3611_s6] sm:$0xff] %v2388_v1  ;;  %v2389_v4 = vpack.c.bf16 %v2013_v8, %v2012_v56  ;;  %v2376_v26 = vadd.f32 -1.0, %v2772_v38 }
 0x1b8   : > { %v2776_v6 = vpop.eup %2775  ;;  %v2377_v49 = vadd.f32 -1.0, %v2774_v50 }
 0x1b9   : > { %v2778_v10 = vpop.eup %2777  ;;  %2043 = vst [vmem:[%s3611_s6 + $0x8] sm:$0xff] %v2389_v4  ;;  %v1994_v7 = vsel %vm1954_vm6, %v3577_v24, %v2376_v26  ;;  %v2378_v63 = vadd.f32 -1.0, %v2776_v6 }
 0x1ba   : > { %v2014_v12 = vadd.f32 %v2006_v3, %v1994_v7  ;;  %v1995_v13 = vsel %vm1955_vm7, %v3579_v29, %v2377_v49  ;;  %v2379_v14 = vadd.f32 -1.0, %v2778_v10 }
 0x1bb   : > { %v2015_v15 = vadd.f32 %v2007_v5, %v1995_v13  ;;  %v1996_v17 = vsel %vm1956_vm8, %v3589_v32, %v2378_v63 }
 0x1bc   : > { %v2016_v18 = vadd.f32 %v2008_v9, %v1996_v17  ;;  %v1997_v19 = vsel %vm1957_vm9, %v3592_v16, %v2379_v14 }
 0x1bd   : > { %v2390_v20 = vpack.c.bf16 %v2015_v15, %v2014_v12  ;;  %v2017_v21 = vadd.f32 %v2009_v11, %v1997_v19 }
 0x1bf   : > { %2044 = vst [vmem:[%s3611_s6 + $0x10] sm:$0xff] %v2390_v20  ;;  %v2391_v22 = vpack.c.bf16 %v2017_v21, %v2016_v18 }
 0x1c1   : > { %2045 = vst [vmem:[%s3611_s6 + $0x18] sm:$0xff] %v2391_v22 }
 0x1c2 PF: > { %s14_s17 = sadd.s32 1, %s2802_s17   ;;  %s3641_s15 = smov %s2798_s16 }
 0x1c3   : > { %p11_p5 = scmp.ge.s32.totalorder %s14_s17, 4   ;;  %s3642_s16 = smov %s3644_s18 }
 0x1c5   :  { %13 = sbr.rel (!%p11_p5) target bundleno = 2 (0x2), region = 69 }

// kernel: dito_trainer_forward.38
= control target key start
LH: loop header
LB: loop body
LE: loop exit
PB: predicated region body
PF: predicated region fallthrough
CT: control target
= control target key end

     0   :  { %s1070_s12 = smov 0   ;;  %s1072_s13 = smov 0   ;;  %s1225_s0 = inlined_call_operand.vmem [shape: bf16[2,66,128], index: 0, kind: input, shape index: {}]   ;;  %s1226_s1 = inlined_call_operand.vmem [shape: bf16[384,128], index: 1, kind: input, shape index: {}]   ;;  %s1227_s2 = inlined_call_operand.vmem [shape: f32[1,128], index: 2, kind: input, shape index: {}]   ;;  %s1228_s3 = inlined_call_operand.vmem [shape: f32[2,64,128], index: 3, kind: output, shape index: {}]  }
   0x1   :  { %s1074_s14 = smov 0  }
   0x2 LB: > { %s25_s15 = sadd.s32 1, %s1044_s13  ;;  %p793_p0 = scmp.ge.s32.totalorder %s1048_s14, 1  ;;  %s1048_s14 = sphi %s1074_s14, %s13_s14   ;;  %s1044_s13 = sphi %s1072_s13, %s1230_s13   ;;  %s1040_s12 = sphi %s1070_s12, %s1229_s12  }
   0x3   : > { %p27_p1 = scmp.ge.s32.totalorder %s25_s15, 2  ;;  %p151_p2 = scmp.lt.s32.totalorder %s1048_s14, 3 }
   0x5   : > { %s1232_s15 = smov (%p27_p1, %s25_s15), 0  ;;  %p152_p3 = pnand %p793_p0, %p151_p2 }
   0x6   : > { %v996_v0 = vld [vmem:[%s1226_s1 + $0x40] sm:$0xff] (!%p152_p3)   ;;  %p179_p4 = scmp.lt.s32.totalorder (!%p152_p3), %s1040_s12, 1  ;;  %v998_v2 = vld [vmem:[%s1226_s1 + $0x48] sm:$0xff] (!%p152_p3)   ;;  %v1000_v4 = vld [vmem:[%s1226_s1 + $0x50] sm:$0xff] (!%p152_p3)   ;;  %vm259_vm0 = vsmask.f32 (!%p152_p3), 7424 }
   0x7   : > { %155 = sbr.rel (%p152_p3) target bundleno = 292 (0x124), region = 32  ;;  %v997_v1 = vld [vmem:[%s1226_s1] sm:$0xff] (!%p152_p3)   ;;  %867 = vmatprep.subr.bf16.mxu1 (!%p152_p3), %v996_v0  ;;  %v999_v3 = vld [vmem:[%s1226_s1 + $0x8] sm:$0xff] (!%p152_p3)   ;;  %v1001_v5 = vld [vmem:[%s1226_s1 + $0x10] sm:$0xff] (!%p152_p3)   ;;  %vm550_vm1 = vcmask (!%p152_p3), 1046528  }
   0x8   : > { %891 = vmatprep.subr.bf16.mxu0 (!%p152_p3), %v997_v1  ;;  %868 = vmatpush3.bf16.msra.mxu1 (!%p152_p3), %v996_v0  ;;  %v1002_v6 = vld [vmem:[%s1226_s1 + $0x58] sm:$0xff] (!%p152_p3)   ;;  %v1004_v8 = vld [vmem:[%s1226_s1 + $0x60] sm:$0xff] (!%p152_p3)   ;;  %v1006_v10 = vld [vmem:[%s1226_s1 + $0x68] sm:$0xff] (!%p152_p3)  }
   0x9   : > { %892 = vmatpush3.bf16.msra.mxu0 (!%p152_p3), %v997_v1  ;;  %869 = vmatprep.subr.bf16.mxu1 (!%p152_p3), %v998_v2  ;;  %v1003_v7 = vld [vmem:[%s1226_s1 + $0x18] sm:$0xff] (!%p152_p3)   ;;  %v1005_v9 = vld [vmem:[%s1226_s1 + $0x20] sm:$0xff] (!%p152_p3)   ;;  %v1007_v11 = vld [vmem:[%s1226_s1 + $0x28] sm:$0xff] (!%p152_p3)  }
   0xa   : > { %893 = vmatprep.subr.bf16.mxu0 (!%p152_p3), %v999_v3  ;;  %v1008_v17 = vld [vmem:[%s1226_s1 + $0x70] sm:$0xff] (!%p152_p3)   ;;  %v1010_v24 = vld [vmem:[%s1226_s1 + $0x78] sm:$0xff] (!%p152_p3)   ;;  %v1015_v36 = vld [vmem:[%s1226_s1 + $0x80] sm:$0xff] (!%p152_p3)  }
   0xb   : > { %v1009_v21 = vld [vmem:[%s1226_s1 + $0x30] sm:$0xff] (!%p152_p3)   ;;  %v1011_v28 = vld [vmem:[%s1226_s1 + $0x38] sm:$0xff] (!%p152_p3)   ;;  %v1016_v43 = vld [vmem:[%s1226_s1 + $0x88] sm:$0xff] (!%p152_p3)  }
   0xc   : > { %870 = vmatpush3.bf16.msra.mxu1 (!%p152_p3), %v998_v2  ;;  %v1017_v48 = vld [vmem:[%s1226_s1 + $0x90] sm:$0xff] (!%p152_p3)   ;;  %v1018_v54 = vld [vmem:[%s1226_s1 + $0x98] sm:$0xff] (!%p152_p3)   ;;  %v1019_v57 = vld [vmem:[%s1226_s1 + $0xa0] sm:$0xff] (!%p152_p3)  }
   0xd   : > { %894 = vmatpush3.bf16.msra.mxu0 (!%p152_p3), %v999_v3  ;;  %871 = vmatprep.subr.bf16.mxu1 (!%p152_p3), %v1000_v4  ;;  %v1021_v58 = vld [vmem:[%s1226_s1 + $0xa8] sm:$0xff] (!%p152_p3)   ;;  %v1023_v59 = vld [vmem:[%s1226_s1 + $0xb0] sm:$0xff] (!%p152_p3)   ;;  %v1024_v60 = vld [vmem:[%s1226_s1 + $0xb8] sm:$0xff] (!%p152_p3)  }
   0xe   : > { %s1234_s12 = smov (!%p179_p4, %s1040_s12), 1  ;;  %895 = vmatprep.subr.bf16.mxu0 %v1001_v5 }
   0xf   : > { %s971_s5 = smul.u32 36, %s1234_s12  ;;  %s830_s22 = sshll.u32 %s1234_s12, 6 }
  0x10   : > { %872 = vmatpush3.bf16.msra.mxu1 %v1000_v4  ;;  %s192_s27 = scalar_lea.vmem %s1228_s3, %s830_s22 }
  0x11   : > { %896 = vmatpush3.bf16.msra.mxu0 %v1001_v5  ;;  %873 = vmatprep.subr.bf16.mxu1 %v1002_v6  ;;  %s1124_s16 = scalar_lea.vmem %s1225_s0, %s971_s5 }
  0x12   : > { %897 = vmatprep.subr.bf16.mxu0 %v1003_v7  ;;  %v195_v12 = vld [vmem:[%s1124_s16] sm:$0xf]  ;;  %v1134_v13 = vld [vmem:[%s1124_s16 + $0x4] sm:$0xf]  ;;  %v1138_v15 = vld [vmem:[%s1124_s16 + $0x8] sm:$0xff]  }
  0x13   : > { %v797_v14 = vcombine.low %v195_v12, %v1134_v13  ;;  %v1141_v16 = vld [vmem:[%s1124_s16 + $0x10] sm:$0xff]   ;;  %v268_v20 = vshll.u32 %v1138_v15, 16  ;;  %v272_v25 = vshrl.u32 %v1138_v15, 16  ;;  %v1160_v30 = vld [vmem:[%s1124_s16 + $0x18] sm:$0xff]   ;;  %v530_v42 = vld [vmem:[%s1124_s16] sm:$0xe] }
  0x14   : > { %874 = vmatpush3.bf16.msra.mxu1 %v1002_v6  ;;  %v276_v26 = vshll.u32 %v1141_v16, 16  ;;  %v280_v31 = vshrl.u32 %v1141_v16, 16  ;;  %v1164_v32 = vld [vmem:[%s1124_s16 + $0x20] ss:$0 sps:$4 sm:$0x11]   ;;  %v284_v35 = vshll.u32 %v1160_v30, 16  ;;  %v818_v45 = vcombine.low %v530_v42, %v1134_v13 }
  0x15   : > { %898 = vmatpush3.bf16.msra.mxu0 %v1003_v7  ;;  %875 = vmatprep.subr.bf16.mxu1 %v1004_v8  ;;  %v261_v18 = vshrl.u32 %v797_v14, 16  ;;  %v263_v19 = vshll.u32 %v797_v14, 16  ;;  %v270_v23 = vrot.slane %v268_v20, 1  ;;  %v288_v40 = vshrl.u32 %v1160_v30, 16 }
  0x16   : > { %899 = vmatprep.subr.bf16.mxu0 %v1005_v9  ;;  %907 = vmatprep.mubr.bf16.mxu0 %v797_v14  ;;  %v278_v34 = vrot.slane %v276_v26, 1  ;;  %v286_v38 = vrot.slane %v284_v35, 1  ;;  %v292_v41 = vshll.u32 %v1164_v32, 16  ;;  %v551_v49 = vrot.slane %v818_v45, 1 }
  0x17   : > { %v265_v22 = vrot.slane %v263_v19, 1  ;;  %v274_v33 = vor.u32 %v272_v25, %v270_v23  ;;  %v552_v50 = vrot.slane %v1138_v15, 1  ;;  %v554_v52 = vrot.slane %v1141_v16, 1 }
  0x18   : > { %876 = vmatpush3.bf16.msra.mxu1 %v1004_v8  ;;  %v282_v37 = vor.u32 %v280_v31, %v278_v34  ;;  %v290_v46 = vor.u32 %v288_v40, %v286_v38  ;;  %v294_v47 = vrot.slane %v292_v41, 1  ;;  %v556_v53 = vrot.slane %v1160_v30, 1 }
  0x19   : > { %900 = vmatpush3.bf16.msra.mxu0 %v1005_v9  ;;  %877 = vmatprep.subr.bf16.mxu1 %v1006_v10  ;;  %v266_v27 = vor.u32 %v265_v22, %v261_v18  ;;  %v279_v39 = vsel %vm259_vm0, %v274_v33, %v278_v34  ;;  %v553_v55 = vsel %vm550_vm1, %v551_v49, %v552_v50  ;;  %v558_v61 = vrot.slane %v1164_v32, 1 }
  0x1a   : > { %901 = vmatprep.subr.bf16.mxu0 %v1007_v11  ;;  %v287_v44 = vsel %vm259_vm0, %v282_v37, %v286_v38  ;;  %v295_v51 = vsel %vm259_vm0, %v290_v46, %v294_v47  ;;  %v557_v56 = vsel %vm550_vm1, %v554_v52, %v556_v53  ;;  %v555_v63 = vsel %vm550_vm1, %v552_v50, %v554_v52 }
  0x1b   : > { %v271_v29 = vsel %vm259_vm0, %v266_v27, %v270_v23  ;;  %v559_v62 = vsel %vm550_vm1, %v556_v53, %v558_v61 }
  0x1c   : > { %878 = vmatpush3.bf16.msra.mxu1 %v1006_v10  ;;  %883 = vmatprep.mubr.bf16.mxu1 %v271_v29 }
  0x1d   : > { %902 = vmatpush3.bf16.msra.mxu0 %v1007_v11  ;;  %879 = vmatprep.subr.bf16.mxu1 %v1008_v17 }
  0x1e   : > { %903 = vmatprep.subr.bf16.mxu0 %v1009_v21 }
  0x20   : > { %880 = vmatpush3.bf16.msra.mxu1 %v1008_v17 }
  0x21   : > { %904 = vmatpush3.bf16.msra.mxu0 %v1009_v21  ;;  %881 = vmatprep.subr.bf16.mxu1 %v1010_v24 }
  0x22   : > { %905 = vmatprep.subr.bf16.mxu0 %v1011_v28 }
  0x24   : > { %882 = vmatpush3.bf16.msra.mxu1 %v1010_v24 }
  0x25   : > { %906 = vmatpush3.bf16.msra.mxu0 %v1011_v28  ;;  %939 = vmatprep.subr.bf16.mxu1 %v1015_v36 }
  0x26   : > { %915 = vmatprep.subr.bf16.mxu0 %v1015_v36 }
  0x27   : > { %884 = vmatmul.mubr.bf16.vlgmr.msra.gmra.mrb[0].mxu1 %v279_v39 }
  0x28   : > { %908 = vmatmul.mubr.bf16.vlgmr.msra.gmra.mrb[0].mxu0 %v1138_v15  ;;  %947 = vmatpush3.bf16.msra.mxu1 %v1015_v36 }
  0x29   : > { %916 = vmatpush3.bf16.msra.mxu0 %v1015_v36  ;;  %940 = vmatprep.subr.bf16.mxu1 %v1016_v43 }
  0x2a   : > { %917 = vmatprep.subr.bf16.mxu0 %v1016_v43  ;;  %887 = vmatprep.mubr.bf16.mxu1 %v287_v44 }
  0x2b   : > { %911 = vmatprep.mubr.bf16.mxu0 %v1141_v16  ;;  %v827_v16 = vld [vmem:[%s1227_s2] ss:$0 sm:$0xff] }
  0x2c   : > { %948 = vmatpush3.bf16.msra.mxu1 %v1016_v43 }
  0x2d   : > { %918 = vmatpush3.bf16.msra.mxu0 %v1016_v43  ;;  %941 = vmatprep.subr.bf16.mxu1 %v1017_v48 }
  0x2e   : > { %919 = vmatprep.subr.bf16.mxu0 %v1017_v48 }
  0x2f   : > { %888 = vmatmul.mubr.bf16.gmra.mrb[4].mxu1 %v295_v51 }
  0x30   : > { %949 = vmatpush3.bf16.msra.mxu1 %v1017_v48  ;;  %912 = vmatmul.mubr.bf16.gmra.mrb[4].mxu0 %v1160_v30 }
  0x31   : > { %920 = vmatpush3.bf16.msra.mxu0 %v1017_v48  ;;  %942 = vmatprep.subr.bf16.mxu1 %v1018_v54 }
  0x32   : > { %921 = vmatprep.subr.bf16.mxu0 %v1018_v54  ;;  %931 = vmatprep.mubr.bf16.mxu0 %v553_v55 }
  0x33   : > { %935 = vmatprep.mubr.bf16.mxu1 %v557_v56 }
  0x34   : > { %950 = vmatpush3.bf16.msra.mxu1 %v1018_v54 }
  0x35   : > { %922 = vmatpush3.bf16.msra.mxu0 %v1018_v54  ;;  %943 = vmatprep.subr.bf16.mxu1 %v1019_v57 }
  0x36   : > { %923 = vmatprep.subr.bf16.mxu0 %v1019_v57 }
  0x38   : > { %951 = vmatpush3.bf16.msra.mxu1 %v1019_v57 }
  0x39   : > { %924 = vmatpush3.bf16.msra.mxu0 %v1019_v57  ;;  %944 = vmatprep.subr.bf16.mxu1 %v1021_v58 }
  0x3a   : > { %925 = vmatprep.subr.bf16.mxu0 %v1021_v58 }
  0x3c   : > { %952 = vmatpush3.bf16.msra.mxu1 %v1021_v58 }
  0x3d   : > { %926 = vmatpush3.bf16.msra.mxu0 %v1021_v58  ;;  %945 = vmatprep.subr.bf16.mxu1 %v1023_v59 }
  0x3e   : > { %927 = vmatprep.subr.bf16.mxu0 %v1023_v59 }
  0x40   : > { %953 = vmatpush3.bf16.msra.mxu1 %v1023_v59 }
  0x41   : > { %928 = vmatpush3.bf16.msra.mxu0 %v1023_v59  ;;  %946 = vmatprep.subr.bf16.mxu1 %v1024_v60 }
  0x42   : > { %929 = vmatprep.subr.bf16.mxu0 %v1024_v60 }
  0x44   : > { %954 = vmatpush3.bf16.msra.mxu1 %v1024_v60 }
  0x45   : > { %930 = vmatpush3.bf16.msra.mxu0 %v1024_v60 }
  0x47   : > { %936 = vmatmul.mubr.bf16.vlgmr.msra.gmra.mrb[8].mxu1 %v559_v62 }
  0x48   : > { %932 = vmatmul.mubr.bf16.vlgmr.msra.gmra.mrb[0].mxu0 %v555_v63 }
  0xfa   : > { %v885_v0 = vpop.f32.mrb[0].mxu1 }
  0xfb   : > { %v382_v1 = vpop.f32.mrb[1].mxu1 }
  0xfc   : > { %v886_v2 = vpop.f32.mrb[2].mxu1 }
  0xfd   : > { %v385_v3 = vpop.f32.mrb[3].mxu1 }
 0x102   : > { %v889_v4 = vpop.f32.mrb[4].mxu1 }
 0x103   : > { %v913_v5 = vpop.f32.mrb[4].mxu0  ;;  %v398_v6 = vpop.f32.mrb[5].mxu1 }
 0x104   : > { %v524_v7 = vadd.f32 %v913_v5, %v889_v4  ;;  %v515_v8 = vpop.f32.mrb[5].mxu0  ;;  %v890_v9 = vpop.f32.mrb[6].mxu1 }
 0x105   : > { %v516_v10 = vadd.f32 %v515_v8, %v398_v6  ;;  %v914_v11 = vpop.f32.mrb[6].mxu0  ;;  %v401_v12 = vpop.f32.mrb[7].mxu1 }
 0x106   : > { %v527_v13 = vadd.f32 %v914_v11, %v890_v9  ;;  %v518_v14 = vpop.f32.mrb[7].mxu0 }
 0x107   : > { %v519_v15 = vadd.f32 %v518_v14, %v401_v12 }
 0x11a   : > { %v937_v17 = vpop.f32.mrb[8].mxu1 }
 0x11b   : > { %v933_v18 = vpop.f32.mrb[0].mxu0  ;;  %v683_v19 = vadd.f32 %v937_v17, %v524_v7  ;;  %v662_v20 = vpop.f32.mrb[9].mxu1 }
 0x11c   : > { %v955_v21 = vadd.f32 %v933_v18, %v885_v0  ;;  %v646_v22 = vpop.f32.mrb[1].mxu0  ;;  %v681_v23 = vadd.f32 %v662_v20, %v516_v10  ;;  %v938_v24 = vpop.f32.mrb[10].mxu1 }
 0x11d   : > { %v698_v25 = vadd.f32 %v827_v16, %v683_v19  ;;  %v956_v26 = vadd.f32 %v646_v22, %v382_v1  ;;  %v934_v27 = vpop.f32.mrb[2].mxu0  ;;  %v684_v28 = vadd.f32 %v938_v24, %v527_v13  ;;  %v665_v29 = vpop.f32.mrb[11].mxu1 }
 0x11e   : > { %v694_v30 = vadd.f32 %v955_v21, %v827_v16  ;;  %v696_v31 = vadd.f32 %v827_v16, %v681_v23  ;;  %v957_v32 = vadd.f32 %v934_v27, %v886_v2  ;;  %v649_v33 = vpop.f32.mrb[3].mxu0  ;;  %v682_v34 = vadd.f32 %v665_v29, %v519_v15 }
 0x11f   : > { %706 = vst [vmem:[%s192_s27 + $0x30] sm:$0xff] %v698_v25  ;;  %v692_v35 = vadd.f32 %v956_v26, %v827_v16  ;;  %v699_v36 = vadd.f32 %v827_v16, %v684_v28  ;;  %v958_v37 = vadd.f32 %v649_v33, %v385_v3 }
 0x120   : > { %702 = vst [vmem:[%s192_s27 + $0x10] sm:$0xff] %v694_v30  ;;  %704 = vst [vmem:[%s192_s27 + $0x20] sm:$0xff] %v696_v31  ;;  %v695_v38 = vadd.f32 %v957_v32, %v827_v16  ;;  %v697_v39 = vadd.f32 %v827_v16, %v682_v34 }
 0x121   : > { %700 = vst [vmem:[%s192_s27] sm:$0xff] %v692_v35  ;;  %707 = vst [vmem:[%s192_s27 + $0x38] sm:$0xff] %v699_v36  ;;  %v693_v40 = vadd.f32 %v958_v37, %v827_v16 }
 0x122   : > { %703 = vst [vmem:[%s192_s27 + $0x18] sm:$0xff] %v695_v38  ;;  %705 = vst [vmem:[%s192_s27 + $0x28] sm:$0xff] %v697_v39 }
 0x123   : > { %701 = vst [vmem:[%s192_s27 + $0x8] sm:$0xff] %v693_v40 }
 0x124 PF: > { %s13_s14 = sadd.s32 1, %s1048_s14   ;;  %s1229_s12 = smov %s1044_s13 }
 0x125   : > { %p10_p5 = scmp.ge.s32.totalorder %s13_s14, 4   ;;  %s1230_s13 = smov %s1232_s15 }
 0x127   :  { %12 = sbr.rel (!%p10_p5) target bundleno = 2 (0x2), region = 62 }

// kernel: dito_trainer_forward.37
= control target key start
LH: loop header
LB: loop body
LE: loop exit
PB: predicated region body
PF: predicated region fallthrough
CT: control target
= control target key end

     0   :  { %s1669_s15 = smov 0   ;;  %s1671_s16 = smov 0   ;;  %s1994_s0 = inlined_call_operand.vmem [shape: bf16[2,66,256], index: 0, kind: input, shape index: {}]   ;;  %s1995_s1 = inlined_call_operand.vmem [shape: bf16[768,128], index: 1, kind: input, shape index: {}]   ;;  %s1996_s2 = inlined_call_operand.vmem [shape: f32[1,128], index: 2, kind: input, shape index: {}]   ;;  %s1997_s3 = inlined_call_operand.vmem [shape: bf16[2,64,128], index: 3, kind: input, shape index: {}]   ;;  %s1998_s4 = inlined_call_operand.vmem [shape: bf16[2,64,128], index: 4, kind: output, shape index: {}]  }
   0x1   :  { %s1673_s17 = smov 0  }
   0x2 LB: > { %s26_s18 = sadd.s32 1, %s1638_s16  ;;  %p1243_p0 = scmp.ge.s32.totalorder %s1642_s17, 1  ;;  %s1642_s17 = sphi %s1673_s17, %s14_s17   ;;  %s1638_s16 = sphi %s1671_s16, %s2000_s16   ;;  %s1634_s15 = sphi %s1669_s15, %s1999_s15  }
   0x3   : > { %p28_p1 = scmp.ge.s32.totalorder %s26_s18, 2  ;;  %p193_p2 = scmp.lt.s32.totalorder %s1642_s17, 3 }
   0x5   : > { %s2002_s18 = smov (%p28_p1, %s26_s18), 0  ;;  %p194_p3 = pnand %p1243_p0, %p193_p2 }
   0x6   : > { %v1541_v0 = vld [vmem:[%s1995_s1 + $0xc0] sm:$0xff] (!%p194_p3)   ;;  %v1545_v4 = vld [vmem:[%s1995_s1 + $0xc8] sm:$0xff] (!%p194_p3)   ;;  %v1549_v8 = vld [vmem:[%s1995_s1 + $0xd0] sm:$0xff] (!%p194_p3)   ;;  %p232_p4 = scmp.lt.s32.totalorder (!%p194_p3), %s1634_s15, 1  ;;  %vm368_vm0 = vsmask.f32 (!%p194_p3), 7424 }
   0x7   : > { %197 = sbr.rel (%p194_p3) target bundleno = 327 (0x147), region = 36  ;;  %v1542_v1 = vld [vmem:[%s1995_s1 + $0x40] sm:$0xff] (!%p194_p3)   ;;  %1380 = vmatprep.subr.bf16.mxu0 (!%p194_p3), %v1541_v0  ;;  %v1546_v5 = vld [vmem:[%s1995_s1 + $0x48] sm:$0xff] (!%p194_p3)   ;;  %v1550_v9 = vld [vmem:[%s1995_s1 + $0x50] sm:$0xff] (!%p194_p3)   ;;  %vm817_vm1 = vcmask (!%p194_p3), 1046528  }
   0x8   : > { %v1543_v2 = vld [vmem:[%s1995_s1 + $0x80] sm:$0xff] (!%p194_p3)   ;;  %1420 = vmatprep.subr.bf16.mxu1 (!%p194_p3), %v1542_v1  ;;  %v1547_v6 = vld [vmem:[%s1995_s1 + $0x88] sm:$0xff] (!%p194_p3)   ;;  %v1551_v10 = vld [vmem:[%s1995_s1 + $0x90] sm:$0xff] (!%p194_p3)  }
   0x9   : > { %v1544_v3 = vld [vmem:[%s1995_s1] sm:$0xff] (!%p194_p3)   ;;  %1381 = vmatpush3.bf16.msra.mxu0 (!%p194_p3), %v1543_v2  ;;  %v1548_v7 = vld [vmem:[%s1995_s1 + $0x8] sm:$0xff] (!%p194_p3)   ;;  %v1552_v11 = vld [vmem:[%s1995_s1 + $0x10] sm:$0xff] (!%p194_p3)  }
   0xa   : > { %1421 = vmatpush3.bf16.msra.mxu1 (!%p194_p3), %v1544_v3  ;;  %1382 = vmatprep.subr.bf16.mxu0 (!%p194_p3), %v1545_v4  ;;  %v1553_v12 = vld [vmem:[%s1995_s1 + $0xd8] sm:$0xff] (!%p194_p3)   ;;  %v1557_v16 = vld [vmem:[%s1995_s1 + $0xe0] sm:$0xff] (!%p194_p3)   ;;  %v1561_v20 = vld [vmem:[%s1995_s1 + $0xe8] sm:$0xff] (!%p194_p3)  }
   0xb   : > { %1422 = vmatprep.subr.bf16.mxu1 (!%p194_p3), %v1546_v5  ;;  %v1554_v13 = vld [vmem:[%s1995_s1 + $0x58] sm:$0xff] (!%p194_p3)   ;;  %v1558_v17 = vld [vmem:[%s1995_s1 + $0x60] sm:$0xff] (!%p194_p3)   ;;  %v1562_v21 = vld [vmem:[%s1995_s1 + $0x68] sm:$0xff] (!%p194_p3)  }
   0xc   : > { %v1555_v14 = vld [vmem:[%s1995_s1 + $0x98] sm:$0xff] (!%p194_p3)   ;;  %v1559_v18 = vld [vmem:[%s1995_s1 + $0xa0] sm:$0xff] (!%p194_p3)   ;;  %v1563_v22 = vld [vmem:[%s1995_s1 + $0xa8] sm:$0xff] (!%p194_p3)  }
   0xd   : > { %1383 = vmatpush3.bf16.msra.mxu0 (!%p194_p3), %v1547_v6  ;;  %v1556_v15 = vld [vmem:[%s1995_s1 + $0x18] sm:$0xff] (!%p194_p3)   ;;  %v1560_v19 = vld [vmem:[%s1995_s1 + $0x20] sm:$0xff] (!%p194_p3)   ;;  %v1564_v23 = vld [vmem:[%s1995_s1 + $0x28] sm:$0xff] (!%p194_p3)  }
   0xe   : > { %1423 = vmatpush3.bf16.msra.mxu1 %v1548_v7  ;;  %1384 = vmatprep.subr.bf16.mxu0 %v1549_v8  ;;  %s2004_s15 = smov (!%p232_p4, %s1634_s15), 1  ;;  %v1565_v24 = vld [vmem:[%s1995_s1 + $0xf0] sm:$0xff]   ;;  %v1569_v28 = vld [vmem:[%s1995_s1 + $0xf8] sm:$0xff]   ;;  %v1578_v38 = vld [vmem:[%s1995_s1 + $0x140] sm:$0xff]  }
   0xf   : > { %1424 = vmatprep.subr.bf16.mxu1 %v1550_v9  ;;  %v1566_v25 = vld [vmem:[%s1995_s1 + $0x70] sm:$0xff]   ;;  %s1516_s27 = smul.u32 72, %s2004_s15  ;;  %v1570_v29 = vld [vmem:[%s1995_s1 + $0x78] sm:$0xff]   ;;  %v1579_v45 = vld [vmem:[%s1995_s1 + $0x100] sm:$0xff]   ;;  %s1328_s7 = sshll.u32 %s2004_s15, 5 }
  0x10   : > { %v1567_v26 = vld [vmem:[%s1995_s1 + $0xb0] sm:$0xff]   ;;  %v1571_v30 = vld [vmem:[%s1995_s1 + $0xb8] sm:$0xff]   ;;  %v1580_v46 = vld [vmem:[%s1995_s1 + $0x148] sm:$0xff]   ;;  %s1949_s10 = scalar_lea.vmem %s1997_s3, %s1328_s7  ;;  %s1968_s14 = scalar_lea.vmem %s1998_s4, %s1328_s7 }
  0x11   : > { %1385 = vmatpush3.bf16.msra.mxu0 %v1551_v10  ;;  %v1568_v27 = vld [vmem:[%s1995_s1 + $0x30] sm:$0xff]   ;;  %s1787_s12 = scalar_lea.vmem %s1994_s0, %s1516_s27  ;;  %v1572_v31 = vld [vmem:[%s1995_s1 + $0x38] sm:$0xff]   ;;  %v1581_v52 = vld [vmem:[%s1995_s1 + $0x108] sm:$0xff]  }
  0x12   : > { %1425 = vmatpush3.bf16.msra.mxu1 %v1552_v11  ;;  %1386 = vmatprep.subr.bf16.mxu0 %v1553_v12  ;;  %v258_v32 = vld [vmem:[%s1787_s12] sm:$0xff]  ;;  %v1797_v33 = vld [vmem:[%s1787_s12 + $0x8] sm:$0xff]  ;;  %v1801_v35 = vld [vmem:[%s1787_s12 + $0x14] ss:$8 sps:$4 sm:$0xff]  }
  0x13   : > { %1426 = vmatprep.subr.bf16.mxu1 %v1554_v13  ;;  %v1250_v34 = vcombine.high %v258_v32, %v1797_v33  ;;  %v1249_v36 = vcombine.low %v258_v32, %v1797_v33  ;;  %v1805_v37 = vld [vmem:[%s1787_s12 + $0x10] ss:$8 sps:$4 sm:$0xff]   ;;  %v389_v41 = vshll.u32 %v1801_v35, 16  ;;  %v401_v53 = vshrl.u32 %v1801_v35, 16  ;;  %v1825_v56 = vld [vmem:[%s1787_s12 + $0x24] ss:$8 sps:$4 sm:$0xff]  }
  0x14   : > { %v377_v44 = vshll.u32 %v1805_v37, 16  ;;  %v393_v54 = vshrl.u32 %v1805_v37, 16  ;;  %v1828_v57 = vld [vmem:[%s1787_s12 + $0x20] ss:$8 sps:$4 sm:$0xff]   ;;  %v1585_v59 = vld [vmem:[%s1995_s1 + $0x150] sm:$0xff]   ;;  %v405_v62 = vshll.u32 %v1825_v56, 16 }
  0x15   : > { %1387 = vmatpush3.bf16.msra.mxu0 %v1555_v14  ;;  %v382_v39 = vshrl.u32 %v1250_v34, 16  ;;  %v384_v40 = vshll.u32 %v1250_v34, 16  ;;  %746 = vmatprep.mubr.bf16.mxu1 %v1250_v34  ;;  %v370_v42 = vshrl.u32 %v1249_v36, 16  ;;  %v372_v43 = vshll.u32 %v1249_v36, 16  ;;  %v1586_v0 = vld [vmem:[%s1995_s1 + $0x110] sm:$0xff]   ;;  %v1587_v1 = vld [vmem:[%s1995_s1 + $0x158] sm:$0xff]  }
  0x16   : > { %1427 = vmatpush3.bf16.msra.mxu1 %v1556_v15  ;;  %1388 = vmatprep.subr.bf16.mxu0 %v1557_v16  ;;  %v391_v48 = vrot.slane %v389_v41, 1  ;;  %v379_v50 = vrot.slane %v377_v44, 1  ;;  %v397_v63 = vshll.u32 %v1828_v57, 16  ;;  %v407_v2 = vrot.slane %v405_v62, 1  ;;  %v1845_v5 = vld [vmem:[%s1787_s12 + $0x34] ss:$8 sps:$4 sm:$0xff]  }
  0x17   : > { %1428 = vmatprep.subr.bf16.mxu1 %v1558_v17  ;;  %v386_v47 = vrot.slane %v384_v40, 1  ;;  %v374_v49 = vrot.slane %v372_v43, 1  ;;  %v417_v6 = vshrl.u32 %v1825_v56, 16  ;;  %v1850_v7 = vld [vmem:[%s1787_s12 + $0x30] ss:$8 sps:$4 sm:$0xff]   ;;  %v421_v11 = vshll.u32 %v1845_v5, 16 }
  0x18   : > { %v403_v61 = vor.u32 %v401_v53, %v391_v48  ;;  %v395_v3 = vor.u32 %v393_v54, %v379_v50  ;;  %v399_v4 = vrot.slane %v397_v63, 1  ;;  %v1588_v9 = vld [vmem:[%s1995_s1 + $0x118] sm:$0xff]   ;;  %v1592_v12 = vld [vmem:[%s1995_s1 + $0x160] sm:$0xff]   ;;  %v409_v14 = vshrl.u32 %v1828_v57, 16 }
  0x19   : > { %1389 = vmatpush3.bf16.msra.mxu0 %v1559_v18  ;;  %v387_v51 = vor.u32 %v386_v47, %v382_v39  ;;  %v375_v55 = vor.u32 %v374_v49, %v370_v42  ;;  %v419_v10 = vor.u32 %v417_v6, %v407_v2  ;;  %v413_v15 = vshll.u32 %v1850_v7, 16  ;;  %v1593_v17 = vld [vmem:[%s1995_s1 + $0x120] sm:$0xff]   ;;  %v1599_v42 = vld [vmem:[%s1995_s1 + $0x130] sm:$0xff]   ;;  %v1600_v43 = vld [vmem:[%s1995_s1 + $0x178] sm:$0xff]  }
  0x1a   : > { %1429 = vmatpush3.bf16.msra.mxu1 %v1560_v19  ;;  %1390 = vmatprep.subr.bf16.mxu0 %v1561_v20  ;;  %v408_v8 = vsel %vm368_vm0, %v403_v61, %v407_v2  ;;  %v400_v13 = vsel %vm368_vm0, %v395_v3, %v399_v4  ;;  %v423_v16 = vrot.slane %v421_v11, 1  ;;  %v433_v18 = vshrl.u32 %v1845_v5, 16  ;;  %v1594_v19 = vld [vmem:[%s1995_s1 + $0x168] sm:$0xff]   ;;  %v298_v20 = vld [vmem:[%s1787_s12 + $0x40] sm:$0x11]  ;;  %v1601_v49 = vld [vmem:[%s1995_s1 + $0x138] sm:$0xff]  }
  0x1b   : > { %1430 = vmatprep.subr.bf16.mxu1 %v1562_v21  ;;  %v392_v58 = vsel %vm368_vm0, %v387_v51, %v391_v48  ;;  %v380_v60 = vsel %vm368_vm0, %v375_v55, %v379_v50  ;;  %v826_v32 = vrot.slane %v1825_v56, 1  ;;  %v830_v34 = vrot.slane %v1845_v5, 1 }
  0x1c   : > { %577 = vmatprep.mubr.bf16.mxu0 %v392_v58  ;;  %v424_v21 = vsel %vm368_vm0, %v419_v10, %v423_v16  ;;  %v822_v48 = vrot.slane %v1801_v35, 1  ;;  %v824_v50 = vrot.slane %v1828_v57, 1  ;;  %v828_v51 = vrot.slane %v1850_v7, 1 }
  0x1d   : > { %1391 = vmatpush3.bf16.msra.mxu0 %v1563_v22  ;;  %v1258_v22 = vcombine.high %v298_v20, %v298_v20  ;;  %v831_v44 = vsel %vm817_vm1, %v826_v32, %v830_v34  ;;  %v819_v58 = vrot.slane %v1805_v37, 1 }
  0x1e   : > { %1431 = vmatpush3.bf16.msra.mxu1 %v1564_v23  ;;  %1392 = vmatprep.subr.bf16.mxu0 %v1565_v24  ;;  %v411_v23 = vor.u32 %v409_v14, %v399_v4  ;;  %v415_v24 = vrot.slane %v413_v15, 1  ;;  %v829_v55 = vsel %vm817_vm1, %v824_v50, %v828_v51 }
  0x1f   : > { %1432 = vmatprep.subr.bf16.mxu1 %v1566_v25  ;;  %v1872_v25 = vcombine.low %v298_v20, %v298_v20  ;;  %v825_v62 = vsel %vm817_vm1, %v819_v58, %v824_v50 }
  0x21   : > { %1393 = vmatpush3.bf16.msra.mxu0 %v1567_v26  ;;  %v435_v26 = vor.u32 %v433_v18, %v423_v16  ;;  %v429_v39 = vshll.u32 %v1872_v25, 16 }
  0x22   : > { %1433 = vmatpush3.bf16.msra.mxu1 %v1568_v27  ;;  %1394 = vmatprep.subr.bf16.mxu0 %v1569_v28  ;;  %v437_v27 = vshll.u32 %v1258_v22, 16  ;;  %v1595_v28 = vld [vmem:[%s1995_s1 + $0x128] sm:$0xff]  }
  0x23   : > { %1434 = vmatprep.subr.bf16.mxu1 %v1570_v29  ;;  %v779_v29 = vld [vmem:[%s1787_s12] sm:$0xee] }
  0x24   : > { %v1292_v41 = vcombine.high %v779_v29, %v1797_v33  ;;  %v1291_v54 = vcombine.low %v779_v29, %v1797_v33 }
  0x25   : > { %1395 = vmatpush3.bf16.msra.mxu0 %v1571_v30  ;;  %v439_v30 = vrot.slane %v437_v27, 1 }
  0x26   : > { %1435 = vmatpush3.bf16.msra.mxu1 %v1572_v31  ;;  %1460 = vmatprep.subr.bf16.mxu0 %v1578_v38  ;;  %v1598_v31 = vld [vmem:[%s1995_s1 + $0x170] sm:$0xff]   ;;  %v821_v47 = vrot.slane %v1292_v41, 1 }
  0x27   : > { %1500 = vmatprep.subr.bf16.mxu1 %v1578_v38  ;;  %v425_v38 = vshrl.u32 %v1850_v7, 16  ;;  %v440_v40 = vsel %vm368_vm0, %v435_v26, %v439_v30 }
  0x28   : > { %578 = vmatmul.mubr.bf16.vlgmr.msra.gmra.mrb[0].mxu0 %v380_v60  ;;  %v827_v60 = vsel %vm817_vm1, %v822_v48, %v826_v32 }
  0x29   : > { %747 = vmatmul.mubr.bf16.vlgmr.msra.gmra.mrb[0].mxu1 %v1249_v36  ;;  %1461 = vmatpush3.bf16.msra.mxu0 %v1579_v45  ;;  %v416_v36 = vsel %vm368_vm0, %v411_v23, %v415_v24 }
  0x2a   : > { %754 = vmatprep.mubr.bf16.mxu1 %v1801_v35  ;;  %1508 = vmatpush3.bf16.msra.mxu1 %v1579_v45  ;;  %v427_v45 = vor.u32 %v425_v38, %v415_v24  ;;  %v823_v35 = vsel %vm817_vm1, %v821_v47, %v822_v48 }
  0x2b   : > { %1501 = vmatprep.subr.bf16.mxu1 %v1580_v46  ;;  %1462 = vmatprep.subr.bf16.mxu0 %v1580_v46  ;;  %v431_v46 = vrot.slane %v429_v39, 1 }
  0x2c   : > { %585 = vmatprep.mubr.bf16.mxu0 %v408_v8 }
  0x2d   : > { %1463 = vmatpush3.bf16.msra.mxu0 %v1581_v52  ;;  %v432_v53 = vsel %vm368_vm0, %v427_v45, %v431_v46 }
  0x2e   : > { %1509 = vmatpush3.bf16.msra.mxu1 %v1581_v52  ;;  %1464 = vmatprep.subr.bf16.mxu0 %v1585_v59  ;;  %v834_v52 = vrot.slane %v1258_v22, 1 }
  0x2f   : > { %1502 = vmatprep.subr.bf16.mxu1 %v1585_v59  ;;  %v832_v59 = vrot.slane %v1872_v25, 1 }
  0x30   : > { %586 = vmatmul.mubr.bf16.gmra.mrb[4].mxu0 %v400_v13 }
  0x31   : > { %755 = vmatmul.mubr.bf16.gmra.mrb[4].mxu1 %v1805_v37  ;;  %1465 = vmatpush3.bf16.msra.mxu0 %v1586_v0  ;;  %v833_v61 = vsel %vm817_vm1, %v828_v51, %v832_v59  ;;  %v1309_v59 = vld [vmem:[%s1996_s2] ss:$0 sm:$0xff] }
  0x32   : > { %762 = vmatprep.mubr.bf16.mxu1 %v1825_v56  ;;  %1510 = vmatpush3.bf16.msra.mxu1 %v1586_v0  ;;  %v835_v56 = vsel %vm817_vm1, %v830_v34, %v834_v52 }
  0x33   : > { %1503 = vmatprep.subr.bf16.mxu1 %v1587_v1  ;;  %593 = vmatprep.mubr.bf16.mxu0 %v424_v21 }
  0x34   : > { %1466 = vmatprep.subr.bf16.mxu0 %v1587_v1 }
  0x35   : > { %1467 = vmatpush3.bf16.msra.mxu0 %v1588_v9 }
  0x36   : > { %1511 = vmatpush3.bf16.msra.mxu1 %v1588_v9  ;;  %1468 = vmatprep.subr.bf16.mxu0 %v1592_v12 }
  0x37   : > { %1504 = vmatprep.subr.bf16.mxu1 %v1592_v12 }
  0x38   : > { %594 = vmatmul.mubr.bf16.gmra.mrb[8].mxu0 %v416_v36 }
  0x39   : > { %763 = vmatmul.mubr.bf16.gmra.mrb[8].mxu1 %v1828_v57  ;;  %1469 = vmatpush3.bf16.msra.mxu0 %v1593_v17  ;;  %v818_v57 = vrot.slane %v1291_v54, 1 }
  0x3a   : > { %1512 = vmatpush3.bf16.msra.mxu1 %v1593_v17  ;;  %770 = vmatprep.mubr.bf16.mxu1 %v1845_v5 }
  0x3b   : > { %1505 = vmatprep.subr.bf16.mxu1 %v1594_v19  ;;  %601 = vmatprep.mubr.bf16.mxu0 %v440_v40  ;;  %v820_v33 = vsel %vm817_vm1, %v818_v57, %v819_v58 }
  0x3c   : > { %1470 = vmatprep.subr.bf16.mxu0 %v1594_v19 }
  0x3d   : > { %1471 = vmatpush3.bf16.msra.mxu0 %v1595_v28 }
  0x3e   : > { %1513 = vmatpush3.bf16.msra.mxu1 %v1595_v28  ;;  %1472 = vmatprep.subr.bf16.mxu0 %v1598_v31 }
  0x3f   : > { %1506 = vmatprep.subr.bf16.mxu1 %v1598_v31 }
  0x40   : > { %602 = vmatmul.mubr.bf16.gmra.mrb[12].mxu0 %v432_v53 }
  0x41   : > { %771 = vmatmul.mubr.bf16.gmra.mrb[12].mxu1 %v1850_v7  ;;  %1473 = vmatpush3.bf16.msra.mxu0 %v1599_v42 }
  0x42   : > { %1514 = vmatpush3.bf16.msra.mxu1 %v1599_v42  ;;  %988 = vmatprep.mubr.bf16.mxu1 %v831_v44 }
  0x43   : > { %1507 = vmatprep.subr.bf16.mxu1 %v1600_v43  ;;  %972 = vmatprep.mubr.bf16.mxu0 %v823_v35 }
  0x44   : > { %1474 = vmatprep.subr.bf16.mxu0 %v1600_v43 }
  0x45   : > { %1475 = vmatpush3.bf16.msra.mxu0 %v1601_v49 }
  0x46   : > { %1515 = vmatpush3.bf16.msra.mxu1 %v1601_v49 }
  0x48   : > { %973 = vmatmul.mubr.bf16.vlgmr.msra.gmra.mrb[16].mxu0 %v820_v33 }
  0x49   : > { %989 = vmatmul.mubr.bf16.vlgmr.msra.gmra.mrb[16].mxu1 %v829_v55  ;;  %980 = vmatprep.mubr.bf16.mxu0 %v827_v60 }
  0x4a   : > { %996 = vmatprep.mubr.bf16.mxu1 %v835_v56 }
  0x50   : > { %981 = vmatmul.mubr.bf16.gmra.mrb[20].mxu0 %v825_v62 }
  0x51   : > { %997 = vmatmul.mubr.bf16.gmra.mrb[20].mxu1 %v833_v61 }
  0xfb   : > { %v1396_v4 = vpop.f32.mrb[0].mxu0 }
  0xfc   : > { %v1436_v63 = vpop.f32.mrb[0].mxu1  ;;  %v1397_v5 = vpop.f32.mrb[1].mxu0 }
  0xfd   : > { %v1437_v37 = vpop.f32.mrb[1].mxu1  ;;  %v1398_v7 = vadd.f32 %v1397_v5, %v1396_v4  ;;  %v1399_v8 = vpop.f32.mrb[2].mxu0 }
  0xfe   : > { %v1438_v0 = vadd.f32 %v1437_v37, %v1436_v63  ;;  %v1439_v1 = vpop.f32.mrb[2].mxu1  ;;  %v1400_v10 = vpop.f32.mrb[3].mxu0 }
  0xff   : > { %v1440_v2 = vpop.f32.mrb[3].mxu1  ;;  %v1401_v14 = vadd.f32 %v1400_v10, %v1399_v8 }
 0x100   : > { %v1441_v3 = vadd.f32 %v1440_v2, %v1439_v1  ;;  %v749_v13 = vadd.f32 %v1438_v0, %v1398_v7 }
 0x102   : > { %v1915_v17 = vadd.f32 %v1441_v3, %v1401_v14 }
 0x103   : > { %v1402_v18 = vpop.f32.mrb[4].mxu0 }
 0x104   : > { %v1442_v6 = vpop.f32.mrb[4].mxu1  ;;  %v1403_v19 = vpop.f32.mrb[5].mxu0 }
 0x105   : > { %v1443_v9 = vpop.f32.mrb[5].mxu1  ;;  %v1404_v20 = vadd.f32 %v1403_v19, %v1402_v18  ;;  %v1405_v21 = vpop.f32.mrb[6].mxu0 }
 0x106   : > { %v1444_v11 = vadd.f32 %v1443_v9, %v1442_v6  ;;  %v1445_v12 = vpop.f32.mrb[6].mxu1  ;;  %v1406_v23 = vpop.f32.mrb[7].mxu0 }
 0x107   : > { %v1446_v15 = vpop.f32.mrb[7].mxu1  ;;  %v1407_v26 = vadd.f32 %v1406_v23, %v1405_v21 }
 0x108   : > { %v1447_v16 = vadd.f32 %v1446_v15, %v1445_v12  ;;  %v1917_v25 = vadd.f32 %v1444_v11, %v1404_v20 }
 0x10a   : > { %v1919_v30 = vadd.f32 %v1447_v16, %v1407_v26 }
 0x10b   : > { %v1408_v32 = vpop.f32.mrb[8].mxu0 }
 0x10c   : > { %v1448_v22 = vpop.f32.mrb[8].mxu1  ;;  %v1409_v34 = vpop.f32.mrb[9].mxu0 }
 0x10d   : > { %v1449_v24 = vpop.f32.mrb[9].mxu1  ;;  %v1410_v36 = vadd.f32 %v1409_v34, %v1408_v32  ;;  %v1411_v38 = vpop.f32.mrb[10].mxu0 }
 0x10e   : > { %v1450_v27 = vadd.f32 %v1449_v24, %v1448_v22  ;;  %v1451_v28 = vpop.f32.mrb[10].mxu1  ;;  %v1412_v40 = vpop.f32.mrb[11].mxu0 }
 0x10f   : > { %v1452_v29 = vpop.f32.mrb[11].mxu1  ;;  %v1413_v43 = vadd.f32 %v1412_v40, %v1411_v38 }
 0x110   : > { %v1453_v31 = vadd.f32 %v1452_v29, %v1451_v28  ;;  %v765_v42 = vadd.f32 %v1450_v27, %v1410_v36 }
 0x112   : > { %v768_v47 = vadd.f32 %v1453_v31, %v1413_v43 }
 0x113   : > { %v1414_v49 = vpop.f32.mrb[12].mxu0 }
 0x114   : > { %v1454_v39 = vpop.f32.mrb[12].mxu1  ;;  %v1415_v50 = vpop.f32.mrb[13].mxu0 }
 0x115   : > { %v1455_v41 = vpop.f32.mrb[13].mxu1  ;;  %v1416_v51 = vadd.f32 %v1415_v50, %v1414_v49  ;;  %v1417_v52 = vpop.f32.mrb[14].mxu0 }
 0x116   : > { %v1456_v44 = vadd.f32 %v1455_v41, %v1454_v39  ;;  %v1457_v45 = vpop.f32.mrb[14].mxu1  ;;  %v1418_v54 = vpop.f32.mrb[15].mxu0 }
 0x117   : > { %v1458_v46 = vpop.f32.mrb[15].mxu1  ;;  %v1419_v56 = vadd.f32 %v1418_v54, %v1417_v52 }
 0x118   : > { %v1459_v48 = vadd.f32 %v1458_v46, %v1457_v45  ;;  %v773_v55 = vadd.f32 %v1456_v44, %v1416_v51 }
 0x11a   : > { %v776_v60 = vadd.f32 %v1459_v48, %v1419_v56 }
 0x11b   : > { %v1476_v63 = vpop.f32.mrb[16].mxu0 }
 0x11c   : > { %v1488_v53 = vpop.f32.mrb[16].mxu1  ;;  %v1477_v1 = vpop.f32.mrb[17].mxu0 }
 0x11d   : > { %v1489_v35 = vpop.f32.mrb[17].mxu1  ;;  %v1478_v2 = vadd.f32 %v1477_v1, %v1476_v63  ;;  %v1479_v4 = vpop.f32.mrb[18].mxu0 }
 0x11e   : > { %v1490_v57 = vadd.f32 %v1489_v35, %v1488_v53  ;;  %v1491_v58 = vpop.f32.mrb[18].mxu1  ;;  %v1480_v7 = vpop.f32.mrb[19].mxu0 }
 0x11f   : > { %v1492_v33 = vpop.f32.mrb[19].mxu1  ;;  %v1005_v9 = vadd.f32 %v1478_v2, %v749_v13  ;;  %v1481_v11 = vadd.f32 %v1480_v7, %v1479_v4 }
 0x120   : > { %v1009_v61 = vadd.f32 %v1490_v57, %v765_v42  ;;  %v1493_v62 = vadd.f32 %v1492_v33, %v1491_v58  ;;  %v1339_v57 = vld [vmem:[%s1949_s10] sm:$0xff]  }
 0x121   : > { %v1930_v18 = vadd.f32 %v1309_v59, %v1005_v9  ;;  %v1006_v19 = vadd.f32 %v1481_v11, %v1915_v17  ;;  %v1340_v63 = vunpack.c.l.bf16 %v1339_v57 }
 0x122   : > { %v1924_v37 = vadd.f32 %v1309_v59, %v1009_v61  ;;  %v1010_v0 = vadd.f32 %v1493_v62, %v768_v47 }
 0x123   : > { %v1036_v23 = vmin.f32 %v1930_v18, 0.0  ;;  %v1934_v24 = vadd.f32 %v1309_v59, %v1006_v19  ;;  %v1482_v13 = vpop.f32.mrb[20].mxu0  ;;  %vm1028_vm4 = vcmp.gt.f32.partialorder %v1930_v18, 0.0 }
 0x124   : > { %v1040_v3 = vmin.f32 %v1924_v37, 0.0  ;;  %v1927_v5 = vadd.f32 %v1309_v59, %v1010_v0  ;;  %v1494_v6 = vpop.f32.mrb[20].mxu1  ;;  %v1483_v27 = vpop.f32.mrb[21].mxu0  ;;  %vm1032_vm2 = vcmp.gt.f32.partialorder %v1924_v37, 0.0  ;;  %v1376_v0 = vld [vmem:[%s1949_s10 + $0x18] sm:$0xff]  }
 0x125   : > { %v1495_v8 = vpop.f32.mrb[21].mxu1  ;;  %v1044_v29 = vmul.f32 1.442695, %v1036_v23  ;;  %v1037_v31 = vmin.f32 %v1934_v24, 0.0  ;;  %v1484_v32 = vadd.f32 %v1483_v27, %v1482_v13  ;;  %v1485_v17 = vpop.f32.mrb[22].mxu0  ;;  %vm1029_vm5 = vcmp.gt.f32.partialorder %v1934_v24, 0.0 }
 0x126   : > { %v1052_v10 = vmul.f32 1.442695, %v1040_v3  ;;  %v1497_v12 = vpop.f32.mrb[22].mxu1  ;;  %v1041_v14 = vmin.f32 %v1927_v5, 0.0  ;;  %v1496_v15 = vadd.f32 %v1495_v8, %v1494_v6  ;;  %v1486_v36 = vpop.f32.mrb[23].mxu0  ;;  %vm1033_vm3 = vcmp.gt.f32.partialorder %v1927_v5, 0.0 }
 0x127   : > { %v1498_v16 = vpop.f32.mrb[23].mxu1  ;;  %v1046_v39 = vmul.f32 1.442695, %v1037_v31  ;;  %v1007_v40 = vadd.f32 %v1484_v32, %v1917_v25  ;;  %v1487_v41 = vadd.f32 %v1486_v36, %v1485_v17  ;;  %v1375_v25 = vld [vmem:[%s1949_s10 + $0x10] sm:$0xff]   ;;  %v1352_v8 = vunpack.c.l.bf16 %v1376_v0 }
 0x128   : > { %1604 = vpow2.f32 %v1052_v10  ;;  %v1499_v20 = vadd.f32 %v1498_v16, %v1497_v12  ;;  %v1054_v21 = vmul.f32 1.442695, %v1041_v14  ;;  %v1011_v22 = vadd.f32 %v1496_v15, %v773_v55  ;;  %v1374_v15 = vld [vmem:[%s1949_s10 + $0x8] sm:$0xff]  }
 0x129   : > { %v1952_v44 = vadd.f32 %v1309_v59, %v1007_v40  ;;  %v1008_v45 = vadd.f32 %v1487_v41, %v1919_v30  ;;  %v1348_v54 = vunpack.c.l.bf16 %v1375_v25  ;;  %v1349_v35 = vunpack.c.h.bf16 %v1375_v25 }
 0x12a   : > { %v1012_v26 = vadd.f32 %v1499_v20, %v776_v60  ;;  %1606 = vpow2.f32 %v1054_v21  ;;  %v1936_v28 = vadd.f32 %v1309_v59, %v1011_v22  ;;  %v1353_v9 = vunpack.c.h.bf16 %v1376_v0 }
 0x12b   : > { %1608 = vpow2.f32 %v1044_v29  ;;  %v1038_v48 = vmin.f32 %v1952_v44, 0.0  ;;  %v1023_v49 = vadd.f32 %v1309_v59, %v1008_v45  ;;  %vm1030_vm8 = vcmp.gt.f32.partialorder %v1952_v44, 0.0 }
 0x12c   : > { %v1042_v34 = vmin.f32 %v1936_v28, 0.0  ;;  %v1941_v38 = vadd.f32 %v1309_v59, %v1012_v26  ;;  %1610 = vpow2.f32 %v1046_v39  ;;  %vm1034_vm6 = vcmp.gt.f32.partialorder %v1936_v28, 0.0 }
 0x12d   : > { %v1048_v51 = vmul.f32 1.442695, %v1038_v48  ;;  %v1039_v52 = vmin.f32 %v1023_v49, 0.0  ;;  %v1345_v13 = vunpack.c.h.bf16 %v1374_v15  ;;  %vm1031_vm9 = vcmp.gt.f32.partialorder %v1023_v49, 0.0 }
 0x12e   : > { %v1056_v42 = vmul.f32 1.442695, %v1042_v34  ;;  %v1043_v43 = vmin.f32 %v1941_v38, 0.0  ;;  %vm1035_vm7 = vcmp.gt.f32.partialorder %v1941_v38, 0.0 }
 0x12f   : > { %v1050_v56 = vmul.f32 1.442695, %v1039_v52 }
 0x130   : > { %1612 = vpow2.f32 %v1056_v42  ;;  %v1058_v46 = vmul.f32 1.442695, %v1043_v43 }
 0x132   : > { %v1605_v47 = vpop.eup %1604  ;;  %1614 = vpow2.f32 %v1058_v46 }
 0x133   : > { %v1314_v50 = vadd.f32 -1.0, %v1605_v47  ;;  %1616 = vpow2.f32 %v1048_v51 }
 0x134   : > { %v1607_v53 = vpop.eup %1606  ;;  %1618 = vpow2.f32 %v1050_v56 }
 0x135   : > { %v1072_v30 = vsel %vm1032_vm2, %v1924_v37, %v1314_v50  ;;  %v1315_v55 = vadd.f32 -1.0, %v1607_v53  ;;  %v1609_v58 = vpop.eup %1608  ;;  %v1341_v37 = vunpack.c.h.bf16 %v1339_v57 }
 0x136   : > { %v1310_v33 = vadd.f32 -1.0, %v1609_v58  ;;  %v1096_v60 = vadd.f32 %v1348_v54, %v1072_v30  ;;  %v1611_v62 = vpop.eup %1610 }
 0x137   : > { %v1073_v59 = vsel %vm1033_vm3, %v1927_v5, %v1315_v55  ;;  %v1311_v3 = vadd.f32 -1.0, %v1611_v62 }
 0x138   : > { %v1097_v61 = vadd.f32 %v1349_v35, %v1073_v59  ;;  %v1068_v2 = vsel %vm1028_vm4, %v1930_v18, %v1310_v33 }
 0x139   : > { %v1069_v7 = vsel %vm1029_vm5, %v1934_v24, %v1311_v3  ;;  %v1092_v10 = vadd.f32 %v1340_v63, %v1068_v2  ;;  %v1344_v24 = vunpack.c.l.bf16 %v1374_v15 }
 0x13a   : > { %v1613_v1 = vpop.eup %1612  ;;  %v1367_v4 = vpack.c.bf16 %v1097_v61, %v1096_v60  ;;  %v1093_v11 = vadd.f32 %v1341_v37, %v1069_v7 }
 0x13b   : > { %v1316_v5 = vadd.f32 -1.0, %v1613_v1 }
 0x13c   : > { %v1615_v6 = vpop.eup %1614  ;;  %1378 = vst [vmem:[%s1968_s14 + $0x10] sm:$0xff] %v1367_v4   ;;  %v1357_v18 = vpack.c.bf16 %v1093_v11, %v1092_v10 }
 0x13d   : > { %v1074_v12 = vsel %vm1034_vm6, %v1936_v28, %v1316_v5  ;;  %v1317_v14 = vadd.f32 -1.0, %v1615_v6  ;;  %v1617_v16 = vpop.eup %1616 }
 0x13e   : > { %v1312_v20 = vadd.f32 -1.0, %v1617_v16  ;;  %v1098_v21 = vadd.f32 %v1352_v8, %v1074_v12  ;;  %v1619_v23 = vpop.eup %1618  ;;  %1358 = vst [vmem:[%s1968_s14] sm:$0xff] %v1357_v18  }
 0x13f   : > { %v1075_v19 = vsel %vm1035_vm7, %v1941_v38, %v1317_v14  ;;  %v1313_v27 = vadd.f32 -1.0, %v1619_v23 }
 0x140   : > { %v1099_v22 = vadd.f32 %v1353_v9, %v1075_v19  ;;  %v1070_v26 = vsel %vm1030_vm8, %v1952_v44, %v1312_v20 }
 0x141   : > { %v1071_v29 = vsel %vm1031_vm9, %v1023_v49, %v1313_v27  ;;  %v1094_v31 = vadd.f32 %v1344_v24, %v1070_v26 }
 0x142   : > { %v1372_v28 = vpack.c.bf16 %v1099_v22, %v1098_v21  ;;  %v1095_v32 = vadd.f32 %v1345_v13, %v1071_v29 }
 0x144   : > { %1379 = vst [vmem:[%s1968_s14 + $0x18] sm:$0xff] %v1372_v28   ;;  %v1362_v17 = vpack.c.bf16 %v1095_v32, %v1094_v31 }
 0x146   : > { %1377 = vst [vmem:[%s1968_s14 + $0x8] sm:$0xff] %v1362_v17  }
 0x147 PF: > { %s14_s17 = sadd.s32 1, %s1642_s17   ;;  %s1999_s15 = smov %s1638_s16 }
 0x148   : > { %p11_p5 = scmp.ge.s32.totalorder %s14_s17, 4   ;;  %s2000_s16 = smov %s2002_s18 }
 0x14a   :  { %13 = sbr.rel (!%p11_p5) target bundleno = 2 (0x2), region = 69 }

// kernel: dito_trainer_forward.39
= control target key start
LH: loop header
LB: loop body
LE: loop exit
PB: predicated region body
PF: predicated region fallthrough
CT: control target
= control target key end

     0   :  { %s122_s0 = inlined_call_operand.vmem [shape: f32[2,64], index: 0, kind: input, shape index: {}]   ;;  %s123_s1 = inlined_call_operand.vmem [shape: f32[2,64], index: 1, kind: input, shape index: {}]   ;;  %s124_s2 = inlined_call_operand.hbm [shape: f32[1,1], index: 2, kind: output, shape index: {}]  }
   0x1   :  { %v18_v0 = vld [vmem:[%s122_s0] sm:$0x3] }
   0x2   :  { %v19_v1 = vld [vmem:[%s123_s1] sm:$0x3] }
   0x3   :  { %v20_v2 = vsub.f32 %v18_v0, %v19_v1 }
   0x4   :  { %7 = vsyncpa [#allocation4], 0  ;;  %vm22_vm0 = vcmask 517120   ;;  %vm16_vm1 = vcmask 0   ;;  %v84_v5 = vmov 0.0   ;;  %vm27_vm2 = vcmask 1041408  }
   0x5   :  { %v21_v3 = vmul.f32 %v20_v2, %v20_v2  ;;  %17 = vst.msk [vmem:[#allocation2] sm:$0x1] %vm16_vm1, %v84_v5  ;;  %s85_s0 = smov [#allocation3]  }
   0x6   :  { %s50_s1 = sshll.u32 %s85_s0, 4  ;;  %s51_s1 = int_to_ptr.vmem [resolvable:$true] %s50_s1 }
   0x7   :  { %v23_v4 = vsel %vm22_vm0, %v21_v3, 0.0  ;;  %s60_s13 = scalar_lea.vmem %s51_s1, 16  ;;  %s64_s14 = scalar_lea.vmem %s51_s1, 32 }
   0x8   :  { %24 = vadd.xlane.f32.xlu0 %v23_v4  ;;  %p61_p0 = scmp.ne.s32.totalorder %s51_s1, %s60_s13  ;;  %p65_p1 = scmp.lt.s32.totalorder %s51_s1, %s51_s1 }
   0x9   :  { %p66_p2 = scmp.lt.s32.totalorder %s64_s14, %s60_s13 }
   0xb   :  { %p67_p3 = por %p66_p2, %p65_p1 }
   0xc   :  { %v26_v13 = vld [vmem:[#allocation2] sm:$0x1] }
   0xd   :  { %p68_p4 = pnand %p67_p3, %p61_p0 }
  0x95   :  { %v25_v6 = vpop.xlane.xlu0 %24 }
  0x96   :  { %v28_v7 = vsel %vm27_vm2, %v25_v6, 0.0 }
  0x97   :  { %v29_v8 = vrot.slane %v28_v7, 4 }
  0x99   :  { %v30_v9 = vadd.f32 %v29_v8, %v28_v7 }
  0x9b   :  { %v31_v10 = vrot.slane %v30_v9, 2 }
  0x9d   :  { %v32_v11 = vadd.f32 %v31_v10, %v30_v9 }
  0x9f   :  { %v33_v12 = vrot.slane %v32_v11, 1 }
  0xa1   :  { %v34_v14 = vadd.f32 %v33_v12, %v32_v11 }
  0xa3   :  { %v35_v15 = vadd.f32 %v34_v14, %v26_v13 }
  0xa5   :  { %37 = vst.msk [vmem:[#allocation2] sm:$0x1] %vm16_vm1, %v35_v15 }
  0xac   :  { %v41_v16 = vld [vmem:[#allocation2] sm:$0x1] }
  0xad   :  { %v42_v17 = vmul.f32 0.0078125, %v41_v16 }
  0xaf   :  { %43 = vst.msk [vmem:[#allocation3] sm:$0x1] %vm16_vm1, %v42_v17 }
  0xb0   :  { %71 = shalt.err (!%p68_p4)
}
  0xb1   :  { %s72_s17 = scalar_lea.hbm %s124_s2, 16 }
  0xb2   :  { %p73_p5 = scmp.ne.s32.totalorder %s124_s2, %s72_s17  ;;  %p76_p6 = scmp.lt.u32.totalorder %s72_s17, %s124_s2 }
  0xb4   :  { %p78_p7 = pnand %p76_p6, %p73_p5 }
  0xb6   :  { %81 = shalt.err (!%p78_p7)
}
  0xb7   :  { %53 = dma.vmem_to_hbm [thread:$0]  %s51_s1, 16, %s124_s2, [#allocation4]  }
  0xb8   :  { %82 = dma.done.wait [#allocation4], 16  }
  0xb9   :  { %83 = vsyncadd [#allocation4], 4294967280 }
  0xba   :  { %57 = vsyncpa [#allocation4], 1 }

</bundles_post_ra>
